<compile_context>
chip_gen: v5e
topology: v5e:2x2
jax: 0.10.0
libtpu: 0.0.40
codegen_flags: <defaults>
</compile_context>

<pallas_src>
import functools

import jax
import jax.numpy as jnp
from jax.experimental import pallas as pl
from jax.experimental.pallas import tpu as pltpu


# (out_channels, kernel, stride) -- static config, NOT part of the params pytree
CONV_CFG = [(32, 8, 4), (64, 4, 2), (64, 3, 1), (64, 3, 1), (64, 3, 1)]
IMAGE_VECTOR_SIZE = 512
FC1_WIDTH = 64
N_PAD = 128          # lane-dense padded conv output channels


# ----------------------------------------------------------------------------
# small helpers
# ----------------------------------------------------------------------------
def _round_up(x, m):
    return (x + m - 1) // m * m


def _conv_out(n, k, s):
    return (n - k) // s + 1


def _full_spec(shape):
    n = len(shape)
    return pl.BlockSpec(shape, lambda i: (0,) * n)


def _space_to_depth(x, s):
    b, h, w, c = x.shape
    x = x.reshape(b, h // s, s, w // s, s, c)
    x = jnp.transpose(x, (0, 1, 3, 2, 4, 5))
    return x.reshape(b, h // s, w // s, s * s * c)


# ----------------------------------------------------------------------------
# Pallas kernel: fused valid-conv (stride 1 after space-to-depth) + bias + ReLU
# ----------------------------------------------------------------------------
def _conv_kernel(x_ref, w_ref, b_ref, o_ref, *, kk, oh, ow):
    """o = relu( sum_{qi,qj} x[:, qi:qi+oh, qj:qj+ow, :] @ w[qi, qj] + b )."""
    bsz, _, _, cin = x_ref.shape
    m = bsz * oh * ow
    acc = None
    for qi in range(kk):                       # fully unrolled: at most 9 taps
        for qj in range(kk):
            tap = x_ref[:, qi:qi + oh, qj:qj + ow, :].reshape(m, cin)
            d = jnp.dot(tap, w_ref[qi, qj, :, :],
                        preferred_element_type=jnp.float32)
            acc = d if acc is None else acc + d
    acc = jnp.maximum(acc + b_ref[...], 0.0)   # f32 bias + ReLU epilogue
    o_ref[...] = acc.astype(o_ref.dtype)


def conv_layer(x, w, b, k, s):
    """x: (B,H,W,Cin) bf16 NHWC; w: (kk,kk,Cin_eff,N) bf16; b: (1,N) f32."""
    bsz, h, wsp, _ = x.shape
    oh = (h - k) // s + 1
    ow = (wsp - k) // s + 1
    if s > 1:
        assert k % s == 0, "space-to-depth path needs kernel % stride == 0"
        x = x[:, :(oh - 1) * s + k, :(ow - 1) * s + k, :]
        x = _space_to_depth(x, s)
        kk = k // s
    else:
        kk = k
    # Pad the output width (and the matching input columns) to a multiple of 8
    # so the in-kernel (B,oh,ow,C)->(B*oh*ow,C) collapse is sublane-aligned and
    # the output store is dense.  Junk columns are sliced off afterwards.
    ow_pad = _round_up(ow, 8)
    need_w = ow_pad + kk - 1
    if x.shape[2] < need_w:
        x = jnp.pad(x, ((0, 0), (0, 0), (0, need_w - x.shape[2]), (0, 0)))
    n = w.shape[-1]
    m = bsz * oh * ow_pad
    out = pl.pallas_call(
        functools.partial(_conv_kernel, kk=kk, oh=oh, ow=ow_pad),
        out_shape=jax.ShapeDtypeStruct((m, n), jnp.bfloat16),
        grid=(1,),
        in_specs=[_full_spec(x.shape), _full_spec(w.shape), _full_spec(b.shape)],
        out_specs=_full_spec((m, n)),
        compiler_params=pltpu.CompilerParams(dimension_semantics=("arbitrary",)),
    )(x, w, b)
    return out.reshape(bsz, oh, ow_pad, n)[:, :, :ow, :]


# ----------------------------------------------------------------------------
# Pallas kernel: fused FC head  relu(f@Wf+bf) -> relu(h@W1x + a*w1a + b1) -> fc2
# ----------------------------------------------------------------------------
def _fc_head_kernel(f_ref, a_ref, wf_ref, bf_ref, w1x_ref, w1a_ref, b1_ref,
                    w2_ref, b2_ref, o_ref):
    h = jnp.dot(f_ref[...], wf_ref[...], preferred_element_type=jnp.float32)
    h = jnp.maximum(h + bf_ref[...], 0.0)                       # (B, 512) f32
    g = jnp.dot(h.astype(jnp.bfloat16), w1x_ref[...],
                preferred_element_type=jnp.float32)
    g = jnp.maximum(g + a_ref[...] * w1a_ref[...] + b1_ref[...], 0.0)  # (B, 64)
    # fc2 has out_features = 1 -> lane reduction instead of an N=1 matmul
    o_ref[...] = jnp.sum(g * w2_ref[...], axis=1, keepdims=True) + b2_ref[...]


def fc_head(feat, a, p):
    bsz = feat.shape[0]
    args = (feat, a, p["fc_feat_w"], p["fc_feat_b"], p["fc1_wx"], p["fc1_wa"],
            p["fc1_b"], p["fc2_w"], p["fc2_b"])
    return pl.pallas_call(
        _fc_head_kernel,
        out_shape=jax.ShapeDtypeStruct((bsz, 1), jnp.float32),
        grid=(1,),
        in_specs=[_full_spec(x.shape) for x in args],
        out_specs=_full_spec((bsz, 1)),
        compiler_params=pltpu.CompilerParams(dimension_semantics=("arbitrary",)),
    )(*args)


# ----------------------------------------------------------------------------
# Parameters: raw (PyTorch layout) init + one-time prep into kernel layout
# ----------------------------------------------------------------------------
def _uniform(key, shape, fan_in):
    bound = 1.0 / float(fan_in) ** 0.5
    return jax.random.uniform(key, shape, jnp.float32, -bound, bound)


def feature_size(input_shape):
    c, h, w = input_shape
    for (o, k, s) in CONV_CFG:
        h, w, c = _conv_out(h, k, s), _conv_out(w, k, s), o
    return c * h * w


def init_params(key, input_shape, num_actions):
    del num_actions  # CnnDQNA.forward is a Q(s, a) critic with scalar output
    keys = jax.random.split(key, 16)
    ki = iter(keys)
    params = {"convs": []}
    c_in = input_shape[0]
    for (o, k, s) in CONV_CFG:
        fan_in = c_in * k * k
        w = _uniform(next(ki), (o, c_in, k, k), fan_in)
        b = _uniform(next(ki), (o,), fan_in)
        params["convs"].append((w, b))           # strides stay static in CONV_CFG
        c_in = o
    fs = feature_size(input_shape)
    params["fc_feat_w"] = _uniform(next(ki), (fs, IMAGE_VECTOR_SIZE), fs)
    params["fc_feat_b"] = _uniform(next(ki), (IMAGE_VECTOR_SIZE,), fs)
    params["fc1_w"] = _uniform(next(ki), (IMAGE_VECTOR_SIZE + 1, FC1_WIDTH),
                               IMAGE_VECTOR_SIZE + 1)
    params["fc1_b"] = _uniform(next(ki), (FC1_WIDTH,), IMAGE_VECTOR_SIZE + 1)
    params["fc2_w"] = _uniform(next(ki), (FC1_WIDTH, 1), FC1_WIDTH)
    params["fc2_b"] = _uniform(next(ki), (1,), FC1_WIDTH)
    return params


def _prep_conv(w_oihw, b, s, cin_in, n_pad):
    o, cin, k, _ = w_oihw.shape
    w = jnp.transpose(w_oihw, (2, 3, 1, 0))                   # OIHW -> HWIO
    if cin_in > cin:                                          # absorb prev padding
        w = jnp.pad(w, ((0, 0), (0, 0), (0, cin_in - cin), (0, 0)))
    if s > 1:                                                 # fold stride (s2d)
        kk = k // s
        w = w.reshape(kk, s, kk, s, cin_in, o)
        w = jnp.transpose(w, (0, 2, 1, 3, 4, 5))
        w = w.reshape(kk, kk, s * s * cin_in, o)
    if n_pad > o:                                             # lane-dense N
        w = jnp.pad(w, ((0, 0), (0, 0), (0, 0), (0, n_pad - o)))
    b = jnp.pad(b, (0, n_pad - o)).reshape(1, n_pad).astype(jnp.float32)
    return w.astype(jnp.bfloat16), b


def prepare_params(raw, input_shape):
    p = {"convs": []}
    cin_in = input_shape[0]
    h, w_sp = input_shape[1], input_shape[2]
    for (o, k, s), (wc, bc) in zip(CONV_CFG, raw["convs"]):
        p["convs"].append(_prep_conv(wc, bc, s, cin_in, N_PAD))
        h, w_sp, cin_in = _conv_out(h, k, s), _conv_out(w_sp, k, s), N_PAD
    c_last = CONV_CFG[-1][0]
    # fc_feat rows: NCHW-flatten order -> NHWC(+channel-pad)-flatten order
    wf = raw["fc_feat_w"].reshape(c_last, h, w_sp, IMAGE_VECTOR_SIZE)
    wf = jnp.transpose(wf, (1, 2, 0, 3))
    wf = jnp.pad(wf, ((0, 0), (0, 0), (0, N_PAD - c_last), (0, 0)))
    p["fc_feat_w"] = wf.reshape(h * w_sp * N_PAD,
                                IMAGE_VECTOR_SIZE).astype(jnp.bfloat16)
    p["fc_feat_b"] = raw["fc_feat_b"].reshape(1, -1).astype(jnp.float32)
    p["fc1_wx"] = raw["fc1_w"][:IMAGE_VECTOR_SIZE].astype(jnp.bfloat16)
    p["fc1_wa"] = raw["fc1_w"][IMAGE_VECTOR_SIZE:].reshape(1, -1).astype(jnp.float32)
    p["fc1_b"] = raw["fc1_b"].reshape(1, -1).astype(jnp.float32)
    p["fc2_w"] = raw["fc2_w"].reshape(1, -1).astype(jnp.float32)
    p["fc2_b"] = raw["fc2_b"].reshape(1, 1).astype(jnp.float32)
    return p


# ----------------------------------------------------------------------------
# Forward pass (Pallas path) and pure-JAX reference
# ----------------------------------------------------------------------------
def cnn_dqn_a_forward(params, state, action):
    # One NCHW->NHWC transpose at the boundary; NHWC / bf16 everywhere after.
    x = jnp.transpose(state, (0, 2, 3, 1)).astype(jnp.bfloat16)
    for (_, k, s), (wk, bk) in zip(CONV_CFG, params["convs"]):
        x = conv_layer(x, wk, bk, k, s)
    bsz = x.shape[0]
    feat = x.reshape(bsz, -1)            # NHWC flatten; fc_feat_w rows permuted to match
    a = action.reshape(bsz, 1).astype(jnp.float32)
    return fc_head(feat, a, params)      # (B, 1) f32


def reference_forward(raw, state, action):
    x = state
    for (_, k, s), (w, b) in zip(CONV_CFG, raw["convs"]):
        x = jax.lax.conv_general_dilated(
            x, w, (s, s), "VALID", dimension_numbers=("NCHW", "OIHW", "NCHW"))
        x = jnp.maximum(x + b.reshape(1, -1, 1, 1), 0.0)
    x = x.reshape(x.shape[0], -1)
    x = jnp.maximum(x @ raw["fc_feat_w"] + raw["fc_feat_b"], 0.0)
    x = jnp.concatenate([x, action.reshape(-1, 1).astype(jnp.float32)], axis=1)
    x = jnp.maximum(x @ raw["fc1_w"] + raw["fc1_b"], 0.0)
    x = x @ raw["fc2_w"] + raw["fc2_b"]
    return x


# ----------------------------------------------------------------------------
if __name__ == "__main__":
    # Smallest spatial size the 5-conv stack supports is 68x68 (-> 1x1 features).
    input_shape = (4, 68, 68)
    num_actions = 6
    batch = 2

    key = jax.random.PRNGKey(0)
    k_param, k_state, k_action = jax.random.split(key, 3)
    raw_params = init_params(k_param, input_shape, num_actions)
    params = prepare_params(raw_params, input_shape)     # one-time kernel layout prep

    state = jax.random.normal(k_state, (batch,) + input_shape, jnp.float32)
    action = jax.random.normal(k_action, (batch,), jnp.float32)

    out = jax.jit(cnn_dqn_a_forward)(params, state, action)
    out = jax.block_until_ready(out)
    assert out.shape == (batch, 1) and out.dtype == jnp.float32

    ref = jax.block_until_ready(reference_forward(raw_params, state, action))
    # bf16 MXU operands with f32 accumulation -> slightly relaxed tolerance.
    assert jnp.allclose(out, ref, rtol=2e-2, atol=2e-2), (out, ref)

    print("KERNEL_OK")
</pallas_src>

<mosaic_0001>
module attributes {stable_mosaic.version = 11 : i64} {
  func.func @_conv_kernel(%arg0: i32, %arg1: memref<2x17x17x64xbf16, #tpu.memory_space<vmem>>, %arg2: memref<2x2x64x128xbf16, #tpu.memory_space<vmem>>, %arg3: memref<1x128xf32, #tpu.memory_space<vmem>>, %arg4: memref<512x128xbf16, #tpu.memory_space<vmem>>) attributes {dimension_semantics = [#tpu.dimension_semantics<arbitrary>], iteration_bounds = array<i64: 1>, scalar_prefetch = 0 : i64, scratch_operands = 0 : i64, tpu.core_type = #tpu.core_type<tc>, window_params = [{pipeline_mode = #tpu.pipeline_mode<synchronous>, transform_indices = @transform_0, window_bounds = array<i64: 2, 17, 17, 64>}, {pipeline_mode = #tpu.pipeline_mode<synchronous>, transform_indices = @transform_1, window_bounds = array<i64: 2, 2, 64, 128>}, {pipeline_mode = #tpu.pipeline_mode<synchronous>, transform_indices = @transform_2, window_bounds = array<i64: 1, 128>}, {pipeline_mode = #tpu.pipeline_mode<synchronous>, transform_indices = @transform_3, window_bounds = array<i64: 512, 128>}]} {
    %c0 = arith.constant 0 : index
    %c0_0 = arith.constant 0 : index
    %c0_1 = arith.constant 0 : index
    %c0_2 = arith.constant 0 : index
    %0 = vector.load %arg1[%c0, %c0_0, %c0_1, %c0_2] : memref<2x17x17x64xbf16, #tpu.memory_space<vmem>>, vector<2x16x16x64xbf16>
    %1 = vector.shape_cast %0 : vector<2x16x16x64xbf16> to vector<512x64xbf16>
    %c0_3 = arith.constant 0 : index
    %c0_4 = arith.constant 0 : index
    %c0_5 = arith.constant 0 : index
    %c0_6 = arith.constant 0 : index
    %2 = vector.load %arg2[%c0_3, %c0_4, %c0_5, %c0_6] : memref<2x2x64x128xbf16, #tpu.memory_space<vmem>>, vector<1x1x64x128xbf16>
    %3 = vector.shape_cast %2 : vector<1x1x64x128xbf16> to vector<64x128xbf16>
    %cst = arith.constant dense<0.000000e+00> : vector<512x128xf32>
    %4 = tpu.matmul %1, %3, %cst {dimension_numbers = #tpu.dot_dimension_numbers<[1], [0], [0], [1], [0, 0, 1, 1], [], []>} : vector<512x64xbf16>, vector<64x128xbf16>, vector<512x128xf32> -> vector<512x128xf32>
    %c0_7 = arith.constant 0 : index
    %c0_8 = arith.constant 0 : index
    %c1 = arith.constant 1 : index
    %c0_9 = arith.constant 0 : index
    %5 = vector.load %arg1[%c0_7, %c0_8, %c1, %c0_9] : memref<2x17x17x64xbf16, #tpu.memory_space<vmem>>, vector<2x16x16x64xbf16>
    %6 = vector.shape_cast %5 : vector<2x16x16x64xbf16> to vector<512x64xbf16>
    %c0_10 = arith.constant 0 : index
    %c1_11 = arith.constant 1 : index
    %c0_12 = arith.constant 0 : index
    %c0_13 = arith.constant 0 : index
    %7 = vector.load %arg2[%c0_10, %c1_11, %c0_12, %c0_13] : memref<2x2x64x128xbf16, #tpu.memory_space<vmem>>, vector<1x1x64x128xbf16>
    %8 = vector.shape_cast %7 : vector<1x1x64x128xbf16> to vector<64x128xbf16>
    %cst_14 = arith.constant dense<0.000000e+00> : vector<512x128xf32>
    %9 = tpu.matmul %6, %8, %cst_14 {dimension_numbers = #tpu.dot_dimension_numbers<[1], [0], [0], [1], [0, 0, 1, 1], [], []>} : vector<512x64xbf16>, vector<64x128xbf16>, vector<512x128xf32> -> vector<512x128xf32>
    %10 = arith.addf %4, %9 : vector<512x128xf32>
    %c0_15 = arith.constant 0 : index
    %c1_16 = arith.constant 1 : index
    %c0_17 = arith.constant 0 : index
    %c0_18 = arith.constant 0 : index
    %11 = vector.load %arg1[%c0_15, %c1_16, %c0_17, %c0_18] : memref<2x17x17x64xbf16, #tpu.memory_space<vmem>>, vector<2x16x16x64xbf16>
    %12 = vector.shape_cast %11 : vector<2x16x16x64xbf16> to vector<512x64xbf16>
    %c1_19 = arith.constant 1 : index
    %c0_20 = arith.constant 0 : index
    %c0_21 = arith.constant 0 : index
    %c0_22 = arith.constant 0 : index
    %13 = vector.load %arg2[%c1_19, %c0_20, %c0_21, %c0_22] : memref<2x2x64x128xbf16, #tpu.memory_space<vmem>>, vector<1x1x64x128xbf16>
    %14 = vector.shape_cast %13 : vector<1x1x64x128xbf16> to vector<64x128xbf16>
    %cst_23 = arith.constant dense<0.000000e+00> : vector<512x128xf32>
    %15 = tpu.matmul %12, %14, %cst_23 {dimension_numbers = #tpu.dot_dimension_numbers<[1], [0], [0], [1], [0, 0, 1, 1], [], []>} : vector<512x64xbf16>, vector<64x128xbf16>, vector<512x128xf32> -> vector<512x128xf32>
    %16 = arith.addf %10, %15 : vector<512x128xf32>
    %c0_24 = arith.constant 0 : index
    %c1_25 = arith.constant 1 : index
    %c1_26 = arith.constant 1 : index
    %c0_27 = arith.constant 0 : index
    %17 = vector.load %arg1[%c0_24, %c1_25, %c1_26, %c0_27] : memref<2x17x17x64xbf16, #tpu.memory_space<vmem>>, vector<2x16x16x64xbf16>
    %18 = vector.shape_cast %17 : vector<2x16x16x64xbf16> to vector<512x64xbf16>
    %c1_28 = arith.constant 1 : index
    %c1_29 = arith.constant 1 : index
    %c0_30 = arith.constant 0 : index
    %c0_31 = arith.constant 0 : index
    %19 = vector.load %arg2[%c1_28, %c1_29, %c0_30, %c0_31] : memref<2x2x64x128xbf16, #tpu.memory_space<vmem>>, vector<1x1x64x128xbf16>
    %20 = vector.shape_cast %19 : vector<1x1x64x128xbf16> to vector<64x128xbf16>
    %cst_32 = arith.constant dense<0.000000e+00> : vector<512x128xf32>
    %21 = tpu.matmul %18, %20, %cst_32 {dimension_numbers = #tpu.dot_dimension_numbers<[1], [0], [0], [1], [0, 0, 1, 1], [], []>} : vector<512x64xbf16>, vector<64x128xbf16>, vector<512x128xf32> -> vector<512x128xf32>
    %22 = arith.addf %16, %21 : vector<512x128xf32>
    %c0_33 = arith.constant 0 : index
    %c0_34 = arith.constant 0 : index
    %23 = vector.load %arg3[%c0_33, %c0_34] : memref<1x128xf32, #tpu.memory_space<vmem>>, vector<1x128xf32>
    %24 = vector.broadcast %23 : vector<1x128xf32> to vector<512x128xf32>
    %25 = arith.addf %22, %24 : vector<512x128xf32>
    %cst_35 = arith.constant 0.000000e+00 : f32
    %26 = vector.broadcast %cst_35 : f32 to vector<512x128xf32>
    %27 = arith.maximumf %25, %26 : vector<512x128xf32>
    %28 = arith.truncf %27 : vector<512x128xf32> to vector<512x128xbf16>
    %c0_36 = arith.constant 0 : index
    %c0_37 = arith.constant 0 : index
    %29 = vector.load %arg4[%c0_36, %c0_37] : memref<512x128xbf16, #tpu.memory_space<vmem>>, vector<512x128xbf16>
    tpu.vector_store %arg4[%c0_36, %c0_37], %28 {strides = array<i32>} : memref<512x128xbf16, #tpu.memory_space<vmem>>, vector<512x128xbf16>,
    return
  }
  func.func @transform_0(%arg0: i32) -> (i32, i32, i32, i32) {
    %c0_i32 = arith.constant 0 : i32
    %c0_i32_0 = arith.constant 0 : i32
    %c0_i32_1 = arith.constant 0 : i32
    %c0_i32_2 = arith.constant 0 : i32
    %c0_i32_3 = arith.constant 0 : i32
    return %c0_i32, %c0_i32_0, %c0_i32_1, %c0_i32_2 : i32, i32, i32, i32
  }
  func.func @transform_1(%arg0: i32) -> (i32, i32, i32, i32) {
    %c0_i32 = arith.constant 0 : i32
    %c0_i32_0 = arith.constant 0 : i32
    %c0_i32_1 = arith.constant 0 : i32
    %c0_i32_2 = arith.constant 0 : i32
    %c0_i32_3 = arith.constant 0 : i32
    return %c0_i32, %c0_i32_0, %c0_i32_1, %c0_i32_2 : i32, i32, i32, i32
  }
  func.func @transform_2(%arg0: i32) -> (i32, i32) {
    %c0_i32 = arith.constant 0 : i32
    %c0_i32_0 = arith.constant 0 : i32
    %c0_i32_1 = arith.constant 0 : i32
    return %c0_i32, %c0_i32_0 : i32, i32
  }
  func.func @transform_3(%arg0: i32) -> (i32, i32) {
    %c0_i32 = arith.constant 0 : i32
    %c0_i32_0 = arith.constant 0 : i32
    %c0_i32_1 = arith.constant 0 : i32
    return %c0_i32, %c0_i32_0 : i32, i32
  }
}

module attributes {stable_mosaic.version = 11 : i64} {
  func.func @_conv_kernel(%arg0: i32, %arg1: memref<2x8x9x512xbf16, #tpu.memory_space<vmem>>, %arg2: memref<2x2x512x128xbf16, #tpu.memory_space<vmem>>, %arg3: memref<1x128xf32, #tpu.memory_space<vmem>>, %arg4: memref<112x128xbf16, #tpu.memory_space<vmem>>) attributes {dimension_semantics = [#tpu.dimension_semantics<arbitrary>], iteration_bounds = array<i64: 1>, scalar_prefetch = 0 : i64, scratch_operands = 0 : i64, tpu.core_type = #tpu.core_type<tc>, window_params = [{pipeline_mode = #tpu.pipeline_mode<synchronous>, transform_indices = @transform_0, window_bounds = array<i64: 2, 8, 9, 512>}, {pipeline_mode = #tpu.pipeline_mode<synchronous>, transform_indices = @transform_1, window_bounds = array<i64: 2, 2, 512, 128>}, {pipeline_mode = #tpu.pipeline_mode<synchronous>, transform_indices = @transform_2, window_bounds = array<i64: 1, 128>}, {pipeline_mode = #tpu.pipeline_mode<synchronous>, transform_indices = @transform_3, window_bounds = array<i64: 112, 128>}]} {
    %c0 = arith.constant 0 : index
    %c0_0 = arith.constant 0 : index
    %c0_1 = arith.constant 0 : index
    %c0_2 = arith.constant 0 : index
    %0 = vector.load %arg1[%c0, %c0_0, %c0_1, %c0_2] : memref<2x8x9x512xbf16, #tpu.memory_space<vmem>>, vector<2x7x8x512xbf16>
    %1 = vector.shape_cast %0 : vector<2x7x8x512xbf16> to vector<112x512xbf16>
    %c0_3 = arith.constant 0 : index
    %c0_4 = arith.constant 0 : index
    %c0_5 = arith.constant 0 : index
    %c0_6 = arith.constant 0 : index
    %2 = vector.load %arg2[%c0_3, %c0_4, %c0_5, %c0_6] : memref<2x2x512x128xbf16, #tpu.memory_space<vmem>>, vector<1x1x512x128xbf16>
    %3 = vector.shape_cast %2 : vector<1x1x512x128xbf16> to vector<512x128xbf16>
    %cst = arith.constant dense<0.000000e+00> : vector<112x128xf32>
    %4 = tpu.matmul %1, %3, %cst {dimension_numbers = #tpu.dot_dimension_numbers<[1], [0], [0], [1], [0, 0, 1, 1], [], []>} : vector<112x512xbf16>, vector<512x128xbf16>, vector<112x128xf32> -> vector<112x128xf32>
    %c0_7 = arith.constant 0 : index
    %c0_8 = arith.constant 0 : index
    %c1 = arith.constant 1 : index
    %c0_9 = arith.constant 0 : index
    %5 = vector.load %arg1[%c0_7, %c0_8, %c1, %c0_9] : memref<2x8x9x512xbf16, #tpu.memory_space<vmem>>, vector<2x7x8x512xbf16>
    %6 = vector.shape_cast %5 : vector<2x7x8x512xbf16> to vector<112x512xbf16>
    %c0_10 = arith.constant 0 : index
    %c1_11 = arith.constant 1 : index
    %c0_12 = arith.constant 0 : index
    %c0_13 = arith.constant 0 : index
    %7 = vector.load %arg2[%c0_10, %c1_11, %c0_12, %c0_13] : memref<2x2x512x128xbf16, #tpu.memory_space<vmem>>, vector<1x1x512x128xbf16>
    %8 = vector.shape_cast %7 : vector<1x1x512x128xbf16> to vector<512x128xbf16>
    %cst_14 = arith.constant dense<0.000000e+00> : vector<112x128xf32>
    %9 = tpu.matmul %6, %8, %cst_14 {dimension_numbers = #tpu.dot_dimension_numbers<[1], [0], [0], [1], [0, 0, 1, 1], [], []>} : vector<112x512xbf16>, vector<512x128xbf16>, vector<112x128xf32> -> vector<112x128xf32>
    %10 = arith.addf %4, %9 : vector<112x128xf32>
    %c0_15 = arith.constant 0 : index
    %c1_16 = arith.constant 1 : index
    %c0_17 = arith.constant 0 : index
    %c0_18 = arith.constant 0 : index
    %11 = vector.load %arg1[%c0_15, %c1_16, %c0_17, %c0_18] : memref<2x8x9x512xbf16, #tpu.memory_space<vmem>>, vector<2x7x8x512xbf16>
    %12 = vector.shape_cast %11 : vector<2x7x8x512xbf16> to vector<112x512xbf16>
    %c1_19 = arith.constant 1 : index
    %c0_20 = arith.constant 0 : index
    %c0_21 = arith.constant 0 : index
    %c0_22 = arith.constant 0 : index
    %13 = vector.load %arg2[%c1_19, %c0_20, %c0_21, %c0_22] : memref<2x2x512x128xbf16, #tpu.memory_space<vmem>>, vector<1x1x512x128xbf16>
    %14 = vector.shape_cast %13 : vector<1x1x512x128xbf16> to vector<512x128xbf16>
    %cst_23 = arith.constant dense<0.000000e+00> : vector<112x128xf32>
    %15 = tpu.matmul %12, %14, %cst_23 {dimension_numbers = #tpu.dot_dimension_numbers<[1], [0], [0], [1], [0, 0, 1, 1], [], []>} : vector<112x512xbf16>, vector<512x128xbf16>, vector<112x128xf32> -> vector<112x128xf32>
    %16 = arith.addf %10, %15 : vector<112x128xf32>
    %c0_24 = arith.constant 0 : index
    %c1_25 = arith.constant 1 : index
    %c1_26 = arith.constant 1 : index
    %c0_27 = arith.constant 0 : index
    %17 = vector.load %arg1[%c0_24, %c1_25, %c1_26, %c0_27] : memref<2x8x9x512xbf16, #tpu.memory_space<vmem>>, vector<2x7x8x512xbf16>
    %18 = vector.shape_cast %17 : vector<2x7x8x512xbf16> to vector<112x512xbf16>
    %c1_28 = arith.constant 1 : index
    %c1_29 = arith.constant 1 : index
    %c0_30 = arith.constant 0 : index
    %c0_31 = arith.constant 0 : index
    %19 = vector.load %arg2[%c1_28, %c1_29, %c0_30, %c0_31] : memref<2x2x512x128xbf16, #tpu.memory_space<vmem>>, vector<1x1x512x128xbf16>
    %20 = vector.shape_cast %19 : vector<1x1x512x128xbf16> to vector<512x128xbf16>
    %cst_32 = arith.constant dense<0.000000e+00> : vector<112x128xf32>
    %21 = tpu.matmul %18, %20, %cst_32 {dimension_numbers = #tpu.dot_dimension_numbers<[1], [0], [0], [1], [0, 0, 1, 1], [], []>} : vector<112x512xbf16>, vector<512x128xbf16>, vector<112x128xf32> -> vector<112x128xf32>
    %22 = arith.addf %16, %21 : vector<112x128xf32>
    %c0_33 = arith.constant 0 : index
    %c0_34 = arith.constant 0 : index
    %23 = vector.load %arg3[%c0_33, %c0_34] : memref<1x128xf32, #tpu.memory_space<vmem>>, vector<1x128xf32>
    %24 = vector.broadcast %23 : vector<1x128xf32> to vector<112x128xf32>
    %25 = arith.addf %22, %24 : vector<112x128xf32>
    %cst_35 = arith.constant 0.000000e+00 : f32
    %26 = vector.broadcast %cst_35 : f32 to vector<112x128xf32>
    %27 = arith.maximumf %25, %26 : vector<112x128xf32>
    %28 = arith.truncf %27 : vector<112x128xf32> to vector<112x128xbf16>
    %c0_36 = arith.constant 0 : index
    %c0_37 = arith.constant 0 : index
    %29 = vector.load %arg4[%c0_36, %c0_37] : memref<112x128xbf16, #tpu.memory_space<vmem>>, vector<112x128xbf16>
    tpu.vector_store %arg4[%c0_36, %c0_37], %28 {strides = array<i32>} : memref<112x128xbf16, #tpu.memory_space<vmem>>, vector<112x128xbf16>,
    return
  }
  func.func @transform_0(%arg0: i32) -> (i32, i32, i32, i32) {
    %c0_i32 = arith.constant 0 : i32
    %c0_i32_0 = arith.constant 0 : i32
    %c0_i32_1 = arith.constant 0 : i32
    %c0_i32_2 = arith.constant 0 : i32
    %c0_i32_3 = arith.constant 0 : i32
    return %c0_i32, %c0_i32_0, %c0_i32_1, %c0_i32_2 : i32, i32, i32, i32
  }
  func.func @transform_1(%arg0: i32) -> (i32, i32, i32, i32) {
    %c0_i32 = arith.constant 0 : i32
    %c0_i32_0 = arith.constant 0 : i32
    %c0_i32_1 = arith.constant 0 : i32
    %c0_i32_2 = arith.constant 0 : i32
    %c0_i32_3 = arith.constant 0 : i32
    return %c0_i32, %c0_i32_0, %c0_i32_1, %c0_i32_2 : i32, i32, i32, i32
  }
  func.func @transform_2(%arg0: i32) -> (i32, i32) {
    %c0_i32 = arith.constant 0 : i32
    %c0_i32_0 = arith.constant 0 : i32
    %c0_i32_1 = arith.constant 0 : i32
    return %c0_i32, %c0_i32_0 : i32, i32
  }
  func.func @transform_3(%arg0: i32) -> (i32, i32) {
    %c0_i32 = arith.constant 0 : i32
    %c0_i32_0 = arith.constant 0 : i32
    %c0_i32_1 = arith.constant 0 : i32
    return %c0_i32, %c0_i32_0 : i32, i32
  }
}

module attributes {stable_mosaic.version = 11 : i64} {
  func.func @_conv_kernel(%arg0: i32, %arg1: memref<2x7x10x128xbf16, #tpu.memory_space<vmem>>, %arg2: memref<3x3x128x128xbf16, #tpu.memory_space<vmem>>, %arg3: memref<1x128xf32, #tpu.memory_space<vmem>>, %arg4: memref<80x128xbf16, #tpu.memory_space<vmem>>) attributes {dimension_semantics = [#tpu.dimension_semantics<arbitrary>], iteration_bounds = array<i64: 1>, scalar_prefetch = 0 : i64, scratch_operands = 0 : i64, tpu.core_type = #tpu.core_type<tc>, window_params = [{pipeline_mode = #tpu.pipeline_mode<synchronous>, transform_indices = @transform_0, window_bounds = array<i64: 2, 7, 10, 128>}, {pipeline_mode = #tpu.pipeline_mode<synchronous>, transform_indices = @transform_1, window_bounds = array<i64: 3, 3, 128, 128>}, {pipeline_mode = #tpu.pipeline_mode<synchronous>, transform_indices = @transform_2, window_bounds = array<i64: 1, 128>}, {pipeline_mode = #tpu.pipeline_mode<synchronous>, transform_indices = @transform_3, window_bounds = array<i64: 80, 128>}]} {
    %c0 = arith.constant 0 : index
    %c0_0 = arith.constant 0 : index
    %c0_1 = arith.constant 0 : index
    %c0_2 = arith.constant 0 : index
    %0 = vector.load %arg1[%c0, %c0_0, %c0_1, %c0_2] : memref<2x7x10x128xbf16, #tpu.memory_space<vmem>>, vector<2x5x8x128xbf16>
    %1 = vector.shape_cast %0 : vector<2x5x8x128xbf16> to vector<80x128xbf16>
    %c0_3 = arith.constant 0 : index
    %c0_4 = arith.constant 0 : index
    %c0_5 = arith.constant 0 : index
    %c0_6 = arith.constant 0 : index
    %2 = vector.load %arg2[%c0_3, %c0_4, %c0_5, %c0_6] : memref<3x3x128x128xbf16, #tpu.memory_space<vmem>>, vector<1x1x128x128xbf16>
    %3 = vector.shape_cast %2 : vector<1x1x128x128xbf16> to vector<128x128xbf16>
    %cst = arith.constant dense<0.000000e+00> : vector<80x128xf32>
    %4 = tpu.matmul %1, %3, %cst {dimension_numbers = #tpu.dot_dimension_numbers<[1], [0], [0], [1], [0, 0, 1, 1], [], []>} : vector<80x128xbf16>, vector<128x128xbf16>, vector<80x128xf32> -> vector<80x128xf32>
    %c0_7 = arith.constant 0 : index
    %c0_8 = arith.constant 0 : index
    %c1 = arith.constant 1 : index
    %c0_9 = arith.constant 0 : index
    %5 = vector.load %arg1[%c0_7, %c0_8, %c1, %c0_9] : memref<2x7x10x128xbf16, #tpu.memory_space<vmem>>, vector<2x5x8x128xbf16>
    %6 = vector.shape_cast %5 : vector<2x5x8x128xbf16> to vector<80x128xbf16>
    %c0_10 = arith.constant 0 : index
    %c1_11 = arith.constant 1 : index
    %c0_12 = arith.constant 0 : index
    %c0_13 = arith.constant 0 : index
    %7 = vector.load %arg2[%c0_10, %c1_11, %c0_12, %c0_13] : memref<3x3x128x128xbf16, #tpu.memory_space<vmem>>, vector<1x1x128x128xbf16>
    %8 = vector.shape_cast %7 : vector<1x1x128x128xbf16> to vector<128x128xbf16>
    %cst_14 = arith.constant dense<0.000000e+00> : vector<80x128xf32>
    %9 = tpu.matmul %6, %8, %cst_14 {dimension_numbers = #tpu.dot_dimension_numbers<[1], [0], [0], [1], [0, 0, 1, 1], [], []>} : vector<80x128xbf16>, vector<128x128xbf16>, vector<80x128xf32> -> vector<80x128xf32>
    %10 = arith.addf %4, %9 : vector<80x128xf32>
    %c0_15 = arith.constant 0 : index
    %c0_16 = arith.constant 0 : index
    %c2 = arith.constant 2 : index
    %c0_17 = arith.constant 0 : index
    %11 = vector.load %arg1[%c0_15, %c0_16, %c2, %c0_17] : memref<2x7x10x128xbf16, #tpu.memory_space<vmem>>, vector<2x5x8x128xbf16>
    %12 = vector.shape_cast %11 : vector<2x5x8x128xbf16> to vector<80x128xbf16>
    %c0_18 = arith.constant 0 : index
    %c2_19 = arith.constant 2 : index
    %c0_20 = arith.constant 0 : index
    %c0_21 = arith.constant 0 : index
    %13 = vector.load %arg2[%c0_18, %c2_19, %c0_20, %c0_21] : memref<3x3x128x128xbf16, #tpu.memory_space<vmem>>, vector<1x1x128x128xbf16>
    %14 = vector.shape_cast %13 : vector<1x1x128x128xbf16> to vector<128x128xbf16>
    %cst_22 = arith.constant dense<0.000000e+00> : vector<80x128xf32>
    %15 = tpu.matmul %12, %14, %cst_22 {dimension_numbers = #tpu.dot_dimension_numbers<[1], [0], [0], [1], [0, 0, 1, 1], [], []>} : vector<80x128xbf16>, vector<128x128xbf16>, vector<80x128xf32> -> vector<80x128xf32>
    %16 = arith.addf %10, %15 : vector<80x128xf32>
    %c0_23 = arith.constant 0 : index
    %c1_24 = arith.constant 1 : index
    %c0_25 = arith.constant 0 : index
    %c0_26 = arith.constant 0 : index
    %17 = vector.load %arg1[%c0_23, %c1_24, %c0_25, %c0_26] : memref<2x7x10x128xbf16, #tpu.memory_space<vmem>>, vector<2x5x8x128xbf16>
    %18 = vector.shape_cast %17 : vector<2x5x8x128xbf16> to vector<80x128xbf16>
    %c1_27 = arith.constant 1 : index
    %c0_28 = arith.constant 0 : index
    %c0_29 = arith.constant 0 : index
    %c0_30 = arith.constant 0 : index
    %19 = vector.load %arg2[%c1_27, %c0_28, %c0_29, %c0_30] : memref<3x3x128x128xbf16, #tpu.memory_space<vmem>>, vector<1x1x128x128xbf16>
    %20 = vector.shape_cast %19 : vector<1x1x128x128xbf16> to vector<128x128xbf16>
    %cst_31 = arith.constant dense<0.000000e+00> : vector<80x128xf32>
    %21 = tpu.matmul %18, %20, %cst_31 {dimension_numbers = #tpu.dot_dimension_numbers<[1], [0], [0], [1], [0, 0, 1, 1], [], []>} : vector<80x128xbf16>, vector<128x128xbf16>, vector<80x128xf32> -> vector<80x128xf32>
    %22 = arith.addf %16, %21 : vector<80x128xf32>
    %c0_32 = arith.constant 0 : index
    %c1_33 = arith.constant 1 : index
    %c1_34 = arith.constant 1 : index
    %c0_35 = arith.constant 0 : index
    %23 = vector.load %arg1[%c0_32, %c1_33, %c1_34, %c0_35] : memref<2x7x10x128xbf16, #tpu.memory_space<vmem>>, vector<2x5x8x128xbf16>
    %24 = vector.shape_cast %23 : vector<2x5x8x128xbf16> to vector<80x128xbf16>
    %c1_36 = arith.constant 1 : index
    %c1_37 = arith.constant 1 : index
    %c0_38 = arith.constant 0 : index
    %c0_39 = arith.constant 0 : index
    %25 = vector.load %arg2[%c1_36, %c1_37, %c0_38, %c0_39] : memref<3x3x128x128xbf16, #tpu.memory_space<vmem>>, vector<1x1x128x128xbf16>
    %26 = vector.shape_cast %25 : vector<1x1x128x128xbf16> to vector<128x128xbf16>
    %cst_40 = arith.constant dense<0.000000e+00> : vector<80x128xf32>
    %27 = tpu.matmul %24, %26, %cst_40 {dimension_numbers = #tpu.dot_dimension_numbers<[1], [0], [0], [1], [0, 0, 1, 1], [], []>} : vector<80x128xbf16>, vector<128x128xbf16>, vector<80x128xf32> -> vector<80x128xf32>
    %28 = arith.addf %22, %27 : vector<80x128xf32>
    %c0_41 = arith.constant 0 : index
    %c1_42 = arith.constant 1 : index
    %c2_43 = arith.constant 2 : index
    %c0_44 = arith.constant 0 : index
    %29 = vector.load %arg1[%c0_41, %c1_42, %c2_43, %c0_44] : memref<2x7x10x128xbf16, #tpu.memory_space<vmem>>, vector<2x5x8x128xbf16>
    %30 = vector.shape_cast %29 : vector<2x5x8x128xbf16> to vector<80x128xbf16>
    %c1_45 = arith.constant 1 : index
    %c2_46 = arith.constant 2 : index
    %c0_47 = arith.constant 0 : index
    %c0_48 = arith.constant 0 : index
    %31 = vector.load %arg2[%c1_45, %c2_46, %c0_47, %c0_48] : memref<3x3x128x128xbf16, #tpu.memory_space<vmem>>, vector<1x1x128x128xbf16>
    %32 = vector.shape_cast %31 : vector<1x1x128x128xbf16> to vector<128x128xbf16>
    %cst_49 = arith.constant dense<0.000000e+00> : vector<80x128xf32>
    %33 = tpu.matmul %30, %32, %cst_49 {dimension_numbers = #tpu.dot_dimension_numbers<[1], [0], [0], [1], [0, 0, 1, 1], [], []>} : vector<80x128xbf16>, vector<128x128xbf16>, vector<80x128xf32> -> vector<80x128xf32>
    %34 = arith.addf %28, %33 : vector<80x128xf32>
    %c0_50 = arith.constant 0 : index
    %c2_51 = arith.constant 2 : index
    %c0_52 = arith.constant 0 : index
    %c0_53 = arith.constant 0 : index
    %35 = vector.load %arg1[%c0_50, %c2_51, %c0_52, %c0_53] : memref<2x7x10x128xbf16, #tpu.memory_space<vmem>>, vector<2x5x8x128xbf16>
    %36 = vector.shape_cast %35 : vector<2x5x8x128xbf16> to vector<80x128xbf16>
    %c2_54 = arith.constant 2 : index
    %c0_55 = arith.constant 0 : index
    %c0_56 = arith.constant 0 : index
    %c0_57 = arith.constant 0 : index
    %37 = vector.load %arg2[%c2_54, %c0_55, %c0_56, %c0_57] : memref<3x3x128x128xbf16, #tpu.memory_space<vmem>>, vector<1x1x128x128xbf16>
    %38 = vector.shape_cast %37 : vector<1x1x128x128xbf16> to vector<128x128xbf16>
    %cst_58 = arith.constant dense<0.000000e+00> : vector<80x128xf32>
    %39 = tpu.matmul %36, %38, %cst_58 {dimension_numbers = #tpu.dot_dimension_numbers<[1], [0], [0], [1], [0, 0, 1, 1], [], []>} : vector<80x128xbf16>, vector<128x128xbf16>, vector<80x128xf32> -> vector<80x128xf32>
    %40 = arith.addf %34, %39 : vector<80x128xf32>
    %c0_59 = arith.constant 0 : index
    %c2_60 = arith.constant 2 : index
    %c1_61 = arith.constant 1 : index
    %c0_62 = arith.constant 0 : index
    %41 = vector.load %arg1[%c0_59, %c2_60, %c1_61, %c0_62] : memref<2x7x10x128xbf16, #tpu.memory_space<vmem>>, vector<2x5x8x128xbf16>
    %42 = vector.shape_cast %41 : vector<2x5x8x128xbf16> to vector<80x128xbf16>
    %c2_63 = arith.constant 2 : index
    %c1_64 = arith.constant 1 : index
    %c0_65 = arith.constant 0 : index
    %c0_66 = arith.constant 0 : index
    %43 = vector.load %arg2[%c2_63, %c1_64, %c0_65, %c0_66] : memref<3x3x128x128xbf16, #tpu.memory_space<vmem>>, vector<1x1x128x128xbf16>
    %44 = vector.shape_cast %43 : vector<1x1x128x128xbf16> to vector<128x128xbf16>
    %cst_67 = arith.constant dense<0.000000e+00> : vector<80x128xf32>
    %45 = tpu.matmul %42, %44, %cst_67 {dimension_numbers = #tpu.dot_dimension_numbers<[1], [0], [0], [1], [0, 0, 1, 1], [], []>} : vector<80x128xbf16>, vector<128x128xbf16>, vector<80x128xf32> -> vector<80x128xf32>
    %46 = arith.addf %40, %45 : vector<80x128xf32>
    %c0_68 = arith.constant 0 : index
    %c2_69 = arith.constant 2 : index
    %c2_70 = arith.constant 2 : index
    %c0_71 = arith.constant 0 : index
    %47 = vector.load %arg1[%c0_68, %c2_69, %c2_70, %c0_71] : memref<2x7x10x128xbf16, #tpu.memory_space<vmem>>, vector<2x5x8x128xbf16>
    %48 = vector.shape_cast %47 : vector<2x5x8x128xbf16> to vector<80x128xbf16>
    %c2_72 = arith.constant 2 : index
    %c2_73 = arith.constant 2 : index
    %c0_74 = arith.constant 0 : index
    %c0_75 = arith.constant 0 : index
    %49 = vector.load %arg2[%c2_72, %c2_73, %c0_74, %c0_75] : memref<3x3x128x128xbf16, #tpu.memory_space<vmem>>, vector<1x1x128x128xbf16>
    %50 = vector.shape_cast %49 : vector<1x1x128x128xbf16> to vector<128x128xbf16>
    %cst_76 = arith.constant dense<0.000000e+00> : vector<80x128xf32>
    %51 = tpu.matmul %48, %50, %cst_76 {dimension_numbers = #tpu.dot_dimension_numbers<[1], [0], [0], [1], [0, 0, 1, 1], [], []>} : vector<80x128xbf16>, vector<128x128xbf16>, vector<80x128xf32> -> vector<80x128xf32>
    %52 = arith.addf %46, %51 : vector<80x128xf32>
    %c0_77 = arith.constant 0 : index
    %c0_78 = arith.constant 0 : index
    %53 = vector.load %arg3[%c0_77, %c0_78] : memref<1x128xf32, #tpu.memory_space<vmem>>, vector<1x128xf32>
    %54 = vector.broadcast %53 : vector<1x128xf32> to vector<80x128xf32>
    %55 = arith.addf %52, %54 : vector<80x128xf32>
    %cst_79 = arith.constant 0.000000e+00 : f32
    %56 = vector.broadcast %cst_79 : f32 to vector<80x128xf32>
    %57 = arith.maximumf %55, %56 : vector<80x128xf32>
    %58 = arith.truncf %57 : vector<80x128xf32> to vector<80x128xbf16>
    %c0_80 = arith.constant 0 : index
    %c0_81 = arith.constant 0 : index
    %59 = vector.load %arg4[%c0_80, %c0_81] : memref<80x128xbf16, #tpu.memory_space<vmem>>, vector<80x128xbf16>
    tpu.vector_store %arg4[%c0_80, %c0_81], %58 {strides = array<i32>} : memref<80x128xbf16, #tpu.memory_space<vmem>>, vector<80x128xbf16>,
    return
  }
  func.func @transform_0(%arg0: i32) -> (i32, i32, i32, i32) {
    %c0_i32 = arith.constant 0 : i32
    %c0_i32_0 = arith.constant 0 : i32
    %c0_i32_1 = arith.constant 0 : i32
    %c0_i32_2 = arith.constant 0 : i32
    %c0_i32_3 = arith.constant 0 : i32
    return %c0_i32, %c0_i32_0, %c0_i32_1, %c0_i32_2 : i32, i32, i32, i32
  }
  func.func @transform_1(%arg0: i32) -> (i32, i32, i32, i32) {
    %c0_i32 = arith.constant 0 : i32
    %c0_i32_0 = arith.constant 0 : i32
    %c0_i32_1 = arith.constant 0 : i32
    %c0_i32_2 = arith.constant 0 : i32
    %c0_i32_3 = arith.constant 0 : i32
    return %c0_i32, %c0_i32_0, %c0_i32_1, %c0_i32_2 : i32, i32, i32, i32
  }
  func.func @transform_2(%arg0: i32) -> (i32, i32) {
    %c0_i32 = arith.constant 0 : i32
    %c0_i32_0 = arith.constant 0 : i32
    %c0_i32_1 = arith.constant 0 : i32
    return %c0_i32, %c0_i32_0 : i32, i32
  }
  func.func @transform_3(%arg0: i32) -> (i32, i32) {
    %c0_i32 = arith.constant 0 : i32
    %c0_i32_0 = arith.constant 0 : i32
    %c0_i32_1 = arith.constant 0 : i32
    return %c0_i32, %c0_i32_0 : i32, i32
  }
}

module attributes {stable_mosaic.version = 11 : i64} {
  func.func @_conv_kernel(%arg0: i32, %arg1: memref<2x5x10x128xbf16, #tpu.memory_space<vmem>>, %arg2: memref<3x3x128x128xbf16, #tpu.memory_space<vmem>>, %arg3: memref<1x128xf32, #tpu.memory_space<vmem>>, %arg4: memref<48x128xbf16, #tpu.memory_space<vmem>>) attributes {dimension_semantics = [#tpu.dimension_semantics<arbitrary>], iteration_bounds = array<i64: 1>, scalar_prefetch = 0 : i64, scratch_operands = 0 : i64, tpu.core_type = #tpu.core_type<tc>, window_params = [{pipeline_mode = #tpu.pipeline_mode<synchronous>, transform_indices = @transform_0, window_bounds = array<i64: 2, 5, 10, 128>}, {pipeline_mode = #tpu.pipeline_mode<synchronous>, transform_indices = @transform_1, window_bounds = array<i64: 3, 3, 128, 128>}, {pipeline_mode = #tpu.pipeline_mode<synchronous>, transform_indices = @transform_2, window_bounds = array<i64: 1, 128>}, {pipeline_mode = #tpu.pipeline_mode<synchronous>, transform_indices = @transform_3, window_bounds = array<i64: 48, 128>}]} {
    %c0 = arith.constant 0 : index
    %c0_0 = arith.constant 0 : index
    %c0_1 = arith.constant 0 : index
    %c0_2 = arith.constant 0 : index
    %0 = vector.load %arg1[%c0, %c0_0, %c0_1, %c0_2] : memref<2x5x10x128xbf16, #tpu.memory_space<vmem>>, vector<2x3x8x128xbf16>
    %1 = vector.shape_cast %0 : vector<2x3x8x128xbf16> to vector<48x128xbf16>
    %c0_3 = arith.constant 0 : index
    %c0_4 = arith.constant 0 : index
    %c0_5 = arith.constant 0 : index
    %c0_6 = arith.constant 0 : index
    %2 = vector.load %arg2[%c0_3, %c0_4, %c0_5, %c0_6] : memref<3x3x128x128xbf16, #tpu.memory_space<vmem>>, vector<1x1x128x128xbf16>
    %3 = vector.shape_cast %2 : vector<1x1x128x128xbf16> to vector<128x128xbf16>
    %cst = arith.constant dense<0.000000e+00> : vector<48x128xf32>
    %4 = tpu.matmul %1, %3, %cst {dimension_numbers = #tpu.dot_dimension_numbers<[1], [0], [0], [1], [0, 0, 1, 1], [], []>} : vector<48x128xbf16>, vector<128x128xbf16>, vector<48x128xf32> -> vector<48x128xf32>
    %c0_7 = arith.constant 0 : index
    %c0_8 = arith.constant 0 : index
    %c1 = arith.constant 1 : index
    %c0_9 = arith.constant 0 : index
    %5 = vector.load %arg1[%c0_7, %c0_8, %c1, %c0_9] : memref<2x5x10x128xbf16, #tpu.memory_space<vmem>>, vector<2x3x8x128xbf16>
    %6 = vector.shape_cast %5 : vector<2x3x8x128xbf16> to vector<48x128xbf16>
    %c0_10 = arith.constant 0 : index
    %c1_11 = arith.constant 1 : index
    %c0_12 = arith.constant 0 : index
    %c0_13 = arith.constant 0 : index
    %7 = vector.load %arg2[%c0_10, %c1_11, %c0_12, %c0_13] : memref<3x3x128x128xbf16, #tpu.memory_space<vmem>>, vector<1x1x128x128xbf16>
    %8 = vector.shape_cast %7 : vector<1x1x128x128xbf16> to vector<128x128xbf16>
    %cst_14 = arith.constant dense<0.000000e+00> : vector<48x128xf32>
    %9 = tpu.matmul %6, %8, %cst_14 {dimension_numbers = #tpu.dot_dimension_numbers<[1], [0], [0], [1], [0, 0, 1, 1], [], []>} : vector<48x128xbf16>, vector<128x128xbf16>, vector<48x128xf32> -> vector<48x128xf32>
    %10 = arith.addf %4, %9 : vector<48x128xf32>
    %c0_15 = arith.constant 0 : index
    %c0_16 = arith.constant 0 : index
    %c2 = arith.constant 2 : index
    %c0_17 = arith.constant 0 : index
    %11 = vector.load %arg1[%c0_15, %c0_16, %c2, %c0_17] : memref<2x5x10x128xbf16, #tpu.memory_space<vmem>>, vector<2x3x8x128xbf16>
    %12 = vector.shape_cast %11 : vector<2x3x8x128xbf16> to vector<48x128xbf16>
    %c0_18 = arith.constant 0 : index
    %c2_19 = arith.constant 2 : index
    %c0_20 = arith.constant 0 : index
    %c0_21 = arith.constant 0 : index
    %13 = vector.load %arg2[%c0_18, %c2_19, %c0_20, %c0_21] : memref<3x3x128x128xbf16, #tpu.memory_space<vmem>>, vector<1x1x128x128xbf16>
    %14 = vector.shape_cast %13 : vector<1x1x128x128xbf16> to vector<128x128xbf16>
    %cst_22 = arith.constant dense<0.000000e+00> : vector<48x128xf32>
    %15 = tpu.matmul %12, %14, %cst_22 {dimension_numbers = #tpu.dot_dimension_numbers<[1], [0], [0], [1], [0, 0, 1, 1], [], []>} : vector<48x128xbf16>, vector<128x128xbf16>, vector<48x128xf32> -> vector<48x128xf32>
    %16 = arith.addf %10, %15 : vector<48x128xf32>
    %c0_23 = arith.constant 0 : index
    %c1_24 = arith.constant 1 : index
    %c0_25 = arith.constant 0 : index
    %c0_26 = arith.constant 0 : index
    %17 = vector.load %arg1[%c0_23, %c1_24, %c0_25, %c0_26] : memref<2x5x10x128xbf16, #tpu.memory_space<vmem>>, vector<2x3x8x128xbf16>
    %18 = vector.shape_cast %17 : vector<2x3x8x128xbf16> to vector<48x128xbf16>
    %c1_27 = arith.constant 1 : index
    %c0_28 = arith.constant 0 : index
    %c0_29 = arith.constant 0 : index
    %c0_30 = arith.constant 0 : index
    %19 = vector.load %arg2[%c1_27, %c0_28, %c0_29, %c0_30] : memref<3x3x128x128xbf16, #tpu.memory_space<vmem>>, vector<1x1x128x128xbf16>
    %20 = vector.shape_cast %19 : vector<1x1x128x128xbf16> to vector<128x128xbf16>
    %cst_31 = arith.constant dense<0.000000e+00> : vector<48x128xf32>
    %21 = tpu.matmul %18, %20, %cst_31 {dimension_numbers = #tpu.dot_dimension_numbers<[1], [0], [0], [1], [0, 0, 1, 1], [], []>} : vector<48x128xbf16>, vector<128x128xbf16>, vector<48x128xf32> -> vector<48x128xf32>
    %22 = arith.addf %16, %21 : vector<48x128xf32>
    %c0_32 = arith.constant 0 : index
    %c1_33 = arith.constant 1 : index
    %c1_34 = arith.constant 1 : index
    %c0_35 = arith.constant 0 : index
    %23 = vector.load %arg1[%c0_32, %c1_33, %c1_34, %c0_35] : memref<2x5x10x128xbf16, #tpu.memory_space<vmem>>, vector<2x3x8x128xbf16>
    %24 = vector.shape_cast %23 : vector<2x3x8x128xbf16> to vector<48x128xbf16>
    %c1_36 = arith.constant 1 : index
    %c1_37 = arith.constant 1 : index
    %c0_38 = arith.constant 0 : index
    %c0_39 = arith.constant 0 : index
    %25 = vector.load %arg2[%c1_36, %c1_37, %c0_38, %c0_39] : memref<3x3x128x128xbf16, #tpu.memory_space<vmem>>, vector<1x1x128x128xbf16>
    %26 = vector.shape_cast %25 : vector<1x1x128x128xbf16> to vector<128x128xbf16>
    %cst_40 = arith.constant dense<0.000000e+00> : vector<48x128xf32>
    %27 = tpu.matmul %24, %26, %cst_40 {dimension_numbers = #tpu.dot_dimension_numbers<[1], [0], [0], [1], [0, 0, 1, 1], [], []>} : vector<48x128xbf16>, vector<128x128xbf16>, vector<48x128xf32> -> vector<48x128xf32>
    %28 = arith.addf %22, %27 : vector<48x128xf32>
    %c0_41 = arith.constant 0 : index
    %c1_42 = arith.constant 1 : index
    %c2_43 = arith.constant 2 : index
    %c0_44 = arith.constant 0 : index
    %29 = vector.load %arg1[%c0_41, %c1_42, %c2_43, %c0_44] : memref<2x5x10x128xbf16, #tpu.memory_space<vmem>>, vector<2x3x8x128xbf16>
    %30 = vector.shape_cast %29 : vector<2x3x8x128xbf16> to vector<48x128xbf16>
    %c1_45 = arith.constant 1 : index
    %c2_46 = arith.constant 2 : index
    %c0_47 = arith.constant 0 : index
    %c0_48 = arith.constant 0 : index
    %31 = vector.load %arg2[%c1_45, %c2_46, %c0_47, %c0_48] : memref<3x3x128x128xbf16, #tpu.memory_space<vmem>>, vector<1x1x128x128xbf16>
    %32 = vector.shape_cast %31 : vector<1x1x128x128xbf16> to vector<128x128xbf16>
    %cst_49 = arith.constant dense<0.000000e+00> : vector<48x128xf32>
    %33 = tpu.matmul %30, %32, %cst_49 {dimension_numbers = #tpu.dot_dimension_numbers<[1], [0], [0], [1], [0, 0, 1, 1], [], []>} : vector<48x128xbf16>, vector<128x128xbf16>, vector<48x128xf32> -> vector<48x128xf32>
    %34 = arith.addf %28, %33 : vector<48x128xf32>
    %c0_50 = arith.constant 0 : index
    %c2_51 = arith.constant 2 : index
    %c0_52 = arith.constant 0 : index
    %c0_53 = arith.constant 0 : index
    %35 = vector.load %arg1[%c0_50, %c2_51, %c0_52, %c0_53] : memref<2x5x10x128xbf16, #tpu.memory_space<vmem>>, vector<2x3x8x128xbf16>
    %36 = vector.shape_cast %35 : vector<2x3x8x128xbf16> to vector<48x128xbf16>
    %c2_54 = arith.constant 2 : index
    %c0_55 = arith.constant 0 : index
    %c0_56 = arith.constant 0 : index
    %c0_57 = arith.constant 0 : index
    %37 = vector.load %arg2[%c2_54, %c0_55, %c0_56, %c0_57] : memref<3x3x128x128xbf16, #tpu.memory_space<vmem>>, vector<1x1x128x128xbf16>
    %38 = vector.shape_cast %37 : vector<1x1x128x128xbf16> to vector<128x128xbf16>
    %cst_58 = arith.constant dense<0.000000e+00> : vector<48x128xf32>
    %39 = tpu.matmul %36, %38, %cst_58 {dimension_numbers = #tpu.dot_dimension_numbers<[1], [0], [0], [1], [0, 0, 1, 1], [], []>} : vector<48x128xbf16>, vector<128x128xbf16>, vector<48x128xf32> -> vector<48x128xf32>
    %40 = arith.addf %34, %39 : vector<48x128xf32>
    %c0_59 = arith.constant 0 : index
    %c2_60 = arith.constant 2 : index
    %c1_61 = arith.constant 1 : index
    %c0_62 = arith.constant 0 : index
    %41 = vector.load %arg1[%c0_59, %c2_60, %c1_61, %c0_62] : memref<2x5x10x128xbf16, #tpu.memory_space<vmem>>, vector<2x3x8x128xbf16>
    %42 = vector.shape_cast %41 : vector<2x3x8x128xbf16> to vector<48x128xbf16>
    %c2_63 = arith.constant 2 : index
    %c1_64 = arith.constant 1 : index
    %c0_65 = arith.constant 0 : index
    %c0_66 = arith.constant 0 : index
    %43 = vector.load %arg2[%c2_63, %c1_64, %c0_65, %c0_66] : memref<3x3x128x128xbf16, #tpu.memory_space<vmem>>, vector<1x1x128x128xbf16>
    %44 = vector.shape_cast %43 : vector<1x1x128x128xbf16> to vector<128x128xbf16>
    %cst_67 = arith.constant dense<0.000000e+00> : vector<48x128xf32>
    %45 = tpu.matmul %42, %44, %cst_67 {dimension_numbers = #tpu.dot_dimension_numbers<[1], [0], [0], [1], [0, 0, 1, 1], [], []>} : vector<48x128xbf16>, vector<128x128xbf16>, vector<48x128xf32> -> vector<48x128xf32>
    %46 = arith.addf %40, %45 : vector<48x128xf32>
    %c0_68 = arith.constant 0 : index
    %c2_69 = arith.constant 2 : index
    %c2_70 = arith.constant 2 : index
    %c0_71 = arith.constant 0 : index
    %47 = vector.load %arg1[%c0_68, %c2_69, %c2_70, %c0_71] : memref<2x5x10x128xbf16, #tpu.memory_space<vmem>>, vector<2x3x8x128xbf16>
    %48 = vector.shape_cast %47 : vector<2x3x8x128xbf16> to vector<48x128xbf16>
    %c2_72 = arith.constant 2 : index
    %c2_73 = arith.constant 2 : index
    %c0_74 = arith.constant 0 : index
    %c0_75 = arith.constant 0 : index
    %49 = vector.load %arg2[%c2_72, %c2_73, %c0_74, %c0_75] : memref<3x3x128x128xbf16, #tpu.memory_space<vmem>>, vector<1x1x128x128xbf16>
    %50 = vector.shape_cast %49 : vector<1x1x128x128xbf16> to vector<128x128xbf16>
    %cst_76 = arith.constant dense<0.000000e+00> : vector<48x128xf32>
    %51 = tpu.matmul %48, %50, %cst_76 {dimension_numbers = #tpu.dot_dimension_numbers<[1], [0], [0], [1], [0, 0, 1, 1], [], []>} : vector<48x128xbf16>, vector<128x128xbf16>, vector<48x128xf32> -> vector<48x128xf32>
    %52 = arith.addf %46, %51 : vector<48x128xf32>
    %c0_77 = arith.constant 0 : index
    %c0_78 = arith.constant 0 : index
    %53 = vector.load %arg3[%c0_77, %c0_78] : memref<1x128xf32, #tpu.memory_space<vmem>>, vector<1x128xf32>
    %54 = vector.broadcast %53 : vector<1x128xf32> to vector<48x128xf32>
    %55 = arith.addf %52, %54 : vector<48x128xf32>
    %cst_79 = arith.constant 0.000000e+00 : f32
    %56 = vector.broadcast %cst_79 : f32 to vector<48x128xf32>
    %57 = arith.maximumf %55, %56 : vector<48x128xf32>
    %58 = arith.truncf %57 : vector<48x128xf32> to vector<48x128xbf16>
    %c0_80 = arith.constant 0 : index
    %c0_81 = arith.constant 0 : index
    %59 = vector.load %arg4[%c0_80, %c0_81] : memref<48x128xbf16, #tpu.memory_space<vmem>>, vector<48x128xbf16>
    tpu.vector_store %arg4[%c0_80, %c0_81], %58 {strides = array<i32>} : memref<48x128xbf16, #tpu.memory_space<vmem>>, vector<48x128xbf16>,
    return
  }
  func.func @transform_0(%arg0: i32) -> (i32, i32, i32, i32) {
    %c0_i32 = arith.constant 0 : i32
    %c0_i32_0 = arith.constant 0 : i32
    %c0_i32_1 = arith.constant 0 : i32
    %c0_i32_2 = arith.constant 0 : i32
    %c0_i32_3 = arith.constant 0 : i32
    return %c0_i32, %c0_i32_0, %c0_i32_1, %c0_i32_2 : i32, i32, i32, i32
  }
  func.func @transform_1(%arg0: i32) -> (i32, i32, i32, i32) {
    %c0_i32 = arith.constant 0 : i32
    %c0_i32_0 = arith.constant 0 : i32
    %c0_i32_1 = arith.constant 0 : i32
    %c0_i32_2 = arith.constant 0 : i32
    %c0_i32_3 = arith.constant 0 : i32
    return %c0_i32, %c0_i32_0, %c0_i32_1, %c0_i32_2 : i32, i32, i32, i32
  }
  func.func @transform_2(%arg0: i32) -> (i32, i32) {
    %c0_i32 = arith.constant 0 : i32
    %c0_i32_0 = arith.constant 0 : i32
    %c0_i32_1 = arith.constant 0 : i32
    return %c0_i32, %c0_i32_0 : i32, i32
  }
  func.func @transform_3(%arg0: i32) -> (i32, i32) {
    %c0_i32 = arith.constant 0 : i32
    %c0_i32_0 = arith.constant 0 : i32
    %c0_i32_1 = arith.constant 0 : i32
    return %c0_i32, %c0_i32_0 : i32, i32
  }
}

module attributes {stable_mosaic.version = 11 : i64} {
  func.func @_conv_kernel(%arg0: i32, %arg1: memref<2x3x10x128xbf16, #tpu.memory_space<vmem>>, %arg2: memref<3x3x128x128xbf16, #tpu.memory_space<vmem>>, %arg3: memref<1x128xf32, #tpu.memory_space<vmem>>, %arg4: memref<16x128xbf16, #tpu.memory_space<vmem>>) attributes {dimension_semantics = [#tpu.dimension_semantics<arbitrary>], iteration_bounds = array<i64: 1>, scalar_prefetch = 0 : i64, scratch_operands = 0 : i64, tpu.core_type = #tpu.core_type<tc>, window_params = [{pipeline_mode = #tpu.pipeline_mode<synchronous>, transform_indices = @transform_0, window_bounds = array<i64: 2, 3, 10, 128>}, {pipeline_mode = #tpu.pipeline_mode<synchronous>, transform_indices = @transform_1, window_bounds = array<i64: 3, 3, 128, 128>}, {pipeline_mode = #tpu.pipeline_mode<synchronous>, transform_indices = @transform_2, window_bounds = array<i64: 1, 128>}, {pipeline_mode = #tpu.pipeline_mode<synchronous>, transform_indices = @transform_3, window_bounds = array<i64: 16, 128>}]} {
    %c0 = arith.constant 0 : index
    %c0_0 = arith.constant 0 : index
    %c0_1 = arith.constant 0 : index
    %c0_2 = arith.constant 0 : index
    %0 = vector.load %arg1[%c0, %c0_0, %c0_1, %c0_2] : memref<2x3x10x128xbf16, #tpu.memory_space<vmem>>, vector<2x1x8x128xbf16>
    %1 = vector.shape_cast %0 : vector<2x1x8x128xbf16> to vector<16x128xbf16>
    %c0_3 = arith.constant 0 : index
    %c0_4 = arith.constant 0 : index
    %c0_5 = arith.constant 0 : index
    %c0_6 = arith.constant 0 : index
    %2 = vector.load %arg2[%c0_3, %c0_4, %c0_5, %c0_6] : memref<3x3x128x128xbf16, #tpu.memory_space<vmem>>, vector<1x1x128x128xbf16>
    %3 = vector.shape_cast %2 : vector<1x1x128x128xbf16> to vector<128x128xbf16>
    %cst = arith.constant dense<0.000000e+00> : vector<16x128xf32>
    %4 = tpu.matmul %1, %3, %cst {dimension_numbers = #tpu.dot_dimension_numbers<[1], [0], [0], [1], [0, 0, 1, 1], [], []>} : vector<16x128xbf16>, vector<128x128xbf16>, vector<16x128xf32> -> vector<16x128xf32>
    %c0_7 = arith.constant 0 : index
    %c0_8 = arith.constant 0 : index
    %c1 = arith.constant 1 : index
    %c0_9 = arith.constant 0 : index
    %5 = vector.load %arg1[%c0_7, %c0_8, %c1, %c0_9] : memref<2x3x10x128xbf16, #tpu.memory_space<vmem>>, vector<2x1x8x128xbf16>
    %6 = vector.shape_cast %5 : vector<2x1x8x128xbf16> to vector<16x128xbf16>
    %c0_10 = arith.constant 0 : index
    %c1_11 = arith.constant 1 : index
    %c0_12 = arith.constant 0 : index
    %c0_13 = arith.constant 0 : index
    %7 = vector.load %arg2[%c0_10, %c1_11, %c0_12, %c0_13] : memref<3x3x128x128xbf16, #tpu.memory_space<vmem>>, vector<1x1x128x128xbf16>
    %8 = vector.shape_cast %7 : vector<1x1x128x128xbf16> to vector<128x128xbf16>
    %cst_14 = arith.constant dense<0.000000e+00> : vector<16x128xf32>
    %9 = tpu.matmul %6, %8, %cst_14 {dimension_numbers = #tpu.dot_dimension_numbers<[1], [0], [0], [1], [0, 0, 1, 1], [], []>} : vector<16x128xbf16>, vector<128x128xbf16>, vector<16x128xf32> -> vector<16x128xf32>
    %10 = arith.addf %4, %9 : vector<16x128xf32>
    %c0_15 = arith.constant 0 : index
    %c0_16 = arith.constant 0 : index
    %c2 = arith.constant 2 : index
    %c0_17 = arith.constant 0 : index
    %11 = vector.load %arg1[%c0_15, %c0_16, %c2, %c0_17] : memref<2x3x10x128xbf16, #tpu.memory_space<vmem>>, vector<2x1x8x128xbf16>
    %12 = vector.shape_cast %11 : vector<2x1x8x128xbf16> to vector<16x128xbf16>
    %c0_18 = arith.constant 0 : index
    %c2_19 = arith.constant 2 : index
    %c0_20 = arith.constant 0 : index
    %c0_21 = arith.constant 0 : index
    %13 = vector.load %arg2[%c0_18, %c2_19, %c0_20, %c0_21] : memref<3x3x128x128xbf16, #tpu.memory_space<vmem>>, vector<1x1x128x128xbf16>
    %14 = vector.shape_cast %13 : vector<1x1x128x128xbf16> to vector<128x128xbf16>
    %cst_22 = arith.constant dense<0.000000e+00> : vector<16x128xf32>
    %15 = tpu.matmul %12, %14, %cst_22 {dimension_numbers = #tpu.dot_dimension_numbers<[1], [0], [0], [1], [0, 0, 1, 1], [], []>} : vector<16x128xbf16>, vector<128x128xbf16>, vector<16x128xf32> -> vector<16x128xf32>
    %16 = arith.addf %10, %15 : vector<16x128xf32>
    %c0_23 = arith.constant 0 : index
    %c1_24 = arith.constant 1 : index
    %c0_25 = arith.constant 0 : index
    %c0_26 = arith.constant 0 : index
    %17 = vector.load %arg1[%c0_23, %c1_24, %c0_25, %c0_26] : memref<2x3x10x128xbf16, #tpu.memory_space<vmem>>, vector<2x1x8x128xbf16>
    %18 = vector.shape_cast %17 : vector<2x1x8x128xbf16> to vector<16x128xbf16>
    %c1_27 = arith.constant 1 : index
    %c0_28 = arith.constant 0 : index
    %c0_29 = arith.constant 0 : index
    %c0_30 = arith.constant 0 : index
    %19 = vector.load %arg2[%c1_27, %c0_28, %c0_29, %c0_30] : memref<3x3x128x128xbf16, #tpu.memory_space<vmem>>, vector<1x1x128x128xbf16>
    %20 = vector.shape_cast %19 : vector<1x1x128x128xbf16> to vector<128x128xbf16>
    %cst_31 = arith.constant dense<0.000000e+00> : vector<16x128xf32>
    %21 = tpu.matmul %18, %20, %cst_31 {dimension_numbers = #tpu.dot_dimension_numbers<[1], [0], [0], [1], [0, 0, 1, 1], [], []>} : vector<16x128xbf16>, vector<128x128xbf16>, vector<16x128xf32> -> vector<16x128xf32>
    %22 = arith.addf %16, %21 : vector<16x128xf32>
    %c0_32 = arith.constant 0 : index
    %c1_33 = arith.constant 1 : index
    %c1_34 = arith.constant 1 : index
    %c0_35 = arith.constant 0 : index
    %23 = vector.load %arg1[%c0_32, %c1_33, %c1_34, %c0_35] : memref<2x3x10x128xbf16, #tpu.memory_space<vmem>>, vector<2x1x8x128xbf16>
    %24 = vector.shape_cast %23 : vector<2x1x8x128xbf16> to vector<16x128xbf16>
    %c1_36 = arith.constant 1 : index
    %c1_37 = arith.constant 1 : index
    %c0_38 = arith.constant 0 : index
    %c0_39 = arith.constant 0 : index
    %25 = vector.load %arg2[%c1_36, %c1_37, %c0_38, %c0_39] : memref<3x3x128x128xbf16, #tpu.memory_space<vmem>>, vector<1x1x128x128xbf16>
    %26 = vector.shape_cast %25 : vector<1x1x128x128xbf16> to vector<128x128xbf16>
    %cst_40 = arith.constant dense<0.000000e+00> : vector<16x128xf32>
    %27 = tpu.matmul %24, %26, %cst_40 {dimension_numbers = #tpu.dot_dimension_numbers<[1], [0], [0], [1], [0, 0, 1, 1], [], []>} : vector<16x128xbf16>, vector<128x128xbf16>, vector<16x128xf32> -> vector<16x128xf32>
    %28 = arith.addf %22, %27 : vector<16x128xf32>
    %c0_41 = arith.constant 0 : index
    %c1_42 = arith.constant 1 : index
    %c2_43 = arith.constant 2 : index
    %c0_44 = arith.constant 0 : index
    %29 = vector.load %arg1[%c0_41, %c1_42, %c2_43, %c0_44] : memref<2x3x10x128xbf16, #tpu.memory_space<vmem>>, vector<2x1x8x128xbf16>
    %30 = vector.shape_cast %29 : vector<2x1x8x128xbf16> to vector<16x128xbf16>
    %c1_45 = arith.constant 1 : index
    %c2_46 = arith.constant 2 : index
    %c0_47 = arith.constant 0 : index
    %c0_48 = arith.constant 0 : index
    %31 = vector.load %arg2[%c1_45, %c2_46, %c0_47, %c0_48] : memref<3x3x128x128xbf16, #tpu.memory_space<vmem>>, vector<1x1x128x128xbf16>
    %32 = vector.shape_cast %31 : vector<1x1x128x128xbf16> to vector<128x128xbf16>
    %cst_49 = arith.constant dense<0.000000e+00> : vector<16x128xf32>
    %33 = tpu.matmul %30, %32, %cst_49 {dimension_numbers = #tpu.dot_dimension_numbers<[1], [0], [0], [1], [0, 0, 1, 1], [], []>} : vector<16x128xbf16>, vector<128x128xbf16>, vector<16x128xf32> -> vector<16x128xf32>
    %34 = arith.addf %28, %33 : vector<16x128xf32>
    %c0_50 = arith.constant 0 : index
    %c2_51 = arith.constant 2 : index
    %c0_52 = arith.constant 0 : index
    %c0_53 = arith.constant 0 : index
    %35 = vector.load %arg1[%c0_50, %c2_51, %c0_52, %c0_53] : memref<2x3x10x128xbf16, #tpu.memory_space<vmem>>, vector<2x1x8x128xbf16>
    %36 = vector.shape_cast %35 : vector<2x1x8x128xbf16> to vector<16x128xbf16>
    %c2_54 = arith.constant 2 : index
    %c0_55 = arith.constant 0 : index
    %c0_56 = arith.constant 0 : index
    %c0_57 = arith.constant 0 : index
    %37 = vector.load %arg2[%c2_54, %c0_55, %c0_56, %c0_57] : memref<3x3x128x128xbf16, #tpu.memory_space<vmem>>, vector<1x1x128x128xbf16>
    %38 = vector.shape_cast %37 : vector<1x1x128x128xbf16> to vector<128x128xbf16>
    %cst_58 = arith.constant dense<0.000000e+00> : vector<16x128xf32>
    %39 = tpu.matmul %36, %38, %cst_58 {dimension_numbers = #tpu.dot_dimension_numbers<[1], [0], [0], [1], [0, 0, 1, 1], [], []>} : vector<16x128xbf16>, vector<128x128xbf16>, vector<16x128xf32> -> vector<16x128xf32>
    %40 = arith.addf %34, %39 : vector<16x128xf32>
    %c0_59 = arith.constant 0 : index
    %c2_60 = arith.constant 2 : index
    %c1_61 = arith.constant 1 : index
    %c0_62 = arith.constant 0 : index
    %41 = vector.load %arg1[%c0_59, %c2_60, %c1_61, %c0_62] : memref<2x3x10x128xbf16, #tpu.memory_space<vmem>>, vector<2x1x8x128xbf16>
    %42 = vector.shape_cast %41 : vector<2x1x8x128xbf16> to vector<16x128xbf16>
    %c2_63 = arith.constant 2 : index
    %c1_64 = arith.constant 1 : index
    %c0_65 = arith.constant 0 : index
    %c0_66 = arith.constant 0 : index
    %43 = vector.load %arg2[%c2_63, %c1_64, %c0_65, %c0_66] : memref<3x3x128x128xbf16, #tpu.memory_space<vmem>>, vector<1x1x128x128xbf16>
    %44 = vector.shape_cast %43 : vector<1x1x128x128xbf16> to vector<128x128xbf16>
    %cst_67 = arith.constant dense<0.000000e+00> : vector<16x128xf32>
    %45 = tpu.matmul %42, %44, %cst_67 {dimension_numbers = #tpu.dot_dimension_numbers<[1], [0], [0], [1], [0, 0, 1, 1], [], []>} : vector<16x128xbf16>, vector<128x128xbf16>, vector<16x128xf32> -> vector<16x128xf32>
    %46 = arith.addf %40, %45 : vector<16x128xf32>
    %c0_68 = arith.constant 0 : index
    %c2_69 = arith.constant 2 : index
    %c2_70 = arith.constant 2 : index
    %c0_71 = arith.constant 0 : index
    %47 = vector.load %arg1[%c0_68, %c2_69, %c2_70, %c0_71] : memref<2x3x10x128xbf16, #tpu.memory_space<vmem>>, vector<2x1x8x128xbf16>
    %48 = vector.shape_cast %47 : vector<2x1x8x128xbf16> to vector<16x128xbf16>
    %c2_72 = arith.constant 2 : index
    %c2_73 = arith.constant 2 : index
    %c0_74 = arith.constant 0 : index
    %c0_75 = arith.constant 0 : index
    %49 = vector.load %arg2[%c2_72, %c2_73, %c0_74, %c0_75] : memref<3x3x128x128xbf16, #tpu.memory_space<vmem>>, vector<1x1x128x128xbf16>
    %50 = vector.shape_cast %49 : vector<1x1x128x128xbf16> to vector<128x128xbf16>
    %cst_76 = arith.constant dense<0.000000e+00> : vector<16x128xf32>
    %51 = tpu.matmul %48, %50, %cst_76 {dimension_numbers = #tpu.dot_dimension_numbers<[1], [0], [0], [1], [0, 0, 1, 1], [], []>} : vector<16x128xbf16>, vector<128x128xbf16>, vector<16x128xf32> -> vector<16x128xf32>
    %52 = arith.addf %46, %51 : vector<16x128xf32>
    %c0_77 = arith.constant 0 : index
    %c0_78 = arith.constant 0 : index
    %53 = vector.load %arg3[%c0_77, %c0_78] : memref<1x128xf32, #tpu.memory_space<vmem>>, vector<1x128xf32>
    %54 = vector.broadcast %53 : vector<1x128xf32> to vector<16x128xf32>
    %55 = arith.addf %52, %54 : vector<16x128xf32>
    %cst_79 = arith.constant 0.000000e+00 : f32
    %56 = vector.broadcast %cst_79 : f32 to vector<16x128xf32>
    %57 = arith.maximumf %55, %56 : vector<16x128xf32>
    %58 = arith.truncf %57 : vector<16x128xf32> to vector<16x128xbf16>
    %c0_80 = arith.constant 0 : index
    %c0_81 = arith.constant 0 : index
    %59 = vector.load %arg4[%c0_80, %c0_81] : memref<16x128xbf16, #tpu.memory_space<vmem>>, vector<16x128xbf16>
    tpu.vector_store %arg4[%c0_80, %c0_81], %58 {strides = array<i32>} : memref<16x128xbf16, #tpu.memory_space<vmem>>, vector<16x128xbf16>,
    return
  }
  func.func @transform_0(%arg0: i32) -> (i32, i32, i32, i32) {
    %c0_i32 = arith.constant 0 : i32
    %c0_i32_0 = arith.constant 0 : i32
    %c0_i32_1 = arith.constant 0 : i32
    %c0_i32_2 = arith.constant 0 : i32
    %c0_i32_3 = arith.constant 0 : i32
    return %c0_i32, %c0_i32_0, %c0_i32_1, %c0_i32_2 : i32, i32, i32, i32
  }
  func.func @transform_1(%arg0: i32) -> (i32, i32, i32, i32) {
    %c0_i32 = arith.constant 0 : i32
    %c0_i32_0 = arith.constant 0 : i32
    %c0_i32_1 = arith.constant 0 : i32
    %c0_i32_2 = arith.constant 0 : i32
    %c0_i32_3 = arith.constant 0 : i32
    return %c0_i32, %c0_i32_0, %c0_i32_1, %c0_i32_2 : i32, i32, i32, i32
  }
  func.func @transform_2(%arg0: i32) -> (i32, i32) {
    %c0_i32 = arith.constant 0 : i32
    %c0_i32_0 = arith.constant 0 : i32
    %c0_i32_1 = arith.constant 0 : i32
    return %c0_i32, %c0_i32_0 : i32, i32
  }
  func.func @transform_3(%arg0: i32) -> (i32, i32) {
    %c0_i32 = arith.constant 0 : i32
    %c0_i32_0 = arith.constant 0 : i32
    %c0_i32_1 = arith.constant 0 : i32
    return %c0_i32, %c0_i32_0 : i32, i32
  }
}

module attributes {stable_mosaic.version = 11 : i64} {
  func.func @_fc_head_kernel(%arg0: i32, %arg1: memref<2x128xbf16, #tpu.memory_space<vmem>>, %arg2: memref<2x1xf32, #tpu.memory_space<vmem>>, %arg3: memref<128x512xbf16, #tpu.memory_space<vmem>>, %arg4: memref<1x512xf32, #tpu.memory_space<vmem>>, %arg5: memref<512x64xbf16, #tpu.memory_space<vmem>>, %arg6: memref<1x64xf32, #tpu.memory_space<vmem>>, %arg7: memref<1x64xf32, #tpu.memory_space<vmem>>, %arg8: memref<1x64xf32, #tpu.memory_space<vmem>>, %arg9: memref<1x1xf32, #tpu.memory_space<vmem>>, %arg10: memref<2x1xf32, #tpu.memory_space<vmem>>) attributes {dimension_semantics = [#tpu.dimension_semantics<arbitrary>], iteration_bounds = array<i64: 1>, scalar_prefetch = 0 : i64, scratch_operands = 0 : i64, tpu.core_type = #tpu.core_type<tc>, window_params = [{pipeline_mode = #tpu.pipeline_mode<synchronous>, transform_indices = @transform_0, window_bounds = array<i64: 2, 128>}, {pipeline_mode = #tpu.pipeline_mode<synchronous>, transform_indices = @transform_1, window_bounds = array<i64: 2, 1>}, {pipeline_mode = #tpu.pipeline_mode<synchronous>, transform_indices = @transform_2, window_bounds = array<i64: 128, 512>}, {pipeline_mode = #tpu.pipeline_mode<synchronous>, transform_indices = @transform_3, window_bounds = array<i64: 1, 512>}, {pipeline_mode = #tpu.pipeline_mode<synchronous>, transform_indices = @transform_4, window_bounds = array<i64: 512, 64>}, {pipeline_mode = #tpu.pipeline_mode<synchronous>, transform_indices = @transform_5, window_bounds = array<i64: 1, 64>}, {pipeline_mode = #tpu.pipeline_mode<synchronous>, transform_indices = @transform_6, window_bounds = array<i64: 1, 64>}, {pipeline_mode = #tpu.pipeline_mode<synchronous>, transform_indices = @transform_7, window_bounds = array<i64: 1, 64>}, {pipeline_mode = #tpu.pipeline_mode<synchronous>, transform_indices = @transform_8, window_bounds = array<i64: 1, 1>}, {pipeline_mode = #tpu.pipeline_mode<synchronous>, transform_indices = @transform_9, window_bounds = array<i64: 2, 1>}]} {
    %c0 = arith.constant 0 : index
    %c0_0 = arith.constant 0 : index
    %0 = vector.load %arg1[%c0, %c0_0] : memref<2x128xbf16, #tpu.memory_space<vmem>>, vector<2x128xbf16>
    %c0_1 = arith.constant 0 : index
    %c0_2 = arith.constant 0 : index
    %1 = vector.load %arg3[%c0_1, %c0_2] : memref<128x512xbf16, #tpu.memory_space<vmem>>, vector<128x512xbf16>
    %cst = arith.constant dense<0.000000e+00> : vector<2x512xf32>
    %2 = tpu.matmul %0, %1, %cst {dimension_numbers = #tpu.dot_dimension_numbers<[1], [0], [0], [1], [0, 0, 1, 1], [], []>} : vector<2x128xbf16>, vector<128x512xbf16>, vector<2x512xf32> -> vector<2x512xf32>
    %c0_3 = arith.constant 0 : index
    %c0_4 = arith.constant 0 : index
    %3 = vector.load %arg4[%c0_3, %c0_4] : memref<1x512xf32, #tpu.memory_space<vmem>>, vector<1x512xf32>
    %4 = vector.broadcast %3 : vector<1x512xf32> to vector<2x512xf32>
    %5 = arith.addf %2, %4 : vector<2x512xf32>
    %cst_5 = arith.constant 0.000000e+00 : f32
    %6 = vector.broadcast %cst_5 : f32 to vector<2x512xf32>
    %7 = arith.maximumf %5, %6 : vector<2x512xf32>
    %8 = arith.truncf %7 : vector<2x512xf32> to vector<2x512xbf16>
    %c0_6 = arith.constant 0 : index
    %c0_7 = arith.constant 0 : index
    %9 = vector.load %arg5[%c0_6, %c0_7] : memref<512x64xbf16, #tpu.memory_space<vmem>>, vector<512x64xbf16>
    %cst_8 = arith.constant dense<0.000000e+00> : vector<2x64xf32>
    %10 = tpu.matmul %8, %9, %cst_8 {dimension_numbers = #tpu.dot_dimension_numbers<[1], [0], [0], [1], [0, 0, 1, 1], [], []>} : vector<2x512xbf16>, vector<512x64xbf16>, vector<2x64xf32> -> vector<2x64xf32>
    %c0_9 = arith.constant 0 : index
    %c0_10 = arith.constant 0 : index
    %11 = vector.load %arg2[%c0_9, %c0_10] : memref<2x1xf32, #tpu.memory_space<vmem>>, vector<2x1xf32>
    %c0_11 = arith.constant 0 : index
    %c0_12 = arith.constant 0 : index
    %12 = vector.load %arg6[%c0_11, %c0_12] : memref<1x64xf32, #tpu.memory_space<vmem>>, vector<1x64xf32>
    %13 = vector.broadcast %11 : vector<2x1xf32> to vector<2x64xf32>
    %14 = vector.broadcast %12 : vector<1x64xf32> to vector<2x64xf32>
    %15 = arith.mulf %13, %14 : vector<2x64xf32>
    %16 = arith.addf %10, %15 : vector<2x64xf32>
    %c0_13 = arith.constant 0 : index
    %c0_14 = arith.constant 0 : index
    %17 = vector.load %arg7[%c0_13, %c0_14] : memref<1x64xf32, #tpu.memory_space<vmem>>, vector<1x64xf32>
    %18 = vector.broadcast %17 : vector<1x64xf32> to vector<2x64xf32>
    %19 = arith.addf %16, %18 : vector<2x64xf32>
    %cst_15 = arith.constant 0.000000e+00 : f32
    %20 = vector.broadcast %cst_15 : f32 to vector<2x64xf32>
    %21 = arith.maximumf %19, %20 : vector<2x64xf32>
    %c0_16 = arith.constant 0 : index
    %c0_17 = arith.constant 0 : index
    %22 = vector.load %arg8[%c0_16, %c0_17] : memref<1x64xf32, #tpu.memory_space<vmem>>, vector<1x64xf32>
    %23 = vector.broadcast %22 : vector<1x64xf32> to vector<2x64xf32>
    %24 = arith.mulf %21, %23 : vector<2x64xf32>
    %cst_18 = arith.constant dense<0.000000e+00> : vector<2xf32>
    %25 = vector.multi_reduction <add>, %24, %cst_18 [1] : vector<2x64xf32> to vector<2xf32>
    %26 = vector.shape_cast %25 : vector<2xf32> to vector<2x1xf32>
    %c0_19 = arith.constant 0 : index
    %c0_20 = arith.constant 0 : index
    %27 = vector.load %arg9[%c0_19, %c0_20] : memref<1x1xf32, #tpu.memory_space<vmem>>, vector<1x1xf32>
    %28 = vector.broadcast %27 : vector<1x1xf32> to vector<2x1xf32>
    %29 = arith.addf %26, %28 : vector<2x1xf32>
    %c0_21 = arith.constant 0 : index
    %c0_22 = arith.constant 0 : index
    %30 = vector.load %arg10[%c0_21, %c0_22] : memref<2x1xf32, #tpu.memory_space<vmem>>, vector<2x1xf32>
    tpu.vector_store %arg10[%c0_21, %c0_22], %29 {strides = array<i32>} : memref<2x1xf32, #tpu.memory_space<vmem>>, vector<2x1xf32>,
    return
  }
  func.func @transform_0(%arg0: i32) -> (i32, i32) {
    %c0_i32 = arith.constant 0 : i32
    %c0_i32_0 = arith.constant 0 : i32
    %c0_i32_1 = arith.constant 0 : i32
    return %c0_i32, %c0_i32_0 : i32, i32
  }
  func.func @transform_1(%arg0: i32) -> (i32, i32) {
    %c0_i32 = arith.constant 0 : i32
    %c0_i32_0 = arith.constant 0 : i32
    %c0_i32_1 = arith.constant 0 : i32
    return %c0_i32, %c0_i32_0 : i32, i32
  }
  func.func @transform_2(%arg0: i32) -> (i32, i32) {
    %c0_i32 = arith.constant 0 : i32
    %c0_i32_0 = arith.constant 0 : i32
    %c0_i32_1 = arith.constant 0 : i32
    return %c0_i32, %c0_i32_0 : i32, i32
  }
  func.func @transform_3(%arg0: i32) -> (i32, i32) {
    %c0_i32 = arith.constant 0 : i32
    %c0_i32_0 = arith.constant 0 : i32
    %c0_i32_1 = arith.constant 0 : i32
    return %c0_i32, %c0_i32_0 : i32, i32
  }
  func.func @transform_4(%arg0: i32) -> (i32, i32) {
    %c0_i32 = arith.constant 0 : i32
    %c0_i32_0 = arith.constant 0 : i32
    %c0_i32_1 = arith.constant 0 : i32
    return %c0_i32, %c0_i32_0 : i32, i32
  }
  func.func @transform_5(%arg0: i32) -> (i32, i32) {
    %c0_i32 = arith.constant 0 : i32
    %c0_i32_0 = arith.constant 0 : i32
    %c0_i32_1 = arith.constant 0 : i32
    return %c0_i32, %c0_i32_0 : i32, i32
  }
  func.func @transform_6(%arg0: i32) -> (i32, i32) {
    %c0_i32 = arith.constant 0 : i32
    %c0_i32_0 = arith.constant 0 : i32
    %c0_i32_1 = arith.constant 0 : i32
    return %c0_i32, %c0_i32_0 : i32, i32
  }
  func.func @transform_7(%arg0: i32) -> (i32, i32) {
    %c0_i32 = arith.constant 0 : i32
    %c0_i32_0 = arith.constant 0 : i32
    %c0_i32_1 = arith.constant 0 : i32
    return %c0_i32, %c0_i32_0 : i32, i32
  }
  func.func @transform_8(%arg0: i32) -> (i32, i32) {
    %c0_i32 = arith.constant 0 : i32
    %c0_i32_0 = arith.constant 0 : i32
    %c0_i32_1 = arith.constant 0 : i32
    return %c0_i32, %c0_i32_0 : i32, i32
  }
  func.func @transform_9(%arg0: i32) -> (i32, i32) {
    %c0_i32 = arith.constant 0 : i32
    %c0_i32_0 = arith.constant 0 : i32
    %c0_i32_1 = arith.constant 0 : i32
    return %c0_i32, %c0_i32_0 : i32, i32
  }
}

</mosaic_0001>

<bundles_post_ra>
// kernel: cnn_dqn_a_forward.6
= control target key start
LH: loop header
LB: loop body
LE: loop exit
PB: predicated region body
PF: predicated region fallthrough
CT: control target
= control target key end

     0   :  { %vm119_vm0 = vsmask.f32 3328  ;;  %vm120_vm1 = vsmask.f32 7440  ;;  %vm1019_vm2 = vcmask 523264   ;;  %s6356_s1 = inlined_call_operand.vmem [shape: bf16[2,2,64,128], index: 1, kind: input, shape index: {}]   ;;  %s6357_s0 = inlined_call_operand.vmem [shape: bf16[2,17,17,64], index: 0, kind: input, shape index: {}]   ;;  %s6358_s2 = inlined_call_operand.vmem [shape: f32[1,128], index: 2, kind: input, shape index: {}]   ;;  %s6359_s3 = inlined_call_operand.vmem [shape: bf16[512,128], index: 3, kind: output, shape index: {}]  }
   0x1   :  { %v4578_v0 = vld [vmem:[%s6356_s1 + $0x38] sm:$0xff]  ;;  %v4577_v4 = vld [vmem:[%s6356_s1 + $0x30] sm:$0xff]  ;;  %v4576_v8 = vld [vmem:[%s6356_s1 + $0x28] sm:$0xff] }
   0x2   :  { %v4574_v1 = vld [vmem:[%s6356_s1 + $0x18] sm:$0xff]  ;;  %1120 = vmatpush.bf16.msra.mxu0 %v4578_v0  ;;  %v4573_v5 = vld [vmem:[%s6356_s1 + $0x10] sm:$0xff]  ;;  %v4572_v9 = vld [vmem:[%s6356_s1 + $0x8] sm:$0xff] }
   0x3   :  { %v4614_v2 = vld [vmem:[%s6356_s1 + $0x58] sm:$0xff]  ;;  %1569 = vmatpush.bf16.msra.mxu1 %v4574_v1  ;;  %v4613_v6 = vld [vmem:[%s6356_s1 + $0x50] sm:$0xff]  ;;  %v15_v10 = vld [vmem:[%s6357_s0] sm:$0xf] }
   0x4   :  { %v4618_v3 = vld [vmem:[%s6356_s1 + $0x78] sm:$0xff]  ;;  %2092 = vmatpush.bf16.msra.mxu2 %v4614_v2  ;;  %v4617_v7 = vld [vmem:[%s6356_s1 + $0x70] sm:$0xff]  ;;  %v16_v11 = vld [vmem:[%s6357_s0 + $0x4] sm:$0xf]  ;;  %v123_v13 = vshrl.u32 %v15_v10, 16  ;;  %v126_v14 = vshll.u32 %v15_v10, 16 }
   0x5   :  { %3414 = vmatpush.bf16.msra.mxu3 %v4618_v3  ;;  %v87_v12 = vld [vmem:[%s6357_s0 + $0x8] sm:$0x1]  ;;  %v132_v15 = vshll.u32 %v16_v11, 16  ;;  %v136_v16 = vshrl.u32 %v16_v11, 16  ;;  %v4387_v20 = vld [vmem:[%s6357_s0 + $0xc] sm:$0xf]  ;;  %vm4908_vm3 = vmor %vm119_vm0, %vm120_vm1 }
   0x6   :  { %1121 = vmatpush.bf16.msra.mxu0 %v4577_v4  ;;  %v4612_v17 = vld [vmem:[%s6356_s1 + $0x48] sm:$0xff]  ;;  %v142_v19 = vshll.u32 %v87_v12, 16  ;;  %v4575_v21 = vld [vmem:[%s6356_s1 + $0x20] sm:$0xff]  ;;  %v125_v23 = vrot.slane %v123_v13, 4  ;;  %v128_v24 = vrot.slane %v126_v14, 5  ;;  %v2418_v30 = vshrl.u32 %v4387_v20, 16 }
   0x7   :  { %1570 = vmatpush.bf16.msra.mxu1 %v4573_v5  ;;  %v4616_v18 = vld [vmem:[%s6356_s1 + $0x68] sm:$0xff]  ;;  %v4571_v22 = vld [vmem:[%s6356_s1] sm:$0xff]  ;;  %v134_v25 = vrot.slane %v132_v15, 5  ;;  %v138_v26 = vrot.slane %v136_v16, 4  ;;  %v4388_v27 = vld [vmem:[%s6357_s0 + $0x10] sm:$0xf] }
   0x8   :  { %2093 = vmatpush.bf16.msra.mxu2 %v4613_v6  ;;  %v144_v28 = vrot.slane %v142_v19, 5  ;;  %v4389_v29 = vld [vmem:[%s6357_s0 + $0x14] sm:$0x1]  ;;  %v2421_v31 = vshll.u32 %v4387_v20, 16  ;;  %v2427_v32 = vshll.u32 %v4388_v27, 16  ;;  %v129_v33 = vor.u32 %v128_v24, %v125_v23  ;;  %v4611_v39 = vld [vmem:[%s6356_s1 + $0x40] sm:$0xff] }
   0x9   :  { %3415 = vmatpush.bf16.msra.mxu3 %v4617_v7  ;;  %v139_v34 = vor.u32 %v138_v26, %v134_v25  ;;  %v2431_v35 = vshrl.u32 %v4388_v27, 16  ;;  %v2437_v36 = vshll.u32 %v4389_v29, 16  ;;  %v17_v37 = vld [vmem:[%s6357_s0 + $0xc] sm:$0xf]  ;;  %v18_v38 = vld [vmem:[%s6357_s0 + $0x10] sm:$0xf] }
   0xa   :  { %1122 = vmatpush.bf16.msra.mxu0 %v4576_v8  ;;  %v4615_v40 = vld [vmem:[%s6356_s1 + $0x60] sm:$0xff]  ;;  %v2420_v42 = vrot.slane %v2418_v30, 4  ;;  %v2423_v43 = vrot.slane %v2421_v31, 5  ;;  %v2429_v44 = vrot.slane %v2427_v32, 5  ;;  %v147_v45 = vshrl.u32 %v17_v37, 16  ;;  %v4579_v58 = vld [vmem:[%s6357_s0 + $0xc] sm:$0xff] }
   0xb   :  { %1571 = vmatpush.bf16.msra.mxu1 %v4572_v9  ;;  %v130_v46 = vrot.slane %v129_v33, 4  ;;  %v140_v47 = vrot.slane %v139_v34, 4  ;;  %v2433_v48 = vrot.slane %v2431_v35, 4  ;;  %v2439_v49 = vrot.slane %v2437_v36, 5  ;;  %v4539_v50 = vld [vmem:[%s6357_s0] sm:$0xff] }
   0xc   :  { %2094 = vmatpush.bf16.msra.mxu2 %v4612_v17  ;;  %v2424_v51 = vor.u32 %v2423_v43, %v2420_v42  ;;  %v88_v52 = vld [vmem:[%s6357_s0 + $0x14] sm:$0x1]  ;;  %v149_v53 = vrot.slane %v147_v45, 4  ;;  %v150_v54 = vshll.u32 %v17_v37, 16  ;;  %v156_v55 = vshll.u32 %v18_v38, 16 }
   0xd   :  { %3416 = vmatpush.bf16.msra.mxu3 %v4616_v18  ;;  %v135_v56 = vsel %vm4908_vm3, %v130_v46, %v134_v25  ;;  %v145_v57 = vsel %vm4908_vm3, %v140_v47, %v144_v28  ;;  %v2434_v59 = vor.u32 %v2433_v48, %v2429_v44  ;;  %v160_v60 = vshrl.u32 %v18_v38, 16  ;;  %v4390_v61 = vld [vmem:[%s6357_s0 + $0x18] sm:$0xf]  ;;  %v4391_v9 = vld [vmem:[%s6357_s0 + $0x1c] sm:$0xf] }
   0xe   :  { %1123 = vmatpush.bf16.msra.mxu0 %v4575_v21  ;;  %v899_v62 = vunpack.c.l.b16 %v135_v56  ;;  %v900_v63 = vunpack.c.l.b16 %v145_v57  ;;  %v2425_v0 = vrot.slane %v2424_v51, 4  ;;  %v152_v1 = vrot.slane %v150_v54, 5  ;;  %v4392_v10 = vld [vmem:[%s6357_s0 + $0x20] sm:$0x1]  ;;  %v19_v20 = vld [vmem:[%s6357_s0 + $0x18] sm:$0xf] }
   0xf   :  { %1572 = vmatpush.bf16.msra.mxu1 %v4571_v22  ;;  %v2435_v2 = vrot.slane %v2434_v59, 4  ;;  %v158_v3 = vrot.slane %v156_v55, 5  ;;  %v162_v4 = vrot.slane %v160_v60, 4  ;;  %v166_v5 = vshll.u32 %v88_v52, 16  ;;  %v20_v28 = vld [vmem:[%s6357_s0 + $0x1c] sm:$0xf] }
  0x10   :  { %2095 = vmatpush.bf16.msra.mxu2 %v4611_v39  ;;  %v963_v6 = vpack.c.b16 %v900_v63, %v899_v62  ;;  %v2430_v7 = vsel %vm4908_vm3, %v2425_v0, %v2429_v44  ;;  %v153_v8 = vor.u32 %v152_v1, %v149_v53  ;;  %v2442_v11 = vshrl.u32 %v4390_v61, 16  ;;  %v4393_v35 = vld [vmem:[%s6357_s0 + $0x24] sm:$0xf]  ;;  %v4394_v47 = vld [vmem:[%s6357_s0 + $0x28] sm:$0xf]  ;;  %v4540_v55 = vld [vmem:[%s6357_s0 + $0xc] sm:$0xff] }
  0x11   :  { %3417 = vmatpush.bf16.msra.mxu3 %v4615_v40  ;;  %v2440_v12 = vsel %vm4908_vm3, %v2435_v2, %v2439_v49  ;;  %v3194_v13 = vunpack.c.l.b16 %v2430_v7  ;;  %v163_v14 = vor.u32 %v162_v4, %v158_v3  ;;  %v168_v15 = vrot.slane %v166_v5, 5  ;;  %v89_v54 = vld [vmem:[%s6357_s0 + $0x20] sm:$0x1]  ;;  %v4580_v59 = vld [vmem:[%s6357_s0 + $0x18] sm:$0xff]  ;;  %v4395_v5 = vld [vmem:[%s6357_s0 + $0x2c] sm:$0x1] }
  0x12   :  { %4107 = vmatmul.msk.bf16.vlgmr.msra.gmra.mxu1 %vm1019_vm2, %v4539_v50  ;;  %3931 = vmatmul.msk.bf16.vlgmr.msra.gmra.mxu0 %vm1019_vm2, %v963_v6  ;;  %v3195_v16 = vunpack.c.l.b16 %v2440_v12  ;;  %v154_v17 = vrot.slane %v153_v8, 4  ;;  %v2444_v18 = vrot.slane %v2442_v11, 4  ;;  %v2445_v19 = vshll.u32 %v4390_v61, 16  ;;  %v21_v11 = vld [vmem:[%s6357_s0 + $0x24] sm:$0xf] }
  0x13   :  { %4355 = vmatmul.msk.bf16.vlgmr.msra.gmra.mxu2 %vm1019_vm2, %v4579_v58  ;;  %v164_v21 = vrot.slane %v163_v14, 4  ;;  %v2451_v22 = vshll.u32 %v4391_v9, 16  ;;  %v2455_v23 = vshrl.u32 %v4391_v9, 16  ;;  %v2461_v24 = vshll.u32 %v4392_v10, 16  ;;  %v22_v14 = vld [vmem:[%s6357_s0 + $0x28] sm:$0xf] }
  0x14   :  { %v3258_v25 = vpack.c.b16 %v3195_v16, %v3194_v13  ;;  %v159_v26 = vsel %vm4908_vm3, %v154_v17, %v158_v3  ;;  %v2447_v27 = vrot.slane %v2445_v19, 5  ;;  %v171_v32 = vshrl.u32 %v19_v20, 16 }
  0x15   :  { %v169_v29 = vsel %vm4908_vm3, %v164_v21, %v168_v15  ;;  %v2453_v30 = vrot.slane %v2451_v22, 5  ;;  %v2457_v31 = vrot.slane %v2455_v23, 4  ;;  %v2463_v34 = vrot.slane %v2461_v24, 5  ;;  %v4396_v24 = vld [vmem:[%s6357_s0 + $0x30] sm:$0xf] }
  0x16   :  { %4507 = vmatmul.msk.bf16.vlgmr.msra.gmra.mxu3 %vm1019_vm2, %v3258_v25  ;;  %v2448_v33 = vor.u32 %v2447_v27, %v2444_v18  ;;  %v174_v37 = vshll.u32 %v19_v20, 16  ;;  %v180_v38 = vshll.u32 %v20_v28, 16  ;;  %v184_v39 = vshrl.u32 %v20_v28, 16  ;;  %v4397_v25 = vld [vmem:[%s6357_s0 + $0x34] sm:$0xf] }
  0x17   :  { %v2458_v36 = vor.u32 %v2457_v31, %v2453_v30  ;;  %v901_v40 = vunpack.c.l.b16 %v159_v26  ;;  %v902_v42 = vunpack.c.l.b16 %v169_v29  ;;  %v173_v45 = vrot.slane %v171_v32, 4 }
  0x18   :  { %v2449_v43 = vrot.slane %v2448_v33, 4  ;;  %v176_v46 = vrot.slane %v174_v37, 5  ;;  %v2466_v48 = vshrl.u32 %v4393_v35, 16  ;;  %v182_v49 = vrot.slane %v180_v38, 5 }
  0x19   :  { %v2459_v44 = vrot.slane %v2458_v36, 4  ;;  %v186_v50 = vrot.slane %v184_v39, 4  ;;  %v2469_v51 = vshll.u32 %v4393_v35, 16  ;;  %v2475_v56 = vshll.u32 %v4394_v47, 16  ;;  %v4541_v39 = vld [vmem:[%s6357_s0 + $0x18] sm:$0xff] }
  0x1a   :  { %v2454_v52 = vsel %vm4908_vm3, %v2449_v43, %v2453_v30  ;;  %v2479_v57 = vshrl.u32 %v4394_v47, 16  ;;  %v964_v58 = vpack.c.b16 %v902_v42, %v901_v40  ;;  %v177_v60 = vor.u32 %v176_v46, %v173_v45  ;;  %v90_v30 = vld [vmem:[%s6357_s0 + $0x2c] sm:$0x1]  ;;  %v4581_v42 = vld [vmem:[%s6357_s0 + $0x24] sm:$0xff] }
  0x1b   :  { %v2464_v53 = vsel %vm4908_vm3, %v2459_v44, %v2463_v34  ;;  %v2468_v61 = vrot.slane %v2466_v48, 4  ;;  %v2471_v62 = vrot.slane %v2469_v51, 5  ;;  %v3196_v63 = vunpack.c.l.b16 %v2454_v52 }
  0x1c   :  { %v3197_v0 = vunpack.c.l.b16 %v2464_v53  ;;  %v187_v1 = vor.u32 %v186_v50, %v182_v49  ;;  %v190_v2 = vshll.u32 %v89_v54, 16  ;;  %v2477_v3 = vrot.slane %v2475_v56, 5  ;;  %v23_v53 = vld [vmem:[%s6357_s0 + $0x30] sm:$0xf]  ;;  %v24_v54 = vld [vmem:[%s6357_s0 + $0x34] sm:$0xf] }
  0x1d   :  { %v2481_v4 = vrot.slane %v2479_v57, 4  ;;  %v178_v6 = vrot.slane %v177_v60, 4  ;;  %v2472_v7 = vor.u32 %v2471_v62, %v2468_v61  ;;  %v2485_v13 = vshll.u32 %v4395_v5, 16 }
  0x1e   :  { %v3259_v8 = vpack.c.b16 %v3197_v0, %v3196_v63  ;;  %v188_v9 = vrot.slane %v187_v1, 4  ;;  %v192_v10 = vrot.slane %v190_v2, 5  ;;  %v195_v17 = vshrl.u32 %v21_v11, 16 }
  0x1f   :  { %v2482_v12 = vor.u32 %v2481_v4, %v2477_v3  ;;  %v183_v15 = vsel %vm4908_vm3, %v178_v6, %v182_v49  ;;  %v2473_v16 = vrot.slane %v2472_v7, 4  ;;  %v198_v19 = vshll.u32 %v21_v11, 16  ;;  %v4398_v49 = vld [vmem:[%s6357_s0 + $0x38] sm:$0x1]  ;;  %v4400_v4 = vld [vmem:[%s6357_s0 + $0x40] sm:$0xf] }
  0x20   :  { %v193_v18 = vsel %vm4908_vm3, %v188_v9, %v192_v10  ;;  %v204_v20 = vshll.u32 %v22_v14, 16  ;;  %v208_v21 = vshrl.u32 %v22_v14, 16  ;;  %v2487_v23 = vrot.slane %v2485_v13, 5  ;;  %v91_v13 = vld [vmem:[%s6357_s0 + $0x38] sm:$0x1] }
  0x21   :  { %v2483_v22 = vrot.slane %v2482_v12, 4  ;;  %v903_v26 = vunpack.c.l.b16 %v183_v15  ;;  %v904_v27 = vunpack.c.l.b16 %v193_v18  ;;  %v2478_v28 = vsel %vm4908_vm3, %v2473_v16, %v2477_v3  ;;  %v4399_v3 = vld [vmem:[%s6357_s0 + $0x3c] sm:$0xf] }
  0x22   :  { %4108 = vmatmul.msk.bf16.gmra.mxu1 %vm1019_vm2, %v4540_v55  ;;  %3932 = vmatmul.msk.bf16.gmra.mxu0 %vm1019_vm2, %v964_v58  ;;  %v197_v29 = vrot.slane %v195_v17, 4  ;;  %v200_v31 = vrot.slane %v198_v19, 5  ;;  %v206_v32 = vrot.slane %v204_v20, 5  ;;  %v210_v33 = vrot.slane %v208_v21, 4 }
  0x23   :  { %4356 = vmatmul.msk.bf16.gmra.mxu2 %vm1019_vm2, %v4580_v59  ;;  %v2490_v34 = vshrl.u32 %v4396_v24, 16  ;;  %v2488_v35 = vsel %vm4908_vm3, %v2483_v22, %v2487_v23  ;;  %v2493_v36 = vshll.u32 %v4396_v24, 16  ;;  %v2499_v37 = vshll.u32 %v4397_v25, 16  ;;  %v4542_v22 = vld [vmem:[%s6357_s0 + $0x24] sm:$0xff] }
  0x24   :  { %v2503_v38 = vshrl.u32 %v4397_v25, 16  ;;  %v965_v40 = vpack.c.b16 %v904_v27, %v903_v26  ;;  %v214_v43 = vshll.u32 %v90_v30, 16  ;;  %v3198_v44 = vunpack.c.l.b16 %v2478_v28  ;;  %v4582_v26 = vld [vmem:[%s6357_s0 + $0x30] sm:$0xff] }
  0x25   :  { %v3199_v45 = vunpack.c.l.b16 %v2488_v35  ;;  %v201_v46 = vor.u32 %v200_v31, %v197_v29  ;;  %v2492_v47 = vrot.slane %v2490_v34, 4  ;;  %v211_v48 = vor.u32 %v210_v33, %v206_v32  ;;  %v4401_v34 = vld [vmem:[%s6357_s0 + $0x44] sm:$0x1] }
  0x26   :  { %4508 = vmatmul.msk.bf16.gmra.mxu3 %vm1019_vm2, %v3259_v8  ;;  %v2495_v50 = vrot.slane %v2493_v36, 5  ;;  %v2501_v51 = vrot.slane %v2499_v37, 5  ;;  %v2505_v52 = vrot.slane %v2503_v38, 4  ;;  %v216_v56 = vrot.slane %v214_v43, 5  ;;  %v25_v43 = vld [vmem:[%s6357_s0 + $0x3c] sm:$0xf] }
  0x27   :  { %v3260_v55 = vpack.c.b16 %v3199_v45, %v3198_v44  ;;  %v2509_v57 = vshll.u32 %v4398_v49, 16  ;;  %v202_v58 = vrot.slane %v201_v46, 4  ;;  %v212_v59 = vrot.slane %v211_v48, 4  ;;  %v26_v44 = vld [vmem:[%s6357_s0 + $0x40] sm:$0xf] }
  0x28   :  { %v2496_v60 = vor.u32 %v2495_v50, %v2492_v47  ;;  %v2506_v61 = vor.u32 %v2505_v52, %v2501_v51  ;;  %v219_v62 = vshrl.u32 %v23_v53, 16  ;;  %v222_v63 = vshll.u32 %v23_v53, 16 }
  0x29   :  { %v228_v0 = vshll.u32 %v24_v54, 16  ;;  %v232_v1 = vshrl.u32 %v24_v54, 16  ;;  %v2511_v2 = vrot.slane %v2509_v57, 5  ;;  %v207_v5 = vsel %vm4908_vm3, %v202_v58, %v206_v32  ;;  %v4402_v54 = vld [vmem:[%s6357_s0 + $0x48] sm:$0xf] }
  0x2a   :  { %v217_v6 = vsel %vm4908_vm3, %v212_v59, %v216_v56  ;;  %v2497_v7 = vrot.slane %v2496_v60, 4  ;;  %v2507_v8 = vrot.slane %v2506_v61, 4  ;;  %v221_v9 = vrot.slane %v219_v62, 4 }
  0x2b   :  { %v224_v10 = vrot.slane %v222_v63, 5  ;;  %v230_v11 = vrot.slane %v228_v0, 5  ;;  %v234_v12 = vrot.slane %v232_v1, 4  ;;  %v2514_v14 = vshrl.u32 %v4399_v3, 16  ;;  %v92_v0 = vld [vmem:[%s6357_s0 + $0x44] sm:$0x1] }
  0x2c   :  { %v2517_v15 = vshll.u32 %v4399_v3, 16  ;;  %v2523_v16 = vshll.u32 %v4400_v4, 16  ;;  %v2527_v17 = vshrl.u32 %v4400_v4, 16  ;;  %v905_v18 = vunpack.c.l.b16 %v207_v5  ;;  %v4543_v5 = vld [vmem:[%s6357_s0 + $0x30] sm:$0xff] }
  0x2d   :  { %v906_v19 = vunpack.c.l.b16 %v217_v6  ;;  %v2502_v20 = vsel %vm4908_vm3, %v2497_v7, %v2501_v51  ;;  %v2512_v21 = vsel %vm4908_vm3, %v2507_v8, %v2511_v2  ;;  %v225_v23 = vor.u32 %v224_v10, %v221_v9  ;;  %v4583_v7 = vld [vmem:[%s6357_s0 + $0x3c] sm:$0xff] }
  0x2e   :  { %v235_v24 = vor.u32 %v234_v12, %v230_v11  ;;  %v238_v25 = vshll.u32 %v91_v13, 16  ;;  %v2516_v27 = vrot.slane %v2514_v14, 4  ;;  %v2519_v28 = vrot.slane %v2517_v15, 5 }
  0x2f   :  { %v2525_v29 = vrot.slane %v2523_v16, 5  ;;  %v2529_v30 = vrot.slane %v2527_v17, 4  ;;  %v966_v31 = vpack.c.b16 %v906_v19, %v905_v18  ;;  %v3200_v32 = vunpack.c.l.b16 %v2502_v20  ;;  %v4404_v17 = vld [vmem:[%s6357_s0 + $0x50] sm:$0x1]  ;;  %v27_v18 = vld [vmem:[%s6357_s0 + $0x48] sm:$0xf] }
  0x30   :  { %v3201_v33 = vunpack.c.l.b16 %v2512_v21  ;;  %v226_v35 = vrot.slane %v225_v23, 4  ;;  %v240_v36 = vrot.slane %v238_v25, 5  ;;  %v236_v37 = vrot.slane %v235_v24, 4  ;;  %v28_v19 = vld [vmem:[%s6357_s0 + $0x4c] sm:$0xf] }
  0x31   :  { %v2520_v38 = vor.u32 %v2519_v28, %v2516_v27  ;;  %v243_v50 = vshrl.u32 %v25_v43, 16  ;;  %v246_v51 = vshll.u32 %v25_v43, 16  ;;  %v252_v52 = vshll.u32 %v26_v44, 16  ;;  %v93_v43 = vld [vmem:[%s6357_s0 + $0x50] sm:$0x1] }
  0x32   :  { %4109 = vmatmul.msk.bf16.gmra.mxu1 %vm1019_vm2, %v4541_v39  ;;  %3933 = vmatmul.msk.bf16.gmra.mxu0 %vm1019_vm2, %v965_v40  ;;  %v2530_v39 = vor.u32 %v2529_v30, %v2525_v29  ;;  %v2533_v40 = vshll.u32 %v4401_v34, 16  ;;  %v231_v45 = vsel %vm4908_vm3, %v226_v35, %v230_v11  ;;  %v241_v46 = vsel %vm4908_vm3, %v236_v37, %v240_v36 }
  0x33   :  { %4357 = vmatmul.msk.bf16.gmra.mxu2 %vm1019_vm2, %v4581_v42  ;;  %v3261_v42 = vpack.c.b16 %v3201_v33, %v3200_v32  ;;  %v2521_v47 = vrot.slane %v2520_v38, 4  ;;  %v256_v53 = vshrl.u32 %v26_v44, 16  ;;  %v907_v56 = vunpack.c.l.b16 %v231_v45  ;;  %v4405_v32 = vld [vmem:[%s6357_s0 + $0x54] sm:$0xf]  ;;  %v4406_v33 = vld [vmem:[%s6357_s0 + $0x58] sm:$0xf] }
  0x34   :  { %v2531_v48 = vrot.slane %v2530_v39, 4  ;;  %v2535_v49 = vrot.slane %v2533_v40, 5  ;;  %v908_v57 = vunpack.c.l.b16 %v241_v46  ;;  %v245_v60 = vrot.slane %v243_v50, 4 }
  0x35   :  { %v2526_v58 = vsel %vm4908_vm3, %v2521_v47, %v2525_v29  ;;  %v248_v61 = vrot.slane %v246_v51, 5  ;;  %v254_v62 = vrot.slane %v252_v52, 5  ;;  %v258_v63 = vrot.slane %v256_v53, 4  ;;  %v4544_v52 = vld [vmem:[%s6357_s0 + $0x3c] sm:$0xff] }
  0x36   :  { %4509 = vmatmul.msk.bf16.gmra.mxu3 %vm1019_vm2, %v3260_v55  ;;  %v4403_v55 = vld [vmem:[%s6357_s0 + $0x4c] sm:$0xf]  ;;  %v2536_v59 = vsel %vm4908_vm3, %v2531_v48, %v2535_v49  ;;  %v2538_v1 = vshrl.u32 %v4402_v54, 16  ;;  %v2541_v2 = vshll.u32 %v4402_v54, 16  ;;  %v967_v6 = vpack.c.b16 %v908_v57, %v907_v56 }
  0x37   :  { %v2547_v3 = vshll.u32 %v4403_v55, 16  ;;  %v2551_v4 = vshrl.u32 %v4403_v55, 16  ;;  %v3202_v8 = vunpack.c.l.b16 %v2526_v58  ;;  %v3203_v9 = vunpack.c.l.b16 %v2536_v59  ;;  %v4584_v56 = vld [vmem:[%s6357_s0 + $0x48] sm:$0xff] }
  0x38   :  { %v249_v10 = vor.u32 %v248_v61, %v245_v60  ;;  %v259_v11 = vor.u32 %v258_v63, %v254_v62  ;;  %v262_v12 = vshll.u32 %v92_v0, 16  ;;  %v2540_v13 = vrot.slane %v2538_v1, 4  ;;  %v4407_v0 = vld [vmem:[%s6357_s0 + $0x5c] sm:$0x1] }
  0x39   :  { %v2543_v14 = vrot.slane %v2541_v2, 5  ;;  %v2549_v15 = vrot.slane %v2547_v3, 5  ;;  %v2553_v16 = vrot.slane %v2551_v4, 4  ;;  %v3262_v20 = vpack.c.b16 %v3203_v9, %v3202_v8  ;;  %v29_v8 = vld [vmem:[%s6357_s0 + $0x54] sm:$0xf] }
  0x3a   :  { %v250_v21 = vrot.slane %v249_v10, 4  ;;  %v260_v23 = vrot.slane %v259_v11, 4  ;;  %v267_v27 = vshrl.u32 %v27_v18, 16  ;;  %v270_v28 = vshll.u32 %v27_v18, 16  ;;  %v30_v9 = vld [vmem:[%s6357_s0 + $0x58] sm:$0xf] }
  0x3b   :  { %v2544_v24 = vor.u32 %v2543_v14, %v2540_v13  ;;  %v2554_v25 = vor.u32 %v2553_v16, %v2549_v15  ;;  %v276_v29 = vshll.u32 %v28_v19, 16  ;;  %v280_v30 = vshrl.u32 %v28_v19, 16  ;;  %v4408_v19 = vld [vmem:[%s6357_s0 + $0x60] sm:$0xf] }
  0x3c   :  { %v269_v38 = vrot.slane %v267_v27, 4  ;;  %v272_v39 = vrot.slane %v270_v28, 5  ;;  %v2562_v44 = vshrl.u32 %v4405_v32, 16  ;;  %v2565_v45 = vshll.u32 %v4405_v32, 16 }
  0x3d   :  { %v2545_v35 = vrot.slane %v2544_v24, 4  ;;  %v2555_v36 = vrot.slane %v2554_v25, 4  ;;  %v278_v40 = vrot.slane %v276_v29, 5  ;;  %v2571_v46 = vshll.u32 %v4406_v33, 16  ;;  %v94_v29 = vld [vmem:[%s6357_s0 + $0x5c] sm:$0x1] }
  0x3e   :  { %v2575_v47 = vshrl.u32 %v4406_v33, 16  ;;  %v273_v53 = vor.u32 %v272_v39, %v269_v38  ;;  %v286_v55 = vshll.u32 %v93_v43, 16  ;;  %v2564_v57 = vrot.slane %v2562_v44, 4 }
  0x3f   :  { %v2550_v50 = vsel %vm4908_vm3, %v2545_v35, %v2549_v15  ;;  %v2567_v58 = vrot.slane %v2565_v45, 5  ;;  %v2573_v59 = vrot.slane %v2571_v46, 5  ;;  %v291_v15 = vshrl.u32 %v29_v8, 16 }
  0x40   :  { %v2577_v60 = vrot.slane %v2575_v47, 4  ;;  %v274_v1 = vrot.slane %v273_v53, 4  ;;  %v288_v2 = vrot.slane %v286_v55, 5  ;;  %v294_v16 = vshll.u32 %v29_v8, 16  ;;  %v4410_v47 = vld [vmem:[%s6357_s0 + $0x68] sm:$0x1] }
  0x41   :  { %v2568_v4 = vor.u32 %v2567_v58, %v2564_v57  ;;  %v304_v18 = vshrl.u32 %v30_v9, 16  ;;  %v293_v25 = vrot.slane %v291_v15, 4 }
  0x42   :  { %4110 = vmatmul.msk.bf16.gmra.mxu1 %vm1019_vm2, %v4542_v22  ;;  %3934 = vmatmul.msk.bf16.gmra.mxu0 %vm1019_vm2, %v966_v31  ;;  %v264_v22 = vrot.slane %v262_v12, 5  ;;  %v255_v31 = vsel %vm4908_vm3, %v250_v21, %v254_v62  ;;  %v3204_v62 = vunpack.c.l.b16 %v2550_v50  ;;  %v279_v10 = vsel %vm4908_vm3, %v274_v1, %v278_v40 }
  0x43   :  { %4358 = vmatmul.msk.bf16.gmra.mxu2 %vm1019_vm2, %v4582_v26  ;;  %v2557_v26 = vshll.u32 %v4404_v17, 16  ;;  %v909_v48 = vunpack.c.l.b16 %v255_v31  ;;  %v2569_v12 = vrot.slane %v2568_v4, 4  ;;  %v300_v17 = vshll.u32 %v30_v9, 16 }
  0x44   :  { %v265_v34 = vsel %vm4908_vm3, %v260_v23, %v264_v22  ;;  %v911_v21 = vunpack.c.l.b16 %v279_v10  ;;  %v306_v28 = vrot.slane %v304_v18, 4  ;;  %v2589_v31 = vshll.u32 %v4408_v19, 16 }
  0x45   :  { %v2559_v37 = vrot.slane %v2557_v26, 5  ;;  %v910_v49 = vunpack.c.l.b16 %v265_v34  ;;  %v2574_v23 = vsel %vm4908_vm3, %v2569_v12, %v2573_v59  ;;  %v296_v26 = vrot.slane %v294_v16, 5  ;;  %v4545_v34 = vld [vmem:[%s6357_s0 + $0x48] sm:$0xff] }
  0x46   :  { %4510 = vmatmul.msk.bf16.gmra.mxu3 %vm1019_vm2, %v3261_v42  ;;  %v282_v42 = vrot.slane %v280_v30, 4  ;;  %v302_v27 = vrot.slane %v300_v17, 5  ;;  %v2586_v30 = vshrl.u32 %v4408_v19, 16  ;;  %v2591_v44 = vrot.slane %v2589_v31, 5  ;;  %v4546_v17 = vld [vmem:[%s6357_s0 + $0x54] sm:$0xff] }
  0x47   :  { %v2560_v51 = vsel %vm4908_vm3, %v2555_v36, %v2559_v37  ;;  %v968_v61 = vpack.c.b16 %v910_v49, %v909_v48  ;;  %v4585_v36 = vld [vmem:[%s6357_s0 + $0x54] sm:$0xff]  ;;  %v3206_v37 = vunpack.c.l.b16 %v2574_v23  ;;  %v297_v39 = vor.u32 %v296_v26, %v293_v25  ;;  %v31_v48 = vld [vmem:[%s6357_s0 + $0x60] sm:$0xf] }
  0x48   :  { %v283_v54 = vor.u32 %v282_v42, %v278_v40  ;;  %v3205_v63 = vunpack.c.l.b16 %v2560_v51  ;;  %v307_v40 = vor.u32 %v306_v28, %v302_v27  ;;  %v310_v42 = vshll.u32 %v94_v29, 16 }
  0x49   :  { %v2588_v43 = vrot.slane %v2586_v30, 4  ;;  %v298_v50 = vrot.slane %v297_v39, 4  ;;  %v315_v57 = vshrl.u32 %v31_v48, 16  ;;  %v318_v58 = vshll.u32 %v31_v48, 16 }
  0x4a   :  { %v284_v3 = vrot.slane %v283_v54, 4  ;;  %v312_v51 = vrot.slane %v310_v42, 5  ;;  %v308_v53 = vrot.slane %v307_v40, 4  ;;  %v4414_v40 = vld [vmem:[%s6357_s0 + $0x78] sm:$0xf] }
  0x4b   :  { %v2592_v54 = vor.u32 %v2591_v44, %v2588_v43  ;;  %v317_v4 = vrot.slane %v315_v57, 4 }
  0x4c   :  { %v289_v11 = vsel %vm4908_vm3, %v284_v3, %v288_v2 }
  0x4d   :  { %v912_v22 = vunpack.c.l.b16 %v289_v11  ;;  %v2593_v1 = vrot.slane %v2592_v54, 4 }
  0x4f   :  { %v969_v35 = vpack.c.b16 %v912_v22, %v911_v21  ;;  %v4586_v21 = vld [vmem:[%s6357_s0 + $0x60] sm:$0xff] }
  0x52   :  { %4111 = vmatmul.msk.bf16.gmra.mxu1 %vm1019_vm2, %v4543_v5  ;;  %3935 = vmatmul.msk.bf16.gmra.mxu0 %vm1019_vm2, %v967_v6  ;;  %v2578_v5 = vor.u32 %v2577_v60, %v2573_v59  ;;  %v2581_v6 = vshll.u32 %v4407_v0, 16  ;;  %v313_v0 = vsel %vm4908_vm3, %v308_v53, %v312_v51  ;;  %v2637_v51 = vshll.u32 %v4414_v40, 16 }
  0x53   :  { %4359 = vmatmul.msk.bf16.gmra.mxu2 %vm1019_vm2, %v4583_v7  ;;  %v3263_v7 = vpack.c.b16 %v3205_v63, %v3204_v62  ;;  %v303_v62 = vsel %vm4908_vm3, %v298_v50, %v302_v27  ;;  %v4412_v63 = vld [vmem:[%s6357_s0 + $0x70] sm:$0xf]  ;;  %v2634_v50 = vshrl.u32 %v4414_v40, 16 }
  0x54   :  { %v2579_v13 = vrot.slane %v2578_v5, 4  ;;  %v2583_v14 = vrot.slane %v2581_v6, 5  ;;  %v320_v5 = vrot.slane %v318_v58, 5  ;;  %v2619_v10 = vshll.u32 %v4412_v63, 16 }
  0x55   :  { %v2623_v11 = vshrl.u32 %v4412_v63, 16  ;;  %v913_v12 = vunpack.c.l.b16 %v303_v62  ;;  %v2639_v62 = vrot.slane %v2637_v51, 5 }
  0x56   :  { %4511 = vmatmul.msk.bf16.gmra.mxu3 %vm1019_vm2, %v3262_v20  ;;  %v4409_v20 = vld [vmem:[%s6357_s0 + $0x64] sm:$0xf]  ;;  %v2584_v24 = vsel %vm4908_vm3, %v2579_v13, %v2583_v14  ;;  %v914_v13 = vunpack.c.l.b16 %v313_v0  ;;  %v95_v14 = vld [vmem:[%s6357_s0 + $0x68] sm:$0x1]  ;;  %v321_v18 = vor.u32 %v320_v5, %v317_v4  ;;  %v2621_v25 = vrot.slane %v2619_v10, 5  ;;  %v4587_v4 = vld [vmem:[%s6357_s0 + $0x6c] sm:$0xff] }
  0x57   :  { %v2595_v32 = vshll.u32 %v4409_v20, 16  ;;  %v2599_v33 = vshrl.u32 %v4409_v20, 16  ;;  %v3207_v38 = vunpack.c.l.b16 %v2584_v24  ;;  %v334_v23 = vshll.u32 %v95_v14, 16  ;;  %v4413_v24 = vld [vmem:[%s6357_s0 + $0x74] sm:$0x1] }
  0x58   :  { %v2625_v26 = vrot.slane %v2623_v11, 4  ;;  %v970_v27 = vpack.c.b16 %v914_v13, %v913_v12  ;;  %v2629_v31 = vshll.u32 %v4413_v24, 16  ;;  %v4416_v12 = vld [vmem:[%s6357_s0 + $0x80] sm:$0x1] }
  0x59   :  { %v2597_v45 = vrot.slane %v2595_v32, 5  ;;  %v2601_v46 = vrot.slane %v2599_v33, 4  ;;  %v3264_v49 = vpack.c.b16 %v3207_v38, %v3206_v37  ;;  %v322_v32 = vrot.slane %v321_v18, 4  ;;  %v33_v37 = vld [vmem:[%s6357_s0 + $0x6c] sm:$0xf] }
  0x5a   :  { %v34_v38 = vld [vmem:[%s6357_s0 + $0x70] sm:$0xf] }
  0x5b   :  { %v2602_v55 = vor.u32 %v2601_v46, %v2597_v45  ;;  %v2598_v15 = vsel %vm4908_vm3, %v2593_v1, %v2597_v45  ;;  %v2631_v45 = vrot.slane %v2629_v31, 5  ;;  %v339_v46 = vshrl.u32 %v33_v37, 16  ;;  %v4547_v1 = vld [vmem:[%s6357_s0 + $0x60] sm:$0xff] }
  0x5c   :  { %v3208_v28 = vunpack.c.l.b16 %v2598_v15  ;;  %v348_v48 = vshll.u32 %v34_v38, 16  ;;  %v4417_v31 = vld [vmem:[%s6357_s0 + $0x84] sm:$0xf] }
  0x5d   :  { %v2603_v2 = vrot.slane %v2602_v55, 4  ;;  %v341_v57 = vrot.slane %v339_v46, 4 }
  0x62   :  { %4112 = vmatmul.msk.bf16.gmra.mxu1 %vm1019_vm2, %v4544_v52  ;;  %3936 = vmatmul.msk.bf16.gmra.mxu0 %vm1019_vm2, %v968_v61  ;;  %v32_v52 = vld [vmem:[%s6357_s0 + $0x64] sm:$0xf]  ;;  %v4411_v61 = vld [vmem:[%s6357_s0 + $0x6c] sm:$0xf] }
  0x63   :  { %4360 = vmatmul.msk.bf16.gmra.mxu2 %vm1019_vm2, %v4584_v56  ;;  %v2605_v56 = vshll.u32 %v4410_v47, 16  ;;  %v324_v59 = vshll.u32 %v32_v52, 16  ;;  %v328_v60 = vshrl.u32 %v32_v52, 16  ;;  %v2610_v6 = vshrl.u32 %v4411_v61, 16  ;;  %v4415_v52 = vld [vmem:[%s6357_s0 + $0x7c] sm:$0xf] }
  0x64   :  { %v342_v47 = vshll.u32 %v33_v37, 16  ;;  %v2643_v63 = vshll.u32 %v4415_v52, 16  ;;  %v2647_v0 = vshrl.u32 %v4415_v52, 16 }
  0x65   :  { %v2607_v3 = vrot.slane %v2605_v56, 5  ;;  %v326_v8 = vrot.slane %v324_v59, 5  ;;  %v330_v9 = vrot.slane %v328_v60, 4  ;;  %v2612_v19 = vrot.slane %v2610_v6, 4 }
  0x66   :  { %4512 = vmatmul.msk.bf16.gmra.mxu3 %vm1019_vm2, %v3263_v7  ;;  %v2613_v7 = vshll.u32 %v4411_v61, 16  ;;  %v344_v58 = vrot.slane %v342_v47, 5  ;;  %v350_v59 = vrot.slane %v348_v48, 5  ;;  %v2636_v61 = vrot.slane %v2634_v50, 4 }
  0x67   :  { %v2608_v16 = vsel %vm4908_vm3, %v2603_v2, %v2607_v3  ;;  %v331_v22 = vor.u32 %v330_v9, %v326_v8  ;;  %v327_v42 = vsel %vm4908_vm3, %v322_v32, %v326_v8  ;;  %v96_v2 = vld [vmem:[%s6357_s0 + $0x74] sm:$0x1]  ;;  %v2645_v14 = vrot.slane %v2643_v63, 5  ;;  %v4588_v63 = vld [vmem:[%s6357_s0 + $0x78] sm:$0xff] }
  0x68   :  { %v2615_v20 = vrot.slane %v2613_v7, 5  ;;  %v3209_v29 = vunpack.c.l.b16 %v2608_v16  ;;  %v915_v53 = vunpack.c.l.b16 %v327_v42  ;;  %v345_v8 = vor.u32 %v344_v58, %v341_v57  ;;  %v35_v16 = vld [vmem:[%s6357_s0 + $0x78] sm:$0xf]  ;;  %v4548_v58 = vld [vmem:[%s6357_s0 + $0x6c] sm:$0xff] }
  0x69   :  { %v332_v33 = vrot.slane %v331_v22, 4  ;;  %v358_v11 = vshll.u32 %v96_v2, 16  ;;  %v2640_v13 = vor.u32 %v2639_v62, %v2636_v61  ;;  %v2649_v15 = vrot.slane %v2647_v0, 4  ;;  %v4419_v2 = vld [vmem:[%s6357_s0 + $0x8c] sm:$0x1] }
  0x6a   :  { %v2616_v30 = vor.u32 %v2615_v20, %v2612_v19  ;;  %v346_v18 = vrot.slane %v345_v8, 4  ;;  %v2653_v19 = vshll.u32 %v4416_v12, 16  ;;  %v36_v20 = vld [vmem:[%s6357_s0 + $0x7c] sm:$0xf]  ;;  %v2677_v12 = vshll.u32 %v4419_v2, 16 }
  0x6b   :  { %v360_v22 = vrot.slane %v358_v11, 5  ;;  %v2650_v24 = vor.u32 %v2649_v15, %v2645_v14 }
  0x6c   :  { %v2617_v39 = vrot.slane %v2616_v30, 4  ;;  %v376_v30 = vshrl.u32 %v36_v20, 16 }
  0x6e   :  { %v2622_v55 = vsel %vm4908_vm3, %v2617_v39, %v2621_v25  ;;  %v2651_v39 = vrot.slane %v2650_v24, 4  ;;  %v378_v47 = vrot.slane %v376_v30, 4 }
  0x6f   :  { %v3210_v5 = vunpack.c.l.b16 %v2622_v55 }
  0x72   :  { %4113 = vmatmul.msk.bf16.gmra.mxu1 %vm1019_vm2, %v4545_v34  ;;  %3937 = vmatmul.msk.bf16.gmra.mxu0 %vm1019_vm2, %v969_v35  ;;  %v336_v34 = vrot.slane %v334_v23, 5  ;;  %v2626_v35 = vor.u32 %v2625_v26, %v2621_v25  ;;  %v2641_v23 = vrot.slane %v2640_v13, 4  ;;  %v363_v26 = vshrl.u32 %v35_v16, 16 }
  0x73   :  { %4361 = vmatmul.msk.bf16.gmra.mxu2 %vm1019_vm2, %v4585_v36  ;;  %v3265_v36 = vpack.c.b16 %v3209_v29, %v3208_v28  ;;  %v372_v29 = vshll.u32 %v36_v20, 16 }
  0x74   :  { %v337_v43 = vsel %vm4908_vm3, %v332_v33, %v336_v34  ;;  %v2627_v44 = vrot.slane %v2626_v35, 4  ;;  %v2655_v33 = vrot.slane %v2653_v19, 5  ;;  %v4418_v34 = vld [vmem:[%s6357_s0 + $0x88] sm:$0xf]  ;;  %v365_v40 = vrot.slane %v363_v26, 4 }
  0x75   :  { %v916_v54 = vunpack.c.l.b16 %v337_v43  ;;  %v2658_v43 = vshrl.u32 %v4417_v31, 16  ;;  %v5248_v46 = vrot.slane %v372_v29, 5  ;;  %v2667_v48 = vshll.u32 %v4418_v34, 16  ;;  %v38_v26 = vld [vmem:[%s6357_s0 + $0x88] sm:$0xf] }
  0x76   :  { %4513 = vmatmul.msk.bf16.gmra.mxu3 %vm1019_vm2, %v3264_v49  ;;  %v352_v49 = vshrl.u32 %v34_v38, 16  ;;  %v2632_v56 = vsel %vm4908_vm3, %v2627_v44, %v2631_v45  ;;  %v2646_v38 = vsel %vm4908_vm3, %v2641_v23, %v2645_v14  ;;  %v2661_v44 = vshll.u32 %v4417_v31, 16 }
  0x77   :  { %v971_v6 = vpack.c.b16 %v916_v54, %v915_v53  ;;  %v3211_v7 = vunpack.c.l.b16 %v2632_v56  ;;  %v97_v53 = vld [vmem:[%s6357_s0 + $0x80] sm:$0x1]  ;;  %v2656_v54 = vsel %vm4908_vm3, %v2651_v39, %v2655_v33  ;;  %v3212_v55 = vunpack.c.l.b16 %v2646_v38 }
  0x78   :  { %v354_v60 = vrot.slane %v352_v49, 4  ;;  %v2671_v49 = vshrl.u32 %v4418_v34, 16  ;;  %v2663_v61 = vrot.slane %v2661_v44, 5  ;;  %v379_v0 = vor.u32 %v378_v47, %v5248_v46 }
  0x79   :  { %v396_v38 = vshll.u32 %v38_v26, 16  ;;  %v400_v39 = vshrl.u32 %v38_v26, 16 }
  0x7a   :  { %v355_v9 = vor.u32 %v354_v60, %v350_v59  ;;  %v2660_v60 = vrot.slane %v2658_v43, 4  ;;  %v380_v15 = vrot.slane %v379_v0, 4 }
  0x7c   :  { %v2664_v11 = vor.u32 %v2663_v61, %v2660_v60  ;;  %v98_v60 = vld [vmem:[%s6357_s0 + $0x8c] sm:$0x1] }
  0x7e   :  { %v2665_v24 = vrot.slane %v2664_v11, 4 }
  0x82   :  { %4114 = vmatmul.msk.bf16.gmra.mxu1 %vm1019_vm2, %v4546_v17  ;;  %3938 = vmatmul.msk.bf16.gmra.mxu0 %vm1019_vm2, %v970_v27  ;;  %v3266_v17 = vpack.c.b16 %v3211_v7, %v3210_v5  ;;  %v366_v27 = vshll.u32 %v35_v16, 16 }
  0x83   :  { %4362 = vmatmul.msk.bf16.gmra.mxu2 %vm1019_vm2, %v4586_v21  ;;  %v356_v21 = vrot.slane %v355_v9, 4  ;;  %v3213_v9 = vunpack.c.l.b16 %v2656_v54  ;;  %v402_v54 = vrot.slane %v400_v39, 4 }
  0x84   :  { %v368_v42 = vrot.slane %v366_v27, 5 }
  0x85   :  { %v361_v37 = vsel %vm4908_vm3, %v356_v21, %v360_v22  ;;  %v3267_v20 = vpack.c.b16 %v3213_v9, %v3212_v55  ;;  %v37_v21 = vld [vmem:[%s6357_s0 + $0x84] sm:$0xf] }
  0x86   :  { %4514 = vmatmul.msk.bf16.gmra.mxu3 %vm1019_vm2, %v3265_v36  ;;  %v351_v36 = vsel %vm4908_vm3, %v346_v18, %v350_v59  ;;  %v918_v52 = vunpack.c.l.b16 %v361_v37  ;;  %v369_v59 = vor.u32 %v368_v42, %v365_v40  ;;  %v387_v31 = vshrl.u32 %v37_v21, 16  ;;  %v4421_v42 = vld [vmem:[%s6357_s0 + $0x94] sm:$0xf] }
  0x87   :  { %v917_v51 = vunpack.c.l.b16 %v351_v36  ;;  %v390_v36 = vshll.u32 %v37_v21, 16  ;;  %v2691_v55 = vshll.u32 %v4421_v42, 16  ;;  %v40_v21 = vld [vmem:[%s6357_s0 + $0x94] sm:$0xf] }
  0x88   :  { %v370_v14 = vrot.slane %v369_v59, 4  ;;  %v4549_v59 = vld [vmem:[%s6357_s0 + $0x78] sm:$0xff] }
  0x89   :  { %v972_v8 = vpack.c.b16 %v918_v52, %v917_v51  ;;  %v389_v51 = vrot.slane %v387_v31, 4  ;;  %v392_v52 = vrot.slane %v390_v36, 5  ;;  %v2693_v11 = vrot.slane %v2691_v55, 5 }
  0x8f   :  { %v1574_v3 = vpop.f32.mrf.mxu1  ;;  %v1125_v10 = vpop.f32.mrf.mxu0 }
  0x90   :  { %v1575_v32 = vadd.f32 %v1574_v3, %v1125_v10  ;;  %v5265_v3 = vrot.slane %v2667_v48, 5 }
  0x92   :  { %4115 = vmatmul.msk.bf16.gmra.mxu1 %vm1019_vm2, %v4547_v1  ;;  %3939 = vmatmul.msk.bf16.gmra.mxu0 %vm1019_vm2, %v971_v6  ;;  %v382_v1 = vshll.u32 %v97_v53, 16  ;;  %v5270_v6 = vld [vmem:[%s6358_s2] ss:$0 sm:$0xff]  ;;  %v2670_v48 = vsel %vm4908_vm3, %v2665_v24, %v5265_v3  ;;  %v5304_v53 = vrot.slane %v396_v38, 5 }
  0x93   :  { %4363 = vmatmul.msk.bf16.gmra.mxu2 %vm1019_vm2, %v4587_v4  ;;  %v2673_v4 = vrot.slane %v2671_v49, 4  ;;  %v3214_v2 = vunpack.c.l.b16 %v2670_v48 }
  0x94   :  { %v384_v16 = vrot.slane %v382_v1, 5  ;;  %v4589_v1 = vld [vmem:[%s6357_s0 + $0x84] sm:$0xff]  ;;  %v403_v9 = vor.u32 %v402_v54, %v5304_v53 }
  0x96   :  { %v2097_v25 = vpop.f32.mrf.mxu2  ;;  %4515 = vmatmul.msk.bf16.gmra.mxu3 %vm1019_vm2, %v3266_v17  ;;  %v2674_v17 = vor.u32 %v2673_v4, %v5265_v3  ;;  %v385_v29 = vsel %vm4908_vm3, %v380_v15, %v384_v16 }
  0x97   :  { %v1576_v28 = vpop.f32.mrf.mxu1  ;;  %v1127_v35 = vpop.f32.mrf.mxu0  ;;  %v2257_v50 = vadd.f32 %v2097_v25, %v1575_v32  ;;  %v2679_v25 = vrot.slane %v2677_v12, 5  ;;  %v4420_v32 = vld [vmem:[%s6357_s0 + $0x90] sm:$0xf]  ;;  %v920_v47 = vunpack.c.l.b16 %v385_v29 }
  0x98   :  { %v1577_v56 = vadd.f32 %v1576_v28, %v1127_v35  ;;  %v375_v28 = vsel %vm4908_vm3, %v370_v14, %v5248_v46  ;;  %v2675_v30 = vrot.slane %v2674_v17, 4  ;;  %v2682_v43 = vshrl.u32 %v4420_v32, 16 }
  0x99   :  { %v3419_v45 = vpop.f32.mrf.mxu3  ;;  %v2685_v44 = vshll.u32 %v4420_v32, 16  ;;  %v919_v46 = vunpack.c.l.b16 %v375_v28  ;;  %v420_v32 = vshll.u32 %v40_v21, 16 }
  0x9a   :  { %v3579_v5 = vadd.f32 %v3419_v45, %v2257_v50  ;;  %v2680_v50 = vsel %vm4908_vm3, %v2675_v30, %v2679_v25  ;;  %v2684_v61 = vrot.slane %v2682_v43, 4 }
  0x9b   :  { %v973_v0 = vpack.c.b16 %v920_v47, %v919_v46  ;;  %v4424_v46 = vld [vmem:[%s6357_s0 + $0xa0] sm:$0xf] }
  0x9c   :  { %v3647_v18 = vadd.f32 %v5270_v6, %v3579_v5  ;;  %v3215_v5 = vunpack.c.l.b16 %v2680_v50 }
  0x9e   :  { %v2099_v57 = vpop.f32.mrf.mxu2  ;;  %v3711_v33 = vmax.f32 %v3647_v18, 0.0  ;;  %v3268_v18 = vpack.c.b16 %v3215_v5, %v3214_v2 }
  0x9f   :  { %v1579_v62 = vpop.f32.mrf.mxu1  ;;  %v2258_v7 = vadd.f32 %v2099_v57, %v1577_v56  ;;  %v1130_v10 = vpop.f32.mrf.mxu0  ;;  %v2695_v56 = vshrl.u32 %v4421_v42, 16 }
  0xa0   :  { %v1580_v35 = vadd.f32 %v1579_v62, %v1130_v10  ;;  %v2687_v62 = vrot.slane %v2685_v44, 5  ;;  %v406_v10 = vshll.u32 %v98_v60, 16  ;;  %v2719_v60 = vshrl.u32 %v4424_v46, 16 }
  0xa1   :  { %v3421_v13 = vpop.f32.mrf.mxu3  ;;  %v2697_v12 = vrot.slane %v2695_v56, 4 }
  0xa2   :  { %4116 = vmatmul.msk.bf16.gmra.mxu1 %vm1019_vm2, %v4548_v58  ;;  %v3580_v19 = vadd.f32 %v3421_v13, %v2258_v7  ;;  %3940 = vmatmul.msk.bf16.gmra.mxu0 %vm1019_vm2, %v972_v8  ;;  %v393_v7 = vor.u32 %v392_v52, %v389_v51  ;;  %v4422_v13 = vld [vmem:[%s6357_s0 + $0x98] sm:$0x1]  ;;  %v2688_v14 = vor.u32 %v2687_v62, %v2684_v61  ;;  %v5344_v52 = vrot.slane %v420_v32, 5 }
  0xa3   :  { %4364 = vmatmul.msk.bf16.gmra.mxu2 %vm1019_vm2, %v4588_v63  ;;  %v2698_v24 = vor.u32 %v2697_v12, %v2693_v11  ;;  %v2701_v25 = vshll.u32 %v4422_v13, 16 }
  0xa4   :  { %v3648_v22 = vadd.f32 %v5270_v6, %v3580_v19  ;;  %v394_v19 = vrot.slane %v393_v7, 4  ;;  %v2689_v28 = vrot.slane %v2688_v14, 4  ;;  %v4425_v14 = vld [vmem:[%s6357_s0 + $0xa4] sm:$0x1] }
  0xa5   :  { %v2699_v42 = vrot.slane %v2698_v24, 4  ;;  %v2703_v43 = vrot.slane %v2701_v25, 5 }
  0xa6   :  { %v2102_v23 = vpop.f32.mrf.mxu2  ;;  %v3712_v34 = vmax.f32 %v3648_v22, 0.0  ;;  %4516 = vmatmul.msk.bf16.gmra.mxu3 %vm1019_vm2, %v3267_v20  ;;  %v39_v20 = vld [vmem:[%s6357_s0 + $0x90] sm:$0xf]  ;;  %v404_v22 = vrot.slane %v403_v9, 4  ;;  %v399_v39 = vsel %vm4908_vm3, %v394_v19, %v5304_v53 }
  0xa7   :  { %v1581_v27 = vpop.f32.mrf.mxu1  ;;  %v1132_v37 = vpop.f32.mrf.mxu0  ;;  %v2259_v49 = vadd.f32 %v2102_v23, %v1580_v35  ;;  %v408_v23 = vrot.slane %v406_v10, 5  ;;  %v411_v30 = vshrl.u32 %v39_v20, 16  ;;  %v414_v31 = vshll.u32 %v39_v20, 16 }
  0xa8   :  { %v4622_v40 = vpack.c.bf16 %v3712_v34, %v3711_v33  ;;  %v1582_v57 = vadd.f32 %v1581_v27, %v1132_v37  ;;  %v424_v33 = vshrl.u32 %v40_v21, 16  ;;  %v4423_v34 = vld [vmem:[%s6357_s0 + $0x9c] sm:$0xf]  ;;  %v921_v55 = vunpack.c.l.b16 %v399_v39 }
  0xa9   :  { %v3424_v45 = vpop.f32.mrf.mxu3  ;;  %v2706_v47 = vshrl.u32 %v4423_v34, 16  ;;  %v2709_v48 = vshll.u32 %v4423_v34, 16  ;;  %v413_v50 = vrot.slane %v411_v30, 4  ;;  %v416_v51 = vrot.slane %v414_v31, 5 }
  0xaa   :  { %4623 = vst [vmem:[%s6359_s3] sm:$0xff] %v4622_v40   ;;  %v3581_v3 = vadd.f32 %v3424_v45, %v2259_v49  ;;  %v409_v40 = vsel %vm4908_vm3, %v404_v22, %v408_v23  ;;  %v2694_v45 = vsel %vm4908_vm3, %v2689_v28, %v2693_v11  ;;  %v426_v53 = vrot.slane %v424_v33, 4  ;;  %v42_v23 = vld [vmem:[%s6357_s0 + $0xa0] sm:$0xf] }
  0xab   :  { %v922_v56 = vunpack.c.l.b16 %v409_v40  ;;  %v444_v33 = vshll.u32 %v42_v23, 16  ;;  %v448_v34 = vshrl.u32 %v42_v23, 16 }
  0xac   :  { %v3649_v16 = vadd.f32 %v5270_v6, %v3581_v3  ;;  %v4590_v3 = vld [vmem:[%s6357_s0 + $0x90] sm:$0xff]  ;;  %v427_v5 = vor.u32 %v426_v53, %v5344_v52 }
  0xad   :  { %v974_v11 = vpack.c.b16 %v922_v56, %v921_v55  ;;  %v5390_v53 = vrot.slane %v444_v33, 5  ;;  %v100_v56 = vld [vmem:[%s6357_s0 + $0xa4] sm:$0x1] }
  0xae   :  { %v2104_v58 = vpop.f32.mrf.mxu2  ;;  %v3713_v35 = vmax.f32 %v3649_v16, 0.0  ;;  %v2721_v16 = vrot.slane %v2719_v60, 4  ;;  %v428_v20 = vrot.slane %v427_v5, 4 }
  0xaf   :  { %v1584_v63 = vpop.f32.mrf.mxu1  ;;  %v2260_v4 = vadd.f32 %v2104_v58, %v1582_v57  ;;  %v1135_v8 = vpop.f32.mrf.mxu0  ;;  %v99_v57 = vld [vmem:[%s6357_s0 + $0x98] sm:$0x1]  ;;  %v2704_v58 = vsel %vm4908_vm3, %v2699_v42, %v2703_v43 }
  0xb0   :  { %v1585_v37 = vadd.f32 %v1584_v63, %v1135_v8  ;;  %v4550_v63 = vld [vmem:[%s6357_s0 + $0x84] sm:$0xff]  ;;  %v430_v7 = vshll.u32 %v99_v57, 16  ;;  %v2711_v8 = vrot.slane %v2709_v48, 5  ;;  %v3217_v12 = vunpack.c.l.b16 %v2704_v58 }
  0xb1   :  { %v3426_v15 = vpop.f32.mrf.mxu3 }
  0xb2   :  { %4117 = vmatmul.msk.bf16.gmra.mxu1 %vm1019_vm2, %v4549_v59  ;;  %v3582_v17 = vadd.f32 %v3426_v15, %v2260_v4  ;;  %3941 = vmatmul.msk.bf16.gmra.mxu0 %vm1019_vm2, %v973_v0  ;;  %v2715_v59 = vshll.u32 %v4424_v46, 16  ;;  %v3216_v0 = vunpack.c.l.b16 %v2694_v45  ;;  %v417_v4 = vor.u32 %v416_v51, %v413_v50  ;;  %v4427_v45 = vld [vmem:[%s6357_s0 + $0xac] sm:$0xf] }
  0xb3   :  { %4365 = vmatmul.msk.bf16.gmra.mxu2 %vm1019_vm2, %v4589_v1  ;;  %v2708_v1 = vrot.slane %v2706_v47, 4  ;;  %v432_v21 = vrot.slane %v430_v7, 5  ;;  %v2739_v57 = vshll.u32 %v4427_v45, 16  ;;  %v2743_v58 = vshrl.u32 %v4427_v45, 16 }
  0xb4   :  { %v3650_v26 = vadd.f32 %v5270_v6, %v3582_v17  ;;  %v5364_v15 = vrot.slane %v2715_v59, 5  ;;  %v41_v17 = vld [vmem:[%s6357_s0 + $0x9c] sm:$0xf]  ;;  %v418_v19 = vrot.slane %v417_v4, 4  ;;  %v4551_v4 = vld [vmem:[%s6357_s0 + $0x90] sm:$0xff] }
  0xb5   :  { %v2712_v22 = vor.u32 %v2711_v8, %v2708_v1  ;;  %v438_v32 = vshll.u32 %v41_v17, 16  ;;  %v454_v8 = vshll.u32 %v100_v56, 16 }
  0xb6   :  { %v2107_v27 = vpop.f32.mrf.mxu2  ;;  %v3714_v36 = vmax.f32 %v3650_v26, 0.0  ;;  %4517 = vmatmul.msk.bf16.gmra.mxu3 %vm1019_vm2, %v3268_v18  ;;  %v3269_v26 = vpack.c.b16 %v3217_v12, %v3216_v0  ;;  %v2722_v28 = vor.u32 %v2721_v16, %v5364_v15  ;;  %v4428_v12 = vld [vmem:[%s6357_s0 + $0xb0] sm:$0x1] }
  0xb7   :  { %v1586_v29 = vpop.f32.mrf.mxu1  ;;  %v1137_v38 = vpop.f32.mrf.mxu0  ;;  %v2261_v54 = vadd.f32 %v2107_v27, %v1585_v37  ;;  %v2725_v27 = vshll.u32 %v4425_v14, 16  ;;  %v423_v37 = vsel %vm4908_vm3, %v418_v19, %v5344_v52  ;;  %v2713_v39 = vrot.slane %v2712_v22, 4 }
  0xb8   :  { %v4627_v44 = vpack.c.bf16 %v3714_v36, %v3713_v35  ;;  %v1587_v61 = vadd.f32 %v1586_v29, %v1137_v38  ;;  %v435_v29 = vshrl.u32 %v41_v17, 16  ;;  %v4426_v35 = vld [vmem:[%s6357_s0 + $0xa8] sm:$0xf]  ;;  %v433_v38 = vsel %vm4908_vm3, %v428_v20, %v432_v21 }
  0xb9   :  { %v3429_v49 = vpop.f32.mrf.mxu3  ;;  %v2723_v47 = vrot.slane %v2722_v28, 4  ;;  %v2733_v50 = vshll.u32 %v4426_v35, 16  ;;  %v440_v52 = vrot.slane %v438_v32, 5  ;;  %v923_v60 = vunpack.c.l.b16 %v423_v37 }
  0xba   :  { %4779 = vst [vmem:[%s6359_s3 + $0x8] sm:$0xff] %v4627_v44   ;;  %v3583_v9 = vadd.f32 %v3429_v49, %v2261_v54  ;;  %v2727_v44 = vrot.slane %v2725_v27, 5  ;;  %v437_v48 = vrot.slane %v435_v29, 4  ;;  %v2730_v49 = vshrl.u32 %v4426_v35, 16 }
  0xbb   :  { %v450_v54 = vrot.slane %v448_v34, 4  ;;  %v2735_v1 = vrot.slane %v2733_v50, 5  ;;  %v2745_v14 = vrot.slane %v2743_v58, 4  ;;  %v456_v23 = vrot.slane %v454_v8, 5  ;;  %v4552_v8 = vld [vmem:[%s6357_s0 + $0x9c] sm:$0xff] }
  0xbc   :  { %v3651_v24 = vadd.f32 %v5270_v6, %v3583_v9  ;;  %v2732_v0 = vrot.slane %v2730_v49, 4  ;;  %v441_v5 = vor.u32 %v440_v52, %v437_v48 }
  0xbd   :  { %v451_v7 = vor.u32 %v450_v54, %v5390_v53  ;;  %v4430_v54 = vld [vmem:[%s6357_s0 + $0xb8] sm:$0xf] }
  0xbe   :  { %v2109_v62 = vpop.f32.mrf.mxu2  ;;  %v3715_v40 = vmax.f32 %v3651_v24, 0.0  ;;  %v2736_v20 = vor.u32 %v2735_v1, %v2732_v0  ;;  %v442_v21 = vrot.slane %v441_v5, 4  ;;  %v2749_v24 = vshll.u32 %v4428_v12, 16  ;;  %v101_v0 = vld [vmem:[%s6357_s0 + $0xb0] sm:$0x1] }
  0xbf   :  { %v1589_v2 = vpop.f32.mrf.mxu1  ;;  %v2262_v10 = vadd.f32 %v2109_v62, %v1587_v61  ;;  %v1140_v13 = vpop.f32.mrf.mxu0  ;;  %v924_v61 = vunpack.c.l.b16 %v433_v38  ;;  %v2718_v62 = vsel %vm4908_vm3, %v2713_v39, %v5364_v15  ;;  %v452_v22 = vrot.slane %v451_v7, 4  ;;  %v4429_v38 = vld [vmem:[%s6357_s0 + $0xb4] sm:$0xf] }
  0xc0   :  { %v1590_v43 = vadd.f32 %v1589_v2, %v1140_v13  ;;  %v5413_v13 = vrot.slane %v2739_v57, 5  ;;  %v2737_v32 = vrot.slane %v2736_v20, 4  ;;  %v447_v35 = vsel %vm4908_vm3, %v442_v21, %v5390_v53 }
  0xc1   :  { %v3431_v18 = vpop.f32.mrf.mxu3  ;;  %v975_v17 = vpack.c.b16 %v924_v61, %v923_v60  ;;  %v2751_v37 = vrot.slane %v2749_v24, 5  ;;  %v2754_v50 = vshrl.u32 %v4429_v38, 16  ;;  %v925_v53 = vunpack.c.l.b16 %v447_v35 }
  0xc2   :  { %4118 = vmatmul.msk.bf16.gmra.mxu1 %vm1019_vm2, %v4550_v63  ;;  %v3584_v25 = vadd.f32 %v3431_v18, %v2262_v10  ;;  %3942 = vmatmul.msk.bf16.gmra.mxu0 %vm1019_vm2, %v974_v11  ;;  %v2728_v63 = vsel %vm4908_vm3, %v2723_v47, %v2727_v44  ;;  %v4591_v10 = vld [vmem:[%s6357_s0 + $0x9c] sm:$0xff]  ;;  %v3218_v11 = vunpack.c.l.b16 %v2718_v62  ;;  %v2742_v57 = vsel %vm4908_vm3, %v2737_v32, %v5413_v13  ;;  %v46_v32 = vld [vmem:[%s6357_s0 + $0xb8] sm:$0xf] }
  0xc3   :  { %4366 = vmatmul.msk.bf16.gmra.mxu2 %vm1019_vm2, %v4590_v3  ;;  %v3219_v18 = vunpack.c.l.b16 %v2728_v63  ;;  %v2756_v1 = vrot.slane %v2754_v50, 4  ;;  %v3220_v12 = vunpack.c.l.b16 %v2742_v57  ;;  %v4433_v50 = vld [vmem:[%s6357_s0 + $0xc4] sm:$0xf] }
  0xc4   :  { %v3652_v30 = vadd.f32 %v5270_v6, %v3584_v25 }
  0xc5   :  { %v3270_v29 = vpack.c.b16 %v3219_v18, %v3218_v11  ;;  %v4592_v11 = vld [vmem:[%s6357_s0 + $0xa8] sm:$0xff]  ;;  %v478_v18 = vshll.u32 %v101_v0, 16  ;;  %v2791_v0 = vshrl.u32 %v4433_v50, 16 }
  0xc6   :  { %v2112_v31 = vpop.f32.mrf.mxu2  ;;  %v3716_v42 = vmax.f32 %v3652_v30, 0.0  ;;  %4518 = vmatmul.msk.bf16.gmra.mxu3 %vm1019_vm2, %v3269_v26  ;;  %v2746_v26 = vor.u32 %v2745_v14, %v5413_v13  ;;  %v43_v30 = vld [vmem:[%s6357_s0 + $0xa8] sm:$0xf] }
  0xc7   :  { %v1591_v36 = vpop.f32.mrf.mxu1  ;;  %v1142_v46 = vpop.f32.mrf.mxu0  ;;  %v2263_v59 = vadd.f32 %v2112_v31, %v1590_v43  ;;  %v44_v31 = vld [vmem:[%s6357_s0 + $0xac] sm:$0xf]  ;;  %v462_v43 = vshll.u32 %v43_v30, 16 }
  0xc8   :  { %v4632_v51 = vpack.c.bf16 %v3716_v42, %v3715_v40  ;;  %v1592_v2 = vadd.f32 %v1591_v36, %v1142_v46  ;;  %v457_v36 = vsel %vm4908_vm3, %v452_v22, %v456_v23  ;;  %v2747_v40 = vrot.slane %v2746_v26, 4  ;;  %v4431_v23 = vld [vmem:[%s6357_s0 + $0xbc] sm:$0x1] }
  0xc9   :  { %v3434_v55 = vpop.f32.mrf.mxu3  ;;  %v459_v42 = vshrl.u32 %v43_v30, 16  ;;  %v468_v44 = vshll.u32 %v44_v31, 16  ;;  %v472_v48 = vshrl.u32 %v44_v31, 16  ;;  %v926_v56 = vunpack.c.l.b16 %v457_v36 }
  0xca   :  { %4780 = vst [vmem:[%s6359_s3 + $0x10] sm:$0xff] %v4632_v51   ;;  %v3585_v15 = vadd.f32 %v3434_v55, %v2263_v59  ;;  %v2757_v51 = vshll.u32 %v4429_v38, 16  ;;  %v464_v59 = vrot.slane %v462_v43, 5  ;;  %v2752_v61 = vsel %vm4908_vm3, %v2747_v40, %v2751_v37  ;;  %v4432_v40 = vld [vmem:[%s6357_s0 + $0xc0] sm:$0xf] }
  0xcb   :  { %v461_v58 = vrot.slane %v459_v42, 4  ;;  %v5447_v62 = vrot.slane %v468_v44, 5  ;;  %v474_v63 = vrot.slane %v472_v48, 4  ;;  %v3221_v13 = vunpack.c.l.b16 %v2752_v61 }
  0xcc   :  { %v3653_v27 = vadd.f32 %v5270_v6, %v3585_v15  ;;  %v480_v31 = vrot.slane %v478_v18, 5  ;;  %v2773_v35 = vshll.u32 %v4431_v23, 16  ;;  %v492_v44 = vshll.u32 %v46_v32, 16 }
  0xcd   :  { %v465_v14 = vor.u32 %v464_v59, %v461_v58  ;;  %v2781_v59 = vshll.u32 %v4432_v40, 16 }
  0xce   :  { %v2114_v3 = vpop.f32.mrf.mxu2  ;;  %v3717_v45 = vmax.f32 %v3653_v27, 0.0  ;;  %v45_v27 = vld [vmem:[%s6357_s0 + $0xb4] sm:$0xf]  ;;  %v5487_v61 = vrot.slane %v492_v44, 5 }
  0xcf   :  { %v1594_v9 = vpop.f32.mrf.mxu1  ;;  %v2264_v16 = vadd.f32 %v2114_v3, %v1592_v2  ;;  %v1145_v19 = vpop.f32.mrf.mxu0  ;;  %v2759_v2 = vrot.slane %v2757_v51, 5  ;;  %v2763_v3 = vshll.u32 %v4430_v54, 16  ;;  %v466_v26 = vrot.slane %v465_v14, 4 }
  0xd0   :  { %v1595_v47 = vadd.f32 %v1594_v9, %v1145_v19  ;;  %v483_v38 = vshrl.u32 %v45_v27, 16 }
  0xd1   :  { %v3436_v25 = vpop.f32.mrf.mxu3  ;;  %v2760_v20 = vor.u32 %v2759_v2, %v2756_v1  ;;  %v2765_v21 = vrot.slane %v2763_v3, 5  ;;  %v471_v43 = vsel %vm4908_vm3, %v466_v26, %v5447_v62 }
  0xd2   :  { %4119 = vmatmul.msk.bf16.gmra.mxu1 %vm1019_vm2, %v4551_v4  ;;  %v3586_v28 = vadd.f32 %v3436_v25, %v2264_v16  ;;  %3943 = vmatmul.msk.bf16.gmra.mxu0 %vm1019_vm2, %v975_v17  ;;  %v2767_v4 = vshrl.u32 %v4430_v54, 16  ;;  %v475_v17 = vor.u32 %v474_v63, %v5447_v62  ;;  %v3271_v25 = vpack.c.b16 %v3221_v13, %v3220_v12 }
  0xd3   :  { %4367 = vmatmul.msk.bf16.gmra.mxu2 %vm1019_vm2, %v4591_v10  ;;  %v976_v10 = vpack.c.b16 %v926_v56, %v925_v53  ;;  %v2775_v54 = vrot.slane %v2773_v35, 5  ;;  %v485_v57 = vrot.slane %v483_v38, 4  ;;  %v2787_v63 = vshll.u32 %v4433_v50, 16 }
  0xd4   :  { %v3654_v33 = vadd.f32 %v5270_v6, %v3586_v28  ;;  %v2769_v22 = vrot.slane %v2767_v4, 4  ;;  %v476_v30 = vrot.slane %v475_v17, 4  ;;  %v927_v2 = vunpack.c.l.b16 %v471_v43  ;;  %v102_v4 = vld [vmem:[%s6357_s0 + $0xbc] sm:$0x1] }
  0xd5   :  { %v2783_v13 = vrot.slane %v2781_v59, 5  ;;  %v502_v17 = vshll.u32 %v102_v4, 16  ;;  %v5504_v18 = vrot.slane %v2787_v63, 5 }
  0xd6   :  { %v2117_v34 = vpop.f32.mrf.mxu2  ;;  %v3718_v46 = vmax.f32 %v3654_v33, 0.0  ;;  %4519 = vmatmul.msk.bf16.gmra.mxu3 %vm1019_vm2, %v3270_v29  ;;  %v2761_v33 = vrot.slane %v2760_v20, 4 }
  0xd7   :  { %v1596_v39 = vpop.f32.mrf.mxu1  ;;  %v1147_v49 = vpop.f32.mrf.mxu0  ;;  %v2265_v60 = vadd.f32 %v2117_v34, %v1595_v47  ;;  %v2770_v34 = vor.u32 %v2769_v22, %v2765_v21 }
  0xd8   :  { %v4637_v52 = vpack.c.bf16 %v3718_v46, %v3717_v45  ;;  %v1597_v5 = vadd.f32 %v1596_v39, %v1147_v49  ;;  %v486_v39 = vshll.u32 %v45_v27, 16  ;;  %v496_v45 = vshrl.u32 %v46_v32, 16 }
  0xd9   :  { %v3439_v55 = vpop.f32.mrf.mxu3  ;;  %v481_v49 = vsel %vm4908_vm3, %v476_v30, %v480_v31  ;;  %v2771_v53 = vrot.slane %v2770_v34, 4  ;;  %v504_v30 = vrot.slane %v502_v17, 5  ;;  %v4594_v17 = vld [vmem:[%s6357_s0 + $0xc0] sm:$0xff] }
  0xda   :  { %4781 = vst [vmem:[%s6359_s3 + $0x18] sm:$0xff] %v4637_v52   ;;  %v3587_v15 = vadd.f32 %v3439_v55, %v2265_v60  ;;  %v2766_v52 = vsel %vm4908_vm3, %v2761_v33, %v2765_v21  ;;  %v2778_v55 = vshrl.u32 %v4432_v40, 16  ;;  %v488_v58 = vrot.slane %v486_v39, 5 }
  0xdb   :  { %v498_v62 = vrot.slane %v496_v45, 4  ;;  %v928_v3 = vunpack.c.l.b16 %v481_v49 }
  0xdc   :  { %v3655_v28 = vadd.f32 %v5270_v6, %v3587_v15  ;;  %v2780_v12 = vrot.slane %v2778_v55, 4  ;;  %v4593_v15 = vld [vmem:[%s6357_s0 + $0xb4] sm:$0xff] }
  0xdd   :  { %v977_v22 = vpack.c.b16 %v928_v3, %v927_v2 }
  0xde   :  { %v2119_v7 = vpop.f32.mrf.mxu2  ;;  %v3719_v46 = vmax.f32 %v3655_v28, 0.0  ;;  %v2784_v27 = vor.u32 %v2783_v13, %v2780_v12  ;;  %v103_v12 = vld [vmem:[%s6357_s0 + $0xd4] sm:$0x1] }
  0xdf   :  { %v1599_v9 = vpop.f32.mrf.mxu1  ;;  %v2266_v16 = vadd.f32 %v2119_v7, %v1597_v5  ;;  %v1150_v19 = vpop.f32.mrf.mxu0  ;;  %v2776_v5 = vsel %vm4908_vm3, %v2771_v53, %v2775_v54  ;;  %v3222_v7 = vunpack.c.l.b16 %v2766_v52 }
  0xe0   :  { %v1600_v48 = vadd.f32 %v1599_v9, %v1150_v19  ;;  %v2793_v19 = vrot.slane %v2791_v0, 4  ;;  %v3223_v23 = vunpack.c.l.b16 %v2776_v5  ;;  %v2785_v40 = vrot.slane %v2784_v27, 4 }
  0xe1   :  { %v3441_v24 = vpop.f32.mrf.mxu3 }
  0xe2   :  { %4120 = vmatmul.msk.bf16.gmra.mxu1 %vm1019_vm2, %v4552_v8  ;;  %v3588_v29 = vadd.f32 %v3441_v24, %v2266_v16  ;;  %3944 = vmatmul.msk.bf16.gmra.mxu0 %vm1019_vm2, %v976_v10  ;;  %v4553_v10 = vld [vmem:[%s6357_s0 + $0xa8] sm:$0xff]  ;;  %v499_v16 = vor.u32 %v498_v62, %v5487_v61  ;;  %v2794_v31 = vor.u32 %v2793_v19, %v5504_v18 }
  0xe3   :  { %4368 = vmatmul.msk.bf16.gmra.mxu2 %vm1019_vm2, %v4592_v11  ;;  %v489_v11 = vor.u32 %v488_v58, %v485_v57  ;;  %v4434_v24 = vld [vmem:[%s6357_s0 + $0xc8] sm:$0x1]  ;;  %v3272_v35 = vpack.c.b16 %v3223_v23, %v3222_v7  ;;  %v4436_v57 = vld [vmem:[%s6357_s0 + $0xdc] sm:$0xf]  ;;  %v2790_v63 = vsel %vm4908_vm3, %v2785_v40, %v5504_v18 }
  0xe4   :  { %v3656_v36 = vadd.f32 %v5270_v6, %v3588_v29  ;;  %v500_v29 = vrot.slane %v499_v16, 4  ;;  %v2797_v32 = vshll.u32 %v4434_v24, 16  ;;  %v2795_v45 = vrot.slane %v2794_v31, 4 }
  0xe5   :  { %v490_v26 = vrot.slane %v489_v11, 4  ;;  %v2811_v7 = vshll.u32 %v4436_v57, 16  ;;  %v4554_v11 = vld [vmem:[%s6357_s0 + $0xb4] sm:$0xff]  ;;  %v3224_v18 = vunpack.c.l.b16 %v2790_v63 }
  0xe6   :  { %v2122_v37 = vpop.f32.mrf.mxu2  ;;  %v3720_v47 = vmax.f32 %v3656_v36, 0.0  ;;  %4520 = vmatmul.msk.bf16.gmra.mxu3 %vm1019_vm2, %v3271_v25  ;;  %v47_v36 = vld [vmem:[%s6357_s0 + $0xcc] sm:$0xf]  ;;  %v505_v44 = vsel %vm4908_vm3, %v500_v29, %v504_v30 }
  0xe7   :  { %v1601_v42 = vpop.f32.mrf.mxu1  ;;  %v1152_v51 = vpop.f32.mrf.mxu0  ;;  %v2267_v1 = vadd.f32 %v2122_v37, %v1600_v48  ;;  %v495_v39 = vsel %vm4908_vm3, %v490_v26, %v5487_v61  ;;  %v4435_v48 = vld [vmem:[%s6357_s0 + $0xd8] sm:$0xf]  ;;  %v510_v52 = vshll.u32 %v47_v36, 16  ;;  %v930_v62 = vunpack.c.l.b16 %v505_v44 }
  0xe8   :  { %v4642_v56 = vpack.c.bf16 %v3720_v47, %v3719_v46  ;;  %v1602_v8 = vadd.f32 %v1601_v42, %v1152_v51  ;;  %v48_v42 = vld [vmem:[%s6357_s0 + $0xd0] sm:$0xf]  ;;  %v2799_v46 = vrot.slane %v2797_v32, 5  ;;  %v507_v47 = vshrl.u32 %v47_v36, 16  ;;  %v50_v36 = vld [vmem:[%s6357_s0 + $0xdc] sm:$0xf] }
  0xe9   :  { %v3444_v60 = vpop.f32.mrf.mxu3  ;;  %v516_v54 = vshll.u32 %v48_v42, 16  ;;  %v520_v55 = vshrl.u32 %v48_v42, 16  ;;  %v2802_v58 = vshrl.u32 %v4435_v48, 16  ;;  %v2805_v59 = vshll.u32 %v4435_v48, 16 }
  0xea   :  { %4782 = vst [vmem:[%s6359_s3 + $0x20] sm:$0xff] %v4642_v56   ;;  %v3589_v20 = vadd.f32 %v3444_v60, %v2267_v1  ;;  %v929_v61 = vunpack.c.l.b16 %v495_v39  ;;  %v2800_v1 = vsel %vm4908_vm3, %v2795_v45, %v2799_v46  ;;  %v509_v2 = vrot.slane %v507_v47, 4 }
  0xeb   :  { %v512_v3 = vrot.slane %v510_v52, 5  ;;  %v5541_v4 = vrot.slane %v516_v54, 5  ;;  %v522_v5 = vrot.slane %v520_v55, 4  ;;  %v2804_v13 = vrot.slane %v2802_v58, 4 }
  0xec   :  { %v3657_v33 = vadd.f32 %v5270_v6, %v3589_v20  ;;  %v978_v16 = vpack.c.b16 %v930_v62, %v929_v61  ;;  %v2813_v26 = vrot.slane %v2811_v7, 5  ;;  %v540_v48 = vshll.u32 %v50_v36, 16  ;;  %v4439_v61 = vld [vmem:[%s6357_s0 + $0xe8] sm:$0xf] }
  0xed   :  { %v523_v24 = vor.u32 %v522_v5, %v5541_v4 }
  0xee   :  { %v2124_v9 = vpop.f32.mrf.mxu2  ;;  %v3721_v49 = vmax.f32 %v3657_v33, 0.0 }
  0xef   :  { %v1604_v14 = vpop.f32.mrf.mxu1  ;;  %v2268_v21 = vadd.f32 %v2124_v9, %v1602_v8  ;;  %v1155_v25 = vpop.f32.mrf.mxu0  ;;  %v2815_v8 = vshrl.u32 %v4436_v57, 16 }
  0xf0   :  { %v1605_v51 = vadd.f32 %v1604_v14, %v1155_v25  ;;  %v2807_v14 = vrot.slane %v2805_v59, 5  ;;  %v526_v25 = vshll.u32 %v103_v12, 16  ;;  %v2839_v12 = vshrl.u32 %v4439_v61, 16 }
  0xf1   :  { %v3446_v28 = vpop.f32.mrf.mxu3  ;;  %v2817_v27 = vrot.slane %v2815_v8, 4 }
  0xf2   :  { %4121 = vmatmul.msk.bf16.gmra.mxu1 %vm1019_vm2, %v4553_v10  ;;  %v3590_v34 = vadd.f32 %v3446_v28, %v2268_v21  ;;  %3945 = vmatmul.msk.bf16.gmra.mxu0 %vm1019_vm2, %v977_v22  ;;  %v3225_v21 = vunpack.c.l.b16 %v2800_v1  ;;  %v513_v22 = vor.u32 %v512_v3, %v509_v2  ;;  %v4437_v28 = vld [vmem:[%s6357_s0 + $0xe0] sm:$0x1]  ;;  %v2808_v29 = vor.u32 %v2807_v14, %v2804_v13 }
  0xf3   :  { %4369 = vmatmul.msk.bf16.gmra.mxu2 %vm1019_vm2, %v4593_v15  ;;  %v2818_v39 = vor.u32 %v2817_v27, %v2813_v26  ;;  %v2821_v40 = vshll.u32 %v4437_v28, 16  ;;  %v5581_v3 = vrot.slane %v540_v48, 5 }
  0xf4   :  { %v3658_v37 = vadd.f32 %v5270_v6, %v3590_v34  ;;  %v3273_v33 = vpack.c.b16 %v3225_v21, %v3224_v18  ;;  %v514_v34 = vrot.slane %v513_v22, 4  ;;  %v2809_v44 = vrot.slane %v2808_v29, 4  ;;  %v4440_v29 = vld [vmem:[%s6357_s0 + $0xec] sm:$0x1] }
  0xf5   :  { %v2819_v57 = vrot.slane %v2818_v39, 4  ;;  %v2823_v58 = vrot.slane %v2821_v40, 5 }
  0xf6   :  { %v2127_v38 = vpop.f32.mrf.mxu2  ;;  %v3722_v50 = vmax.f32 %v3658_v37, 0.0  ;;  %4521 = vmatmul.msk.bf16.gmra.mxu3 %vm1019_vm2, %v3272_v35  ;;  %v49_v35 = vld [vmem:[%s6357_s0 + $0xd8] sm:$0xf]  ;;  %v524_v37 = vrot.slane %v523_v24, 4  ;;  %v519_v55 = vsel %vm4908_vm3, %v514_v34, %v5541_v4 }
  0xf7   :  { %v1606_v43 = vpop.f32.mrf.mxu1  ;;  %v1157_v53 = vpop.f32.mrf.mxu0  ;;  %v2269_v0 = vadd.f32 %v2127_v38, %v1605_v51  ;;  %v528_v38 = vrot.slane %v526_v25, 5  ;;  %v531_v46 = vshrl.u32 %v49_v35, 16  ;;  %v534_v47 = vshll.u32 %v49_v35, 16 }
  0xf8   :  { %v4647_v56 = vpack.c.bf16 %v3722_v50, %v3721_v49  ;;  %v1607_v9 = vadd.f32 %v1606_v43, %v1157_v53  ;;  %v544_v49 = vshrl.u32 %v50_v36, 16  ;;  %v4438_v50 = vld [vmem:[%s6357_s0 + $0xe4] sm:$0xf]  ;;  %v931_v7 = vunpack.c.l.b16 %v519_v55 }
  0xf9   :  { %v3449_v60 = vpop.f32.mrf.mxu3  ;;  %v2826_v62 = vshrl.u32 %v4438_v50, 16  ;;  %v2829_v63 = vshll.u32 %v4438_v50, 16  ;;  %v533_v1 = vrot.slane %v531_v46, 4  ;;  %v536_v2 = vrot.slane %v534_v47, 5  ;;  %v5617_v46 = vld [vmem:[%s6358_s2] ss:$0 sm:$0xff] }
  0xfa   :  { %4783 = vst [vmem:[%s6359_s3 + $0x28] sm:$0xff] %v4647_v56   ;;  %v3591_v19 = vadd.f32 %v3449_v60, %v2269_v0  ;;  %v529_v56 = vsel %vm4908_vm3, %v524_v37, %v528_v38  ;;  %v2814_v60 = vsel %vm4908_vm3, %v2809_v44, %v2813_v26  ;;  %v546_v4 = vrot.slane %v544_v49, 4  ;;  %v52_v38 = vld [vmem:[%s6357_s0 + $0xe8] sm:$0xf] }
  0xfb   :  { %v932_v8 = vunpack.c.l.b16 %v529_v56  ;;  %v564_v50 = vshll.u32 %v52_v38, 16 }
  0xfc   :  { %v3659_v31 = vadd.f32 %v5270_v6, %v3591_v19  ;;  %v4595_v19 = vld [vmem:[%s6357_s0 + $0xd8] sm:$0xff]  ;;  %v547_v21 = vor.u32 %v546_v4, %v5581_v3 }
  0xfd   :  { %v979_v26 = vpack.c.b16 %v932_v8, %v931_v7  ;;  %v5632_v4 = vrot.slane %v564_v50, 5  ;;  %v105_v8 = vld [vmem:[%s6357_s0 + $0xec] sm:$0x1] }
  0xfe   :  { %v2129_v10 = vpop.f32.mrf.mxu2  ;;  %v3723_v51 = vmax.f32 %v3659_v31, 0.0  ;;  %v2841_v31 = vrot.slane %v2839_v12, 4  ;;  %v548_v35 = vrot.slane %v547_v21, 4 }
  0xff   :  { %v1609_v15 = vpop.f32.mrf.mxu1  ;;  %v2270_v20 = vadd.f32 %v2129_v10, %v1607_v9  ;;  %v1160_v23 = vpop.f32.mrf.mxu0  ;;  %v104_v9 = vld [vmem:[%s6357_s0 + $0xe0] sm:$0x1]  ;;  %v2824_v10 = vsel %vm4908_vm3, %v2819_v57, %v2823_v58 }
 0x100   :  { %v1610_v53 = vadd.f32 %v1609_v15, %v1160_v23  ;;  %v4555_v15 = vld [vmem:[%s6357_s0 + $0xcc] sm:$0xff]  ;;  %v550_v22 = vshll.u32 %v104_v9, 16  ;;  %v2831_v23 = vrot.slane %v2829_v63, 5  ;;  %v3227_v27 = vunpack.c.l.b16 %v2824_v10 }
 0x101   :  { %v3451_v30 = vpop.f32.mrf.mxu3 }
 0x102   :  { %4122 = vmatmul.msk.bf16.gmra.mxu1 %vm1019_vm2, %v4554_v11  ;;  %v3592_v32 = vadd.f32 %v3451_v30, %v2270_v20  ;;  %3946 = vmatmul.msk.bf16.gmra.mxu0 %vm1019_vm2, %v978_v16  ;;  %v2835_v11 = vshll.u32 %v4439_v61, 16  ;;  %v3226_v16 = vunpack.c.l.b16 %v2814_v60  ;;  %v537_v20 = vor.u32 %v536_v2, %v533_v1  ;;  %v4442_v60 = vld [vmem:[%s6357_s0 + $0xf4] sm:$0xf] }
 0x103   :  { %4370 = vmatmul.msk.bf16.gmra.mxu2 %vm1019_vm2, %v4594_v17  ;;  %v2828_v17 = vrot.slane %v2826_v62, 4  ;;  %v552_v36 = vrot.slane %v550_v22, 5  ;;  %v2859_v9 = vshll.u32 %v4442_v60, 16  ;;  %v2863_v10 = vshrl.u32 %v4442_v60, 16 }
 0x104   :  { %v3660_v42 = vadd.f32 %v5270_v6, %v3592_v32  ;;  %v5601_v30 = vrot.slane %v2835_v11, 5  ;;  %v51_v32 = vld [vmem:[%s6357_s0 + $0xe4] sm:$0xf]  ;;  %v538_v34 = vrot.slane %v537_v20, 4  ;;  %v4556_v20 = vld [vmem:[%s6357_s0 + $0xd8] sm:$0xff] }
 0x105   :  { %v2832_v37 = vor.u32 %v2831_v23, %v2828_v17  ;;  %v558_v49 = vshll.u32 %v51_v32, 16  ;;  %v574_v23 = vshll.u32 %v105_v8, 16 }
 0x106   :  { %v2132_v43 = vpop.f32.mrf.mxu2  ;;  %v3724_v52 = vmax.f32 %v3660_v42, 0.0  ;;  %4522 = vmatmul.msk.bf16.gmra.mxu3 %vm1019_vm2, %v3273_v33  ;;  %v3274_v42 = vpack.c.b16 %v3227_v27, %v3226_v16  ;;  %v2842_v44 = vor.u32 %v2841_v31, %v5601_v30  ;;  %v4443_v27 = vld [vmem:[%s6357_s0 + $0xf8] sm:$0x1] }
 0x107   :  { %v1611_v45 = vpop.f32.mrf.mxu1  ;;  %v1162_v54 = vpop.f32.mrf.mxu0  ;;  %v2271_v5 = vadd.f32 %v2132_v43, %v1610_v53  ;;  %v2845_v43 = vshll.u32 %v4440_v29, 16  ;;  %v543_v53 = vsel %vm4908_vm3, %v538_v34, %v5581_v3  ;;  %v2833_v55 = vrot.slane %v2832_v37, 4 }
 0x108   :  { %v4652_v59 = vpack.c.bf16 %v3724_v52, %v3723_v51  ;;  %v1612_v13 = vadd.f32 %v1611_v45, %v1162_v54  ;;  %v555_v45 = vshrl.u32 %v51_v32, 16  ;;  %v568_v51 = vshrl.u32 %v52_v38, 16 }
 0x109   :  { %v3454_v0 = vpop.f32.mrf.mxu3  ;;  %v553_v54 = vsel %vm4908_vm3, %v548_v35, %v552_v36  ;;  %v2843_v62 = vrot.slane %v2842_v44, 4  ;;  %v560_v3 = vrot.slane %v558_v49, 5  ;;  %v933_v12 = vunpack.c.l.b16 %v543_v53 }
 0x10a   :  { %4784 = vst [vmem:[%s6359_s3 + $0x30] sm:$0xff] %v4652_v59   ;;  %v3593_v24 = vadd.f32 %v3454_v0, %v2271_v5  ;;  %v2847_v59 = vrot.slane %v2845_v43, 5  ;;  %v557_v63 = vrot.slane %v555_v45, 4  ;;  %v570_v5 = vrot.slane %v568_v51, 4 }
 0x10b   :  { %v2865_v29 = vrot.slane %v2863_v10, 4  ;;  %v576_v38 = vrot.slane %v574_v23, 5  ;;  %v4557_v23 = vld [vmem:[%s6357_s0 + $0xe4] sm:$0xff] }
 0x10c   :  { %v3661_v39 = vadd.f32 %v5270_v6, %v3593_v24  ;;  %v4441_v6 = vld [vmem:[%s6357_s0 + $0xf0] sm:$0xf]  ;;  %v561_v21 = vor.u32 %v560_v3, %v557_v63  ;;  %v571_v22 = vor.u32 %v570_v5, %v5632_v4  ;;  %v4445_v5 = vld [vmem:[%s6357_s0 + $0x100] sm:$0xf] }
 0x10d   :  { %v2850_v0 = vshrl.u32 %v4441_v6, 16  ;;  %v2853_v1 = vshll.u32 %v4441_v6, 16 }
 0x10e   :  { %v2134_v14 = vpop.f32.mrf.mxu2  ;;  %v3725_v56 = vmax.f32 %v3661_v39, 0.0  ;;  %v562_v36 = vrot.slane %v561_v21, 4  ;;  %v572_v37 = vrot.slane %v571_v22, 4  ;;  %v2869_v39 = vshll.u32 %v4443_v27, 16 }
 0x10f   :  { %v1614_v18 = vpop.f32.mrf.mxu1  ;;  %v2272_v25 = vadd.f32 %v2134_v14, %v1612_v13  ;;  %v1165_v28 = vpop.f32.mrf.mxu0  ;;  %v934_v13 = vunpack.c.l.b16 %v553_v54  ;;  %v2838_v14 = vsel %vm4908_vm3, %v2833_v55, %v5601_v30  ;;  %v2852_v16 = vrot.slane %v2850_v0, 4  ;;  %v4444_v54 = vld [vmem:[%s6357_s0 + $0xfc] sm:$0xf] }
 0x110   :  { %v1615_v58 = vadd.f32 %v1614_v18, %v1165_v28  ;;  %v2855_v17 = vrot.slane %v2853_v1, 5  ;;  %v5655_v28 = vrot.slane %v2859_v9, 5  ;;  %v567_v6 = vsel %vm4908_vm3, %v562_v36, %v5632_v4 }
 0x111   :  { %v3456_v33 = vpop.f32.mrf.mxu3  ;;  %v980_v32 = vpack.c.b16 %v934_v13, %v933_v12  ;;  %v2871_v53 = vrot.slane %v2869_v39, 5  ;;  %v2874_v1 = vshrl.u32 %v4444_v54, 16  ;;  %v935_v4 = vunpack.c.l.b16 %v567_v6 }
 0x112   :  { %4123 = vmatmul.msk.bf16.gmra.mxu1 %vm1019_vm2, %v4555_v15  ;;  %v3594_v40 = vadd.f32 %v3456_v33, %v2272_v25  ;;  %3947 = vmatmul.msk.bf16.gmra.mxu0 %vm1019_vm2, %v979_v26  ;;  %v2848_v15 = vsel %vm4908_vm3, %v2843_v62, %v2847_v59  ;;  %v4596_v25 = vld [vmem:[%s6357_s0 + $0xe4] sm:$0xff]  ;;  %v3228_v26 = vunpack.c.l.b16 %v2838_v14  ;;  %v2856_v35 = vor.u32 %v2855_v17, %v2852_v16  ;;  %v106_v16 = vld [vmem:[%s6357_s0 + $0xf8] sm:$0x1] }
 0x113   :  { %4371 = vmatmul.msk.bf16.gmra.mxu2 %vm1019_vm2, %v4595_v19  ;;  %v3229_v33 = vunpack.c.l.b16 %v2848_v15  ;;  %v2876_v17 = vrot.slane %v2874_v1, 4  ;;  %v4448_v1 = vld [vmem:[%s6357_s0 + $0x10c] sm:$0xf] }
 0x114   :  { %v3662_v47 = vadd.f32 %v5617_v46, %v3594_v40  ;;  %v2857_v49 = vrot.slane %v2856_v35, 4 }
 0x115   :  { %v3275_v45 = vpack.c.b16 %v3229_v33, %v3228_v26  ;;  %v4597_v26 = vld [vmem:[%s6357_s0 + $0xf0] sm:$0xff]  ;;  %v598_v33 = vshll.u32 %v106_v16, 16  ;;  %v2911_v16 = vshrl.u32 %v4448_v1, 16 }
 0x116   :  { %v2137_v48 = vpop.f32.mrf.mxu2  ;;  %v3726_v57 = vmax.f32 %v3662_v47, 0.0  ;;  %4523 = vmatmul.msk.bf16.gmra.mxu3 %vm1019_vm2, %v3274_v42  ;;  %v2866_v42 = vor.u32 %v2865_v29, %v5655_v28  ;;  %v53_v47 = vld [vmem:[%s6357_s0 + $0xf0] sm:$0xf]  ;;  %v2862_v9 = vsel %vm4908_vm3, %v2857_v49, %v5655_v28  ;;  %v56_v49 = vld [vmem:[%s6357_s0 + $0x100] sm:$0xf] }
 0x117   :  { %v1616_v52 = vpop.f32.mrf.mxu1  ;;  %v1167_v61 = vpop.f32.mrf.mxu0  ;;  %v2273_v11 = vadd.f32 %v2137_v48, %v1615_v58  ;;  %v54_v48 = vld [vmem:[%s6357_s0 + $0xf4] sm:$0xf]  ;;  %v582_v58 = vshll.u32 %v53_v47, 16  ;;  %v3230_v27 = vunpack.c.l.b16 %v2862_v9 }
 0x118   :  { %v4657_v2 = vpack.c.bf16 %v3726_v57, %v3725_v56  ;;  %v1617_v18 = vadd.f32 %v1616_v52, %v1167_v61  ;;  %v577_v52 = vsel %vm4908_vm3, %v572_v37, %v576_v38  ;;  %v2867_v56 = vrot.slane %v2866_v42, 4  ;;  %v4446_v38 = vld [vmem:[%s6357_s0 + $0x104] sm:$0x1] }
 0x119   :  { %v3459_v7 = vpop.f32.mrf.mxu3  ;;  %v579_v57 = vshrl.u32 %v53_v47, 16  ;;  %v588_v59 = vshll.u32 %v54_v48, 16  ;;  %v592_v63 = vshrl.u32 %v54_v48, 16  ;;  %v936_v8 = vunpack.c.l.b16 %v577_v52 }
 0x11a   :  { %4785 = vst [vmem:[%s6359_s3 + $0x38] sm:$0xff] %v4657_v2   ;;  %v3595_v30 = vadd.f32 %v3459_v7, %v2273_v11  ;;  %v2877_v2 = vshll.u32 %v4444_v54, 16  ;;  %v584_v11 = vrot.slane %v582_v58, 5  ;;  %v2872_v13 = vsel %vm4908_vm3, %v2867_v56, %v2871_v53  ;;  %v4447_v56 = vld [vmem:[%s6357_s0 + $0x108] sm:$0xf] }
 0x11b   :  { %v581_v10 = vrot.slane %v579_v57, 4  ;;  %v5689_v14 = vrot.slane %v588_v59, 5  ;;  %v594_v15 = vrot.slane %v592_v63, 4  ;;  %v3231_v28 = vunpack.c.l.b16 %v2872_v13 }
 0x11c   :  { %v3663_v43 = vadd.f32 %v5617_v46, %v3595_v30  ;;  %v600_v48 = vrot.slane %v598_v33, 5  ;;  %v2893_v6 = vshll.u32 %v4446_v38, 16  ;;  %v612_v59 = vshll.u32 %v56_v49, 16 }
 0x11d   :  { %v585_v29 = vor.u32 %v584_v11, %v581_v10  ;;  %v2901_v11 = vshll.u32 %v4447_v56, 16 }
 0x11e   :  { %v2139_v19 = vpop.f32.mrf.mxu2  ;;  %v3727_v60 = vmax.f32 %v3663_v43, 0.0  ;;  %v55_v43 = vld [vmem:[%s6357_s0 + $0xfc] sm:$0xf]  ;;  %v5729_v13 = vrot.slane %v612_v59, 5 }
 0x11f   :  { %v1619_v24 = vpop.f32.mrf.mxu1  ;;  %v2274_v31 = vadd.f32 %v2139_v19, %v1617_v18  ;;  %v1170_v34 = vpop.f32.mrf.mxu0  ;;  %v2879_v18 = vrot.slane %v2877_v2, 5  ;;  %v2883_v19 = vshll.u32 %v4445_v5, 16  ;;  %v586_v42 = vrot.slane %v585_v29, 4 }
 0x120   :  { %v1620_v62 = vadd.f32 %v1619_v24, %v1170_v34  ;;  %v603_v54 = vshrl.u32 %v55_v43, 16 }
 0x121   :  { %v3461_v40 = vpop.f32.mrf.mxu3  ;;  %v2880_v35 = vor.u32 %v2879_v18, %v2876_v17  ;;  %v2885_v36 = vrot.slane %v2883_v19, 5  ;;  %v591_v58 = vsel %vm4908_vm3, %v586_v42, %v5689_v14 }
 0x122   :  { %4124 = vmatmul.msk.bf16.gmra.mxu1 %vm1019_vm2, %v4556_v20  ;;  %v3596_v44 = vadd.f32 %v3461_v40, %v2274_v31  ;;  %3948 = vmatmul.msk.bf16.gmra.mxu0 %vm1019_vm2, %v980_v32  ;;  %v2887_v20 = vshrl.u32 %v4445_v5, 16  ;;  %v595_v32 = vor.u32 %v594_v15, %v5689_v14  ;;  %v3276_v40 = vpack.c.b16 %v3231_v28, %v3230_v27 }
 0x123   :  { %4372 = vmatmul.msk.bf16.gmra.mxu2 %vm1019_vm2, %v4596_v25  ;;  %v981_v25 = vpack.c.b16 %v936_v8, %v935_v4  ;;  %v2895_v5 = vrot.slane %v2893_v6, 5  ;;  %v605_v9 = vrot.slane %v603_v54, 4  ;;  %v2907_v15 = vshll.u32 %v4448_v1, 16 }
 0x124   :  { %v3664_v50 = vadd.f32 %v5617_v46, %v3596_v44  ;;  %v2889_v37 = vrot.slane %v2887_v20, 4  ;;  %v596_v47 = vrot.slane %v595_v32, 4  ;;  %v937_v18 = vunpack.c.l.b16 %v591_v58  ;;  %v107_v20 = vld [vmem:[%s6357_s0 + $0x104] sm:$0x1] }
 0x125   :  { %v2903_v28 = vrot.slane %v2901_v11, 5  ;;  %v622_v32 = vshll.u32 %v107_v20, 16  ;;  %v5746_v33 = vrot.slane %v2907_v15, 5 }
 0x126   :  { %v2142_v51 = vpop.f32.mrf.mxu2  ;;  %v3728_v61 = vmax.f32 %v3664_v50, 0.0  ;;  %4524 = vmatmul.msk.bf16.gmra.mxu3 %vm1019_vm2, %v3275_v45  ;;  %v2881_v50 = vrot.slane %v2880_v35, 4 }
 0x127   :  { %v1621_v55 = vpop.f32.mrf.mxu1  ;;  %v1172_v0 = vpop.f32.mrf.mxu0  ;;  %v2275_v12 = vadd.f32 %v2142_v51, %v1620_v62  ;;  %v2890_v51 = vor.u32 %v2889_v37, %v2885_v36 }
 0x128   :  { %v4662_v3 = vpack.c.bf16 %v3728_v61, %v3727_v60  ;;  %v1622_v21 = vadd.f32 %v1621_v55, %v1172_v0  ;;  %v606_v55 = vshll.u32 %v55_v43, 16  ;;  %v616_v60 = vshrl.u32 %v56_v49, 16 }
 0x129   :  { %v3464_v7 = vpop.f32.mrf.mxu3  ;;  %v601_v0 = vsel %vm4908_vm3, %v596_v47, %v600_v48  ;;  %v2891_v4 = vrot.slane %v2890_v51, 4  ;;  %v624_v47 = vrot.slane %v622_v32, 5  ;;  %v4599_v32 = vld [vmem:[%s6357_s0 + $0x108] sm:$0xff] }
 0x12a   :  { %4786 = vst [vmem:[%s6359_s3 + $0x40] sm:$0xff] %v4662_v3   ;;  %v3597_v30 = vadd.f32 %v3464_v7, %v2275_v12  ;;  %v2886_v3 = vsel %vm4908_vm3, %v2881_v50, %v2885_v36  ;;  %v2898_v7 = vshrl.u32 %v4447_v56, 16  ;;  %v608_v10 = vrot.slane %v606_v55, 5 }
 0x12b   :  { %v618_v14 = vrot.slane %v616_v60, 4  ;;  %v938_v19 = vunpack.c.l.b16 %v601_v0 }
 0x12c   :  { %v3665_v44 = vadd.f32 %v5617_v46, %v3597_v30  ;;  %v2900_v27 = vrot.slane %v2898_v7, 4  ;;  %v4598_v30 = vld [vmem:[%s6357_s0 + $0xfc] sm:$0xff] }
 0x12d   :  { %v982_v37 = vpack.c.b16 %v938_v19, %v937_v18 }
 0x12e   :  { %v2144_v22 = vpop.f32.mrf.mxu2  ;;  %v3729_v61 = vmax.f32 %v3665_v44, 0.0  ;;  %v2904_v43 = vor.u32 %v2903_v28, %v2900_v27  ;;  %v108_v27 = vld [vmem:[%s6357_s0 + $0x110] sm:$0x1] }
 0x12f   :  { %v1624_v24 = vpop.f32.mrf.mxu1  ;;  %v2276_v31 = vadd.f32 %v2144_v22, %v1622_v21  ;;  %v1175_v34 = vpop.f32.mrf.mxu0  ;;  %v2896_v21 = vsel %vm4908_vm3, %v2891_v4, %v2895_v5  ;;  %v3232_v22 = vunpack.c.l.b16 %v2886_v3 }
 0x130   :  { %v1625_v63 = vadd.f32 %v1624_v24, %v1175_v34  ;;  %v2913_v34 = vrot.slane %v2911_v16, 4  ;;  %v3233_v38 = vunpack.c.l.b16 %v2896_v21  ;;  %v2905_v56 = vrot.slane %v2904_v43, 4 }
 0x131   :  { %v3466_v39 = vpop.f32.mrf.mxu3 }
 0x132   :  { %4125 = vmatmul.msk.bf16.gmra.mxu1 %vm1019_vm2, %v4557_v23  ;;  %v3598_v45 = vadd.f32 %v3466_v39, %v2276_v31  ;;  %3949 = vmatmul.msk.bf16.gmra.mxu0 %vm1019_vm2, %v981_v25  ;;  %v4558_v25 = vld [vmem:[%s6357_s0 + $0xf0] sm:$0xff]  ;;  %v619_v31 = vor.u32 %v618_v14, %v5729_v13  ;;  %v2914_v48 = vor.u32 %v2913_v34, %v5746_v33 }
 0x133   :  { %4373 = vmatmul.msk.bf16.gmra.mxu2 %vm1019_vm2, %v4597_v26  ;;  %v609_v26 = vor.u32 %v608_v10, %v605_v9  ;;  %v4449_v39 = vld [vmem:[%s6357_s0 + $0x110] sm:$0x1]  ;;  %v3277_v6 = vpack.c.b16 %v3233_v38, %v3232_v22  ;;  %v4451_v9 = vld [vmem:[%s6357_s0 + $0x118] sm:$0xf]  ;;  %v2910_v15 = vsel %vm4908_vm3, %v2905_v56, %v5746_v33 }
 0x134   :  { %v3666_v52 = vadd.f32 %v5617_v46, %v3598_v45  ;;  %v620_v45 = vrot.slane %v619_v31, 4  ;;  %v2917_v49 = vshll.u32 %v4449_v39, 16  ;;  %v2915_v60 = vrot.slane %v2914_v48, 4 }
 0x135   :  { %v610_v42 = vrot.slane %v609_v26, 4  ;;  %v2931_v22 = vshll.u32 %v4451_v9, 16  ;;  %v4559_v26 = vld [vmem:[%s6357_s0 + $0xfc] sm:$0xff]  ;;  %v3234_v33 = vunpack.c.l.b16 %v2910_v15 }
 0x136   :  { %v2147_v53 = vpop.f32.mrf.mxu2  ;;  %v3730_v62 = vmax.f32 %v3666_v52, 0.0  ;;  %4525 = vmatmul.msk.bf16.gmra.mxu3 %vm1019_vm2, %v3276_v40  ;;  %v57_v52 = vld [vmem:[%s6357_s0 + $0x108] sm:$0xf]  ;;  %v625_v59 = vsel %vm4908_vm3, %v620_v45, %v624_v47 }
 0x137   :  { %v1626_v57 = vpop.f32.mrf.mxu1  ;;  %v1177_v2 = vpop.f32.mrf.mxu0  ;;  %v2277_v17 = vadd.f32 %v2147_v53, %v1625_v63  ;;  %v615_v55 = vsel %vm4908_vm3, %v610_v42, %v5729_v13  ;;  %v4450_v63 = vld [vmem:[%s6357_s0 + $0x114] sm:$0xf]  ;;  %v630_v3 = vshll.u32 %v57_v52, 16  ;;  %v940_v14 = vunpack.c.l.b16 %v625_v59 }
 0x138   :  { %v4667_v8 = vpack.c.bf16 %v3730_v62, %v3729_v61  ;;  %v1627_v23 = vadd.f32 %v1626_v57, %v1177_v2  ;;  %v58_v57 = vld [vmem:[%s6357_s0 + $0x10c] sm:$0xf]  ;;  %v2919_v61 = vrot.slane %v2917_v49, 5  ;;  %v627_v62 = vshrl.u32 %v57_v52, 16  ;;  %v60_v52 = vld [vmem:[%s6357_s0 + $0x118] sm:$0xf] }
 0x139   :  { %v3469_v12 = vpop.f32.mrf.mxu3  ;;  %v636_v5 = vshll.u32 %v58_v57, 16  ;;  %v640_v7 = vshrl.u32 %v58_v57, 16  ;;  %v2922_v10 = vshrl.u32 %v4450_v63, 16  ;;  %v2925_v11 = vshll.u32 %v4450_v63, 16 }
 0x13a   :  { %4787 = vst [vmem:[%s6359_s3 + $0x48] sm:$0xff] %v4667_v8   ;;  %v3599_v35 = vadd.f32 %v3469_v12, %v2277_v17  ;;  %v939_v13 = vunpack.c.l.b16 %v615_v55  ;;  %v2920_v17 = vsel %vm4908_vm3, %v2915_v60, %v2919_v61  ;;  %v629_v18 = vrot.slane %v627_v62, 4 }
 0x13b   :  { %v632_v19 = vrot.slane %v630_v3, 5  ;;  %v5783_v20 = vrot.slane %v636_v5, 5  ;;  %v642_v21 = vrot.slane %v640_v7, 4  ;;  %v2924_v28 = vrot.slane %v2922_v10, 4 }
 0x13c   :  { %v3667_v50 = vadd.f32 %v5617_v46, %v3599_v35  ;;  %v983_v31 = vpack.c.b16 %v940_v14, %v939_v13  ;;  %v2933_v42 = vrot.slane %v2931_v22, 5  ;;  %v660_v63 = vshll.u32 %v60_v52, 16  ;;  %v4454_v13 = vld [vmem:[%s6357_s0 + $0x124] sm:$0xf] }
 0x13d   :  { %v643_v39 = vor.u32 %v642_v21, %v5783_v20 }
 0x13e   :  { %v2149_v24 = vpop.f32.mrf.mxu2  ;;  %v3731_v0 = vmax.f32 %v3667_v50, 0.0 }
 0x13f   :  { %v1629_v29 = vpop.f32.mrf.mxu1  ;;  %v2278_v36 = vadd.f32 %v2149_v24, %v1627_v23  ;;  %v1180_v40 = vpop.f32.mrf.mxu0  ;;  %v2935_v23 = vshrl.u32 %v4451_v9, 16 }
 0x140   :  { %v1630_v2 = vadd.f32 %v1629_v29, %v1180_v40  ;;  %v2927_v29 = vrot.slane %v2925_v11, 5  ;;  %v646_v40 = vshll.u32 %v108_v27, 16  ;;  %v2959_v27 = vshrl.u32 %v4454_v13, 16 }
 0x141   :  { %v3471_v44 = vpop.f32.mrf.mxu3  ;;  %v2937_v43 = vrot.slane %v2935_v23, 4 }
 0x142   :  { %4126 = vmatmul.msk.bf16.gmra.mxu1 %vm1019_vm2, %v4558_v25  ;;  %v3600_v51 = vadd.f32 %v3471_v44, %v2278_v36  ;;  %3950 = vmatmul.msk.bf16.gmra.mxu0 %vm1019_vm2, %v982_v37  ;;  %v3235_v36 = vunpack.c.l.b16 %v2920_v17  ;;  %v633_v37 = vor.u32 %v632_v19, %v629_v18  ;;  %v4452_v44 = vld [vmem:[%s6357_s0 + $0x11c] sm:$0x1]  ;;  %v2928_v45 = vor.u32 %v2927_v29, %v2924_v28 }
 0x143   :  { %4374 = vmatmul.msk.bf16.gmra.mxu2 %vm1019_vm2, %v4598_v30  ;;  %v2938_v55 = vor.u32 %v2937_v43, %v2933_v42  ;;  %v2941_v56 = vshll.u32 %v4452_v44, 16  ;;  %v5823_v19 = vrot.slane %v660_v63, 5 }
 0x144   :  { %v3668_v53 = vadd.f32 %v5617_v46, %v3600_v51  ;;  %v3278_v50 = vpack.c.b16 %v3235_v36, %v3234_v33  ;;  %v634_v51 = vrot.slane %v633_v37, 4  ;;  %v2929_v59 = vrot.slane %v2928_v45, 4  ;;  %v4455_v45 = vld [vmem:[%s6357_s0 + $0x128] sm:$0x1] }
 0x145   :  { %v2939_v9 = vrot.slane %v2938_v55, 4  ;;  %v2943_v10 = vrot.slane %v2941_v56, 5 }
 0x146   :  { %v2152_v54 = vpop.f32.mrf.mxu2  ;;  %v3732_v1 = vmax.f32 %v3668_v53, 0.0  ;;  %4526 = vmatmul.msk.bf16.gmra.mxu3 %vm1019_vm2, %v3277_v6  ;;  %v59_v6 = vld [vmem:[%s6357_s0 + $0x114] sm:$0xf]  ;;  %v644_v53 = vrot.slane %v643_v39, 4  ;;  %v639_v7 = vsel %vm4908_vm3, %v634_v51, %v5783_v20 }
 0x147   :  { %v1631_v58 = vpop.f32.mrf.mxu1  ;;  %v1182_v4 = vpop.f32.mrf.mxu0  ;;  %v2279_v16 = vadd.f32 %v2152_v54, %v1630_v2  ;;  %v648_v54 = vrot.slane %v646_v40, 5  ;;  %v651_v61 = vshrl.u32 %v59_v6, 16  ;;  %v654_v62 = vshll.u32 %v59_v6, 16 }
 0x148   :  { %v4672_v8 = vpack.c.bf16 %v3732_v1, %v3731_v0  ;;  %v1632_v24 = vadd.f32 %v1631_v58, %v1182_v4  ;;  %v664_v0 = vshrl.u32 %v60_v52, 16  ;;  %v4453_v1 = vld [vmem:[%s6357_s0 + $0x120] sm:$0xf]  ;;  %v941_v22 = vunpack.c.l.b16 %v639_v7 }
 0x149   :  { %v3474_v12 = vpop.f32.mrf.mxu3  ;;  %v2946_v14 = vshrl.u32 %v4453_v1, 16  ;;  %v2949_v15 = vshll.u32 %v4453_v1, 16  ;;  %v653_v17 = vrot.slane %v651_v61, 4  ;;  %v656_v18 = vrot.slane %v654_v62, 5 }
 0x14a   :  { %4788 = vst [vmem:[%s6359_s3 + $0x50] sm:$0xff] %v4672_v8   ;;  %v3601_v34 = vadd.f32 %v3474_v12, %v2279_v16  ;;  %v649_v8 = vsel %vm4908_vm3, %v644_v53, %v648_v54  ;;  %v2934_v12 = vsel %vm4908_vm3, %v2929_v59, %v2933_v42  ;;  %v666_v20 = vrot.slane %v664_v0, 4  ;;  %v62_v54 = vld [vmem:[%s6357_s0 + $0x124] sm:$0xf] }
 0x14b   :  { %v942_v23 = vunpack.c.l.b16 %v649_v8  ;;  %v684_v0 = vshll.u32 %v62_v54, 16  ;;  %v688_v1 = vshrl.u32 %v62_v54, 16 }
 0x14c   :  { %v3669_v48 = vadd.f32 %v5617_v46, %v3601_v34  ;;  %v4600_v34 = vld [vmem:[%s6357_s0 + $0x114] sm:$0xff]  ;;  %v667_v36 = vor.u32 %v666_v20, %v5823_v19 }
 0x14d   :  { %v984_v42 = vpack.c.b16 %v942_v23, %v941_v22  ;;  %v5869_v20 = vrot.slane %v684_v0, 5  ;;  %v110_v23 = vld [vmem:[%s6357_s0 + $0x128] sm:$0x1] }
 0x14e   :  { %v2154_v25 = vpop.f32.mrf.mxu2  ;;  %v3733_v2 = vmax.f32 %v3669_v48, 0.0  ;;  %v2961_v48 = vrot.slane %v2959_v27, 4  ;;  %v668_v6 = vrot.slane %v667_v36, 4 }
 0x14f   :  { %v1634_v30 = vpop.f32.mrf.mxu1  ;;  %v2280_v35 = vadd.f32 %v2154_v25, %v1632_v24  ;;  %v1185_v38 = vpop.f32.mrf.mxu0  ;;  %v109_v24 = vld [vmem:[%s6357_s0 + $0x11c] sm:$0x1]  ;;  %v2944_v25 = vsel %vm4908_vm3, %v2939_v9, %v2943_v10 }
 0x150   :  { %v1635_v4 = vadd.f32 %v1634_v30, %v1185_v38  ;;  %v4560_v30 = vld [vmem:[%s6357_s0 + $0x108] sm:$0xff]  ;;  %v670_v37 = vshll.u32 %v109_v24, 16  ;;  %v2951_v38 = vrot.slane %v2949_v15, 5  ;;  %v3237_v43 = vunpack.c.l.b16 %v2944_v25 }
 0x151   :  { %v3476_v47 = vpop.f32.mrf.mxu3 }
 0x152   :  { %4127 = vmatmul.msk.bf16.gmra.mxu1 %vm1019_vm2, %v4559_v26  ;;  %v3602_v49 = vadd.f32 %v3476_v47, %v2280_v35  ;;  %3951 = vmatmul.msk.bf16.gmra.mxu0 %vm1019_vm2, %v983_v31  ;;  %v2955_v26 = vshll.u32 %v4454_v13, 16  ;;  %v3236_v31 = vunpack.c.l.b16 %v2934_v12  ;;  %v657_v35 = vor.u32 %v656_v18, %v653_v17  ;;  %v4457_v12 = vld [vmem:[%s6357_s0 + $0x130] sm:$0xf] }
 0x153   :  { %4375 = vmatmul.msk.bf16.gmra.mxu2 %vm1019_vm2, %v4599_v32  ;;  %v2948_v32 = vrot.slane %v2946_v14, 4  ;;  %v672_v52 = vrot.slane %v670_v37, 5  ;;  %v2979_v24 = vshll.u32 %v4457_v12, 16  ;;  %v2983_v25 = vshrl.u32 %v4457_v12, 16 }
 0x154   :  { %v3670_v57 = vadd.f32 %v5617_v46, %v3602_v49  ;;  %v5843_v47 = vrot.slane %v2955_v26, 5  ;;  %v61_v49 = vld [vmem:[%s6357_s0 + $0x120] sm:$0xf]  ;;  %v658_v51 = vrot.slane %v657_v35, 4  ;;  %v4561_v35 = vld [vmem:[%s6357_s0 + $0x114] sm:$0xff] }
 0x155   :  { %v2952_v53 = vor.u32 %v2951_v38, %v2948_v32  ;;  %v678_v63 = vshll.u32 %v61_v49, 16  ;;  %v694_v38 = vshll.u32 %v110_v23, 16 }
 0x156   :  { %v2157_v58 = vpop.f32.mrf.mxu2  ;;  %v3734_v3 = vmax.f32 %v3670_v57, 0.0  ;;  %4527 = vmatmul.msk.bf16.gmra.mxu3 %vm1019_vm2, %v3278_v50  ;;  %v3279_v57 = vpack.c.b16 %v3237_v43, %v3236_v31  ;;  %v2962_v59 = vor.u32 %v2961_v48, %v5843_v47  ;;  %v4458_v43 = vld [vmem:[%s6357_s0 + $0x134] sm:$0x1] }
 0x157   :  { %v1636_v60 = vpop.f32.mrf.mxu1  ;;  %v1187_v5 = vpop.f32.mrf.mxu0  ;;  %v2281_v21 = vadd.f32 %v2157_v58, %v1635_v4  ;;  %v2965_v58 = vshll.u32 %v4455_v45, 16  ;;  %v663_v4 = vsel %vm4908_vm3, %v658_v51, %v5823_v19  ;;  %v2953_v7 = vrot.slane %v2952_v53, 4 }
 0x158   :  { %v4677_v11 = vpack.c.bf16 %v3734_v3, %v3733_v2  ;;  %v1637_v28 = vadd.f32 %v1636_v60, %v1187_v5  ;;  %v675_v60 = vshrl.u32 %v61_v49, 16  ;;  %v4456_v2 = vld [vmem:[%s6357_s0 + $0x12c] sm:$0xf]  ;;  %v673_v5 = vsel %vm4908_vm3, %v668_v6, %v672_v52 }
 0x159   :  { %v3479_v16 = vpop.f32.mrf.mxu3  ;;  %v2963_v14 = vrot.slane %v2962_v59, 4  ;;  %v2973_v17 = vshll.u32 %v4456_v2, 16  ;;  %v680_v19 = vrot.slane %v678_v63, 5  ;;  %v943_v27 = vunpack.c.l.b16 %v663_v4 }
 0x15a   :  { %4789 = vst [vmem:[%s6359_s3 + $0x58] sm:$0xff] %v4677_v11   ;;  %v3603_v39 = vadd.f32 %v3479_v16, %v2281_v21  ;;  %v2967_v11 = vrot.slane %v2965_v58, 5  ;;  %v677_v15 = vrot.slane %v675_v60, 4  ;;  %v2970_v16 = vshrl.u32 %v4456_v2, 16 }
 0x15b   :  { %v690_v21 = vrot.slane %v688_v1, 4  ;;  %v2975_v32 = vrot.slane %v2973_v17, 5  ;;  %v2985_v45 = vrot.slane %v2983_v25, 4  ;;  %v696_v54 = vrot.slane %v694_v38, 5  ;;  %v4562_v38 = vld [vmem:[%s6357_s0 + $0x120] sm:$0xff] }
 0x15c   :  { %v3671_v55 = vadd.f32 %v5617_v46, %v3603_v39  ;;  %v2972_v31 = vrot.slane %v2970_v16, 4  ;;  %v681_v36 = vor.u32 %v680_v19, %v677_v15 }
 0x15d   :  { %v691_v37 = vor.u32 %v690_v21, %v5869_v20  ;;  %v4460_v21 = vld [vmem:[%s6357_s0 + $0x13c] sm:$0xf] }
 0x15e   :  { %v2159_v29 = vpop.f32.mrf.mxu2  ;;  %v3735_v8 = vmax.f32 %v3671_v55, 0.0  ;;  %v2976_v6 = vor.u32 %v2975_v32, %v2972_v31  ;;  %v682_v52 = vrot.slane %v681_v36, 4  ;;  %v2989_v55 = vshll.u32 %v4458_v43, 16  ;;  %v111_v31 = vld [vmem:[%s6357_s0 + $0x134] sm:$0x1] }
 0x15f   :  { %v1639_v33 = vpop.f32.mrf.mxu1  ;;  %v2282_v40 = vadd.f32 %v2159_v29, %v1637_v28  ;;  %v1190_v44 = vpop.f32.mrf.mxu0  ;;  %v944_v28 = vunpack.c.l.b16 %v673_v5  ;;  %v2958_v29 = vsel %vm4908_vm3, %v2953_v7, %v5843_v47  ;;  %v692_v53 = vrot.slane %v691_v37, 4  ;;  %v4459_v5 = vld [vmem:[%s6357_s0 + $0x138] sm:$0xf] }
 0x160   :  { %v1640_v10 = vadd.f32 %v1639_v33, %v1190_v44  ;;  %v5892_v44 = vrot.slane %v2979_v24, 5  ;;  %v2977_v63 = vrot.slane %v2976_v6, 4  ;;  %v687_v2 = vsel %vm4908_vm3, %v682_v52, %v5869_v20 }
 0x161   :  { %v3481_v50 = vpop.f32.mrf.mxu3  ;;  %v985_v49 = vpack.c.b16 %v944_v28, %v943_v27  ;;  %v2991_v4 = vrot.slane %v2989_v55, 5  ;;  %v2994_v17 = vshrl.u32 %v4459_v5, 16  ;;  %v945_v20 = vunpack.c.l.b16 %v687_v2 }
 0x162   :  { %4128 = vmatmul.msk.bf16.gmra.mxu1 %vm1019_vm2, %v4560_v30  ;;  %v3604_v56 = vadd.f32 %v3481_v50, %v2282_v40  ;;  %3952 = vmatmul.msk.bf16.gmra.mxu0 %vm1019_vm2, %v984_v42  ;;  %v2968_v30 = vsel %vm4908_vm3, %v2963_v14, %v2967_v11  ;;  %v4601_v40 = vld [vmem:[%s6357_s0 + $0x120] sm:$0xff]  ;;  %v3238_v42 = vunpack.c.l.b16 %v2958_v29  ;;  %v2982_v24 = vsel %vm4908_vm3, %v2977_v63, %v5892_v44  ;;  %v66_v63 = vld [vmem:[%s6357_s0 + $0x13c] sm:$0xf] }
 0x163   :  { %4376 = vmatmul.msk.bf16.gmra.mxu2 %vm1019_vm2, %v4600_v34  ;;  %v3239_v50 = vunpack.c.l.b16 %v2968_v30  ;;  %v2996_v32 = vrot.slane %v2994_v17, 4  ;;  %v3240_v43 = vunpack.c.l.b16 %v2982_v24 }
 0x164   :  { %v3672_v61 = vadd.f32 %v5617_v46, %v3604_v56 }
 0x165   :  { %v3280_v60 = vpack.c.b16 %v3239_v50, %v3238_v42  ;;  %v4602_v42 = vld [vmem:[%s6357_s0 + $0x12c] sm:$0xff]  ;;  %v718_v50 = vshll.u32 %v111_v31, 16 }
 0x166   :  { %v2162_v62 = vpop.f32.mrf.mxu2  ;;  %v3736_v9 = vmax.f32 %v3672_v61, 0.0  ;;  %4528 = vmatmul.msk.bf16.gmra.mxu3 %vm1019_vm2, %v3279_v57  ;;  %v2986_v57 = vor.u32 %v2985_v45, %v5892_v44  ;;  %v63_v61 = vld [vmem:[%s6357_s0 + $0x12c] sm:$0xf] }
 0x167   :  { %v1641_v3 = vpop.f32.mrf.mxu1  ;;  %v1192_v13 = vpop.f32.mrf.mxu0  ;;  %v2283_v26 = vadd.f32 %v2162_v62, %v1640_v10  ;;  %v64_v62 = vld [vmem:[%s6357_s0 + $0x130] sm:$0xf]  ;;  %v702_v10 = vshll.u32 %v63_v61, 16 }
 0x168   :  { %v4682_v18 = vpack.c.bf16 %v3736_v9, %v3735_v8  ;;  %v1642_v33 = vadd.f32 %v1641_v3, %v1192_v13  ;;  %v697_v3 = vsel %vm4908_vm3, %v692_v53, %v696_v54  ;;  %v2987_v8 = vrot.slane %v2986_v57, 4  ;;  %v4461_v54 = vld [vmem:[%s6357_s0 + $0x140] sm:$0x1] }
 0x169   :  { %v3484_v22 = vpop.f32.mrf.mxu3  ;;  %v699_v9 = vshrl.u32 %v63_v61, 16  ;;  %v708_v11 = vshll.u32 %v64_v62, 16  ;;  %v712_v15 = vshrl.u32 %v64_v62, 16  ;;  %v946_v23 = vunpack.c.l.b16 %v697_v3 }
 0x16a   :  { %4790 = vst [vmem:[%s6359_s3 + $0x60] sm:$0xff] %v4682_v18   ;;  %v3605_v47 = vadd.f32 %v3484_v22, %v2283_v26  ;;  %v2997_v18 = vshll.u32 %v4459_v5, 16  ;;  %v704_v26 = vrot.slane %v702_v10, 5  ;;  %v2992_v28 = vsel %vm4908_vm3, %v2987_v8, %v2991_v4  ;;  %v4462_v8 = vld [vmem:[%s6357_s0 + $0x144] sm:$0xf] }
 0x16b   :  { %v701_v25 = vrot.slane %v699_v9, 4  ;;  %v5926_v29 = vrot.slane %v708_v11, 5  ;;  %v714_v30 = vrot.slane %v712_v15, 4  ;;  %v3241_v44 = vunpack.c.l.b16 %v2992_v28 }
 0x16c   :  { %v3673_v58 = vadd.f32 %v5617_v46, %v3605_v47  ;;  %v720_v62 = vrot.slane %v718_v50, 5  ;;  %v3013_v2 = vshll.u32 %v4461_v54, 16  ;;  %v732_v11 = vshll.u32 %v66_v63, 16  ;;  %v4464_v54 = vld [vmem:[%s6357_s0 + $0x14c] sm:$0x1] }
 0x16d   :  { %v705_v45 = vor.u32 %v704_v26, %v701_v25  ;;  %v3021_v25 = vshll.u32 %v4462_v8, 16 }
 0x16e   :  { %v2164_v34 = vpop.f32.mrf.mxu2  ;;  %v3737_v12 = vmax.f32 %v3673_v58, 0.0  ;;  %v65_v58 = vld [vmem:[%s6357_s0 + $0x138] sm:$0xf] }
 0x16f   :  { %v1644_v39 = vpop.f32.mrf.mxu1  ;;  %v2284_v48 = vadd.f32 %v2164_v34, %v1642_v33  ;;  %v1195_v51 = vpop.f32.mrf.mxu0  ;;  %v2999_v33 = vrot.slane %v2997_v18, 5  ;;  %v3003_v34 = vshll.u32 %v4460_v21, 16  ;;  %v706_v57 = vrot.slane %v705_v45, 4  ;;  %v4603_v45 = vld [vmem:[%s6357_s0 + $0x138] sm:$0xff] }
 0x170   :  { %v1645_v14 = vadd.f32 %v1644_v39, %v1195_v51  ;;  %v723_v5 = vshrl.u32 %v65_v58, 16 }
 0x171   :  { %v3486_v56 = vpop.f32.mrf.mxu3  ;;  %v3000_v6 = vor.u32 %v2999_v33, %v2996_v32  ;;  %v3005_v52 = vrot.slane %v3003_v34, 5  ;;  %v711_v10 = vsel %vm4908_vm3, %v706_v57, %v5926_v29  ;;  %v112_v34 = vld [vmem:[%s6357_s0 + $0x140] sm:$0x1] }
 0x172   :  { %4129 = vmatmul.msk.bf16.gmra.mxu1 %vm1019_vm2, %v4561_v35  ;;  %v3606_v59 = vadd.f32 %v3486_v56, %v2284_v48  ;;  %3953 = vmatmul.msk.bf16.gmra.mxu0 %vm1019_vm2, %v985_v49  ;;  %v3007_v35 = vshrl.u32 %v4460_v21, 16  ;;  %v715_v49 = vor.u32 %v714_v30, %v5926_v29  ;;  %v3281_v56 = vpack.c.b16 %v3241_v44, %v3240_v43 }
 0x173   :  { %4377 = vmatmul.msk.bf16.gmra.mxu2 %vm1019_vm2, %v4601_v40  ;;  %v986_v40 = vpack.c.b16 %v946_v23, %v945_v20  ;;  %v3015_v20 = vrot.slane %v3013_v2, 5  ;;  %v3018_v21 = vshrl.u32 %v4462_v8, 16  ;;  %v725_v23 = vrot.slane %v723_v5, 4 }
 0x174   :  { %v3674_v0 = vadd.f32 %v5617_v46, %v3606_v59  ;;  %v3009_v53 = vrot.slane %v3007_v35, 4  ;;  %v716_v61 = vrot.slane %v715_v49, 4  ;;  %v947_v32 = vunpack.c.l.b16 %v711_v10 }
 0x175   :  { %v3023_v43 = vrot.slane %v3021_v25, 5 }
 0x176   :  { %v2167_v1 = vpop.f32.mrf.mxu2  ;;  %v3738_v13 = vmax.f32 %v3674_v0, 0.0  ;;  %4529 = vmatmul.msk.bf16.gmra.mxu3 %vm1019_vm2, %v3280_v60  ;;  %v3001_v0 = vrot.slane %v3000_v6, 4 }
 0x177   :  { %v1646_v7 = vpop.f32.mrf.mxu1  ;;  %v1197_v16 = vpop.f32.mrf.mxu0  ;;  %v2285_v27 = vadd.f32 %v2167_v1, %v1645_v14  ;;  %v3010_v1 = vor.u32 %v3009_v53, %v3005_v52 }
 0x178   :  { %v4687_v19 = vpack.c.bf16 %v3738_v13, %v3737_v12  ;;  %v1647_v36 = vadd.f32 %v1646_v7, %v1197_v16  ;;  %v726_v7 = vshll.u32 %v65_v58, 16  ;;  %v736_v12 = vshrl.u32 %v66_v63, 16  ;;  %v4463_v16 = vld [vmem:[%s6357_s0 + $0x148] sm:$0xf]  ;;  %v5994_v63 = vld [vmem:[%s6358_s2] ss:$0 sm:$0xff] }
 0x179   :  { %v3489_v22 = vpop.f32.mrf.mxu3  ;;  %v3006_v18 = vsel %vm4908_vm3, %v3001_v0, %v3005_v52  ;;  %v3027_v29 = vshll.u32 %v4463_v16, 16  ;;  %v3031_v30 = vshrl.u32 %v4463_v16, 16 }
 0x17a   :  { %4791 = vst [vmem:[%s6359_s3 + $0x68] sm:$0xff] %v4687_v19   ;;  %v3607_v47 = vadd.f32 %v3489_v22, %v2285_v27  ;;  %v3011_v19 = vrot.slane %v3010_v1, 4  ;;  %v728_v24 = vrot.slane %v726_v7, 5  ;;  %v5966_v27 = vrot.slane %v732_v11, 5 }
 0x17b   :  { %v738_v28 = vrot.slane %v736_v12, 4  ;;  %v5983_v49 = vrot.slane %v3027_v29, 5  ;;  %v3033_v50 = vrot.slane %v3031_v30, 4 }
 0x17c   :  { %v3675_v59 = vadd.f32 %v5617_v46, %v3607_v47  ;;  %v3016_v35 = vsel %vm4908_vm3, %v3011_v19, %v3015_v20 }
 0x17d   :  { %v739_v47 = vor.u32 %v738_v28, %v5966_v27  ;;  %v3243_v53 = vunpack.c.l.b16 %v3016_v35 }
 0x17e   :  { %v2169_v37 = vpop.f32.mrf.mxu2  ;;  %v3739_v13 = vmax.f32 %v3675_v59, 0.0 }
 0x17f   :  { %v1649_v39 = vpop.f32.mrf.mxu1  ;;  %v2286_v48 = vadd.f32 %v2169_v37, %v1647_v36  ;;  %v1200_v51 = vpop.f32.mrf.mxu0  ;;  %v3242_v36 = vunpack.c.l.b16 %v3006_v18  ;;  %v740_v59 = vrot.slane %v739_v47, 4 }
 0x180   :  { %v1650_v15 = vadd.f32 %v1649_v39, %v1200_v51  ;;  %v4563_v39 = vld [vmem:[%s6357_s0 + $0x12c] sm:$0xff] }
 0x181   :  { %v3491_v55 = vpop.f32.mrf.mxu3  ;;  %v3282_v2 = vpack.c.b16 %v3243_v53, %v3242_v36 }
 0x182   :  { %4130 = vmatmul.msk.bf16.gmra.mxu1 %vm1019_vm2, %v4562_v38  ;;  %v3608_v60 = vadd.f32 %v3491_v55, %v2286_v48  ;;  %3954 = vmatmul.msk.bf16.gmra.mxu0 %vm1019_vm2, %v986_v40  ;;  %v729_v40 = vor.u32 %v728_v24, %v725_v23  ;;  %v742_v48 = vshll.u32 %v112_v34, 16  ;;  %v4466_v23 = vld [vmem:[%s6357_s0 + $0x154] sm:$0xf] }
 0x183   :  { %4378 = vmatmul.msk.bf16.gmra.mxu2 %vm1019_vm2, %v4602_v42  ;;  %v3020_v42 = vrot.slane %v3018_v21, 4  ;;  %v3051_v36 = vshll.u32 %v4466_v23, 16 }
 0x184   :  { %v3676_v3 = vadd.f32 %v5617_v46, %v3608_v60  ;;  %v721_v46 = vsel %vm4908_vm3, %v716_v61, %v720_v62  ;;  %v744_v60 = vrot.slane %v742_v48, 5  ;;  %v3034_v61 = vor.u32 %v3033_v50, %v5983_v49  ;;  %v4604_v48 = vld [vmem:[%s6357_s0 + $0x144] sm:$0xff] }
 0x185   :  { %v948_v33 = vunpack.c.l.b16 %v721_v46  ;;  %v3024_v57 = vor.u32 %v3023_v43, %v3020_v42  ;;  %v3037_v62 = vshll.u32 %v4464_v54, 16  ;;  %v113_v42 = vld [vmem:[%s6357_s0 + $0x14c] sm:$0x1] }
 0x186   :  { %v2172_v4 = vpop.f32.mrf.mxu2  ;;  %v3740_v14 = vmax.f32 %v3676_v3, 0.0  ;;  %4530 = vmatmul.msk.bf16.gmra.mxu3 %vm1019_vm2, %v3281_v56  ;;  %v730_v56 = vrot.slane %v729_v40, 4  ;;  %v67_v3 = vld [vmem:[%s6357_s0 + $0x144] sm:$0xf]  ;;  %v745_v11 = vsel %vm4908_vm3, %v740_v59, %v744_v60  ;;  %v3035_v12 = vrot.slane %v3034_v61, 4  ;;  %v4564_v40 = vld [vmem:[%s6357_s0 + $0x138] sm:$0xff] }
 0x187   :  { %v1651_v9 = vpop.f32.mrf.mxu1  ;;  %v1202_v17 = vpop.f32.mrf.mxu0  ;;  %v2287_v31 = vadd.f32 %v2172_v4, %v1650_v15  ;;  %v987_v52 = vpack.c.b16 %v948_v33, %v947_v32  ;;  %v3025_v8 = vrot.slane %v3024_v57, 4  ;;  %v4465_v15 = vld [vmem:[%s6357_s0 + $0x150] sm:$0xf]  ;;  %v750_v18 = vshll.u32 %v67_v3, 16 }
 0x188   :  { %v4692_v22 = vpack.c.bf16 %v3740_v14, %v3739_v13  ;;  %v1652_v37 = vadd.f32 %v1651_v9, %v1202_v17  ;;  %v735_v7 = vsel %vm4908_vm3, %v730_v56, %v5966_v27  ;;  %v68_v9 = vld [vmem:[%s6357_s0 + $0x148] sm:$0xf]  ;;  %v3039_v13 = vrot.slane %v3037_v62, 5 }
 0x189   :  { %v3494_v26 = vpop.f32.mrf.mxu3  ;;  %v747_v14 = vshrl.u32 %v67_v3, 16  ;;  %v756_v20 = vshll.u32 %v68_v9, 16  ;;  %v760_v21 = vshrl.u32 %v68_v9, 16  ;;  %v3042_v24 = vshrl.u32 %v4465_v15, 16  ;;  %v70_v3 = vld [vmem:[%s6357_s0 + $0x154] sm:$0xf] }
 0x18a   :  { %4792 = vst [vmem:[%s6359_s3 + $0x70] sm:$0xff] %v4692_v22   ;;  %v3609_v51 = vadd.f32 %v3494_v26, %v2287_v31  ;;  %v3045_v25 = vshll.u32 %v4465_v15, 16  ;;  %v949_v27 = vunpack.c.l.b16 %v735_v7  ;;  %v950_v28 = vunpack.c.l.b16 %v745_v11 }
 0x18b   :  { %v3030_v29 = vsel %vm4908_vm3, %v3025_v8, %v5983_v49  ;;  %v3040_v31 = vsel %vm4908_vm3, %v3035_v12, %v3039_v13  ;;  %v749_v32 = vrot.slane %v747_v14, 4  ;;  %v752_v33 = vrot.slane %v750_v18, 5 }
 0x18c   :  { %v3677_v0 = vadd.f32 %v5994_v63, %v3609_v51  ;;  %v6025_v34 = vrot.slane %v756_v20, 5  ;;  %v762_v35 = vrot.slane %v760_v21, 4  ;;  %v3044_v43 = vrot.slane %v3042_v24, 4 }
 0x18d   :  { %v988_v47 = vpack.c.b16 %v950_v28, %v949_v27  ;;  %v3244_v49 = vunpack.c.l.b16 %v3030_v29  ;;  %v3053_v56 = vrot.slane %v3051_v36, 5  ;;  %v780_v15 = vshll.u32 %v70_v3, 16  ;;  %v4469_v27 = vld [vmem:[%s6357_s0 + $0x160] sm:$0xf] }
 0x18e   :  { %v2174_v38 = vpop.f32.mrf.mxu2  ;;  %v3741_v46 = vmax.f32 %v3677_v0, 0.0  ;;  %v763_v54 = vor.u32 %v762_v35, %v6025_v34 }
 0x18f   :  { %v1654_v44 = vpop.f32.mrf.mxu1  ;;  %v2288_v6 = vadd.f32 %v2174_v38, %v1652_v37  ;;  %v1205_v55 = vpop.f32.mrf.mxu0  ;;  %v3055_v37 = vshrl.u32 %v4466_v23, 16 }
 0x190   :  { %v1655_v17 = vadd.f32 %v1654_v44, %v1205_v55  ;;  %v3047_v44 = vrot.slane %v3045_v25, 5  ;;  %v766_v55 = vshll.u32 %v113_v42, 16  ;;  %v3079_v42 = vshrl.u32 %v4469_v27, 16 }
 0x191   :  { %v3496_v58 = vpop.f32.mrf.mxu3  ;;  %v3057_v57 = vrot.slane %v3055_v37, 4 }
 0x192   :  { %4131 = vmatmul.msk.bf16.gmra.mxu1 %vm1019_vm2, %v4563_v39  ;;  %v3610_v1 = vadd.f32 %v3496_v58, %v2288_v6  ;;  %3955 = vmatmul.msk.bf16.gmra.mxu0 %vm1019_vm2, %v987_v52  ;;  %v3245_v6 = vunpack.c.l.b16 %v3040_v31  ;;  %v753_v52 = vor.u32 %v752_v33, %v749_v32  ;;  %v4467_v58 = vld [vmem:[%s6357_s0 + $0x158] sm:$0x1]  ;;  %v3048_v59 = vor.u32 %v3047_v44, %v3044_v43 }
 0x193   :  { %4379 = vmatmul.msk.bf16.gmra.mxu2 %vm1019_vm2, %v4603_v45  ;;  %v3058_v7 = vor.u32 %v3057_v57, %v3053_v56  ;;  %v3061_v8 = vshll.u32 %v4467_v58, 16  ;;  %v6065_v33 = vrot.slane %v780_v15, 5 }
 0x194   :  { %v3678_v4 = vadd.f32 %v5994_v63, %v3610_v1  ;;  %v3283_v0 = vpack.c.b16 %v3245_v6, %v3244_v49  ;;  %v754_v1 = vrot.slane %v753_v52, 4  ;;  %v3049_v11 = vrot.slane %v3048_v59, 4  ;;  %v4470_v59 = vld [vmem:[%s6357_s0 + $0x164] sm:$0x1] }
 0x195   :  { %v3059_v23 = vrot.slane %v3058_v7, 4  ;;  %v3063_v24 = vrot.slane %v3061_v8, 5 }
 0x196   :  { %v2177_v5 = vpop.f32.mrf.mxu2  ;;  %v3742_v16 = vmax.f32 %v3678_v4, 0.0  ;;  %4531 = vmatmul.msk.bf16.gmra.mxu3 %vm1019_vm2, %v3282_v2  ;;  %v69_v2 = vld [vmem:[%s6357_s0 + $0x150] sm:$0xf]  ;;  %v764_v4 = vrot.slane %v763_v54, 4  ;;  %v759_v21 = vsel %vm4908_vm3, %v754_v1, %v6025_v34 }
 0x197   :  { %v1656_v10 = vpop.f32.mrf.mxu1  ;;  %v1207_v19 = vpop.f32.mrf.mxu0  ;;  %v2289_v30 = vadd.f32 %v2177_v5, %v1655_v17  ;;  %v768_v5 = vrot.slane %v766_v55, 5  ;;  %v771_v13 = vshrl.u32 %v69_v2, 16  ;;  %v774_v14 = vshll.u32 %v69_v2, 16 }
 0x198   :  { %v4697_v22 = vpack.c.bf16 %v3742_v16, %v3741_v46  ;;  %v1657_v38 = vadd.f32 %v1656_v10, %v1207_v19  ;;  %v784_v46 = vshrl.u32 %v70_v3, 16  ;;  %v4468_v16 = vld [vmem:[%s6357_s0 + $0x15c] sm:$0xf]  ;;  %v951_v36 = vunpack.c.l.b16 %v759_v21 }
 0x199   :  { %v3499_v26 = vpop.f32.mrf.mxu3  ;;  %v3066_v28 = vshrl.u32 %v4468_v16, 16  ;;  %v3069_v29 = vshll.u32 %v4468_v16, 16  ;;  %v773_v31 = vrot.slane %v771_v13, 4  ;;  %v776_v32 = vrot.slane %v774_v14, 5 }
 0x19a   :  { %4793 = vst [vmem:[%s6359_s3 + $0x78] sm:$0xff] %v4697_v22   ;;  %v3611_v50 = vadd.f32 %v3499_v26, %v2289_v30  ;;  %v769_v22 = vsel %vm4908_vm3, %v764_v4, %v768_v5  ;;  %v3054_v26 = vsel %vm4908_vm3, %v3049_v11, %v3053_v56  ;;  %v786_v34 = vrot.slane %v784_v46, 4  ;;  %v72_v5 = vld [vmem:[%s6357_s0 + $0x160] sm:$0xf] }
 0x19b   :  { %v952_v37 = vunpack.c.l.b16 %v769_v22  ;;  %v804_v46 = vshll.u32 %v72_v5, 16  ;;  %v808_v16 = vshrl.u32 %v72_v5, 16 }
 0x19c   :  { %v3679_v61 = vadd.f32 %v5994_v63, %v3611_v50  ;;  %v4605_v50 = vld [vmem:[%s6357_s0 + $0x150] sm:$0xff]  ;;  %v787_v6 = vor.u32 %v786_v34, %v6065_v33 }
 0x19d   :  { %v989_v56 = vpack.c.b16 %v952_v37, %v951_v36  ;;  %v6111_v34 = vrot.slane %v804_v46, 5  ;;  %v115_v37 = vld [vmem:[%s6357_s0 + $0x164] sm:$0x1] }
 0x19e   :  { %v2179_v39 = vpop.f32.mrf.mxu2  ;;  %v3743_v17 = vmax.f32 %v3679_v61, 0.0  ;;  %v3081_v61 = vrot.slane %v3079_v42, 4  ;;  %v788_v2 = vrot.slane %v787_v6, 4 }
 0x19f   :  { %v1659_v45 = vpop.f32.mrf.mxu1  ;;  %v2290_v51 = vadd.f32 %v2179_v39, %v1657_v38  ;;  %v1210_v53 = vpop.f32.mrf.mxu0  ;;  %v114_v38 = vld [vmem:[%s6357_s0 + $0x158] sm:$0x1]  ;;  %v3064_v39 = vsel %vm4908_vm3, %v3059_v23, %v3063_v24 }
 0x1a0   :  { %v1660_v19 = vadd.f32 %v1659_v45, %v1210_v53  ;;  %v4565_v45 = vld [vmem:[%s6357_s0 + $0x144] sm:$0xff]  ;;  %v790_v52 = vshll.u32 %v114_v38, 16  ;;  %v3071_v53 = vrot.slane %v3069_v29, 5  ;;  %v3247_v57 = vunpack.c.l.b16 %v3064_v39 }
 0x1a1   :  { %v3501_v60 = vpop.f32.mrf.mxu3 }
 0x1a2   :  { %4132 = vmatmul.msk.bf16.gmra.mxu1 %vm1019_vm2, %v4564_v40  ;;  %v3612_v62 = vadd.f32 %v3501_v60, %v2290_v51  ;;  %3956 = vmatmul.msk.bf16.gmra.mxu0 %vm1019_vm2, %v988_v47  ;;  %v3075_v40 = vshll.u32 %v4469_v27, 16  ;;  %v3246_v47 = vunpack.c.l.b16 %v3054_v26  ;;  %v777_v51 = vor.u32 %v776_v32, %v773_v31  ;;  %v4472_v26 = vld [vmem:[%s6357_s0 + $0x16c] sm:$0xf] }
 0x1a3   :  { %4380 = vmatmul.msk.bf16.gmra.mxu2 %vm1019_vm2, %v4604_v48  ;;  %v3068_v48 = vrot.slane %v3066_v28, 4  ;;  %v792_v3 = vrot.slane %v790_v52, 5  ;;  %v3099_v38 = vshll.u32 %v4472_v26, 16  ;;  %v3103_v39 = vshrl.u32 %v4472_v26, 16 }
 0x1a4   :  { %v3680_v9 = vadd.f32 %v5994_v63, %v3612_v62  ;;  %v6085_v60 = vrot.slane %v3075_v40, 5  ;;  %v71_v62 = vld [vmem:[%s6357_s0 + $0x15c] sm:$0xf]  ;;  %v778_v1 = vrot.slane %v777_v51, 4  ;;  %v4566_v51 = vld [vmem:[%s6357_s0 + $0x150] sm:$0xff] }
 0x1a5   :  { %v3072_v4 = vor.u32 %v3071_v53, %v3068_v48  ;;  %v798_v15 = vshll.u32 %v71_v62, 16  ;;  %v814_v53 = vshll.u32 %v115_v37, 16 }
 0x1a6   :  { %v2182_v10 = vpop.f32.mrf.mxu2  ;;  %v3744_v18 = vmax.f32 %v3680_v9, 0.0  ;;  %4532 = vmatmul.msk.bf16.gmra.mxu3 %vm1019_vm2, %v3283_v0  ;;  %v3284_v9 = vpack.c.b16 %v3247_v57, %v3246_v47  ;;  %v3082_v11 = vor.u32 %v3081_v61, %v6085_v60  ;;  %v4473_v57 = vld [vmem:[%s6357_s0 + $0x170] sm:$0x1] }
 0x1a7   :  { %v1661_v12 = vpop.f32.mrf.mxu1  ;;  %v1212_v20 = vpop.f32.mrf.mxu0  ;;  %v2291_v35 = vadd.f32 %v2182_v10, %v1660_v19  ;;  %v3085_v10 = vshll.u32 %v4470_v59, 16  ;;  %v783_v19 = vsel %vm4908_vm3, %v778_v1, %v6065_v33  ;;  %v3073_v21 = vrot.slane %v3072_v4, 4 }
 0x1a8   :  { %v4702_v25 = vpack.c.bf16 %v3744_v18, %v3743_v17  ;;  %v1662_v43 = vadd.f32 %v1661_v12, %v1212_v20  ;;  %v795_v12 = vshrl.u32 %v71_v62, 16  ;;  %v4471_v17 = vld [vmem:[%s6357_s0 + $0x168] sm:$0xf]  ;;  %v793_v20 = vsel %vm4908_vm3, %v788_v2, %v792_v3 }
 0x1a9   :  { %v3504_v30 = vpop.f32.mrf.mxu3  ;;  %v3083_v28 = vrot.slane %v3082_v11, 4  ;;  %v3093_v31 = vshll.u32 %v4471_v17, 16  ;;  %v800_v33 = vrot.slane %v798_v15, 5  ;;  %v953_v42 = vunpack.c.l.b16 %v783_v19 }
 0x1aa   :  { %4794 = vst [vmem:[%s6359_s3 + $0x80] sm:$0xff] %v4702_v25   ;;  %v3613_v54 = vadd.f32 %v3504_v30, %v2291_v35  ;;  %v3087_v25 = vrot.slane %v3085_v10, 5  ;;  %v797_v29 = vrot.slane %v795_v12, 4  ;;  %v3090_v30 = vshrl.u32 %v4471_v17, 16 }
 0x1ab   :  { %v810_v35 = vrot.slane %v808_v16, 4  ;;  %v3095_v48 = vrot.slane %v3093_v31, 5  ;;  %v3105_v59 = vrot.slane %v3103_v39, 4  ;;  %v816_v5 = vrot.slane %v814_v53, 5  ;;  %v4567_v53 = vld [vmem:[%s6357_s0 + $0x15c] sm:$0xff] }
 0x1ac   :  { %v3681_v7 = vadd.f32 %v5994_v63, %v3613_v54  ;;  %v3092_v47 = vrot.slane %v3090_v30, 4  ;;  %v801_v6 = vor.u32 %v800_v33, %v797_v29 }
 0x1ad   :  { %v811_v52 = vor.u32 %v810_v35, %v6111_v34  ;;  %v4475_v35 = vld [vmem:[%s6357_s0 + $0x178] sm:$0xf] }
 0x1ae   :  { %v2184_v44 = vpop.f32.mrf.mxu2  ;;  %v3745_v22 = vmax.f32 %v3681_v7, 0.0  ;;  %v3096_v2 = vor.u32 %v3095_v48, %v3092_v47  ;;  %v802_v3 = vrot.slane %v801_v6, 4  ;;  %v3109_v7 = vshll.u32 %v4473_v57, 16  ;;  %v116_v47 = vld [vmem:[%s6357_s0 + $0x170] sm:$0x1] }
 0x1af   :  { %v1664_v49 = vpop.f32.mrf.mxu1  ;;  %v2292_v55 = vadd.f32 %v2184_v44, %v1662_v43  ;;  %v1215_v58 = vpop.f32.mrf.mxu0  ;;  %v954_v43 = vunpack.c.l.b16 %v793_v20  ;;  %v3078_v44 = vsel %vm4908_vm3, %v3073_v21, %v6085_v60  ;;  %v812_v4 = vrot.slane %v811_v52, 4  ;;  %v4474_v20 = vld [vmem:[%s6357_s0 + $0x174] sm:$0xf] }
 0x1b0   :  { %v1665_v24 = vadd.f32 %v1664_v49, %v1215_v58  ;;  %v6134_v58 = vrot.slane %v3099_v38, 5  ;;  %v3097_v15 = vrot.slane %v3096_v2, 4  ;;  %v807_v17 = vsel %vm4908_vm3, %v802_v3, %v6111_v34 }
 0x1b1   :  { %v3506_v0 = vpop.f32.mrf.mxu3  ;;  %v990_v62 = vpack.c.b16 %v954_v43, %v953_v42  ;;  %v3111_v19 = vrot.slane %v3109_v7, 5  ;;  %v3114_v31 = vshrl.u32 %v4474_v20, 16  ;;  %v955_v34 = vunpack.c.l.b16 %v807_v17 }
 0x1b2   :  { %4133 = vmatmul.msk.bf16.gmra.mxu1 %vm1019_vm2, %v4565_v45  ;;  %v3614_v8 = vadd.f32 %v3506_v0, %v2292_v55  ;;  %3957 = vmatmul.msk.bf16.gmra.mxu0 %vm1019_vm2, %v989_v56  ;;  %v3088_v45 = vsel %vm4908_vm3, %v3083_v28, %v3087_v25  ;;  %v4606_v55 = vld [vmem:[%s6357_s0 + $0x15c] sm:$0xff]  ;;  %v3248_v56 = vunpack.c.l.b16 %v3078_v44  ;;  %v3102_v38 = vsel %vm4908_vm3, %v3097_v15, %v6134_v58  ;;  %v76_v15 = vld [vmem:[%s6357_s0 + $0x178] sm:$0xf] }
 0x1b3   :  { %4381 = vmatmul.msk.bf16.gmra.mxu2 %vm1019_vm2, %v4605_v50  ;;  %v3249_v0 = vunpack.c.l.b16 %v3088_v45  ;;  %v3116_v48 = vrot.slane %v3114_v31, 4  ;;  %v3250_v57 = vunpack.c.l.b16 %v3102_v38  ;;  %v4478_v31 = vld [vmem:[%s6357_s0 + $0x184] sm:$0xf] }
 0x1b4   :  { %v3682_v13 = vadd.f32 %v5994_v63, %v3614_v8 }
 0x1b5   :  { %v3285_v12 = vpack.c.b16 %v3249_v0, %v3248_v56  ;;  %v4607_v56 = vld [vmem:[%s6357_s0 + $0x168] sm:$0xff]  ;;  %v838_v0 = vshll.u32 %v116_v47, 16  ;;  %v3151_v47 = vshrl.u32 %v4478_v31, 16 }
 0x1b6   :  { %v2187_v14 = vpop.f32.mrf.mxu2  ;;  %v3746_v23 = vmax.f32 %v3682_v13, 0.0  ;;  %4533 = vmatmul.msk.bf16.gmra.mxu3 %vm1019_vm2, %v3284_v9  ;;  %v3106_v9 = vor.u32 %v3105_v59, %v6134_v58  ;;  %v73_v13 = vld [vmem:[%s6357_s0 + $0x168] sm:$0xf] }
 0x1b7   :  { %v1666_v18 = vpop.f32.mrf.mxu1  ;;  %v1217_v27 = vpop.f32.mrf.mxu0  ;;  %v2293_v40 = vadd.f32 %v2187_v14, %v1665_v24  ;;  %v74_v14 = vld [vmem:[%s6357_s0 + $0x16c] sm:$0xf]  ;;  %v822_v24 = vshll.u32 %v73_v13, 16 }
 0x1b8   :  { %v4707_v32 = vpack.c.bf16 %v3746_v23, %v3745_v22  ;;  %v1667_v49 = vadd.f32 %v1666_v18, %v1217_v27  ;;  %v817_v18 = vsel %vm4908_vm3, %v812_v4, %v816_v5  ;;  %v3107_v22 = vrot.slane %v3106_v9, 4  ;;  %v4476_v5 = vld [vmem:[%s6357_s0 + $0x17c] sm:$0x1] }
 0x1b9   :  { %v3509_v36 = vpop.f32.mrf.mxu3  ;;  %v819_v23 = vshrl.u32 %v73_v13, 16  ;;  %v828_v25 = vshll.u32 %v74_v14, 16  ;;  %v832_v29 = vshrl.u32 %v74_v14, 16  ;;  %v956_v37 = vunpack.c.l.b16 %v817_v18 }
 0x1ba   :  { %4795 = vst [vmem:[%s6359_s3 + $0x88] sm:$0xff] %v4707_v32   ;;  %v3615_v60 = vadd.f32 %v3509_v36, %v2293_v40  ;;  %v3117_v32 = vshll.u32 %v4474_v20, 16  ;;  %v824_v40 = vrot.slane %v822_v24, 5  ;;  %v3112_v43 = vsel %vm4908_vm3, %v3107_v22, %v3111_v19  ;;  %v4477_v22 = vld [vmem:[%s6357_s0 + $0x180] sm:$0xf] }
 0x1bb   :  { %v821_v39 = vrot.slane %v819_v23, 4  ;;  %v6168_v44 = vrot.slane %v828_v25, 5  ;;  %v834_v45 = vrot.slane %v832_v29, 4  ;;  %v3251_v58 = vunpack.c.l.b16 %v3112_v43 }
 0x1bc   :  { %v3683_v10 = vadd.f32 %v5994_v63, %v3615_v60  ;;  %v840_v14 = vrot.slane %v838_v0, 5  ;;  %v3133_v17 = vshll.u32 %v4476_v5, 16  ;;  %v852_v25 = vshll.u32 %v76_v15, 16 }
 0x1bd   :  { %v825_v59 = vor.u32 %v824_v40, %v821_v39  ;;  %v3141_v40 = vshll.u32 %v4477_v22, 16 }
 0x1be   :  { %v2189_v50 = vpop.f32.mrf.mxu2  ;;  %v3747_v26 = vmax.f32 %v3683_v10, 0.0  ;;  %v75_v10 = vld [vmem:[%s6357_s0 + $0x174] sm:$0xf]  ;;  %v6208_v43 = vrot.slane %v852_v25, 5 }
 0x1bf   :  { %v1669_v54 = vpop.f32.mrf.mxu1  ;;  %v2294_v61 = vadd.f32 %v2189_v50, %v1667_v49  ;;  %v1220_v1 = vpop.f32.mrf.mxu0  ;;  %v3119_v49 = vrot.slane %v3117_v32, 5  ;;  %v3123_v50 = vshll.u32 %v4475_v35, 16  ;;  %v826_v9 = vrot.slane %v825_v59, 4 }
 0x1c0   :  { %v1670_v28 = vadd.f32 %v1669_v54, %v1220_v1  ;;  %v843_v20 = vshrl.u32 %v75_v10, 16 }
 0x1c1   :  { %v3511_v8 = vpop.f32.mrf.mxu3  ;;  %v3120_v2 = vor.u32 %v3119_v49, %v3116_v48  ;;  %v3125_v3 = vrot.slane %v3123_v50, 5  ;;  %v831_v24 = vsel %vm4908_vm3, %v826_v9, %v6168_v44 }
 0x1c2   :  { %4134 = vmatmul.msk.bf16.gmra.mxu1 %vm1019_vm2, %v4566_v51  ;;  %v3616_v11 = vadd.f32 %v3511_v8, %v2294_v61  ;;  %3958 = vmatmul.msk.bf16.gmra.mxu0 %vm1019_vm2, %v990_v62  ;;  %v3127_v51 = vshrl.u32 %v4475_v35, 16  ;;  %v835_v62 = vor.u32 %v834_v45, %v6168_v44  ;;  %v3286_v8 = vpack.c.b16 %v3251_v58, %v3250_v57 }
 0x1c3   :  { %4382 = vmatmul.msk.bf16.gmra.mxu2 %vm1019_vm2, %v4606_v55  ;;  %v991_v55 = vpack.c.b16 %v956_v37, %v955_v34  ;;  %v3135_v35 = vrot.slane %v3133_v17, 5  ;;  %v845_v38 = vrot.slane %v843_v20, 4  ;;  %v3147_v45 = vshll.u32 %v4478_v31, 16 }
 0x1c4   :  { %v3684_v46 = vadd.f32 %v5994_v63, %v3616_v11  ;;  %v3129_v4 = vrot.slane %v3127_v51, 4  ;;  %v836_v13 = vrot.slane %v835_v62, 4  ;;  %v957_v49 = vunpack.c.l.b16 %v831_v24  ;;  %v117_v51 = vld [vmem:[%s6357_s0 + $0x17c] sm:$0x1] }
 0x1c5   :  { %v3143_v58 = vrot.slane %v3141_v40, 5  ;;  %v862_v62 = vshll.u32 %v117_v51, 16  ;;  %v6225_v0 = vrot.slane %v3147_v45, 5 }
 0x1c6   :  { %v2192_v16 = vpop.f32.mrf.mxu2  ;;  %v3748_v27 = vmax.f32 %v3684_v46, 0.0  ;;  %4534 = vmatmul.msk.bf16.gmra.mxu3 %vm1019_vm2, %v3285_v12  ;;  %v3121_v46 = vrot.slane %v3120_v2, 4 }
 0x1c7   :  { %v1671_v21 = vpop.f32.mrf.mxu1  ;;  %v1222_v30 = vpop.f32.mrf.mxu0  ;;  %v2295_v42 = vadd.f32 %v2192_v16, %v1670_v28  ;;  %v3130_v16 = vor.u32 %v3129_v4, %v3125_v3 }
 0x1c8   :  { %v4712_v33 = vpack.c.bf16 %v3748_v27, %v3747_v26  ;;  %v1672_v6 = vadd.f32 %v1671_v21, %v1222_v30  ;;  %v846_v21 = vshll.u32 %v75_v10, 16  ;;  %v856_v26 = vshrl.u32 %v76_v15, 16 }
 0x1c9   :  { %v3514_v36 = vpop.f32.mrf.mxu3  ;;  %v841_v30 = vsel %vm4908_vm3, %v836_v13, %v840_v14  ;;  %v3131_v34 = vrot.slane %v3130_v16, 4  ;;  %v864_v13 = vrot.slane %v862_v62, 5 }
 0x1ca   :  { %4796 = vst [vmem:[%s6359_s3 + $0x90] sm:$0xff] %v4712_v33   ;;  %v3617_v60 = vadd.f32 %v3514_v36, %v2295_v42  ;;  %v3126_v33 = vsel %vm4908_vm3, %v3121_v46, %v3125_v3  ;;  %v3138_v36 = vshrl.u32 %v4477_v22, 16  ;;  %v848_v39 = vrot.slane %v846_v21, 5 }
 0x1cb   :  { %v858_v44 = vrot.slane %v856_v26, 4  ;;  %v958_v50 = vunpack.c.l.b16 %v841_v30 }
 0x1cc   :  { %v3685_v11 = vadd.f32 %v5994_v63, %v3617_v60  ;;  %v3140_v57 = vrot.slane %v3138_v36, 4  ;;  %v4608_v60 = vld [vmem:[%s6357_s0 + $0x174] sm:$0xff] }
 0x1cd   :  { %v992_v4 = vpack.c.b16 %v958_v50, %v957_v49 }
 0x1ce   :  { %v2194_v52 = vpop.f32.mrf.mxu2  ;;  %v3749_v27 = vmax.f32 %v3685_v11, 0.0  ;;  %v3144_v10 = vor.u32 %v3143_v58, %v3140_v57  ;;  %v118_v57 = vld [vmem:[%s6357_s0 + $0x188] sm:$0x1] }
 0x1cf   :  { %v1674_v54 = vpop.f32.mrf.mxu1  ;;  %v2296_v61 = vadd.f32 %v2194_v52, %v1672_v6  ;;  %v1225_v1 = vpop.f32.mrf.mxu0  ;;  %v3136_v6 = vsel %vm4908_vm3, %v3131_v34, %v3135_v35  ;;  %v3252_v52 = vunpack.c.l.b16 %v3126_v33  ;;  %v4480_v33 = vld [vmem:[%s6357_s0 + $0x18c] sm:$0xf] }
 0x1d0   :  { %v1675_v29 = vadd.f32 %v1674_v54, %v1225_v1  ;;  %v3153_v1 = vrot.slane %v3151_v47, 4  ;;  %v3253_v5 = vunpack.c.l.b16 %v3136_v6  ;;  %v3145_v22 = vrot.slane %v3144_v10, 4 }
 0x1d1   :  { %v3516_v7 = vpop.f32.mrf.mxu3  ;;  %v3162_v45 = vshrl.u32 %v4480_v33, 16  ;;  %v3165_v50 = vshll.u32 %v4480_v33, 16 }
 0x1d2   :  { %4135 = vmatmul.msk.bf16.gmra.mxu1 %vm1019_vm2, %v4567_v53  ;;  %v3618_v12 = vadd.f32 %v3516_v7, %v2296_v61  ;;  %3959 = vmatmul.msk.bf16.gmra.mxu0 %vm1019_vm2, %v991_v55  ;;  %v4568_v55 = vld [vmem:[%s6357_s0 + $0x168] sm:$0xff]  ;;  %v859_v61 = vor.u32 %v858_v44, %v6208_v43  ;;  %v3154_v14 = vor.u32 %v3153_v1, %v6225_v0 }
 0x1d3   :  { %4383 = vmatmul.msk.bf16.gmra.mxu2 %vm1019_vm2, %v4607_v56  ;;  %v849_v56 = vor.u32 %v848_v39, %v845_v38  ;;  %v4479_v7 = vld [vmem:[%s6357_s0 + $0x188] sm:$0x1]  ;;  %v3287_v17 = vpack.c.b16 %v3253_v5, %v3252_v52  ;;  %v4481_v39 = vld [vmem:[%s6357_s0 + $0x190] sm:$0xf] }
 0x1d4   :  { %v3686_v18 = vadd.f32 %v5994_v63, %v3618_v12  ;;  %v860_v12 = vrot.slane %v859_v61, 4  ;;  %v3157_v15 = vshll.u32 %v4479_v7, 16  ;;  %v3155_v26 = vrot.slane %v3154_v14, 4 }
 0x1d5   :  { %v850_v9 = vrot.slane %v849_v56, 4  ;;  %v3171_v52 = vshll.u32 %v4481_v39, 16  ;;  %v4569_v56 = vld [vmem:[%s6357_s0 + $0x174] sm:$0xff] }
 0x1d6   :  { %v2197_v19 = vpop.f32.mrf.mxu2  ;;  %v3750_v28 = vmax.f32 %v3686_v18, 0.0  ;;  %4535 = vmatmul.msk.bf16.gmra.mxu3 %vm1019_vm2, %v3286_v8  ;;  %v77_v18 = vld [vmem:[%s6357_s0 + $0x180] sm:$0xf]  ;;  %v865_v25 = vsel %vm4908_vm3, %v860_v12, %v864_v13 }
 0x1d7   :  { %v1676_v23 = vpop.f32.mrf.mxu1  ;;  %v1227_v32 = vpop.f32.mrf.mxu0  ;;  %v2297_v48 = vadd.f32 %v2197_v19, %v1675_v29  ;;  %v855_v21 = vsel %vm4908_vm3, %v850_v9, %v6208_v43  ;;  %v3150_v43 = vsel %vm4908_vm3, %v3145_v22, %v6225_v0  ;;  %v3164_v0 = vrot.slane %v3162_v45, 4  ;;  %v4610_v45 = vld [vmem:[%s6357_s0 + $0x18c] sm:$0xff] }
 0x1d8   :  { %v4717_v37 = vpack.c.bf16 %v3750_v28, %v3749_v27  ;;  %v1677_v53 = vadd.f32 %v1676_v23, %v1227_v32  ;;  %v78_v23 = vld [vmem:[%s6357_s0 + $0x184] sm:$0xf]  ;;  %v3159_v27 = vrot.slane %v3157_v15, 5  ;;  %v867_v28 = vshrl.u32 %v77_v18, 16 }
 0x1d9   :  { %v3519_v42 = vpop.f32.mrf.mxu3  ;;  %v870_v32 = vshll.u32 %v77_v18, 16  ;;  %v876_v35 = vshll.u32 %v78_v23, 16  ;;  %v880_v36 = vshrl.u32 %v78_v23, 16  ;;  %v959_v38 = vunpack.c.l.b16 %v855_v21 }
 0x1da   :  { %4797 = vst [vmem:[%s6359_s3 + $0x98] sm:$0xff] %v4717_v37   ;;  %v3619_v2 = vadd.f32 %v3519_v42, %v2297_v48  ;;  %v960_v42 = vunpack.c.l.b16 %v865_v25  ;;  %v3160_v44 = vsel %vm4908_vm3, %v3155_v26, %v3159_v27  ;;  %v869_v48 = vrot.slane %v867_v28, 4 }
 0x1db   :  { %v872_v49 = vrot.slane %v870_v32, 5  ;;  %v878_v51 = vrot.slane %v876_v35, 5  ;;  %v882_v6 = vrot.slane %v880_v36, 4  ;;  %v3254_v61 = vunpack.c.l.b16 %v3150_v43  ;;  %v4570_v43 = vld [vmem:[%s6357_s0 + $0x180] sm:$0xff] }
 0x1dc   :  { %v3687_v46 = vadd.f32 %v5994_v63, %v3619_v2  ;;  %v3255_v62 = vunpack.c.l.b16 %v3160_v44  ;;  %v3173_v9 = vrot.slane %v3171_v52, 5 }
 0x1dd   :  { %v883_v7 = vor.u32 %v882_v6, %v878_v51 }
 0x1de   :  { %v2199_v54 = vpop.f32.mrf.mxu2  ;;  %v3751_v29 = vmax.f32 %v3687_v46, 0.0  ;;  %v3288_v13 = vpack.c.b16 %v3255_v62, %v3254_v61 }
 0x1df   :  { %v1679_v59 = vpop.f32.mrf.mxu1  ;;  %v2298_v3 = vadd.f32 %v2199_v54, %v1677_v53  ;;  %v1230_v8 = vpop.f32.mrf.mxu0  ;;  %v3175_v53 = vshrl.u32 %v4481_v39, 16 }
 0x1e0   :  { %v1680_v31 = vadd.f32 %v1679_v59, %v1230_v8  ;;  %v993_v59 = vpack.c.b16 %v960_v42, %v959_v38  ;;  %v886_v8 = vshll.u32 %v118_v57, 16 }
 0x1e1   :  { %v3521_v11 = vpop.f32.mrf.mxu3  ;;  %v3177_v10 = vrot.slane %v3175_v53, 4 }
 0x1e2   :  { %4136 = vmatmul.msk.bf16.gmra.mxu1 %vm1019_vm2, %v4568_v55  ;;  %v3620_v16 = vadd.f32 %v3521_v11, %v2298_v3  ;;  %3960 = vmatmul.msk.bf16.gmra.mxu0 %vm1019_vm2, %v992_v4  ;;  %v873_v3 = vor.u32 %v872_v49, %v869_v48  ;;  %v3167_v4 = vrot.slane %v3165_v50, 5  ;;  %v4482_v11 = vld [vmem:[%s6357_s0 + $0x194] sm:$0x1]  ;;  %v888_v18 = vrot.slane %v886_v8, 5 }
 0x1e3   :  { %4384 = vmatmul.msk.bf16.gmra.mxu2 %vm1019_vm2, %v4608_v60  ;;  %v4609_v60 = vld [vmem:[%s6357_s0 + $0x180] sm:$0xff] }
 0x1e4   :  { %v3688_v19 = vadd.f32 %v5994_v63, %v3620_v16  ;;  %v874_v46 = vrot.slane %v873_v3, 4  ;;  %v3168_v16 = vor.u32 %v3167_v4, %v3164_v0 }
 0x1e6   :  { %v2202_v20 = vpop.f32.mrf.mxu2  ;;  %v3752_v30 = vmax.f32 %v3688_v19, 0.0  ;;  %4536 = vmatmul.msk.bf16.gmra.mxu3 %vm1019_vm2, %v3287_v17  ;;  %v884_v17 = vrot.slane %v883_v7, 4  ;;  %v3178_v19 = vor.u32 %v3177_v10, %v3173_v9  ;;  %v3169_v27 = vrot.slane %v3168_v16, 4 }
 0x1e7   :  { %v1681_v24 = vpop.f32.mrf.mxu1  ;;  %v1232_v34 = vpop.f32.mrf.mxu0  ;;  %v2299_v47 = vadd.f32 %v2202_v20, %v1680_v31  ;;  %v3181_v20 = vshll.u32 %v4482_v11, 16 }
 0x1e8   :  { %v4722_v37 = vpack.c.bf16 %v3752_v30, %v3751_v29  ;;  %v1682_v54 = vadd.f32 %v1681_v24, %v1232_v34  ;;  %v879_v29 = vsel %vm4908_vm3, %v874_v46, %v878_v51  ;;  %v889_v30 = vsel %vm4908_vm3, %v884_v17, %v888_v18 }
 0x1e9   :  { %v3524_v40 = vpop.f32.mrf.mxu3  ;;  %v3179_v31 = vrot.slane %v3178_v19, 4  ;;  %v3183_v32 = vrot.slane %v3181_v20, 5  ;;  %v961_v36 = vunpack.c.l.b16 %v879_v29  ;;  %v3174_v38 = vsel %vm4908_vm3, %v3169_v27, %v3173_v9 }
 0x1ea   :  { %4798 = vst [vmem:[%s6359_s3 + $0xa0] sm:$0xff] %v4722_v37   ;;  %v3621_v1 = vadd.f32 %v3524_v40, %v2299_v47  ;;  %v962_v37 = vunpack.c.l.b16 %v889_v30  ;;  %v3256_v47 = vunpack.c.l.b16 %v3174_v38 }
 0x1eb   :  { %v3184_v39 = vsel %vm4908_vm3, %v3179_v31, %v3183_v32 }
 0x1ec   :  { %v3689_v14 = vadd.f32 %v5994_v63, %v3621_v1  ;;  %v994_v50 = vpack.c.b16 %v962_v37, %v961_v36  ;;  %v3257_v51 = vunpack.c.l.b16 %v3184_v39 }
 0x1ee   :  { %v2204_v55 = vpop.f32.mrf.mxu2  ;;  %v3753_v24 = vmax.f32 %v3689_v14, 0.0 }
 0x1ef   :  { %v1684_v58 = vpop.f32.mrf.mxu1  ;;  %v2300_v2 = vadd.f32 %v2204_v55, %v1682_v54  ;;  %v1235_v5 = vpop.f32.mrf.mxu0  ;;  %v3289_v54 = vpack.c.b16 %v3257_v51, %v3256_v47 }
 0x1f0   :  { %v1685_v26 = vadd.f32 %v1684_v58, %v1235_v5 }
 0x1f1   :  { %v3526_v12 = vpop.f32.mrf.mxu3 }
 0x1f2   :  { %4137 = vmatmul.msk.bf16.gmra.mxu1 %vm1019_vm2, %v4569_v56  ;;  %v3622_v15 = vadd.f32 %v3526_v12, %v2300_v2  ;;  %3961 = vmatmul.msk.bf16.gmra.mxu0 %vm1019_vm2, %v993_v59 }
 0x1f3   :  { %4385 = vmatmul.msk.bf16.gmra.mxu2 %vm1019_vm2, %v4609_v60 }
 0x1f4   :  { %v3690_v21 = vadd.f32 %v5994_v63, %v3622_v15 }
 0x1f6   :  { %v2207_v22 = vpop.f32.mrf.mxu2  ;;  %v3754_v25 = vmax.f32 %v3690_v21, 0.0  ;;  %4537 = vmatmul.msk.bf16.gmra.mxu3 %vm1019_vm2, %v3288_v13 }
 0x1f7   :  { %v1686_v23 = vpop.f32.mrf.mxu1  ;;  %v1237_v28 = vpop.f32.mrf.mxu0  ;;  %v2301_v35 = vadd.f32 %v2207_v22, %v1685_v26 }
 0x1f8   :  { %v4727_v33 = vpack.c.bf16 %v3754_v25, %v3753_v24  ;;  %v1687_v40 = vadd.f32 %v1686_v23, %v1237_v28 }
 0x1f9   :  { %v3529_v34 = vpop.f32.mrf.mxu3 }
 0x1fa   :  { %4799 = vst [vmem:[%s6359_s3 + $0xa8] sm:$0xff] %v4727_v33   ;;  %v3623_v48 = vadd.f32 %v3529_v34, %v2301_v35 }
 0x1fc   :  { %v3691_v52 = vadd.f32 %v5994_v63, %v3623_v48  ;;  %v6319_v48 = vld [vmem:[%s6358_s2] ss:$0 sm:$0xff] }
 0x1fe   :  { %v2209_v42 = vpop.f32.mrf.mxu2  ;;  %v3755_v58 = vmax.f32 %v3691_v52, 0.0 }
 0x1ff   :  { %v1689_v44 = vpop.f32.mrf.mxu1  ;;  %v2302_v49 = vadd.f32 %v2209_v42, %v1687_v40  ;;  %v1240_v6 = vpop.f32.mrf.mxu0 }
 0x200   :  { %v1690_v60 = vadd.f32 %v1689_v44, %v1240_v6 }
 0x201   :  { %v3531_v41 = vpop.f32.mrf.mxu3 }
 0x202   :  { %4138 = vmatmul.msk.bf16.gmra.mxu1 %vm1019_vm2, %v4570_v43  ;;  %v3624_v53 = vadd.f32 %v3531_v41, %v2302_v49  ;;  %3962 = vmatmul.msk.bf16.gmra.mxu0 %vm1019_vm2, %v994_v50 }
 0x203   :  { %4386 = vmatmul.msk.bf16.gmra.mxu2 %vm1019_vm2, %v4610_v45 }
 0x204   :  { %v3692_v55 = vadd.f32 %v5994_v63, %v3624_v53 }
 0x206   :  { %v2212_v56 = vpop.f32.mrf.mxu2  ;;  %v3756_v59 = vmax.f32 %v3692_v55, 0.0  ;;  %4538 = vmatmul.msk.bf16.gmra.mxu3 %vm1019_vm2, %v3289_v54 }
 0x207   :  { %v1691_v57 = vpop.f32.mrf.mxu1  ;;  %v1242_v61 = vpop.f32.mrf.mxu0  ;;  %v2303_v1 = vadd.f32 %v2212_v56, %v1690_v60 }
 0x208   :  { %v4732_v62 = vpack.c.bf16 %v3756_v59, %v3755_v58  ;;  %v1692_v2 = vadd.f32 %v1691_v57, %v1242_v61 }
 0x209   :  { %v3534_v0 = vpop.f32.mrf.mxu3 }
 0x20a   :  { %4800 = vst [vmem:[%s6359_s3 + $0xb0] sm:$0xff] %v4732_v62   ;;  %v3625_v5 = vadd.f32 %v3534_v0, %v2303_v1 }
 0x20c   :  { %v3693_v10 = vadd.f32 %v5994_v63, %v3625_v5 }
 0x20e   :  { %v2214_v3 = vpop.f32.mrf.mxu2  ;;  %v3757_v15 = vmax.f32 %v3693_v10, 0.0 }
 0x20f   :  { %v1694_v4 = vpop.f32.mrf.mxu1  ;;  %v2304_v7 = vadd.f32 %v2214_v3, %v1692_v2  ;;  %v1245_v8 = vpop.f32.mrf.mxu0 }
 0x210   :  { %v1695_v16 = vadd.f32 %v1694_v4, %v1245_v8 }
 0x211   :  { %v3536_v9 = vpop.f32.mrf.mxu3 }
 0x212   :  { %v3626_v11 = vadd.f32 %v3536_v9, %v2304_v7 }
 0x214   :  { %v3694_v12 = vadd.f32 %v5994_v63, %v3626_v11 }
 0x216   :  { %v2217_v13 = vpop.f32.mrf.mxu2  ;;  %v3758_v46 = vmax.f32 %v3694_v12, 0.0 }
 0x217   :  { %v1696_v14 = vpop.f32.mrf.mxu1  ;;  %v1247_v17 = vpop.f32.mrf.mxu0  ;;  %v2305_v20 = vadd.f32 %v2217_v13, %v1695_v16 }
 0x218   :  { %v4737_v18 = vpack.c.bf16 %v3758_v46, %v3757_v15  ;;  %v1697_v21 = vadd.f32 %v1696_v14, %v1247_v17 }
 0x219   :  { %v3539_v19 = vpop.f32.mrf.mxu3 }
 0x21a   :  { %4801 = vst [vmem:[%s6359_s3 + $0xb8] sm:$0xff] %v4737_v18   ;;  %v3627_v24 = vadd.f32 %v3539_v19, %v2305_v20 }
 0x21c   :  { %v3695_v28 = vadd.f32 %v5994_v63, %v3627_v24 }
 0x21e   :  { %v2219_v22 = vpop.f32.mrf.mxu2  ;;  %v3759_v33 = vmax.f32 %v3695_v28, 0.0 }
 0x21f   :  { %v1699_v23 = vpop.f32.mrf.mxu1  ;;  %v2306_v25 = vadd.f32 %v2219_v22, %v1697_v21  ;;  %v1250_v26 = vpop.f32.mrf.mxu0 }
 0x220   :  { %v1700_v35 = vadd.f32 %v1699_v23, %v1250_v26 }
 0x221   :  { %v3541_v27 = vpop.f32.mrf.mxu3 }
 0x222   :  { %v3628_v29 = vadd.f32 %v3541_v27, %v2306_v25 }
 0x224   :  { %v3696_v30 = vadd.f32 %v5994_v63, %v3628_v29 }
 0x226   :  { %v2222_v31 = vpop.f32.mrf.mxu2  ;;  %v3760_v34 = vmax.f32 %v3696_v30, 0.0 }
 0x227   :  { %v1701_v32 = vpop.f32.mrf.mxu1  ;;  %v1252_v36 = vpop.f32.mrf.mxu0  ;;  %v2307_v39 = vadd.f32 %v2222_v31, %v1700_v35 }
 0x228   :  { %v4742_v37 = vpack.c.bf16 %v3760_v34, %v3759_v33  ;;  %v1702_v40 = vadd.f32 %v1701_v32, %v1252_v36 }
 0x229   :  { %v3544_v38 = vpop.f32.mrf.mxu3 }
 0x22a   :  { %4802 = vst [vmem:[%s6359_s3 + $0xc0] sm:$0xff] %v4742_v37   ;;  %v3629_v44 = vadd.f32 %v3544_v38, %v2307_v39 }
 0x22c   :  { %v3697_v49 = vadd.f32 %v6319_v48, %v3629_v44 }
 0x22e   :  { %v2224_v42 = vpop.f32.mrf.mxu2  ;;  %v3761_v52 = vmax.f32 %v3697_v49, 0.0 }
 0x22f   :  { %v1704_v43 = vpop.f32.mrf.mxu1  ;;  %v2308_v45 = vadd.f32 %v2224_v42, %v1702_v40  ;;  %v1255_v47 = vpop.f32.mrf.mxu0 }
 0x230   :  { %v1705_v54 = vadd.f32 %v1704_v43, %v1255_v47 }
 0x231   :  { %v3546_v63 = vpop.f32.mrf.mxu3 }
 0x232   :  { %v3630_v50 = vadd.f32 %v3546_v63, %v2308_v45 }
 0x234   :  { %v3698_v51 = vadd.f32 %v6319_v48, %v3630_v50 }
 0x236   :  { %v2227_v6 = vpop.f32.mrf.mxu2  ;;  %v3762_v53 = vmax.f32 %v3698_v51, 0.0 }
 0x237   :  { %v1706_v41 = vpop.f32.mrf.mxu1  ;;  %v1257_v55 = vpop.f32.mrf.mxu0  ;;  %v2309_v58 = vadd.f32 %v2227_v6, %v1705_v54 }
 0x238   :  { %v4747_v56 = vpack.c.bf16 %v3762_v53, %v3761_v52  ;;  %v1707_v59 = vadd.f32 %v1706_v41, %v1257_v55 }
 0x239   :  { %v3549_v57 = vpop.f32.mrf.mxu3 }
 0x23a   :  { %4803 = vst [vmem:[%s6359_s3 + $0xc8] sm:$0xff] %v4747_v56   ;;  %v3631_v62 = vadd.f32 %v3549_v57, %v2309_v58 }
 0x23c   :  { %v3699_v3 = vadd.f32 %v6319_v48, %v3631_v62 }
 0x23e   :  { %v2229_v60 = vpop.f32.mrf.mxu2  ;;  %v3763_v9 = vmax.f32 %v3699_v3, 0.0 }
 0x23f   :  { %v1709_v61 = vpop.f32.mrf.mxu1  ;;  %v2310_v0 = vadd.f32 %v2229_v60, %v1707_v59  ;;  %v1260_v1 = vpop.f32.mrf.mxu0 }
 0x240   :  { %v1710_v11 = vadd.f32 %v1709_v61, %v1260_v1 }
 0x241   :  { %v3551_v2 = vpop.f32.mrf.mxu3 }
 0x242   :  { %v3632_v4 = vadd.f32 %v3551_v2, %v2310_v0 }
 0x244   :  { %v3700_v5 = vadd.f32 %v6319_v48, %v3632_v4 }
 0x246   :  { %v2232_v7 = vpop.f32.mrf.mxu2  ;;  %v3764_v10 = vmax.f32 %v3700_v5, 0.0 }
 0x247   :  { %v1711_v8 = vpop.f32.mrf.mxu1  ;;  %v1262_v12 = vpop.f32.mrf.mxu0  ;;  %v2311_v15 = vadd.f32 %v2232_v7, %v1710_v11 }
 0x248   :  { %v4752_v13 = vpack.c.bf16 %v3764_v10, %v3763_v9  ;;  %v1712_v46 = vadd.f32 %v1711_v8, %v1262_v12 }
 0x249   :  { %v3554_v14 = vpop.f32.mrf.mxu3 }
 0x24a   :  { %4804 = vst [vmem:[%s6359_s3 + $0xd0] sm:$0xff] %v4752_v13   ;;  %v3633_v18 = vadd.f32 %v3554_v14, %v2311_v15 }
 0x24c   :  { %v3701_v22 = vadd.f32 %v6319_v48, %v3633_v18 }
 0x24e   :  { %v2234_v16 = vpop.f32.mrf.mxu2  ;;  %v3765_v27 = vmax.f32 %v3701_v22, 0.0 }
 0x24f   :  { %v1714_v17 = vpop.f32.mrf.mxu1  ;;  %v2312_v19 = vadd.f32 %v2234_v16, %v1712_v46  ;;  %v1265_v20 = vpop.f32.mrf.mxu0 }
 0x250   :  { %v1715_v29 = vadd.f32 %v1714_v17, %v1265_v20 }
 0x251   :  { %v3556_v21 = vpop.f32.mrf.mxu3 }
 0x252   :  { %v3634_v23 = vadd.f32 %v3556_v21, %v2312_v19 }
 0x254   :  { %v3702_v24 = vadd.f32 %v6319_v48, %v3634_v23 }
 0x256   :  { %v2237_v25 = vpop.f32.mrf.mxu2  ;;  %v3766_v28 = vmax.f32 %v3702_v24, 0.0 }
 0x257   :  { %v1716_v26 = vpop.f32.mrf.mxu1  ;;  %v1267_v30 = vpop.f32.mrf.mxu0  ;;  %v2313_v33 = vadd.f32 %v2237_v25, %v1715_v29 }
 0x258   :  { %v4757_v31 = vpack.c.bf16 %v3766_v28, %v3765_v27  ;;  %v1717_v34 = vadd.f32 %v1716_v26, %v1267_v30 }
 0x259   :  { %v3559_v32 = vpop.f32.mrf.mxu3 }
 0x25a   :  { %4805 = vst [vmem:[%s6359_s3 + $0xd8] sm:$0xff] %v4757_v31   ;;  %v3635_v37 = vadd.f32 %v3559_v32, %v2313_v33 }
 0x25c   :  { %v3703_v42 = vadd.f32 %v6319_v48, %v3635_v37 }
 0x25e   :  { %v2239_v35 = vpop.f32.mrf.mxu2  ;;  %v3767_v63 = vmax.f32 %v3703_v42, 0.0 }
 0x25f   :  { %v1719_v36 = vpop.f32.mrf.mxu1  ;;  %v2314_v38 = vadd.f32 %v2239_v35, %v1717_v34  ;;  %v1270_v39 = vpop.f32.mrf.mxu0 }
 0x260   :  { %v1720_v50 = vadd.f32 %v1719_v36, %v1270_v39 }
 0x261   :  { %v3561_v40 = vpop.f32.mrf.mxu3 }
 0x262   :  { %v3636_v43 = vadd.f32 %v3561_v40, %v2314_v38 }
 0x264   :  { %v3704_v44 = vadd.f32 %v6319_v48, %v3636_v43 }
 0x266   :  { %v2242_v45 = vpop.f32.mrf.mxu2  ;;  %v3768_v49 = vmax.f32 %v3704_v44, 0.0 }
 0x267   :  { %v1721_v47 = vpop.f32.mrf.mxu1  ;;  %v1272_v51 = vpop.f32.mrf.mxu0  ;;  %v2315_v52 = vadd.f32 %v2242_v45, %v1720_v50 }
 0x268   :  { %v4762_v6 = vpack.c.bf16 %v3768_v49, %v3767_v63  ;;  %v1722_v53 = vadd.f32 %v1721_v47, %v1272_v51 }
 0x269   :  { %v3564_v41 = vpop.f32.mrf.mxu3 }
 0x26a   :  { %4806 = vst [vmem:[%s6359_s3 + $0xe0] sm:$0xff] %v4762_v6   ;;  %v3637_v56 = vadd.f32 %v3564_v41, %v2315_v52 }
 0x26c   :  { %v3705_v60 = vadd.f32 %v6319_v48, %v3637_v56 }
 0x26e   :  { %v2244_v54 = vpop.f32.mrf.mxu2  ;;  %v3769_v2 = vmax.f32 %v3705_v60, 0.0 }
 0x26f   :  { %v1724_v55 = vpop.f32.mrf.mxu1  ;;  %v2316_v57 = vadd.f32 %v2244_v54, %v1722_v53  ;;  %v1275_v58 = vpop.f32.mrf.mxu0 }
 0x270   :  { %v1725_v4 = vadd.f32 %v1724_v55, %v1275_v58 }
 0x271   :  { %v3566_v59 = vpop.f32.mrf.mxu3 }
 0x272   :  { %v3638_v61 = vadd.f32 %v3566_v59, %v2316_v57 }
 0x274   :  { %v3706_v62 = vadd.f32 %v6319_v48, %v3638_v61 }
 0x276   :  { %v2247_v0 = vpop.f32.mrf.mxu2  ;;  %v3770_v3 = vmax.f32 %v3706_v62, 0.0 }
 0x277   :  { %v1726_v1 = vpop.f32.mrf.mxu1  ;;  %v1277_v5 = vpop.f32.mrf.mxu0  ;;  %v2317_v9 = vadd.f32 %v2247_v0, %v1725_v4 }
 0x278   :  { %v4767_v7 = vpack.c.bf16 %v3770_v3, %v3769_v2  ;;  %v1727_v10 = vadd.f32 %v1726_v1, %v1277_v5 }
 0x279   :  { %v3569_v8 = vpop.f32.mrf.mxu3 }
 0x27a   :  { %4807 = vst [vmem:[%s6359_s3 + $0xe8] sm:$0xff] %v4767_v7   ;;  %v3639_v12 = vadd.f32 %v3569_v8, %v2317_v9 }
 0x27c   :  { %v3707_v16 = vadd.f32 %v6319_v48, %v3639_v12 }
 0x27e   :  { %v2249_v11 = vpop.f32.mrf.mxu2  ;;  %v3771_v20 = vmax.f32 %v3707_v16, 0.0 }
 0x27f   :  { %v2318_v13 = vadd.f32 %v2249_v11, %v1727_v10  ;;  %v1729_v14 = vpop.f32.mrf.mxu1  ;;  %v1280_v15 = vpop.f32.mrf.mxu0 }
 0x280   :  { %v1730_v22 = vadd.f32 %v1729_v14, %v1280_v15 }
 0x281   :  { %v3571_v46 = vpop.f32.mrf.mxu3 }
 0x282   :  { %v3640_v17 = vadd.f32 %v3571_v46, %v2318_v13 }
 0x284   :  { %v3708_v18 = vadd.f32 %v6319_v48, %v3640_v17 }
 0x286   :  { %v2252_v19 = vpop.f32.mrf.mxu2  ;;  %v3772_v21 = vmax.f32 %v3708_v18, 0.0 }
 0x287   :  { %v1731_v24 = vpop.f32.mrf.mxu1  ;;  %v1282_v26 = vpop.f32.mrf.mxu0  ;;  %v2319_v27 = vadd.f32 %v2252_v19, %v1730_v22 }
 0x288   :  { %v4772_v23 = vpack.c.bf16 %v3772_v21, %v3771_v20  ;;  %v1732_v28 = vadd.f32 %v1731_v24, %v1282_v26 }
 0x289   :  { %v3574_v25 = vpop.f32.mrf.mxu3 }
 0x28a   :  { %4808 = vst [vmem:[%s6359_s3 + $0xf0] sm:$0xff] %v4772_v23   ;;  %v3641_v30 = vadd.f32 %v3574_v25, %v2319_v27 }
 0x28c   :  { %v3709_v33 = vadd.f32 %v6319_v48, %v3641_v30 }
 0x28e   :  { %v2254_v29 = vpop.f32.mrf.mxu2  ;;  %v3773_v36 = vmax.f32 %v3709_v33, 0.0 }
 0x28f   :  { %v2320_v31 = vadd.f32 %v2254_v29, %v1732_v28 }
 0x291   :  { %v3576_v32 = vpop.f32.mrf.mxu3 }
 0x292   :  { %v3642_v34 = vadd.f32 %v3576_v32, %v2320_v31 }
 0x294   :  { %v3710_v35 = vadd.f32 %v6319_v48, %v3642_v34 }
 0x296   :  { %v3774_v37 = vmax.f32 %v3710_v35, 0.0 }
 0x298   :  { %v4777_v38 = vpack.c.bf16 %v3774_v37, %v3773_v36 }
 0x29a   :  { %4809 = vst [vmem:[%s6359_s3 + $0xf8] sm:$0xff] %v4777_v38  }

// kernel: cnn_dqn_a_forward.7
= control target key start
LH: loop header
LB: loop body
LE: loop exit
PB: predicated region body
PF: predicated region fallthrough
CT: control target
= control target key end

     0   :  { %vm134_vm0 = vsmask.f32 3328  ;;  %vm135_vm1 = vsmask.f32 7440  ;;  %s5867_s1 = inlined_call_operand.vmem [shape: bf16[2,2,512,128], index: 1, kind: input, shape index: {}]   ;;  %s5868_s0 = inlined_call_operand.vmem [shape: bf16[2,8,9,512], index: 0, kind: input, shape index: {}]   ;;  %s5869_s2 = inlined_call_operand.vmem [shape: f32[1,128], index: 2, kind: input, shape index: {}]   ;;  %s5870_s3 = inlined_call_operand.vmem [shape: bf16[112,128], index: 3, kind: output, shape index: {}]  }
   0x1   :  { %v4348_v0 = vld [vmem:[%s5867_s1 + $0x138] sm:$0xff]  ;;  %v4347_v4 = vld [vmem:[%s5867_s1 + $0x130] sm:$0xff]  ;;  %v4346_v8 = vld [vmem:[%s5867_s1 + $0x128] sm:$0xff] }
   0x2   :  { %v4356_v1 = vld [vmem:[%s5867_s1 + $0x178] sm:$0xff]  ;;  %898 = vmatpush.bf16.msra.mxu0 %v4348_v0  ;;  %v4355_v5 = vld [vmem:[%s5867_s1 + $0x170] sm:$0xff]  ;;  %v4354_v9 = vld [vmem:[%s5867_s1 + $0x168] sm:$0xff] }
   0x3   :  { %v4364_v2 = vld [vmem:[%s5867_s1 + $0x1b8] sm:$0xff]  ;;  %942 = vmatpush.bf16.msra.mxu1 %v4356_v1  ;;  %v4363_v6 = vld [vmem:[%s5867_s1 + $0x1b0] sm:$0xff]  ;;  %v4362_v10 = vld [vmem:[%s5867_s1 + $0x1a8] sm:$0xff] }
   0x4   :  { %v4372_v3 = vld [vmem:[%s5867_s1 + $0x1f8] sm:$0xff]  ;;  %986 = vmatpush.bf16.msra.mxu2 %v4364_v2  ;;  %v4371_v7 = vld [vmem:[%s5867_s1 + $0x1f0] sm:$0xff]  ;;  %v4370_v11 = vld [vmem:[%s5867_s1 + $0x1e8] sm:$0xff] }
   0x5   :  { %1030 = vmatpush.bf16.msra.mxu3 %v4372_v3  ;;  %v4345_v12 = vld [vmem:[%s5867_s1 + $0x120] sm:$0xff]  ;;  %v106_v18 = vld [vmem:[%s5868_s0 + $0x10] sm:$0x11]  ;;  %v15_v25 = vld [vmem:[%s5868_s0 + $0x8] sm:$0xff] }
   0x6   :  { %899 = vmatpush.bf16.msra.mxu0 %v4347_v4  ;;  %v4353_v13 = vld [vmem:[%s5867_s1 + $0x160] sm:$0xff]  ;;  %v108_v19 = vld [vmem:[%s5868_s0 + $0x30] sm:$0x11]  ;;  %v147_v22 = vshll.u32 %v106_v18, 16  ;;  %v4344_v26 = vld [vmem:[%s5867_s1 + $0x118] sm:$0xff]  ;;  %v152_v39 = vshrl.u32 %v15_v25, 16 }
   0x7   :  { %943 = vmatpush.bf16.msra.mxu1 %v4355_v5  ;;  %v4361_v14 = vld [vmem:[%s5867_s1 + $0x1a0] sm:$0xff]  ;;  %v175_v28 = vshll.u32 %v108_v19, 16  ;;  %v17_v29 = vld [vmem:[%s5868_s0 + $0x28] sm:$0xff]  ;;  %v107_v30 = vld [vmem:[%s5868_s0 + $0x18] sm:$0x11]  ;;  %v155_v40 = vshll.u32 %v15_v25, 16 }
   0x8   :  { %987 = vmatpush.bf16.msra.mxu2 %v4363_v6  ;;  %v4369_v15 = vld [vmem:[%s5867_s1 + $0x1e0] sm:$0xff]  ;;  %v4352_v31 = vld [vmem:[%s5867_s1 + $0x158] sm:$0xff]  ;;  %v149_v38 = vrot.slane %v147_v22, 5  ;;  %v161_v41 = vshll.u32 %v107_v30, 16  ;;  %v180_v44 = vshrl.u32 %v17_v29, 16  ;;  %v183_v45 = vshll.u32 %v17_v29, 16  ;;  %vm4616_vm2 = vmor %vm134_vm0, %vm135_vm1 }
   0x9   :  { %1031 = vmatpush.bf16.msra.mxu3 %v4371_v7  ;;  %v14_v16 = vld [vmem:[%s5868_s0] sm:$0xff]  ;;  %v109_v35 = vld [vmem:[%s5868_s0 + $0x38] sm:$0x11]  ;;  %v177_v48 = vrot.slane %v175_v28, 5  ;;  %v154_v49 = vrot.slane %v152_v39, 4  ;;  %v157_v50 = vrot.slane %v155_v40, 5 }
   0xa   :  { %900 = vmatpush.bf16.msra.mxu0 %v4346_v8  ;;  %v16_v17 = vld [vmem:[%s5868_s0 + $0x20] sm:$0xff]  ;;  %v138_v20 = vshrl.u32 %v14_v16, 16  ;;  %v141_v21 = vshll.u32 %v14_v16, 16  ;;  %v4360_v36 = vld [vmem:[%s5867_s1 + $0x198] sm:$0xff]  ;;  %v189_v51 = vshll.u32 %v109_v35, 16  ;;  %v4343_v52 = vld [vmem:[%s5867_s1 + $0x110] sm:$0xff] }
   0xb   :  { %944 = vmatpush.bf16.msra.mxu1 %v4354_v9  ;;  %v166_v23 = vshrl.u32 %v16_v17, 16  ;;  %v169_v24 = vshll.u32 %v16_v17, 16  ;;  %v4368_v37 = vld [vmem:[%s5867_s1 + $0x1d8] sm:$0xff]  ;;  %v18_v46 = vld [vmem:[%s5868_s0 + $0x40] sm:$0xff]  ;;  %v4351_v53 = vld [vmem:[%s5867_s1 + $0x150] sm:$0xff]  ;;  %v182_v56 = vrot.slane %v180_v44, 4  ;;  %v158_v60 = vor.u32 %v157_v50, %v154_v49 }
   0xc   :  { %988 = vmatpush.bf16.msra.mxu2 %v4362_v10  ;;  %v140_v27 = vrot.slane %v138_v20, 4  ;;  %v143_v32 = vrot.slane %v141_v21, 5  ;;  %v185_v57 = vrot.slane %v183_v45, 5  ;;  %v4359_v58 = vld [vmem:[%s5867_s1 + $0x190] sm:$0xff]  ;;  %v194_v61 = vshrl.u32 %v18_v46, 16  ;;  %v20_v3 = vld [vmem:[%s5868_s0 + $0x60] sm:$0xff] }
   0xd   :  { %1032 = vmatpush.bf16.msra.mxu3 %v4370_v11  ;;  %v168_v33 = vrot.slane %v166_v23, 4  ;;  %v171_v34 = vrot.slane %v169_v24, 5  ;;  %v4367_v59 = vld [vmem:[%s5867_s1 + $0x1d0] sm:$0xff]  ;;  %v197_v62 = vshll.u32 %v18_v46, 16  ;;  %v163_v0 = vrot.slane %v161_v41, 5  ;;  %v4342_v5 = vld [vmem:[%s5867_s1 + $0x108] sm:$0xff] }
   0xe   :  { %901 = vmatpush.bf16.msra.mxu0 %v4345_v12  ;;  %v144_v42 = vor.u32 %v143_v32, %v140_v27  ;;  %v186_v1 = vor.u32 %v185_v57, %v182_v56  ;;  %v191_v2 = vrot.slane %v189_v51, 5  ;;  %v4350_v6 = vld [vmem:[%s5867_s1 + $0x148] sm:$0xff]  ;;  %v159_v7 = vrot.slane %v158_v60, 4  ;;  %v110_v18 = vld [vmem:[%s5868_s0 + $0x50] sm:$0x11]  ;;  %v4349_v27 = vld [vmem:[%s5867_s1 + $0x140] sm:$0xff] }
   0xf   :  { %945 = vmatpush.bf16.msra.mxu1 %v4353_v13  ;;  %v172_v43 = vor.u32 %v171_v34, %v168_v33  ;;  %v4358_v9 = vld [vmem:[%s5867_s1 + $0x188] sm:$0xff]  ;;  %v196_v12 = vrot.slane %v194_v61, 4  ;;  %v199_v13 = vrot.slane %v197_v62, 5  ;;  %v225_v19 = vshll.u32 %v20_v3, 16  ;;  %v112_v25 = vld [vmem:[%s5868_s0 + $0x70] sm:$0x11] }
  0x10   :  { %989 = vmatpush.bf16.msra.mxu2 %v4361_v14  ;;  %v145_v54 = vrot.slane %v144_v42, 4  ;;  %v187_v8 = vrot.slane %v186_v1, 4  ;;  %v4366_v10 = vld [vmem:[%s5867_s1 + $0x1c8] sm:$0xff]  ;;  %v222_v14 = vshrl.u32 %v20_v3, 16  ;;  %v164_v16 = vsel %vm4616_vm2, %v159_v7, %v163_v0  ;;  %v111_v32 = vld [vmem:[%s5868_s0 + $0x58] sm:$0x11] }
  0x11   :  { %1033 = vmatpush.bf16.msra.mxu3 %v4369_v15  ;;  %v173_v55 = vrot.slane %v172_v43, 4  ;;  %v19_v20 = vld [vmem:[%s5868_s0 + $0x48] sm:$0xff]  ;;  %v596_v23 = vunpack.c.l.b16 %v164_v16  ;;  %v597_v28 = vunpack.c.h.b16 %v164_v16  ;;  %v4357_v33 = vld [vmem:[%s5867_s1 + $0x180] sm:$0xff]  ;;  %v200_v35 = vor.u32 %v199_v13, %v196_v12  ;;  %v4332_v41 = vld [vmem:[%s5867_s1 + $0xb8] sm:$0xff] }
  0x12   :  { %902 = vmatpush.bf16.msra.mxu0 %v4344_v26  ;;  %v150_v63 = vsel %vm4616_vm2, %v145_v54, %v149_v38  ;;  %v192_v17 = vsel %vm4616_vm2, %v187_v8, %v191_v2  ;;  %v4341_v26 = vld [vmem:[%s5867_s1 + $0x100] sm:$0xff]  ;;  %v224_v30 = vrot.slane %v222_v14, 4  ;;  %v208_v38 = vshrl.u32 %v19_v20, 16  ;;  %v4340_v42 = vld [vmem:[%s5867_s1 + $0xf8] sm:$0xff]  ;;  %v4331_v61 = vld [vmem:[%s5867_s1 + $0xb0] sm:$0xff] }
  0x13   :  { %946 = vmatpush.bf16.msra.mxu1 %v4352_v31  ;;  %v178_v4 = vsel %vm4616_vm2, %v173_v55, %v177_v48  ;;  %v594_v11 = vunpack.c.l.b16 %v150_v63  ;;  %v595_v21 = vunpack.c.h.b16 %v150_v63  ;;  %v600_v24 = vunpack.c.l.b16 %v192_v17  ;;  %v4365_v34 = vld [vmem:[%s5867_s1 + $0x1c0] sm:$0xff]  ;;  %v113_v45 = vld [vmem:[%s5868_s0 + $0x78] sm:$0x11]  ;;  %v4339_v2 = vld [vmem:[%s5867_s1 + $0xf0] sm:$0xff] }
  0x14   :  { %990 = vmatpush.bf16.msra.mxu2 %v4360_v36  ;;  %v598_v15 = vunpack.c.l.b16 %v178_v4  ;;  %v599_v22 = vunpack.c.h.b16 %v178_v4  ;;  %v601_v29 = vunpack.c.h.b16 %v192_v17  ;;  %v227_v31 = vrot.slane %v225_v19, 5  ;;  %v4316_v55 = vld [vmem:[%s5867_s1 + $0x38] sm:$0xff]  ;;  %v24_v8 = vld [vmem:[%s5868_s0 + $0xa0] sm:$0xff]  ;;  %v23_v12 = vld [vmem:[%s5868_s0 + $0x88] sm:$0xff] }
  0x15   :  { %1034 = vmatpush.bf16.msra.mxu3 %v4368_v37  ;;  %v203_v36 = vshll.u32 %v110_v18, 16  ;;  %v21_v37 = vld [vmem:[%s5868_s0 + $0x68] sm:$0xff]  ;;  %v211_v39 = vshll.u32 %v19_v20, 16  ;;  %v231_v44 = vshll.u32 %v112_v25, 16  ;;  %v210_v48 = vrot.slane %v208_v38, 4  ;;  %v4324_v56 = vld [vmem:[%s5867_s1 + $0x78] sm:$0xff] }
  0x16   :  { %903 = vmatpush.bf16.msra.mxu0 %v4343_v52  ;;  %v650_v40 = vpack.c.b16 %v598_v15, %v594_v11  ;;  %v228_v43 = vor.u32 %v227_v31, %v224_v30  ;;  %v651_v46 = vpack.c.b16 %v599_v22, %v595_v21  ;;  %v217_v50 = vshll.u32 %v111_v32, 16  ;;  %v4323_v11 = vld [vmem:[%s5867_s1 + $0x70] sm:$0xff]  ;;  %v4330_v15 = vld [vmem:[%s5867_s1 + $0xa8] sm:$0xff] }
  0x17   :  { %947 = vmatpush.bf16.msra.mxu1 %v4351_v53  ;;  %v213_v49 = vrot.slane %v211_v39, 5  ;;  %v652_v51 = vpack.c.b16 %v600_v24, %v596_v23  ;;  %v653_v52 = vpack.c.b16 %v601_v29, %v597_v28  ;;  %v236_v53 = vshrl.u32 %v21_v37, 16  ;;  %v4338_v16 = vld [vmem:[%s5867_s1 + $0xe8] sm:$0xff] }
  0x18   :  { %991 = vmatpush.bf16.msra.mxu2 %v4359_v58  ;;  %v239_v54 = vshll.u32 %v21_v37, 16  ;;  %v201_v57 = vrot.slane %v200_v35, 4  ;;  %v205_v58 = vrot.slane %v203_v36, 5  ;;  %v245_v60 = vshll.u32 %v113_v45, 16  ;;  %v25_v29 = vld [vmem:[%s5868_s0 + $0xa8] sm:$0xff]  ;;  %v4329_v36 = vld [vmem:[%s5867_s1 + $0xa0] sm:$0xff] }
  0x19   :  { %1035 = vmatpush.bf16.msra.mxu3 %v4367_v59  ;;  %v214_v59 = vor.u32 %v213_v49, %v210_v48  ;;  %v229_v62 = vrot.slane %v228_v43, 4  ;;  %v233_v63 = vrot.slane %v231_v44, 5  ;;  %v238_v0 = vrot.slane %v236_v53, 4  ;;  %v4314_v30 = vld [vmem:[%s5867_s1 + $0x28] sm:$0xff]  ;;  %v4337_v37 = vld [vmem:[%s5867_s1 + $0xe0] sm:$0xff] }
  0x1a   :  { %904 = vmatpush.bf16.msra.mxu0 %v4342_v5  ;;  %v241_v1 = vrot.slane %v239_v54, 5  ;;  %v219_v4 = vrot.slane %v217_v50, 5  ;;  %v22_v5 = vld [vmem:[%s5868_s0 + $0x80] sm:$0xff]  ;;  %v247_v7 = vrot.slane %v245_v60, 5  ;;  %v278_v20 = vshrl.u32 %v24_v8, 16  ;;  %v4322_v31 = vld [vmem:[%s5867_s1 + $0x68] sm:$0xff] }
  0x1b   :  { %948 = vmatpush.bf16.msra.mxu1 %v4350_v6  ;;  %v215_v3 = vrot.slane %v214_v59, 4  ;;  %v234_v13 = vsel %vm4616_vm2, %v229_v62, %v233_v63  ;;  %v250_v17 = vshrl.u32 %v22_v5, 16  ;;  %v253_v18 = vshll.u32 %v22_v5, 16  ;;  %v116_v43 = vld [vmem:[%s5868_s0 + $0xb0] sm:$0x11]  ;;  %v4313_v50 = vld [vmem:[%s5867_s1 + $0x20] sm:$0xff] }
  0x1c   :  { %992 = vmatpush.bf16.msra.mxu2 %v4358_v9  ;;  %v242_v6 = vor.u32 %v241_v1, %v238_v0  ;;  %v206_v9 = vsel %vm4616_vm2, %v201_v57, %v205_v58  ;;  %v281_v21 = vshll.u32 %v24_v8, 16  ;;  %v264_v23 = vshrl.u32 %v23_v12, 16  ;;  %v115_v49 = vld [vmem:[%s5868_s0 + $0x98] sm:$0x11] }
  0x1d   :  { %1036 = vmatpush.bf16.msra.mxu3 %v4366_v10  ;;  %v4315_v10 = vld [vmem:[%s5867_s1 + $0x30] sm:$0xff]  ;;  %v220_v19 = vsel %vm4616_vm2, %v215_v3, %v219_v4  ;;  %v267_v24 = vshll.u32 %v23_v12, 16  ;;  %v602_v25 = vunpack.c.l.b16 %v206_v9  ;;  %v607_v28 = vunpack.c.h.b16 %v234_v13  ;;  %v117_v54 = vld [vmem:[%s5868_s0 + $0xb8] sm:$0x11] }
  0x1e   :  { %905 = vmatpush.bf16.msra.mxu0 %v4341_v26  ;;  %v243_v14 = vrot.slane %v242_v6, 4  ;;  %v606_v26 = vunpack.c.l.b16 %v234_v13  ;;  %v604_v32 = vunpack.c.l.b16 %v220_v19  ;;  %v255_v35 = vrot.slane %v253_v18, 5  ;;  %v4312_v12 = vld [vmem:[%s5867_s1 + $0x18] sm:$0xff] }
  0x1f   :  { %949 = vmatpush.bf16.msra.mxu1 %v4349_v27  ;;  %v603_v27 = vunpack.c.h.b16 %v206_v9  ;;  %v266_v44 = vrot.slane %v264_v23, 4  ;;  %v269_v45 = vrot.slane %v267_v24, 5  ;;  %v295_v48 = vshll.u32 %v25_v29, 16 }
  0x20   :  { %993 = vmatpush.bf16.msra.mxu2 %v4357_v33  ;;  %v248_v22 = vsel %vm4616_vm2, %v243_v14, %v247_v7  ;;  %v605_v33 = vunpack.c.h.b16 %v220_v19  ;;  %v287_v60 = vshll.u32 %v116_v43, 16  ;;  %v273_v0 = vshll.u32 %v115_v49, 16  ;;  %v26_v7 = vld [vmem:[%s5868_s0 + $0xc0] sm:$0xff] }
  0x21   :  { %1037 = vmatpush.bf16.msra.mxu3 %v4365_v34  ;;  %906 = vmatmul.bf16.vlgmr.msra.gmra.mxu0 %v650_v40  ;;  %v252_v34 = vrot.slane %v250_v17, 4  ;;  %v608_v38 = vunpack.c.l.b16 %v248_v22  ;;  %v609_v39 = vunpack.c.h.b16 %v248_v22  ;;  %v114_v40 = vld [vmem:[%s5868_s0 + $0x90] sm:$0x11]  ;;  %v655_v57 = vpack.c.b16 %v607_v28, %v603_v27  ;;  %v4320_v17 = vld [vmem:[%s5867_s1 + $0x58] sm:$0xff] }
  0x22   :  { %950 = vmatmul.bf16.vlgmr.msra.gmra.mxu1 %v651_v46  ;;  %1406 = vmatpush.bf16.msrb.mxu0 %v4316_v55  ;;  %v292_v46 = vshrl.u32 %v25_v29, 16  ;;  %v259_v53 = vshll.u32 %v114_v40, 16  ;;  %v270_v63 = vor.u32 %v269_v45, %v266_v44  ;;  %v289_v6 = vrot.slane %v287_v60, 5  ;;  %v120_v44 = vld [vmem:[%s5868_s0 + $0x110] sm:$0x11] }
  0x23   :  { %994 = vmatmul.bf16.vlgmr.msra.gmra.mxu2 %v652_v51  ;;  %1450 = vmatpush.bf16.msrb.mxu1 %v4324_v56  ;;  %v4321_v51 = vld [vmem:[%s5867_s1 + $0x60] sm:$0xff]  ;;  %v297_v56 = vrot.slane %v295_v48, 5  ;;  %v256_v58 = vor.u32 %v255_v35, %v252_v34  ;;  %v657_v62 = vpack.c.b16 %v609_v39, %v605_v33  ;;  %v275_v9 = vrot.slane %v273_v0, 5 }
  0x24   :  { %1494 = vmatpush.bf16.msrb.mxu2 %v4332_v41  ;;  %1038 = vmatmul.bf16.vlgmr.msra.gmra.mxu3 %v653_v52  ;;  %v280_v41 = vrot.slane %v278_v20, 4  ;;  %v654_v52 = vpack.c.b16 %v606_v26, %v602_v25  ;;  %v294_v55 = vrot.slane %v292_v46, 4  ;;  %v261_v4 = vrot.slane %v259_v53, 5  ;;  %v29_v20 = vld [vmem:[%s5868_s0 + $0x108] sm:$0xff]  ;;  %v30_v0 = vld [vmem:[%s5868_s0 + $0x120] sm:$0xff] }
  0x25   :  { %1538 = vmatpush.bf16.msrb.mxu3 %v4340_v42  ;;  %v283_v42 = vrot.slane %v281_v21, 5  ;;  %v257_v3 = vrot.slane %v256_v58, 4  ;;  %v271_v8 = vrot.slane %v270_v63, 4  ;;  %v306_v18 = vshrl.u32 %v26_v7, 16 }
  0x26   :  { %1407 = vmatpush.bf16.msrb.mxu0 %v4315_v10  ;;  %v298_v1 = vor.u32 %v297_v56, %v294_v55  ;;  %v4328_v10 = vld [vmem:[%s5867_s1 + $0x98] sm:$0xff]  ;;  %v309_v19 = vshll.u32 %v26_v7, 16  ;;  %v348_v29 = vshrl.u32 %v29_v20, 16  ;;  %v362_v7 = vshrl.u32 %v30_v0, 16 }
  0x27   :  { %1451 = vmatpush.bf16.msrb.mxu1 %v4323_v11  ;;  %v284_v59 = vor.u32 %v283_v42, %v280_v41  ;;  %v4336_v11 = vld [vmem:[%s5867_s1 + $0xd8] sm:$0xff]  ;;  %v262_v21 = vsel %vm4616_vm2, %v257_v3, %v261_v4  ;;  %v276_v23 = vsel %vm4616_vm2, %v271_v8, %v275_v9  ;;  %v308_v33 = vrot.slane %v306_v18, 4  ;;  %v118_v41 = vld [vmem:[%s5868_s0 + $0xd0] sm:$0x11]  ;;  %v32_v3 = vld [vmem:[%s5868_s0 + $0x140] sm:$0xff] }
  0x28   :  { %1495 = vmatpush.bf16.msrb.mxu2 %v4331_v61  ;;  %v656_v61 = vpack.c.b16 %v608_v38, %v604_v32  ;;  %v299_v13 = vrot.slane %v298_v1, 4  ;;  %v611_v32 = vunpack.c.h.b16 %v262_v21  ;;  %v311_v34 = vrot.slane %v309_v19, 5  ;;  %v31_v4 = vld [vmem:[%s5868_s0 + $0x128] sm:$0xff]  ;;  %v4327_v9 = vld [vmem:[%s5867_s1 + $0x90] sm:$0xff] }
  0x29   :  { %1539 = vmatpush.bf16.msrb.mxu3 %v4339_v2  ;;  %v301_v2 = vshll.u32 %v117_v54, 16  ;;  %v285_v5 = vrot.slane %v284_v59, 4  ;;  %v613_v38 = vunpack.c.h.b16 %v276_v23  ;;  %v350_v48 = vrot.slane %v348_v29, 4  ;;  %v33_v19 = vld [vmem:[%s5868_s0 + $0x148] sm:$0xff] }
  0x2a   :  { %1408 = vmatpush.bf16.msrb.mxu0 %v4314_v30  ;;  %v351_v30 = vshll.u32 %v29_v20, 16  ;;  %v312_v54 = vor.u32 %v311_v34, %v308_v33  ;;  %v315_v55 = vshll.u32 %v118_v41, 16  ;;  %v343_v59 = vshll.u32 %v120_v44, 16 }
  0x2b   :  { %1452 = vmatpush.bf16.msrb.mxu1 %v4322_v31  ;;  %v303_v14 = vrot.slane %v301_v2, 5  ;;  %v290_v22 = vsel %vm4616_vm2, %v285_v5, %v289_v6  ;;  %v610_v31 = vunpack.c.l.b16 %v262_v21  ;;  %v365_v8 = vshll.u32 %v30_v0, 16 }
  0x2c   :  { %1496 = vmatpush.bf16.msrb.mxu2 %v4330_v15  ;;  %v28_v15 = vld [vmem:[%s5868_s0 + $0x100] sm:$0xff]  ;;  %v614_v35 = vunpack.c.l.b16 %v290_v22  ;;  %v353_v49 = vrot.slane %v351_v30, 5  ;;  %v313_v1 = vrot.slane %v312_v54, 4  ;;  %v317_v2 = vrot.slane %v315_v55, 5  ;;  %v122_v30 = vld [vmem:[%s5868_s0 + $0x130] sm:$0x11] }
  0x2d   :  { %1540 = vmatpush.bf16.msrb.mxu3 %v4338_v16  ;;  %v27_v16 = vld [vmem:[%s5868_s0 + $0xc8] sm:$0xff]  ;;  %v334_v24 = vshrl.u32 %v28_v15, 16  ;;  %v337_v25 = vshll.u32 %v28_v15, 16  ;;  %v304_v27 = vsel %vm4616_vm2, %v299_v13, %v303_v14  ;;  %v345_v6 = vrot.slane %v343_v59, 5  ;;  %v4311_v15 = vld [vmem:[%s5867_s1 + $0x10] sm:$0xff] }
  0x2e   :  { %1409 = vmatpush.bf16.msrb.mxu0 %v4313_v50  ;;  %v320_v26 = vshrl.u32 %v27_v16, 16  ;;  %v323_v28 = vshll.u32 %v27_v16, 16  ;;  %v616_v39 = vunpack.c.l.b16 %v304_v27  ;;  %v617_v40 = vunpack.c.h.b16 %v304_v27  ;;  %v119_v50 = vld [vmem:[%s5868_s0 + $0xd8] sm:$0x11]  ;;  %v4319_v16 = vld [vmem:[%s5867_s1 + $0x50] sm:$0xff] }
  0x2f   :  { %1453 = vmatpush.bf16.msrb.mxu1 %v4321_v51  ;;  %v336_v42 = vrot.slane %v334_v24, 4  ;;  %v339_v43 = vrot.slane %v337_v25, 5  ;;  %v121_v51 = vld [vmem:[%s5868_s0 + $0x118] sm:$0x11]  ;;  %v393_v18 = vshll.u32 %v32_v3, 16  ;;  %v376_v20 = vshrl.u32 %v31_v4, 16 }
  0x30   :  { %1497 = vmatpush.bf16.msrb.mxu2 %v4329_v36  ;;  %v615_v36 = vunpack.c.h.b16 %v290_v22  ;;  %v322_v45 = vrot.slane %v320_v26, 4  ;;  %v325_v46 = vrot.slane %v323_v28, 5  ;;  %v357_v63 = vshll.u32 %v121_v51, 16 }
  0x31   :  { %1541 = vmatpush.bf16.msrb.mxu3 %v4337_v37  ;;  %911 = vmatmul.bf16.gmra.mxu0 %v654_v52  ;;  %v612_v37 = vunpack.c.l.b16 %v276_v23  ;;  %v658_v52 = vpack.c.b16 %v614_v35, %v610_v31  ;;  %v340_v58 = vor.u32 %v339_v43, %v336_v42  ;;  %v379_v21 = vshll.u32 %v31_v4, 16  ;;  %v36_v4 = vld [vmem:[%s5868_s0 + $0x180] sm:$0xff] }
  0x32   :  { %955 = vmatmul.bf16.gmra.mxu1 %v655_v57  ;;  %1410 = vmatpush.bf16.msrb.mxu0 %v4312_v12  ;;  %v659_v53 = vpack.c.b16 %v615_v36, %v611_v32  ;;  %v661_v57 = vpack.c.b16 %v617_v40, %v613_v38  ;;  %v326_v60 = vor.u32 %v325_v46, %v322_v45  ;;  %v359_v14 = vrot.slane %v357_v63, 5  ;;  %v123_v40 = vld [vmem:[%s5868_s0 + $0x138] sm:$0x11] }
  0x33   :  { %999 = vmatmul.bf16.gmra.mxu2 %v656_v61  ;;  %1454 = vmatpush.bf16.msrb.mxu1 %v4320_v17  ;;  %v660_v56 = vpack.c.b16 %v616_v39, %v612_v37  ;;  %v329_v61 = vshll.u32 %v119_v50, 16  ;;  %v341_v5 = vrot.slane %v340_v58, 4  ;;  %v390_v17 = vshrl.u32 %v32_v3, 16  ;;  %v124_v39 = vld [vmem:[%s5868_s0 + $0x150] sm:$0x11]  ;;  %v34_v3 = vld [vmem:[%s5868_s0 + $0x160] sm:$0xff] }
  0x34   :  { %1043 = vmatmul.bf16.gmra.mxu3 %v657_v62  ;;  %1498 = vmatpush.bf16.msrb.mxu2 %v4328_v10  ;;  %v354_v62 = vor.u32 %v353_v49, %v350_v48  ;;  %v4335_v10 = vld [vmem:[%s5867_s1 + $0xd0] sm:$0xff]  ;;  %v318_v22 = vsel %vm4616_vm2, %v313_v1, %v317_v2  ;;  %v364_v24 = vrot.slane %v362_v7, 4  ;;  %v367_v25 = vrot.slane %v365_v8, 5  ;;  %v4334_v7 = vld [vmem:[%s5867_s1 + $0xc8] sm:$0xff] }
  0x35   :  { %1542 = vmatpush.bf16.msrb.mxu3 %v4336_v11  ;;  %v327_v11 = vrot.slane %v326_v60, 4  ;;  %v331_v12 = vrot.slane %v329_v61, 5  ;;  %v346_v23 = vsel %vm4616_vm2, %v341_v5, %v345_v6  ;;  %v404_v28 = vshrl.u32 %v33_v19, 16  ;;  %v35_v5 = vld [vmem:[%s5868_s0 + $0x168] sm:$0xff] }
  0x36   :  { %v355_v13 = vrot.slane %v354_v62, 4  ;;  %1411 = vmatpush.bf16.msrb.mxu0 %v4311_v15  ;;  %v407_v29 = vshll.u32 %v33_v19, 16  ;;  %v392_v31 = vrot.slane %v390_v17, 4  ;;  %v395_v32 = vrot.slane %v393_v18, 5  ;;  %v4326_v6 = vld [vmem:[%s5867_s1 + $0x88] sm:$0xff] }
  0x37   :  { %1455 = vmatpush.bf16.msrb.mxu1 %v4319_v16  ;;  %v332_v26 = vsel %vm4616_vm2, %v327_v11, %v331_v12  ;;  %v378_v33 = vrot.slane %v376_v20, 4  ;;  %v381_v34 = vrot.slane %v379_v21, 5  ;;  %v618_v35 = vunpack.c.l.b16 %v318_v22  ;;  %v4310_v8 = vld [vmem:[%s5867_s1 + $0x8] sm:$0xff] }
  0x38   :  { %1499 = vmatpush.bf16.msrb.mxu2 %v4327_v9  ;;  %v360_v27 = vsel %vm4616_vm2, %v355_v13, %v359_v14  ;;  %v622_v36 = vunpack.c.l.b16 %v346_v23  ;;  %v619_v37 = vunpack.c.h.b16 %v318_v22  ;;  %v623_v38 = vunpack.c.h.b16 %v346_v23  ;;  %v37_v12 = vld [vmem:[%s5868_s0 + $0x188] sm:$0xff] }
  0x39   :  { %1543 = vmatpush.bf16.msrb.mxu3 %v4335_v10  ;;  %v620_v41 = vunpack.c.l.b16 %v332_v26  ;;  %v624_v42 = vunpack.c.l.b16 %v360_v27  ;;  %v621_v43 = vunpack.c.h.b16 %v332_v26  ;;  %v625_v44 = vunpack.c.h.b16 %v360_v27  ;;  %v4318_v13 = vld [vmem:[%s5867_s1 + $0x48] sm:$0xff] }
  0x3a   :  { %v368_v45 = vor.u32 %v367_v25, %v364_v24  ;;  %v371_v46 = vshll.u32 %v122_v30, 16  ;;  %v406_v48 = vrot.slane %v404_v28, 4  ;;  %v409_v49 = vrot.slane %v407_v29, 5  ;;  %1412 = vmatpush.bf16.msrb.mxu0 %v4310_v8  ;;  %v39_v8 = vld [vmem:[%s5868_s0 + $0x1a8] sm:$0xff] }
  0x3b   :  { %v396_v50 = vor.u32 %v395_v32, %v392_v31  ;;  %v399_v51 = vshll.u32 %v124_v39, 16  ;;  %v385_v54 = vshll.u32 %v123_v40, 16  ;;  %v662_v55 = vpack.c.b16 %v622_v36, %v618_v35  ;;  %1456 = vmatpush.bf16.msrb.mxu1 %v4318_v13  ;;  %v126_v31 = vld [vmem:[%s5868_s0 + $0x170] sm:$0x11] }
  0x3c   :  { %v665_v58 = vpack.c.b16 %v625_v44, %v621_v43  ;;  %v369_v59 = vrot.slane %v368_v45, 4  ;;  %v373_v60 = vrot.slane %v371_v46, 5  ;;  %v410_v61 = vor.u32 %v409_v49, %v406_v48  ;;  %1500 = vmatpush.bf16.msrb.mxu2 %v4326_v6  ;;  %v129_v44 = vld [vmem:[%s5868_s0 + $0x198] sm:$0x11]  ;;  %v40_v6 = vld [vmem:[%s5868_s0 + $0x1c0] sm:$0xff] }
  0x3d   :  { %v397_v63 = vrot.slane %v396_v50, 4  ;;  %v401_v0 = vrot.slane %v399_v51, 5  ;;  %v387_v2 = vrot.slane %v385_v54, 5  ;;  %v418_v16 = vshrl.u32 %v34_v3, 16  ;;  %1544 = vmatpush.bf16.msrb.mxu3 %v4334_v7  ;;  %v4317_v7 = vld [vmem:[%s5867_s1 + $0x40] sm:$0xff] }
  0x3e   :  { %v374_v9 = vsel %vm4616_vm2, %v369_v59, %v373_v60  ;;  %v411_v10 = vrot.slane %v410_v61, 4  ;;  %v421_v17 = vshll.u32 %v34_v3, 16  ;;  %v446_v18 = vshrl.u32 %v36_v4, 16  ;;  %v4325_v3 = vld [vmem:[%s5867_s1 + $0x80] sm:$0xff] }
  0x3f   :  { %v402_v14 = vsel %vm4616_vm2, %v397_v63, %v401_v0  ;;  %v449_v19 = vshll.u32 %v36_v4, 16  ;;  %v432_v20 = vshrl.u32 %v35_v5, 16  ;;  %v435_v21 = vshll.u32 %v35_v5, 16  ;;  %v38_v0 = vld [vmem:[%s5868_s0 + $0x1a0] sm:$0xff]  ;;  %1457 = vmatpush.bf16.msrb.mxu1 %v4317_v7 }
  0x40   :  { %v626_v22 = vunpack.c.l.b16 %v374_v9  ;;  %v460_v23 = vshrl.u32 %v37_v12, 16  ;;  %v463_v24 = vshll.u32 %v37_v12, 16  ;;  %v630_v25 = vunpack.c.l.b16 %v402_v14  ;;  %v4333_v4 = vld [vmem:[%s5867_s1 + $0xc0] sm:$0xff]  ;;  %1501 = vmatpush.bf16.msrb.mxu2 %v4325_v3 }
  0x41   :  { %916 = vmatmul.bf16.gmra.mxu0 %v658_v52  ;;  %v125_v52 = vld [vmem:[%s5868_s0 + $0x158] sm:$0x11]  ;;  %v627_v26 = vunpack.c.h.b16 %v374_v9  ;;  %v631_v27 = vunpack.c.h.b16 %v402_v14  ;;  %v420_v32 = vrot.slane %v418_v16, 4  ;;  %v448_v35 = vrot.slane %v446_v18, 4  ;;  %v4309_v5 = vld [vmem:[%s5867_s1] sm:$0xff]  ;;  %v41_v9 = vld [vmem:[%s5868_s0 + $0x1c8] sm:$0xff]  ;;  %1545 = vmatpush.bf16.msrb.mxu3 %v4333_v4 }
  0x42   :  { %960 = vmatmul.bf16.gmra.mxu1 %v659_v53  ;;  %v382_v53 = vor.u32 %v381_v34, %v378_v33  ;;  %v413_v62 = vshll.u32 %v125_v52, 16  ;;  %v423_v33 = vrot.slane %v421_v17, 5  ;;  %v128_v34 = vld [vmem:[%s5868_s0 + $0x190] sm:$0x11]  ;;  %v451_v36 = vrot.slane %v449_v19, 5  ;;  %1413 = vmatpush.bf16.msrb.mxu0 %v4309_v5 }
  0x43   :  { %1004 = vmatmul.bf16.gmra.mxu2 %v660_v56  ;;  %v663_v56 = vpack.c.b16 %v623_v38, %v619_v37  ;;  %v434_v37 = vrot.slane %v432_v20, 4  ;;  %v437_v38 = vrot.slane %v435_v21, 5  ;;  %v465_v43 = vrot.slane %v463_v24, 5 }
  0x44   :  { %1048 = vmatmul.bf16.gmra.mxu3 %v661_v57  ;;  %v664_v57 = vpack.c.b16 %v624_v42, %v620_v41  ;;  %v383_v1 = vrot.slane %v382_v53, 4  ;;  %v415_v11 = vrot.slane %v413_v62, 5  ;;  %v127_v41 = vld [vmem:[%s5868_s0 + $0x178] sm:$0x11]  ;;  %v462_v42 = vrot.slane %v460_v23, 4 }
  0x45   :  { %v666_v45 = vpack.c.b16 %v630_v25, %v626_v22  ;;  %v667_v46 = vpack.c.b16 %v631_v27, %v627_v26  ;;  %v427_v48 = vshll.u32 %v126_v31, 16  ;;  %v455_v49 = vshll.u32 %v128_v34, 16  ;;  %v132_v31 = vld [vmem:[%s5868_s0 + $0x1d0] sm:$0x11] }
  0x46   :  { %v388_v15 = vsel %vm4616_vm2, %v383_v1, %v387_v2  ;;  %v416_v28 = vsel %vm4616_vm2, %v411_v10, %v415_v11  ;;  %v424_v50 = vor.u32 %v423_v33, %v420_v32  ;;  %v452_v51 = vor.u32 %v451_v36, %v448_v35 }
  0x47   :  { %v628_v29 = vunpack.c.l.b16 %v388_v15  ;;  %v629_v30 = vunpack.c.h.b16 %v388_v15  ;;  %v632_v39 = vunpack.c.l.b16 %v416_v28  ;;  %v633_v40 = vunpack.c.h.b16 %v416_v28 }
  0x48   :  { %v438_v52 = vor.u32 %v437_v38, %v434_v37  ;;  %v441_v53 = vshll.u32 %v127_v41, 16  ;;  %v457_v59 = vrot.slane %v455_v49, 5  ;;  %v425_v60 = vrot.slane %v424_v50, 4  ;;  %v133_v41 = vld [vmem:[%s5868_s0 + $0x1d8] sm:$0x11] }
  0x49   :  { %v668_v54 = vpack.c.b16 %v632_v39, %v628_v29  ;;  %v453_v61 = vrot.slane %v452_v51, 4  ;;  %v474_v13 = vshrl.u32 %v38_v0, 16  ;;  %v477_v15 = vshll.u32 %v38_v0, 16 }
  0x4a   :  { %v439_v62 = vrot.slane %v438_v52, 4  ;;  %v443_v63 = vrot.slane %v441_v53, 5  ;;  %v502_v16 = vshrl.u32 %v40_v6, 16  ;;  %v505_v17 = vshll.u32 %v40_v6, 16 }
  0x4b   :  { %v458_v11 = vsel %vm4616_vm2, %v453_v61, %v457_v59  ;;  %v488_v18 = vshrl.u32 %v39_v8, 16  ;;  %v491_v19 = vshll.u32 %v39_v8, 16  ;;  %v516_v20 = vshrl.u32 %v41_v9, 16  ;;  %v4424_v59 = vld [vmem:[%s5867_s1 + $0x2b8] sm:$0xff] }
  0x4c   :  { %v444_v12 = vsel %vm4616_vm2, %v439_v62, %v443_v63  ;;  %v519_v21 = vshll.u32 %v41_v9, 16  ;;  %v638_v23 = vunpack.c.l.b16 %v458_v11  ;;  %v639_v25 = vunpack.c.h.b16 %v458_v11  ;;  %v4408_v61 = vld [vmem:[%s5867_s1 + $0x238] sm:$0xff]  ;;  %2096 = vmatpush.bf16.msra.mxu2 %v4424_v59 }
  0x4d   :  { %v636_v26 = vunpack.c.l.b16 %v444_v12  ;;  %v637_v28 = vunpack.c.h.b16 %v444_v12  ;;  %v476_v32 = vrot.slane %v474_v13, 4  ;;  %v479_v33 = vrot.slane %v477_v15, 5  ;;  %2008 = vmatpush.bf16.msra.mxu0 %v4408_v61 }
  0x4e   :  { %v504_v34 = vrot.slane %v502_v16, 4  ;;  %v507_v35 = vrot.slane %v505_v17, 5  ;;  %v490_v36 = vrot.slane %v488_v18, 4  ;;  %v493_v37 = vrot.slane %v491_v19, 5  ;;  %v4423_v19 = vld [vmem:[%s5867_s1 + $0x2b0] sm:$0xff] }
  0x4f   :  { %v518_v38 = vrot.slane %v516_v20, 4  ;;  %v521_v39 = vrot.slane %v519_v21, 5  ;;  %v480_v49 = vor.u32 %v479_v33, %v476_v32  ;;  %v4431_v20 = vld [vmem:[%s5867_s1 + $0x2f0] sm:$0xff] }
  0x50   :  { %v508_v50 = vor.u32 %v507_v35, %v504_v34  ;;  %v494_v51 = vor.u32 %v493_v37, %v490_v36  ;;  %v4407_v21 = vld [vmem:[%s5867_s1 + $0x230] sm:$0xff]  ;;  %2097 = vmatpush.bf16.msra.mxu2 %v4423_v19  ;;  %v4422_v35 = vld [vmem:[%s5867_s1 + $0x2a8] sm:$0xff] }
  0x51   :  { %921 = vmatmul.bf16.gmra.mxu0 %v662_v55  ;;  %v669_v55 = vpack.c.b16 %v633_v40, %v629_v30  ;;  %v130_v30 = vld [vmem:[%s5868_s0 + $0x1b0] sm:$0x11]  ;;  %v131_v40 = vld [vmem:[%s5868_s0 + $0x1b8] sm:$0x11]  ;;  %v522_v53 = vor.u32 %v521_v39, %v518_v38  ;;  %v4430_v36 = vld [vmem:[%s5867_s1 + $0x2e8] sm:$0xff] }
  0x52   :  { %965 = vmatmul.bf16.gmra.mxu1 %v663_v56  ;;  %v466_v56 = vor.u32 %v465_v43, %v462_v42  ;;  %v497_v52 = vshll.u32 %v131_v40, 16  ;;  %v495_v62 = vrot.slane %v494_v51, 4  ;;  %2009 = vmatpush.bf16.msra.mxu0 %v4407_v21  ;;  %v4406_v37 = vld [vmem:[%s5867_s1 + $0x228] sm:$0xff]  ;;  %v4421_v39 = vld [vmem:[%s5867_s1 + $0x2a0] sm:$0xff] }
  0x53   :  { %1009 = vmatmul.bf16.gmra.mxu2 %v664_v57  ;;  %v469_v57 = vshll.u32 %v129_v44, 16  ;;  %v483_v44 = vshll.u32 %v130_v30, 16  ;;  %v523_v0 = vrot.slane %v522_v53, 4  ;;  %v3473_v30 = vld [vmem:[%s5868_s0 + $0x28] sm:$0xf0] }
  0x54   :  { %1053 = vmatmul.bf16.gmra.mxu3 %v665_v58  ;;  %v429_v58 = vrot.slane %v427_v48, 5  ;;  %v467_v1 = vrot.slane %v466_v56, 4  ;;  %v481_v56 = vrot.slane %v480_v49, 4  ;;  %v499_v63 = vrot.slane %v497_v52, 5  ;;  %v4414_v38 = vld [vmem:[%s5867_s1 + $0x268] sm:$0xff]  ;;  %2098 = vmatpush.bf16.msra.mxu2 %v4422_v35 }
  0x55   :  { %v471_v2 = vrot.slane %v469_v57, 5  ;;  %v509_v57 = vrot.slane %v508_v50, 4  ;;  %v3479_v40 = vld [vmem:[%s5868_s0 + $0x40] sm:$0xf] }
  0x56   :  { %v430_v10 = vsel %vm4616_vm2, %v425_v60, %v429_v58  ;;  %v4432_v60 = vld [vmem:[%s5867_s1 + $0x2f8] sm:$0xff]  ;;  %v500_v5 = vsel %vm4616_vm2, %v495_v62, %v499_v63  ;;  %2010 = vmatpush.bf16.msra.mxu0 %v4406_v37  ;;  %v3511_v35 = vld [vmem:[%s5868_s0 + $0xc0] sm:$0xf]  ;;  %v4411_v37 = vld [vmem:[%s5867_s1 + $0x250] sm:$0xff] }
  0x57   :  { %v472_v14 = vsel %vm4616_vm2, %v467_v1, %v471_v2  ;;  %v634_v22 = vunpack.c.l.b16 %v430_v10  ;;  %v635_v24 = vunpack.c.h.b16 %v430_v10  ;;  %v4416_v2 = vld [vmem:[%s5867_s1 + $0x278] sm:$0xff]  ;;  %2140 = vmatpush.bf16.msra.mxu3 %v4432_v60  ;;  %v644_v11 = vunpack.c.l.b16 %v500_v5 }
  0x58   :  { %v640_v27 = vunpack.c.l.b16 %v472_v14  ;;  %v641_v29 = vunpack.c.h.b16 %v472_v14  ;;  %2052 = vmatpush.bf16.msra.mxu1 %v4416_v2  ;;  %v645_v13 = vunpack.c.h.b16 %v500_v5  ;;  %2099 = vmatpush.bf16.msra.mxu2 %v4421_v39  ;;  %v4420_v2 = vld [vmem:[%s5867_s1 + $0x298] sm:$0xff]  ;;  %v4291_v5 = vld [vmem:[%s5868_s0 + $0x9c] sm:$0xf0]  ;;  %v3513_v39 = vld [vmem:[%s5868_s0 + $0x100] sm:$0xf0] }
  0x59   :  { %v670_v42 = vpack.c.b16 %v638_v23, %v634_v22  ;;  %v671_v43 = vpack.c.b16 %v639_v25, %v635_v24  ;;  %v4415_v22 = vld [vmem:[%s5867_s1 + $0x270] sm:$0xff]  ;;  %v3463_v23 = vld [vmem:[%s5868_s0] sm:$0xf]  ;;  %v4281_v25 = vld [vmem:[%s5868_s0 + $0x4] sm:$0xf] }
  0x5a   :  { %v673_v48 = vpack.c.b16 %v641_v29, %v637_v28  ;;  %v4283_v24 = vld [vmem:[%s5868_s0 + $0x1c] sm:$0xf0]  ;;  %v4284_v28 = vld [vmem:[%s5868_s0 + $0x24] sm:$0xf0]  ;;  %v4282_v29 = vld [vmem:[%s5868_s0 + $0xc] sm:$0xf] }
  0x5b   :  { %2141 = vmatpush.bf16.msra.mxu3 %v4431_v20  ;;  %v3476_v34 = vor.u32 %v4282_v29, %v3473_v30 }
  0x5c   :  { %2053 = vmatpush.bf16.msra.mxu1 %v4415_v22  ;;  %2100 = vmatpush.bf16.msra.mxu2 %v4420_v2  ;;  %v4402_v2 = vld [vmem:[%s5867_s1 + $0x208] sm:$0xff] }
  0x5f   :  { %2142 = vmatpush.bf16.msra.mxu3 %v4430_v36  ;;  %v4295_v36 = vld [vmem:[%s5868_s0 + $0xfc] sm:$0xf0] }
  0x60   :  { %2054 = vmatpush.bf16.msra.mxu1 %v4414_v38  ;;  %v4293_v38 = vld [vmem:[%s5868_s0 + $0xc4] sm:$0xf] }
  0x61   :  { %926 = vmatmul.bf16.gmra.mxu0 %v666_v45  ;;  %v511_v45 = vshll.u32 %v132_v31, 16  ;;  %v3464_v31 = vor.u32 %v4283_v24, %v3463_v23  ;;  %v4404_v23 = vld [vmem:[%s5867_s1 + $0x218] sm:$0xff] }
  0x62   :  { %970 = vmatmul.bf16.gmra.mxu1 %v667_v46  ;;  %v672_v46 = vpack.c.b16 %v640_v27, %v636_v26  ;;  %v3465_v26 = vld [vmem:[%s5868_s0 + $0x20] sm:$0xf0]  ;;  %v3471_v27 = vld [vmem:[%s5868_s0 + $0x8] sm:$0xf]  ;;  %v4412_v24 = vld [vmem:[%s5867_s1 + $0x258] sm:$0xff] }
  0x63   :  { %1014 = vmatmul.bf16.gmra.mxu2 %v668_v54  ;;  %v525_v54 = vshll.u32 %v133_v41, 16  ;;  %v513_v58 = vrot.slane %v511_v45, 5  ;;  %v3468_v32 = vor.u32 %v4281_v25, %v3465_v26  ;;  %v3472_v33 = vor.u32 %v4284_v28, %v3471_v27  ;;  %v4287_v41 = vld [vmem:[%s5868_s0 + $0x5c] sm:$0xf0]  ;;  %v4288_v45 = vld [vmem:[%s5868_s0 + $0x64] sm:$0xf0] }
  0x64   :  { %1058 = vmatmul.bf16.gmra.mxu3 %v669_v55  ;;  %v485_v55 = vrot.slane %v483_v44, 5  ;;  %v3487_v44 = vld [vmem:[%s5868_s0 + $0x48] sm:$0xf]  ;;  %v3480_v49 = vor.u32 %v4287_v41, %v3479_v40 }
  0x65   :  { %v527_v1 = vrot.slane %v525_v54, 5  ;;  %v514_v4 = vsel %vm4616_vm2, %v509_v57, %v513_v58  ;;  %v3488_v53 = vor.u32 %v4288_v45, %v3487_v44  ;;  %v4405_v57 = vld [vmem:[%s5867_s1 + $0x220] sm:$0xff]  ;;  %v3519_v40 = vld [vmem:[%s5868_s0 + $0xc8] sm:$0xf] }
  0x66   :  { %v486_v3 = vsel %vm4616_vm2, %v481_v56, %v485_v55  ;;  %v646_v8 = vunpack.c.l.b16 %v514_v4  ;;  %v647_v10 = vunpack.c.h.b16 %v514_v4  ;;  %v4429_v56 = vld [vmem:[%s5867_s1 + $0x2e0] sm:$0xff]  ;;  %2011 = vmatpush.bf16.msra.mxu0 %v4405_v57  ;;  %v4296_v41 = vld [vmem:[%s5868_s0 + $0x104] sm:$0xf0] }
  0x67   :  { %v528_v6 = vsel %vm4616_vm2, %v523_v0, %v527_v1  ;;  %v642_v7 = vunpack.c.l.b16 %v486_v3  ;;  %v643_v9 = vunpack.c.h.b16 %v486_v3  ;;  %v4413_v58 = vld [vmem:[%s5867_s1 + $0x260] sm:$0xff]  ;;  %2143 = vmatpush.bf16.msra.mxu3 %v4429_v56  ;;  %v4428_v3 = vld [vmem:[%s5867_s1 + $0x2d8] sm:$0xff] }
  0x68   :  { %v648_v12 = vunpack.c.l.b16 %v528_v6  ;;  %v649_v14 = vunpack.c.h.b16 %v528_v6  ;;  %2055 = vmatpush.bf16.msra.mxu1 %v4413_v58  ;;  %v3495_v4 = vld [vmem:[%s5868_s0 + $0x80] sm:$0xf]  ;;  %v4289_v6 = vld [vmem:[%s5868_s0 + $0x84] sm:$0xf] }
  0x69   :  { %v674_v15 = vpack.c.b16 %v646_v8, %v642_v7  ;;  %v675_v16 = vpack.c.b16 %v647_v10, %v643_v9  ;;  %v3497_v7 = vld [vmem:[%s5868_s0 + $0xa0] sm:$0xf0]  ;;  %v3503_v8 = vld [vmem:[%s5868_s0 + $0x88] sm:$0xf]  ;;  %v4290_v10 = vld [vmem:[%s5868_s0 + $0x8c] sm:$0xf] }
  0x6a   :  { %v676_v17 = vpack.c.b16 %v648_v12, %v644_v11  ;;  %v677_v18 = vpack.c.b16 %v649_v14, %v645_v13  ;;  %v4292_v9 = vld [vmem:[%s5868_s0 + $0xa4] sm:$0xf0]  ;;  %v3505_v11 = vld [vmem:[%s5868_s0 + $0xa8] sm:$0xf0]  ;;  %v3496_v14 = vor.u32 %v4291_v5, %v3495_v4  ;;  %2012 = vmatpush.bf16.msra.mxu0 %v4404_v23  ;;  %v4299_v4 = vld [vmem:[%s5868_s0 + $0x13c] sm:$0xf0] }
  0x6b   :  { %2144 = vmatpush.bf16.msra.mxu3 %v4428_v3  ;;  %v3504_v19 = vor.u32 %v4292_v9, %v3503_v8  ;;  %v3508_v20 = vor.u32 %v4290_v10, %v3505_v11  ;;  %v3527_v3 = vld [vmem:[%s5868_s0 + $0x120] sm:$0xf]  ;;  %v4410_v5 = vld [vmem:[%s5867_s1 + $0x248] sm:$0xff] }
  0x6c   :  { %2056 = vmatpush.bf16.msra.mxu1 %v4412_v24  ;;  %v3535_v8 = vld [vmem:[%s5868_s0 + $0x128] sm:$0xf]  ;;  %v4298_v10 = vld [vmem:[%s5868_s0 + $0x12c] sm:$0xf]  ;;  %v4417_v24 = vld [vmem:[%s5867_s1 + $0x280] sm:$0xff] }
  0x6d   :  { %v4300_v9 = vld [vmem:[%s5868_s0 + $0x144] sm:$0xf0]  ;;  %v3537_v11 = vld [vmem:[%s5868_s0 + $0x148] sm:$0xf0] }
  0x70   :  { %2057 = vmatpush.bf16.msra.mxu1 %v4411_v37  ;;  %v4303_v37 = vld [vmem:[%s5868_s0 + $0x17c] sm:$0xf0] }
  0x71   :  { %931 = vmatmul.bf16.gmra.mxu0 %v670_v42  ;;  %v4285_v42 = vld [vmem:[%s5868_s0 + $0x44] sm:$0xf] }
  0x72   :  { %975 = vmatmul.bf16.gmra.mxu1 %v671_v43  ;;  %v3481_v43 = vld [vmem:[%s5868_s0 + $0x60] sm:$0xf0] }
  0x73   :  { %1019 = vmatmul.bf16.gmra.mxu2 %v672_v46  ;;  %v4286_v46 = vld [vmem:[%s5868_s0 + $0x4c] sm:$0xf]  ;;  %v3484_v50 = vor.u32 %v4285_v42, %v3481_v43 }
  0x74   :  { %1063 = vmatmul.bf16.gmra.mxu3 %v673_v48  ;;  %v3489_v48 = vld [vmem:[%s5868_s0 + $0x68] sm:$0xf0]  ;;  %2058 = vmatpush.bf16.msra.mxu1 %v4410_v5  ;;  %v4448_v5 = vld [vmem:[%s5867_s1 + $0x378] sm:$0xff] }
  0x75   :  { %v3492_v54 = vor.u32 %v4286_v46, %v3489_v48  ;;  %v4294_v42 = vld [vmem:[%s5868_s0 + $0xcc] sm:$0xf]  ;;  %v3512_v46 = vor.u32 %v4295_v36, %v3511_v35  ;;  %v3516_v48 = vor.u32 %v4293_v38, %v3513_v39  ;;  %v4409_v35 = vld [vmem:[%s5867_s1 + $0x240] sm:$0xff] }
  0x76   :  { %v3521_v43 = vld [vmem:[%s5868_s0 + $0x108] sm:$0xf0]  ;;  %v3543_v36 = vld [vmem:[%s5868_s0 + $0x160] sm:$0xf]  ;;  %v4301_v38 = vld [vmem:[%s5868_s0 + $0x164] sm:$0xf] }
  0x77   :  { %v3545_v39 = vld [vmem:[%s5868_s0 + $0x180] sm:$0xf0] }
  0x78   :  { %2059 = vmatpush.bf16.msra.mxu1 %v4409_v35 }
  0x81   :  { %936 = vmatmul.bf16.gmra.mxu0 %v674_v15  ;;  %v3500_v15 = vor.u32 %v4289_v6, %v3497_v7  ;;  %v4297_v6 = vld [vmem:[%s5868_s0 + $0x124] sm:$0xf] }
  0x82   :  { %980 = vmatmul.bf16.gmra.mxu1 %v675_v16  ;;  %v3529_v7 = vld [vmem:[%s5868_s0 + $0x140] sm:$0xf0] }
  0x83   :  { %1024 = vmatmul.bf16.gmra.mxu2 %v676_v17 }
  0x84   :  { %1068 = vmatmul.bf16.gmra.mxu3 %v677_v18 }
  0x91   :  { %1414 = vmatmul.bf16.vlgmr.msrb.gmra.mxu0 %v3464_v31 }
  0x92   :  { %1458 = vmatmul.bf16.vlgmr.msrb.gmra.mxu1 %v3468_v32  ;;  %v4419_v32 = vld [vmem:[%s5867_s1 + $0x290] sm:$0xff] }
  0x93   :  { %1502 = vmatmul.bf16.vlgmr.msrb.gmra.mxu2 %v3472_v33  ;;  %v4427_v33 = vld [vmem:[%s5867_s1 + $0x2d0] sm:$0xff]  ;;  %3059 = vmatpush.bf16.msrb.mxu1 %v4448_v5 }
  0x94   :  { %1546 = vmatmul.bf16.vlgmr.msrb.gmra.mxu3 %v3476_v34  ;;  %v4403_v34 = vld [vmem:[%s5867_s1 + $0x210] sm:$0xff]  ;;  %2101 = vmatpush.bf16.msra.mxu2 %v4419_v32 }
  0x95   :  { %2145 = vmatpush.bf16.msra.mxu3 %v4427_v33  ;;  %2013 = vmatpush.bf16.msra.mxu0 %v4403_v34  ;;  %v4425_v33 = vld [vmem:[%s5867_s1 + $0x2c0] sm:$0xff] }
  0x96   :  { %v4401_v34 = vld [vmem:[%s5867_s1 + $0x200] sm:$0xff] }
  0x99   :  { %2014 = vmatpush.bf16.msra.mxu0 %v4402_v2 }
  0x9d   :  { %2015 = vmatpush.bf16.msra.mxu0 %v4401_v34 }
  0x9e   :  { %v907_v51 = vpop.f32.mrf.mxu0 }
  0x9f   :  { %v951_v52 = vpop.f32.mrf.mxu1 }
  0xa0   :  { %v952_v55 = vadd.f32 %v951_v52, %v907_v51  ;;  %v3520_v52 = vor.u32 %v4296_v41, %v3519_v40  ;;  %v3551_v40 = vld [vmem:[%s5868_s0 + $0x168] sm:$0xf] }
  0xa1   :  { %1419 = vmatmul.bf16.gmra.mxu0 %v3480_v49  ;;  %v4304_v41 = vld [vmem:[%s5868_s0 + $0x184] sm:$0xf0] }
  0xa2   :  { %1463 = vmatmul.bf16.gmra.mxu1 %v3484_v50 }
  0xa3   :  { %1507 = vmatmul.bf16.gmra.mxu2 %v3488_v53  ;;  %v3524_v53 = vor.u32 %v4294_v42, %v3521_v43  ;;  %v4302_v42 = vld [vmem:[%s5868_s0 + $0x16c] sm:$0xf] }
  0xa4   :  { %1551 = vmatmul.bf16.gmra.mxu3 %v3492_v54  ;;  %v3553_v43 = vld [vmem:[%s5868_s0 + $0x188] sm:$0xf0] }
  0xa6   :  { %v995_v59 = vpop.f32.mrf.mxu2  ;;  %v909_v62 = vpop.f32.mrf.mxu0 }
  0xa7   :  { %v1039_v60 = vpop.f32.mrf.mxu3  ;;  %v996_v61 = vadd.f32 %v995_v59, %v952_v55  ;;  %v953_v63 = vpop.f32.mrf.mxu1 }
  0xa8   :  { %v954_v0 = vadd.f32 %v953_v63, %v909_v62  ;;  %v4418_v63 = vld [vmem:[%s5867_s1 + $0x288] sm:$0xff] }
  0xa9   :  { %v5045_v1 = vadd.f32 %v1039_v60, %v996_v61  ;;  %2102 = vmatpush.bf16.msra.mxu2 %v4418_v63 }
  0xad   :  { %2103 = vmatpush.bf16.msra.mxu2 %v4417_v24 }
  0xae   :  { %v997_v12 = vpop.f32.mrf.mxu2  ;;  %v912_v17 = vpop.f32.mrf.mxu0 }
  0xaf   :  { %v1041_v13 = vpop.f32.mrf.mxu3  ;;  %v998_v16 = vadd.f32 %v997_v12, %v954_v0  ;;  %v956_v18 = vpop.f32.mrf.mxu1  ;;  %v4426_v0 = vld [vmem:[%s5867_s1 + $0x2c8] sm:$0xff] }
  0xb0   :  { %v957_v21 = vadd.f32 %v956_v18, %v912_v17  ;;  %2146 = vmatpush.bf16.msra.mxu3 %v4426_v0 }
  0xb1   :  { %v5077_v22 = vadd.f32 %v1041_v13, %v998_v16  ;;  %1424 = vmatmul.bf16.gmra.mxu0 %v3496_v14  ;;  %v3528_v14 = vor.u32 %v4299_v4, %v3527_v3  ;;  %v4440_v4 = vld [vmem:[%s5867_s1 + $0x338] sm:$0xff] }
  0xb2   :  { %1468 = vmatmul.bf16.gmra.mxu1 %v3500_v15  ;;  %v3532_v15 = vor.u32 %v4297_v6, %v3529_v7  ;;  %v3559_v6 = vld [vmem:[%s5868_s0 + $0x1a0] sm:$0xf]  ;;  %3015 = vmatpush.bf16.msrb.mxu0 %v4440_v4  ;;  %v4446_v4 = vld [vmem:[%s5867_s1 + $0x368] sm:$0xff] }
  0xb3   :  { %1512 = vmatmul.bf16.gmra.mxu2 %v3504_v19  ;;  %v3536_v19 = vor.u32 %v4300_v9, %v3535_v8  ;;  %v4307_v7 = vld [vmem:[%s5868_s0 + $0x1bc] sm:$0xf0]  ;;  %v4305_v8 = vld [vmem:[%s5868_s0 + $0x1a4] sm:$0xf] }
  0xb4   :  { %1556 = vmatmul.bf16.gmra.mxu3 %v3508_v20  ;;  %v3540_v20 = vor.u32 %v4298_v10, %v3537_v11  ;;  %v3561_v9 = vld [vmem:[%s5868_s0 + $0x1c0] sm:$0xf0]  ;;  %v3567_v10 = vld [vmem:[%s5868_s0 + $0x1a8] sm:$0xf] }
  0xb5   :  { %2147 = vmatpush.bf16.msra.mxu3 %v4425_v33  ;;  %v4308_v11 = vld [vmem:[%s5868_s0 + $0x1c4] sm:$0xf0] }
  0xb6   :  { %v1000_v25 = vpop.f32.mrf.mxu2  ;;  %v914_v28 = vpop.f32.mrf.mxu0 }
  0xb7   :  { %v1044_v26 = vpop.f32.mrf.mxu3  ;;  %v1001_v27 = vadd.f32 %v1000_v25, %v957_v21  ;;  %v958_v29 = vpop.f32.mrf.mxu1 }
  0xb8   :  { %v959_v30 = vadd.f32 %v958_v29, %v914_v28 }
  0xb9   :  { %v5085_v31 = vadd.f32 %v1044_v26, %v1001_v27 }
  0xbe   :  { %v1002_v44 = vpop.f32.mrf.mxu2  ;;  %v917_v50 = vpop.f32.mrf.mxu0 }
  0xbf   :  { %v1046_v45 = vpop.f32.mrf.mxu3  ;;  %v1003_v49 = vadd.f32 %v1002_v44, %v959_v30  ;;  %v961_v51 = vpop.f32.mrf.mxu1 }
  0xc0   :  { %v962_v54 = vadd.f32 %v961_v51, %v917_v50 }
  0xc1   :  { %v5123_v55 = vadd.f32 %v1046_v45, %v1003_v49  ;;  %1429 = vmatmul.bf16.gmra.mxu0 %v3512_v46  ;;  %v3544_v46 = vor.u32 %v4303_v37, %v3543_v36 }
  0xc2   :  { %1473 = vmatmul.bf16.gmra.mxu1 %v3516_v48  ;;  %v3548_v48 = vor.u32 %v4301_v38, %v3545_v39 }
  0xc3   :  { %1517 = vmatmul.bf16.gmra.mxu2 %v3520_v52  ;;  %v3552_v52 = vor.u32 %v4304_v41, %v3551_v40  ;;  %v3795_v40 = vld [vmem:[%s5868_s0 + $0x20] sm:$0xf] }
  0xc4   :  { %1561 = vmatmul.bf16.gmra.mxu3 %v3524_v53  ;;  %v3556_v53 = vor.u32 %v4302_v42, %v3553_v43  ;;  %v4375_v41 = vld [vmem:[%s5868_s0 + $0x3c] sm:$0xf0]  ;;  %v4373_v42 = vld [vmem:[%s5868_s0 + $0x24] sm:$0xf] }
  0xc5   :  { %v3797_v43 = vld [vmem:[%s5868_s0 + $0x40] sm:$0xf0] }
  0xc6   :  { %v1005_v56 = vpop.f32.mrf.mxu2  ;;  %v919_v59 = vpop.f32.mrf.mxu0 }
  0xc7   :  { %v1049_v57 = vpop.f32.mrf.mxu3  ;;  %v1006_v58 = vadd.f32 %v1005_v56, %v962_v54  ;;  %v963_v60 = vpop.f32.mrf.mxu1 }
  0xc8   :  { %v964_v61 = vadd.f32 %v963_v60, %v919_v59 }
  0xc9   :  { %v5125_v62 = vadd.f32 %v1049_v57, %v1006_v58  ;;  %v4456_v57 = vld [vmem:[%s5867_s1 + $0x3b8] sm:$0xff] }
  0xca   :  { %v4464_v58 = vld [vmem:[%s5867_s1 + $0x3f8] sm:$0xff]  ;;  %3103 = vmatpush.bf16.msrb.mxu2 %v4456_v57 }
  0xcb   :  { %3147 = vmatpush.bf16.msrb.mxu3 %v4464_v58 }
  0xce   :  { %v1007_v12 = vpop.f32.mrf.mxu2  ;;  %v922_v17 = vpop.f32.mrf.mxu0 }
  0xcf   :  { %v1051_v13 = vpop.f32.mrf.mxu3  ;;  %v1008_v16 = vadd.f32 %v1007_v12, %v964_v61  ;;  %v966_v18 = vpop.f32.mrf.mxu1  ;;  %v4306_v12 = vld [vmem:[%s5868_s0 + $0x1ac] sm:$0xf] }
  0xd0   :  { %v967_v21 = vadd.f32 %v966_v18, %v922_v17  ;;  %v3564_v17 = vor.u32 %v4305_v8, %v3561_v9 }
  0xd1   :  { %v5163_v23 = vadd.f32 %v1051_v13, %v1008_v16  ;;  %1434 = vmatmul.bf16.gmra.mxu0 %v3528_v14  ;;  %v3569_v13 = vld [vmem:[%s5868_s0 + $0x1c8] sm:$0xf0]  ;;  %v3560_v16 = vor.u32 %v4307_v7, %v3559_v6 }
  0xd2   :  { %1478 = vmatmul.bf16.gmra.mxu1 %v3532_v15  ;;  %v3572_v24 = vor.u32 %v4306_v12, %v3569_v13  ;;  %v3811_v12 = vld [vmem:[%s5868_s0 + $0x60] sm:$0xf] }
  0xd3   :  { %1522 = vmatmul.bf16.gmra.mxu2 %v3536_v19  ;;  %v4379_v13 = vld [vmem:[%s5868_s0 + $0x7c] sm:$0xf0] }
  0xd4   :  { %1566 = vmatmul.bf16.gmra.mxu3 %v3540_v20 }
  0xd6   :  { %v1010_v25 = vpop.f32.mrf.mxu2  ;;  %v924_v28 = vpop.f32.mrf.mxu0 }
  0xd7   :  { %v1054_v26 = vpop.f32.mrf.mxu3  ;;  %v1011_v27 = vadd.f32 %v1010_v25, %v967_v21  ;;  %v968_v29 = vpop.f32.mrf.mxu1  ;;  %v3568_v21 = vor.u32 %v4308_v11, %v3567_v10 }
  0xd8   :  { %v969_v30 = vadd.f32 %v968_v29, %v924_v28  ;;  %v4463_v28 = vld [vmem:[%s5867_s1 + $0x3f0] sm:$0xff] }
  0xd9   :  { %v5168_v32 = vadd.f32 %v1054_v26, %v1011_v27  ;;  %v4455_v27 = vld [vmem:[%s5867_s1 + $0x3b0] sm:$0xff]  ;;  %3148 = vmatpush.bf16.msrb.mxu3 %v4463_v28 }
  0xda   :  { %v4439_v29 = vld [vmem:[%s5867_s1 + $0x330] sm:$0xff]  ;;  %3104 = vmatpush.bf16.msrb.mxu2 %v4455_v27 }
  0xdb   :  { %3016 = vmatpush.bf16.msrb.mxu0 %v4439_v29 }
  0xde   :  { %v1012_v44 = vpop.f32.mrf.mxu2  ;;  %v927_v50 = vpop.f32.mrf.mxu0 }
  0xdf   :  { %v1056_v45 = vpop.f32.mrf.mxu3  ;;  %v1013_v49 = vadd.f32 %v1012_v44, %v969_v30  ;;  %v971_v51 = vpop.f32.mrf.mxu1  ;;  %v4447_v30 = vld [vmem:[%s5867_s1 + $0x370] sm:$0xff]  ;;  %v3803_v44 = vld [vmem:[%s5868_s0 + $0x28] sm:$0xf] }
  0xe0   :  { %v972_v54 = vadd.f32 %v971_v51, %v927_v50  ;;  %3060 = vmatpush.bf16.msrb.mxu1 %v4447_v30  ;;  %v3796_v51 = vor.u32 %v4375_v41, %v3795_v40  ;;  %v4437_v40 = vld [vmem:[%s5867_s1 + $0x320] sm:$0xff] }
  0xe1   :  { %v5203_v56 = vadd.f32 %v1056_v45, %v1013_v49  ;;  %1439 = vmatmul.bf16.gmra.mxu0 %v3544_v46  ;;  %v4376_v45 = vld [vmem:[%s5868_s0 + $0x44] sm:$0xf0]  ;;  %v4374_v46 = vld [vmem:[%s5868_s0 + $0x2c] sm:$0xf]  ;;  %v4445_v41 = vld [vmem:[%s5867_s1 + $0x360] sm:$0xff] }
  0xe2   :  { %1483 = vmatmul.bf16.gmra.mxu1 %v3548_v48  ;;  %v3805_v48 = vld [vmem:[%s5868_s0 + $0x48] sm:$0xf0]  ;;  %v3804_v58 = vor.u32 %v4376_v45, %v3803_v44 }
  0xe3   :  { %1527 = vmatmul.bf16.gmra.mxu2 %v3552_v52  ;;  %v3800_v52 = vor.u32 %v4373_v42, %v3797_v43 }
  0xe4   :  { %1571 = vmatmul.bf16.gmra.mxu3 %v3556_v53  ;;  %3061 = vmatpush.bf16.msrb.mxu1 %v4446_v4 }
  0xe6   :  { %v1015_v59 = vpop.f32.mrf.mxu2  ;;  %v929_v63 = vpop.f32.mrf.mxu0 }
  0xe7   :  { %v1059_v60 = vpop.f32.mrf.mxu3  ;;  %v1016_v61 = vadd.f32 %v1015_v59, %v972_v54  ;;  %v973_v0 = vpop.f32.mrf.mxu1  ;;  %v3808_v59 = vor.u32 %v4374_v46, %v3805_v48 }
  0xe8   :  { %v974_v2 = vadd.f32 %v973_v0, %v929_v63  ;;  %v4454_v63 = vld [vmem:[%s5867_s1 + $0x3a8] sm:$0xff]  ;;  %3062 = vmatpush.bf16.msrb.mxu1 %v4445_v41 }
  0xe9   :  { %v5211_v3 = vadd.f32 %v1059_v60, %v1016_v61  ;;  %v4462_v0 = vld [vmem:[%s5867_s1 + $0x3e8] sm:$0xff]  ;;  %3105 = vmatpush.bf16.msrb.mxu2 %v4454_v63 }
  0xea   :  { %3149 = vmatpush.bf16.msrb.mxu3 %v4462_v0 }
  0xee   :  { %v1017_v14 = vpop.f32.mrf.mxu2  ;;  %v932_v19 = vpop.f32.mrf.mxu0 }
  0xef   :  { %v1061_v15 = vpop.f32.mrf.mxu3  ;;  %v1018_v18 = vadd.f32 %v1017_v14, %v974_v2  ;;  %v976_v20 = vpop.f32.mrf.mxu1  ;;  %v4438_v2 = vld [vmem:[%s5867_s1 + $0x328] sm:$0xff]  ;;  %v4453_v14 = vld [vmem:[%s5867_s1 + $0x3a0] sm:$0xff] }
  0xf0   :  { %v977_v25 = vadd.f32 %v976_v20, %v932_v19  ;;  %3017 = vmatpush.bf16.msrb.mxu0 %v4438_v2  ;;  %v4378_v19 = vld [vmem:[%s5868_s0 + $0x6c] sm:$0xf]  ;;  %3106 = vmatpush.bf16.msrb.mxu2 %v4453_v14  ;;  %v4444_v14 = vld [vmem:[%s5867_s1 + $0x358] sm:$0xff] }
  0xf1   :  { %v5243_v26 = vadd.f32 %v1061_v15, %v1018_v18  ;;  %1444 = vmatmul.bf16.gmra.mxu0 %v3560_v16  ;;  %v4377_v15 = vld [vmem:[%s5868_s0 + $0x64] sm:$0xf]  ;;  %v4380_v18 = vld [vmem:[%s5868_s0 + $0x84] sm:$0xf0]  ;;  %v3821_v20 = vld [vmem:[%s5868_s0 + $0x88] sm:$0xf0]  ;;  %3063 = vmatpush.bf16.msrb.mxu1 %v4444_v14 }
  0xf2   :  { %1488 = vmatmul.bf16.gmra.mxu1 %v3564_v17  ;;  %v3813_v16 = vld [vmem:[%s5868_s0 + $0x80] sm:$0xf0]  ;;  %v3819_v17 = vld [vmem:[%s5868_s0 + $0x68] sm:$0xf]  ;;  %v3869_v14 = vld [vmem:[%s5868_s0 + $0x168] sm:$0xf0] }
  0xf3   :  { %1532 = vmatmul.bf16.gmra.mxu2 %v3568_v21  ;;  %v3816_v27 = vor.u32 %v4377_v15, %v3813_v16 }
  0xf4   :  { %1576 = vmatmul.bf16.gmra.mxu3 %v3572_v24  ;;  %3018 = vmatpush.bf16.msrb.mxu0 %v4437_v40  ;;  %v3853_v40 = vld [vmem:[%s5868_s0 + $0x128] sm:$0xf0] }
  0xf6   :  { %v1020_v33 = vpop.f32.mrf.mxu2  ;;  %v934_v36 = vpop.f32.mrf.mxu0 }
  0xf7   :  { %v1064_v34 = vpop.f32.mrf.mxu3  ;;  %v1021_v35 = vadd.f32 %v1020_v33, %v977_v25  ;;  %v978_v37 = vpop.f32.mrf.mxu1  ;;  %v3812_v25 = vor.u32 %v4379_v13, %v3811_v12  ;;  %v3820_v33 = vor.u32 %v4380_v18, %v3819_v17  ;;  %v4436_v13 = vld [vmem:[%s5867_s1 + $0x318] sm:$0xff] }
  0xf8   :  { %v979_v38 = vadd.f32 %v978_v37, %v934_v36  ;;  %v4461_v37 = vld [vmem:[%s5867_s1 + $0x3e0] sm:$0xff]  ;;  %3019 = vmatpush.bf16.msrb.mxu0 %v4436_v13  ;;  %v4390_v13 = vld [vmem:[%s5868_s0 + $0x14c] sm:$0xf] }
  0xf9   :  { %v5257_v39 = vadd.f32 %v1064_v34, %v1021_v35  ;;  %v3824_v34 = vor.u32 %v4378_v19, %v3821_v20  ;;  %3150 = vmatpush.bf16.msrb.mxu3 %v4461_v37  ;;  %v4388_v37 = vld [vmem:[%s5868_s0 + $0x124] sm:$0xf0] }
  0xfe   :  { %v1022_v49 = vpop.f32.mrf.mxu2  ;;  %v937_v54 = vpop.f32.mrf.mxu0 }
  0xff   :  { %v1066_v50 = vpop.f32.mrf.mxu3  ;;  %v1023_v53 = vadd.f32 %v1022_v49, %v979_v38  ;;  %v981_v57 = vpop.f32.mrf.mxu1  ;;  %v3827_v49 = vld [vmem:[%s5868_s0 + $0xa0] sm:$0xf] }
 0x100   :  { %v982_v60 = vadd.f32 %v981_v57, %v937_v54  ;;  %v3829_v54 = vld [vmem:[%s5868_s0 + $0xc0] sm:$0xf0]  ;;  %v3835_v57 = vld [vmem:[%s5868_s0 + $0xa8] sm:$0xf] }
 0x101   :  { %v5283_v61 = vadd.f32 %v1066_v50, %v1023_v53  ;;  %2016 = vmatmul.bf16.vlgmr.msra.gmra.mxu0 %v3796_v51  ;;  %v4383_v51 = vld [vmem:[%s5868_s0 + $0xbc] sm:$0xf0]  ;;  %v4460_v53 = vld [vmem:[%s5867_s1 + $0x3d8] sm:$0xff] }
 0x102   :  { %2060 = vmatmul.bf16.vlgmr.msra.gmra.mxu1 %v3800_v52  ;;  %v4452_v52 = vld [vmem:[%s5867_s1 + $0x398] sm:$0xff]  ;;  %3151 = vmatpush.bf16.msrb.mxu3 %v4460_v53  ;;  %v3828_v2 = vor.u32 %v4383_v51, %v3827_v49 }
 0x103   :  { %2104 = vmatmul.bf16.vlgmr.msra.gmra.mxu2 %v3804_v58  ;;  %v4384_v58 = vld [vmem:[%s5868_s0 + $0xc4] sm:$0xf0] }
 0x104   :  { %2148 = vmatmul.bf16.vlgmr.msra.gmra.mxu3 %v3808_v59  ;;  %v4382_v59 = vld [vmem:[%s5868_s0 + $0xac] sm:$0xf]  ;;  %3107 = vmatpush.bf16.msrb.mxu2 %v4452_v52 }
 0x106   :  { %v1025_v5 = vpop.f32.mrf.mxu2  ;;  %v939_v8 = vpop.f32.mrf.mxu0 }
 0x107   :  { %v1069_v6 = vpop.f32.mrf.mxu3  ;;  %v1026_v7 = vadd.f32 %v1025_v5, %v982_v60  ;;  %v983_v9 = vpop.f32.mrf.mxu1  ;;  %v3837_v60 = vld [vmem:[%s5868_s0 + $0xc8] sm:$0xf0] }
 0x108   :  { %v984_v10 = vadd.f32 %v983_v9, %v939_v8  ;;  %v3836_v8 = vor.u32 %v4384_v58, %v3835_v57  ;;  %v3840_v9 = vor.u32 %v4382_v59, %v3837_v60 }
 0x109   :  { %v5297_v11 = vadd.f32 %v1069_v6, %v1026_v7 }
 0x10e   :  { %v1027_v21 = vpop.f32.mrf.mxu2  ;;  %v1415_v29 = vpop.f32.mrf.mxu0 }
 0x10f   :  { %v1071_v24 = vpop.f32.mrf.mxu3  ;;  %v1028_v28 = vadd.f32 %v1027_v21, %v984_v10  ;;  %v1459_v30 = vpop.f32.mrf.mxu1  ;;  %v1416_v35 = vadd.f32 %v1415_v29, %v5045_v1  ;;  %v4451_v29 = vld [vmem:[%s5867_s1 + $0x390] sm:$0xff] }
 0x110   :  { %3108 = vmatpush.bf16.msrb.mxu2 %v4451_v29 }
 0x111   :  { %v5327_v36 = vadd.f32 %v1071_v24, %v1028_v28  ;;  %v1460_v38 = vadd.f32 %v1459_v30, %v1416_v35  ;;  %2021 = vmatmul.bf16.gmra.mxu0 %v3812_v25  ;;  %v3843_v24 = vld [vmem:[%s5868_s0 + $0xe0] sm:$0xf]  ;;  %v4435_v30 = vld [vmem:[%s5867_s1 + $0x310] sm:$0xff] }
 0x112   :  { %2065 = vmatmul.bf16.gmra.mxu1 %v3816_v27  ;;  %v4387_v25 = vld [vmem:[%s5868_s0 + $0x11c] sm:$0xf0]  ;;  %v4385_v27 = vld [vmem:[%s5868_s0 + $0xe4] sm:$0xf]  ;;  %v4443_v35 = vld [vmem:[%s5867_s1 + $0x350] sm:$0xff]  ;;  %3020 = vmatpush.bf16.msrb.mxu0 %v4435_v30 }
 0x113   :  { %2109 = vmatmul.bf16.gmra.mxu2 %v3820_v33  ;;  %v3845_v33 = vld [vmem:[%s5868_s0 + $0x120] sm:$0xf0]  ;;  %3064 = vmatpush.bf16.msrb.mxu1 %v4443_v35 }
 0x114   :  { %2153 = vmatmul.bf16.gmra.mxu3 %v3824_v34  ;;  %v3851_v34 = vld [vmem:[%s5868_s0 + $0xe8] sm:$0xf] }
 0x115   :  { %v3852_v49 = vor.u32 %v4388_v37, %v3851_v34 }
 0x116   :  { %v1503_v1 = vpop.f32.mrf.mxu2  ;;  %v1417_v44 = vpop.f32.mrf.mxu0 }
 0x117   :  { %v1547_v42 = vpop.f32.mrf.mxu3  ;;  %v1504_v43 = vadd.f32 %v1503_v1, %v1460_v38  ;;  %v1461_v45 = vpop.f32.mrf.mxu1  ;;  %v1418_v46 = vadd.f32 %v1417_v44, %v5077_v22  ;;  %v4381_v22 = vld [vmem:[%s5868_s0 + $0xa4] sm:$0xf]  ;;  %v4386_v38 = vld [vmem:[%s5868_s0 + $0xec] sm:$0xf] }
 0x118   :  { %v3832_v4 = vor.u32 %v4381_v22, %v3829_v54 }
 0x119   :  { %v5339_v48 = vadd.f32 %v1547_v42, %v1504_v43  ;;  %v1462_v50 = vadd.f32 %v1461_v45, %v1418_v46  ;;  %v3844_v42 = vor.u32 %v4387_v25, %v3843_v24  ;;  %v3848_v43 = vor.u32 %v4385_v27, %v3845_v33 }
 0x11a   :  { %v3872_v25 = vor.u32 %v4390_v13, %v3869_v14 }
 0x11e   :  { %v1505_v63 = vpop.f32.mrf.mxu2  ;;  %v1420_v6 = vpop.f32.mrf.mxu0 }
 0x11f   :  { %v1549_v0 = vpop.f32.mrf.mxu3  ;;  %v1506_v5 = vadd.f32 %v1505_v63, %v1462_v50  ;;  %v1464_v7 = vpop.f32.mrf.mxu1  ;;  %v1421_v10 = vadd.f32 %v1420_v6, %v5085_v31  ;;  %v3856_v50 = vor.u32 %v4386_v38, %v3853_v40  ;;  %v4442_v6 = vld [vmem:[%s5867_s1 + $0x348] sm:$0xff]  ;;  %v3875_v40 = vld [vmem:[%s5868_s0 + $0x180] sm:$0xf] }
 0x120   :  { %3065 = vmatpush.bf16.msrb.mxu1 %v4442_v6 }
 0x121   :  { %v5372_v12 = vadd.f32 %v1549_v0, %v1506_v5  ;;  %v1465_v15 = vadd.f32 %v1464_v7, %v1421_v10  ;;  %2026 = vmatmul.bf16.gmra.mxu0 %v3828_v2  ;;  %v4391_v0 = vld [vmem:[%s5868_s0 + $0x15c] sm:$0xf0]  ;;  %v4450_v2 = vld [vmem:[%s5867_s1 + $0x388] sm:$0xff]  ;;  %v4389_v7 = vld [vmem:[%s5868_s0 + $0x144] sm:$0xf] }
 0x122   :  { %2070 = vmatmul.bf16.gmra.mxu1 %v3832_v4  ;;  %v4458_v5 = vld [vmem:[%s5867_s1 + $0x3c8] sm:$0xff]  ;;  %3109 = vmatpush.bf16.msrb.mxu2 %v4450_v2 }
 0x123   :  { %2114 = vmatmul.bf16.gmra.mxu2 %v3836_v8  ;;  %v3861_v8 = vld [vmem:[%s5868_s0 + $0x160] sm:$0xf0]  ;;  %v4392_v10 = vld [vmem:[%s5868_s0 + $0x164] sm:$0xf0] }
 0x124   :  { %2158 = vmatmul.bf16.gmra.mxu3 %v3840_v9  ;;  %v3867_v9 = vld [vmem:[%s5868_s0 + $0x148] sm:$0xf] }
 0x125   :  { %v3868_v24 = vor.u32 %v4392_v10, %v3867_v9  ;;  %v4034_v9 = vld [vmem:[%s5868_s0 + $0x28] sm:$0xff] }
 0x126   :  { %v1508_v16 = vpop.f32.mrf.mxu2  ;;  %v1422_v18 = vpop.f32.mrf.mxu0 }
 0x127   :  { %v1552_v17 = vpop.f32.mrf.mxu3  ;;  %v1509_v31 = vadd.f32 %v1508_v16, %v1465_v15  ;;  %v1466_v19 = vpop.f32.mrf.mxu1  ;;  %v1423_v20 = vadd.f32 %v1422_v18, %v5123_v55  ;;  %v4459_v55 = vld [vmem:[%s5867_s1 + $0x3d0] sm:$0xff] }
 0x128   :  { %3152 = vmatpush.bf16.msrb.mxu3 %v4459_v55  ;;  %v4449_v55 = vld [vmem:[%s5867_s1 + $0x380] sm:$0xff] }
 0x129   :  { %v5381_v21 = vadd.f32 %v1552_v17, %v1509_v31  ;;  %v1467_v28 = vadd.f32 %v1466_v19, %v1423_v20  ;;  %v3864_v31 = vor.u32 %v4389_v7, %v3861_v8  ;;  %3110 = vmatpush.bf16.msrb.mxu2 %v4449_v55  ;;  %v4037_v8 = vld [vmem:[%s5868_s0 + $0x40] sm:$0xff] }
 0x12a   :  { %v2283_v14 = vshrl.u32 %v4037_v8, 16  ;;  %v3893_v55 = vld [vmem:[%s5868_s0 + $0x1e0] sm:$0xf0] }
 0x12c   :  { %3153 = vmatpush.bf16.msrb.mxu3 %v4458_v5 }
 0x12e   :  { %v1510_v41 = vpop.f32.mrf.mxu2  ;;  %v1425_v45 = vpop.f32.mrf.mxu0 }
 0x12f   :  { %v1554_v1 = vpop.f32.mrf.mxu3  ;;  %v1511_v44 = vadd.f32 %v1510_v41, %v1467_v28  ;;  %v1469_v46 = vpop.f32.mrf.mxu1  ;;  %v1426_v51 = vadd.f32 %v1425_v45, %v5125_v62  ;;  %v3859_v62 = vld [vmem:[%s5868_s0 + $0x140] sm:$0xf]  ;;  %v3877_v45 = vld [vmem:[%s5868_s0 + $0x1a0] sm:$0xf0] }
 0x130   :  { %v3860_v17 = vor.u32 %v4391_v0, %v3859_v62  ;;  %v4457_v41 = vld [vmem:[%s5867_s1 + $0x3c0] sm:$0xff] }
 0x131   :  { %v5420_v52 = vadd.f32 %v1554_v1, %v1511_v44  ;;  %v1470_v53 = vadd.f32 %v1469_v46, %v1426_v51  ;;  %2031 = vmatmul.bf16.gmra.mxu0 %v3844_v42  ;;  %v4395_v42 = vld [vmem:[%s5868_s0 + $0x19c] sm:$0xf0]  ;;  %v4393_v44 = vld [vmem:[%s5868_s0 + $0x184] sm:$0xf]  ;;  %v3883_v46 = vld [vmem:[%s5868_s0 + $0x188] sm:$0xf]  ;;  %3154 = vmatpush.bf16.msrb.mxu3 %v4457_v41 }
 0x132   :  { %2075 = vmatmul.bf16.gmra.mxu1 %v3848_v43  ;;  %v4433_v43 = vld [vmem:[%s5867_s1 + $0x300] sm:$0xff]  ;;  %v3885_v51 = vld [vmem:[%s5868_s0 + $0x1a8] sm:$0xf0] }
 0x133   :  { %2119 = vmatmul.bf16.gmra.mxu2 %v3852_v49  ;;  %v4396_v49 = vld [vmem:[%s5868_s0 + $0x1a4] sm:$0xf0] }
 0x134   :  { %2163 = vmatmul.bf16.gmra.mxu3 %v3856_v50  ;;  %v4394_v50 = vld [vmem:[%s5868_s0 + $0x18c] sm:$0xf]  ;;  %v3884_v0 = vor.u32 %v4396_v49, %v3883_v46  ;;  %v4036_v46 = vld [vmem:[%s5868_s0 + $0x38] sm:$0x11] }
 0x135   :  { %v3888_v2 = vor.u32 %v4394_v50, %v3885_v51  ;;  %v4040_v51 = vld [vmem:[%s5868_s0 + $0x58] sm:$0x11] }
 0x136   :  { %v1513_v22 = vpop.f32.mrf.mxu2  ;;  %v1427_v58 = vpop.f32.mrf.mxu0 }
 0x137   :  { %v1557_v54 = vpop.f32.mrf.mxu3  ;;  %v1514_v57 = vadd.f32 %v1513_v22, %v1470_v53  ;;  %v1471_v59 = vpop.f32.mrf.mxu1  ;;  %v1428_v60 = vadd.f32 %v1427_v58, %v5163_v23  ;;  %v4434_v23 = vld [vmem:[%s5867_s1 + $0x308] sm:$0xff]  ;;  %v4033_v58 = vld [vmem:[%s5868_s0 + $0x20] sm:$0xff] }
 0x138   :  { %3021 = vmatpush.bf16.msrb.mxu0 %v4434_v23  ;;  %v2255_v23 = vshrl.u32 %v4033_v58, 16  ;;  %v2258_v6 = vshll.u32 %v4033_v58, 16 }
 0x139   :  { %v5423_v63 = vadd.f32 %v1557_v54, %v1514_v57  ;;  %v1472_v4 = vadd.f32 %v1471_v59, %v1428_v60  ;;  %v3876_v54 = vor.u32 %v4395_v42, %v3875_v40  ;;  %v3880_v57 = vor.u32 %v4393_v44, %v3877_v45  ;;  %v4398_v40 = vld [vmem:[%s5868_s0 + $0x1cc] sm:$0xf] }
 0x13a   :  { %v2257_v10 = vrot.slane %v2255_v23, 4  ;;  %v2260_v13 = vrot.slane %v2258_v6, 5 }
 0x13c   :  { %3022 = vmatpush.bf16.msrb.mxu0 %v4433_v43  ;;  %v2261_v42 = vor.u32 %v2260_v13, %v2257_v10  ;;  %v2285_v43 = vrot.slane %v2283_v14, 4 }
 0x13e   :  { %v1515_v15 = vpop.f32.mrf.mxu2  ;;  %v1430_v19 = vpop.f32.mrf.mxu0  ;;  %v2262_v6 = vrot.slane %v2261_v42, 4  ;;  %v4047_v42 = vld [vmem:[%s5868_s0 + $0x90] sm:$0x11] }
 0x13f   :  { %v1559_v16 = vpop.f32.mrf.mxu3  ;;  %v1516_v18 = vadd.f32 %v1515_v15, %v1472_v4  ;;  %v1474_v20 = vpop.f32.mrf.mxu1  ;;  %v1431_v27 = vadd.f32 %v1430_v19, %v5168_v32  ;;  %v2286_v15 = vshll.u32 %v4037_v8, 16 }
 0x141   :  { %v5462_v28 = vadd.f32 %v1559_v16, %v1516_v18  ;;  %v1475_v29 = vadd.f32 %v1474_v20, %v1431_v27  ;;  %2036 = vmatmul.bf16.gmra.mxu0 %v3860_v17  ;;  %v2272_v18 = vshll.u32 %v4034_v9, 16  ;;  %v4399_v27 = vld [vmem:[%s5868_s0 + $0x1dc] sm:$0xf0] }
 0x142   :  { %2080 = vmatmul.bf16.gmra.mxu1 %v3864_v31  ;;  %v2269_v31 = vshrl.u32 %v4034_v9, 16  ;;  %v2306_v9 = vshll.u32 %v4040_v51, 16 }
 0x143   :  { %2124 = vmatmul.bf16.gmra.mxu2 %v3868_v24  ;;  %v2274_v50 = vrot.slane %v2272_v18, 5 }
 0x144   :  { %2168 = vmatmul.bf16.gmra.mxu3 %v3872_v25  ;;  %v3891_v25 = vld [vmem:[%s5868_s0 + $0x1c0] sm:$0xf]  ;;  %v2271_v49 = vrot.slane %v2269_v31, 4 }
 0x146   :  { %v1518_v30 = vpop.f32.mrf.mxu2  ;;  %v1432_v35 = vpop.f32.mrf.mxu0  ;;  %v2275_v8 = vor.u32 %v2274_v50, %v2271_v49 }
 0x147   :  { %v1562_v33 = vpop.f32.mrf.mxu3  ;;  %v1519_v34 = vadd.f32 %v1518_v30, %v1475_v29  ;;  %v1476_v37 = vpop.f32.mrf.mxu1  ;;  %v1433_v38 = vadd.f32 %v1432_v35, %v5203_v56  ;;  %v4441_v56 = vld [vmem:[%s5867_s1 + $0x340] sm:$0xff]  ;;  %v4035_v30 = vld [vmem:[%s5868_s0 + $0x30] sm:$0x11] }
 0x148   :  { %3066 = vmatpush.bf16.msrb.mxu1 %v4441_v56  ;;  %v4397_v29 = vld [vmem:[%s5868_s0 + $0x1c4] sm:$0xf]  ;;  %v2288_v56 = vrot.slane %v2286_v15, 5  ;;  %v2264_v45 = vshll.u32 %v4035_v30, 16  ;;  %v2276_v30 = vrot.slane %v2275_v8, 4 }
 0x149   :  { %v5468_v32 = vadd.f32 %v1562_v33, %v1519_v34  ;;  %v1477_v1 = vadd.f32 %v1476_v37, %v1433_v38  ;;  %v3899_v37 = vld [vmem:[%s5868_s0 + $0x1c8] sm:$0xf] }
 0x14a   :  { %v4400_v38 = vld [vmem:[%s5868_s0 + $0x1e4] sm:$0xf0] }
 0x14e   :  { %v1520_v53 = vpop.f32.mrf.mxu2  ;;  %v1435_v60 = vpop.f32.mrf.mxu0 }
 0x14f   :  { %v1564_v22 = vpop.f32.mrf.mxu3  ;;  %v1521_v59 = vadd.f32 %v1520_v53, %v1477_v1  ;;  %v1479_v62 = vpop.f32.mrf.mxu1  ;;  %v1436_v4 = vadd.f32 %v1435_v60, %v5211_v3  ;;  %v4038_v3 = vld [vmem:[%s5868_s0 + $0x48] sm:$0xff]  ;;  %v3900_v60 = vor.u32 %v4400_v38, %v3899_v37 }
 0x150   :  { %v2297_v33 = vshrl.u32 %v4038_v3, 16  ;;  %v2300_v34 = vshll.u32 %v4038_v3, 16  ;;  %v3901_v1 = vld [vmem:[%s5868_s0 + $0x1e8] sm:$0xf0]  ;;  %v4045_v3 = vld [vmem:[%s5868_s0 + $0x80] sm:$0xff] }
 0x151   :  { %v5507_v5 = vadd.f32 %v1564_v22, %v1521_v59  ;;  %v1480_v7 = vadd.f32 %v1479_v62, %v1436_v4  ;;  %2041 = vmatmul.bf16.gmra.mxu0 %v3876_v54  ;;  %v3892_v54 = vor.u32 %v4399_v27, %v3891_v25  ;;  %v4041_v59 = vld [vmem:[%s5868_s0 + $0x60] sm:$0xff]  ;;  %v3904_v62 = vor.u32 %v4398_v40, %v3901_v1  ;;  %v4042_v27 = vld [vmem:[%s5868_s0 + $0x68] sm:$0xff]  ;;  %v4043_v40 = vld [vmem:[%s5868_s0 + $0x70] sm:$0x11] }
 0x152   :  { %2085 = vmatmul.bf16.gmra.mxu1 %v3880_v57  ;;  %v2299_v53 = vrot.slane %v2297_v33, 4  ;;  %v2302_v22 = vrot.slane %v2300_v34, 5  ;;  %v3896_v57 = vor.u32 %v4397_v29, %v3893_v55  ;;  %v2342_v25 = vshll.u32 %v4045_v3, 16 }
 0x153   :  { %2129 = vmatmul.bf16.gmra.mxu2 %v3884_v0  ;;  %v2289_v0 = vor.u32 %v2288_v56, %v2285_v43  ;;  %v2325_v1 = vshrl.u32 %v4042_v27, 16 }
 0x154   :  { %2173 = vmatmul.bf16.gmra.mxu3 %v3888_v2  ;;  %v2278_v2 = vshll.u32 %v4036_v46, 16  ;;  %v2303_v15 = vor.u32 %v2302_v22, %v2299_v53  ;;  %v2344_v56 = vrot.slane %v2342_v25, 5 }
 0x156   :  { %v1523_v16 = vpop.f32.mrf.mxu2  ;;  %v1437_v20 = vpop.f32.mrf.mxu0  ;;  %v2280_v33 = vrot.slane %v2278_v2, 5  ;;  %v2304_v34 = vrot.slane %v2303_v15, 4  ;;  %v2327_v2 = vrot.slane %v2325_v1, 4 }
 0x157   :  { %v1567_v17 = vpop.f32.mrf.mxu3  ;;  %v1524_v19 = vadd.f32 %v1523_v16, %v1480_v7  ;;  %v1481_v24 = vpop.f32.mrf.mxu1  ;;  %v1438_v35 = vadd.f32 %v1437_v20, %v5243_v26  ;;  %v4039_v26 = vld [vmem:[%s5868_s0 + $0x50] sm:$0x11]  ;;  %v2266_v7 = vrot.slane %v2264_v45, 5  ;;  %v2311_v16 = vshrl.u32 %v4041_v59, 16 }
 0x158   :  { %v2292_v58 = vshll.u32 %v4039_v26, 16  ;;  %v2290_v20 = vrot.slane %v2289_v0, 4  ;;  %v2328_v26 = vshll.u32 %v4042_v27, 16  ;;  %v2281_v53 = vsel %vm4616_vm2, %v2276_v30, %v2280_v33 }
 0x159   :  { %v5543_v41 = vadd.f32 %v1567_v17, %v1524_v19  ;;  %v1482_v44 = vadd.f32 %v1481_v24, %v1438_v35  ;;  %v2314_v17 = vshll.u32 %v4041_v59, 16  ;;  %v2339_v24 = vshrl.u32 %v4045_v3, 16 }
 0x15a   :  { %v2294_v18 = vrot.slane %v2292_v58, 5  ;;  %v2267_v55 = vsel %vm4616_vm2, %v2262_v6, %v2266_v7  ;;  %v2308_v35 = vrot.slane %v2306_v9, 5  ;;  %v2313_v37 = vrot.slane %v2311_v16, 4  ;;  %v4044_v7 = vld [vmem:[%s5868_s0 + $0x78] sm:$0x11] }
 0x15b   :  { %v2316_v38 = vrot.slane %v2314_v17, 5  ;;  %v2341_v43 = vrot.slane %v2339_v24, 4  ;;  %v2711_v51 = vunpack.c.l.b16 %v2267_v55  ;;  %v2348_v0 = vshll.u32 %v4047_v42, 16  ;;  %v4049_v42 = vld [vmem:[%s5868_s0 + $0xa0] sm:$0xff] }
 0x15c   :  { %v2295_v50 = vsel %vm4616_vm2, %v2290_v20, %v2294_v18  ;;  %v2309_v58 = vsel %vm4616_vm2, %v2304_v34, %v2308_v35  ;;  %v2713_v15 = vunpack.c.l.b16 %v2281_v53  ;;  %v2714_v17 = vunpack.c.h.b16 %v2281_v53 }
 0x15d   :  { %v2317_v59 = vor.u32 %v2316_v38, %v2313_v37  ;;  %v2345_v6 = vor.u32 %v2344_v56, %v2341_v43  ;;  %v2717_v16 = vunpack.c.l.b16 %v2309_v58  ;;  %v2334_v25 = vshll.u32 %v4044_v7, 16  ;;  %v4053_v43 = vld [vmem:[%s5868_s0 + $0xc0] sm:$0xff] }
 0x15e   :  { %v1525_v4 = vpop.f32.mrf.mxu2  ;;  %v1440_v13 = vpop.f32.mrf.mxu0 }
 0x15f   :  { %v1569_v23 = vpop.f32.mrf.mxu3  ;;  %v1526_v10 = vadd.f32 %v1525_v4, %v1482_v44  ;;  %v1484_v14 = vpop.f32.mrf.mxu1  ;;  %v1441_v31 = vadd.f32 %v1440_v13, %v5257_v39  ;;  %v4046_v39 = vld [vmem:[%s5868_s0 + $0x88] sm:$0xff]  ;;  %v2330_v4 = vrot.slane %v2328_v26, 5  ;;  %v2712_v13 = vunpack.c.h.b16 %v2267_v55 }
 0x160   :  { %v2353_v44 = vshrl.u32 %v4046_v39, 16  ;;  %v2356_v45 = vshll.u32 %v4046_v39, 16  ;;  %v2318_v18 = vrot.slane %v2317_v59, 4  ;;  %v2346_v27 = vrot.slane %v2345_v6, 4 }
 0x161   :  { %v5564_v19 = vadd.f32 %v1569_v23, %v1526_v10  ;;  %v1485_v29 = vadd.f32 %v1484_v14, %v1441_v31  ;;  %2046 = vmatmul.bf16.gmra.mxu0 %v3892_v54  ;;  %v2715_v10 = vunpack.c.l.b16 %v2295_v50  ;;  %v2716_v14 = vunpack.c.h.b16 %v2295_v50 }
 0x162   :  { %2090 = vmatmul.bf16.gmra.mxu1 %v3896_v57  ;;  %v2355_v8 = vrot.slane %v2353_v44, 4  ;;  %v2358_v9 = vrot.slane %v2356_v45, 5  ;;  %v2718_v31 = vunpack.c.h.b16 %v2309_v58  ;;  %v2331_v24 = vor.u32 %v2330_v4, %v2327_v2  ;;  %v4054_v2 = vld [vmem:[%s5868_s0 + $0xc8] sm:$0xff] }
 0x163   :  { %2134 = vmatmul.bf16.gmra.mxu2 %v3900_v60  ;;  %v2320_v60 = vshll.u32 %v4043_v40, 16  ;;  %v2767_v55 = vpack.c.b16 %v2715_v10, %v2711_v51  ;;  %v2768_v35 = vpack.c.b16 %v2716_v14, %v2712_v13  ;;  %v2769_v1 = vpack.c.b16 %v2717_v16, %v2713_v15  ;;  %v4051_v13 = vld [vmem:[%s5868_s0 + $0xb0] sm:$0x11] }
 0x164   :  { %2178 = vmatmul.bf16.gmra.mxu3 %v3904_v62  ;;  %v2359_v30 = vor.u32 %v2358_v9, %v2355_v8  ;;  %v2770_v26 = vpack.c.b16 %v2718_v31, %v2714_v17  ;;  %v2332_v45 = vrot.slane %v2331_v24, 4  ;;  %v2395_v58 = vshrl.u32 %v4053_v43, 16 }
 0x165   :  { %v2322_v20 = vrot.slane %v2320_v60, 5  ;;  %v2398_v59 = vshll.u32 %v4053_v43, 16  ;;  %v2409_v24 = vshrl.u32 %v4054_v2, 16 }
 0x166   :  { %v1528_v46 = vpop.f32.mrf.mxu2  ;;  %v1442_v54 = vpop.f32.mrf.mxu0  ;;  %v2360_v51 = vrot.slane %v2359_v30, 4  ;;  %v2397_v15 = vrot.slane %v2395_v58, 4 }
 0x167   :  { %v1572_v49 = vpop.f32.mrf.mxu3  ;;  %v1529_v22 = vadd.f32 %v1528_v46, %v1485_v29  ;;  %v1486_v57 = vpop.f32.mrf.mxu1  ;;  %v1443_v62 = vadd.f32 %v1442_v54, %v5283_v61  ;;  %v4048_v61 = vld [vmem:[%s5868_s0 + $0x98] sm:$0x11]  ;;  %v2350_v29 = vrot.slane %v2348_v0, 5  ;;  %v2323_v44 = vsel %vm4616_vm2, %v2318_v18, %v2322_v20  ;;  %v4055_v18 = vld [vmem:[%s5868_s0 + $0xd0] sm:$0x11] }
 0x168   :  { %v2362_v33 = vshll.u32 %v4048_v61, 16  ;;  %v2336_v46 = vrot.slane %v2334_v25, 5  ;;  %v2367_v54 = vshrl.u32 %v4049_v42, 16  ;;  %v2719_v60 = vunpack.c.l.b16 %v2323_v44 }
 0x169   :  { %v5587_v23 = vadd.f32 %v1572_v49, %v1529_v22  ;;  %v1487_v3 = vadd.f32 %v1486_v57, %v1443_v62  ;;  %v2351_v50 = vsel %vm4616_vm2, %v2346_v27, %v2350_v29  ;;  %v2370_v57 = vshll.u32 %v4049_v42, 16 }
 0x16a   :  { %v2364_v53 = vrot.slane %v2362_v33, 5  ;;  %v2723_v62 = vunpack.c.l.b16 %v2351_v50  ;;  %v2720_v0 = vunpack.c.h.b16 %v2323_v44  ;;  %v2337_v4 = vsel %vm4616_vm2, %v2332_v45, %v2336_v46  ;;  %v4056_v44 = vld [vmem:[%s5868_s0 + $0xd8] sm:$0x11] }
 0x16b   :  { %v2724_v10 = vunpack.c.h.b16 %v2351_v50  ;;  %v2369_v14 = vrot.slane %v2367_v54, 4  ;;  %v2372_v61 = vrot.slane %v2370_v57, 5  ;;  %v2400_v20 = vrot.slane %v2398_v59, 5 }
 0x16c   :  { %v2365_v6 = vsel %vm4616_vm2, %v2360_v51, %v2364_v53  ;;  %v2412_v25 = vshll.u32 %v4054_v2, 16  ;;  %v2721_v29 = vunpack.c.l.b16 %v2337_v4  ;;  %v2722_v33 = vunpack.c.h.b16 %v2337_v4  ;;  %v4057_v53 = vld [vmem:[%s5868_s0 + $0xe0] sm:$0xff] }
 0x16d   :  { %v2725_v30 = vunpack.c.l.b16 %v2365_v6  ;;  %v2401_v42 = vor.u32 %v2400_v20, %v2397_v15  ;;  %v2411_v43 = vrot.slane %v2409_v24, 4  ;;  %v2772_v45 = vpack.c.b16 %v2724_v10, %v2720_v0  ;;  %v4061_v0 = vld [vmem:[%s5868_s0 + $0x120] sm:$0xff] }
 0x16e   :  { %v1530_v39 = vpop.f32.mrf.mxu2  ;;  %v1445_v38 = vpop.f32.mrf.mxu0  ;;  %v2451_v15 = vshrl.u32 %v4061_v0, 16 }
 0x16f   :  { %v1574_v34 = vpop.f32.mrf.mxu3  ;;  %v1531_v37 = vadd.f32 %v1530_v39, %v1487_v3  ;;  %v1489_v40 = vpop.f32.mrf.mxu1  ;;  %v1446_v56 = vadd.f32 %v1445_v38, %v5297_v11  ;;  %v4050_v11 = vld [vmem:[%s5868_s0 + $0xa8] sm:$0xff]  ;;  %v2373_v38 = vor.u32 %v2372_v61, %v2369_v14  ;;  %v2773_v46 = vpack.c.b16 %v2725_v30, %v2721_v29 }
 0x170   :  { %v2381_v7 = vshrl.u32 %v4050_v11, 16  ;;  %v2384_v8 = vshll.u32 %v4050_v11, 16  ;;  %v2402_v4 = vrot.slane %v2401_v42, 4 }
 0x171   :  { %v5604_v49 = vadd.f32 %v1574_v34, %v1531_v37  ;;  %v1490_v22 = vadd.f32 %v1489_v40, %v1446_v56  ;;  %3023 = vmatmul.bf16.vlgmr.msrb.gmra.mxu0 %v2767_v55  ;;  %v2726_v34 = vunpack.c.h.b16 %v2365_v6  ;;  %v2376_v40 = vshll.u32 %v4051_v13, 16 }
 0x172   :  { %3067 = vmatmul.bf16.vlgmr.msrb.gmra.mxu1 %v2768_v35  ;;  %v2383_v55 = vrot.slane %v2381_v7, 4  ;;  %v2386_v35 = vrot.slane %v2384_v8, 5  ;;  %v2414_v56 = vrot.slane %v2412_v25, 5  ;;  %v2374_v58 = vrot.slane %v2373_v38, 4 }
 0x173   :  { %3111 = vmatmul.bf16.vlgmr.msrb.gmra.mxu2 %v2769_v1  ;;  %v2404_v1 = vshll.u32 %v4055_v18, 16  ;;  %v2774_v57 = vpack.c.b16 %v2726_v34, %v2722_v33  ;;  %v2378_v11 = vrot.slane %v2376_v40, 5  ;;  %v2418_v7 = vshll.u32 %v4056_v44, 16  ;;  %v4059_v40 = vld [vmem:[%s5868_s0 + $0xf0] sm:$0x11] }
 0x174   :  { %3155 = vmatmul.bf16.vlgmr.msrb.gmra.mxu3 %v2770_v26  ;;  %v4052_v26 = vld [vmem:[%s5868_s0 + $0xb8] sm:$0x11]  ;;  %v2387_v50 = vor.u32 %v2386_v35, %v2383_v55  ;;  %v2415_v6 = vor.u32 %v2414_v56, %v2411_v43  ;;  %v4063_v44 = vld [vmem:[%s5868_s0 + $0x130] sm:$0x11] }
 0x175   :  { %v2390_v51 = vshll.u32 %v4052_v26, 16  ;;  %v2406_v59 = vrot.slane %v2404_v1, 5  ;;  %v2379_v61 = vsel %vm4616_vm2, %v2374_v58, %v2378_v11  ;;  %v2420_v20 = vrot.slane %v2418_v7, 5 }
 0x176   :  { %v1533_v9 = vpop.f32.mrf.mxu2  ;;  %v1447_v17 = vpop.f32.mrf.mxu0  ;;  %v2388_v13 = vrot.slane %v2387_v50, 4  ;;  %v2416_v18 = vrot.slane %v2415_v6, 4  ;;  %v2727_v29 = vunpack.c.l.b16 %v2379_v61  ;;  %v2728_v38 = vunpack.c.h.b16 %v2379_v61 }
 0x177   :  { %v1577_v3 = vpop.f32.mrf.mxu3  ;;  %v1534_v16 = vadd.f32 %v1533_v9, %v1490_v22  ;;  %v1491_v31 = vpop.f32.mrf.mxu1  ;;  %v1448_v27 = vadd.f32 %v1447_v17, %v5327_v36  ;;  %v2771_v36 = vpack.c.b16 %v2723_v62, %v2719_v60  ;;  %v2423_v9 = vshrl.u32 %v4057_v53, 16  ;;  %v4058_v17 = vld [vmem:[%s5868_s0 + $0xe8] sm:$0xff] }
 0x178   :  { %v2392_v14 = vrot.slane %v2390_v51, 5  ;;  %v2437_v33 = vshrl.u32 %v4058_v17, 16  ;;  %v2440_v34 = vshll.u32 %v4058_v17, 16  ;;  %v2453_v1 = vrot.slane %v2451_v15, 4 }
 0x179   :  { %v5625_v39 = vadd.f32 %v1577_v3, %v1534_v16  ;;  %v1492_v37 = vadd.f32 %v1491_v31, %v1448_v27  ;;  %v2426_v3 = vshll.u32 %v4057_v53, 16  ;;  %v2454_v16 = vshll.u32 %v4061_v0, 16  ;;  %v4062_v27 = vld [vmem:[%s5868_s0 + $0x128] sm:$0xff]  ;;  %v4064_v0 = vld [vmem:[%s5868_s0 + $0x138] sm:$0x11] }
 0x17a   :  { %v2407_v31 = vsel %vm4616_vm2, %v2402_v4, %v2406_v59  ;;  %v2425_v24 = vrot.slane %v2423_v9, 4  ;;  %v2393_v30 = vsel %vm4616_vm2, %v2388_v13, %v2392_v14  ;;  %v2439_v58 = vrot.slane %v2437_v33, 4  ;;  %v4060_v4 = vld [vmem:[%s5868_s0 + $0xf8] sm:$0x11] }
 0x17b   :  { %v2428_v25 = vrot.slane %v2426_v3, 5  ;;  %v2456_v26 = vrot.slane %v2454_v16, 5  ;;  %v2732_v51 = vunpack.c.h.b16 %v2407_v31  ;;  %v2729_v53 = vunpack.c.l.b16 %v2393_v30 }
 0x17c   :  { %v2442_v11 = vrot.slane %v2440_v34, 5  ;;  %v2446_v15 = vshll.u32 %v4060_v4, 16 }
 0x17e   :  { %v1535_v22 = vpop.f32.mrf.mxu2  ;;  %v2017_v60 = vpop.f32.mrf.mxu0  ;;  %v2443_v61 = vor.u32 %v2442_v11, %v2439_v58 }
 0x17f   :  { %v1579_v54 = vpop.f32.mrf.mxu3  ;;  %v1536_v2 = vadd.f32 %v1535_v22, %v1492_v37  ;;  %v2061_v62 = vpop.f32.mrf.mxu1  ;;  %v2731_v37 = vunpack.c.l.b16 %v2407_v31  ;;  %v2429_v22 = vor.u32 %v2428_v25, %v2425_v24  ;;  %v2776_v31 = vpack.c.b16 %v2732_v51, %v2728_v38 }
 0x180   :  { %v2062_v8 = vadd.f32 %v2061_v62, %v2017_v60  ;;  %v2457_v60 = vor.u32 %v2456_v26, %v2453_v1  ;;  %v2460_v62 = vshll.u32 %v4063_v44, 16  ;;  %v2474_v24 = vshll.u32 %v4064_v0, 16 }
 0x181   :  { %v5639_v10 = vadd.f32 %v1579_v54, %v1536_v2  ;;  %3028 = vmatmul.bf16.gmra.mxu0 %v2771_v36  ;;  %v2421_v36 = vsel %vm4616_vm2, %v2416_v18, %v2420_v20  ;;  %v2730_v2 = vunpack.c.h.b16 %v2393_v30  ;;  %v2775_v3 = vpack.c.b16 %v2731_v37, %v2727_v29  ;;  %v4065_v29 = vld [vmem:[%s5868_s0 + $0x140] sm:$0xff] }
 0x182   :  { %3072 = vmatmul.bf16.gmra.mxu1 %v2772_v45  ;;  %v2465_v45 = vshrl.u32 %v4062_v27, 16  ;;  %v2733_v59 = vunpack.c.l.b16 %v2421_v36  ;;  %v2734_v7 = vunpack.c.h.b16 %v2421_v36  ;;  %v2430_v13 = vrot.slane %v2429_v22, 4  ;;  %v4066_v36 = vld [vmem:[%s5868_s0 + $0x148] sm:$0xff] }
 0x183   :  { %3116 = vmatmul.bf16.gmra.mxu2 %v2773_v46  ;;  %v2468_v46 = vshll.u32 %v4062_v27, 16  ;;  %v2458_v18 = vrot.slane %v2457_v60, 4  ;;  %v2462_v20 = vrot.slane %v2460_v62, 5  ;;  %v2448_v1 = vrot.slane %v2446_v15, 5  ;;  %v4071_v15 = vld [vmem:[%s5868_s0 + $0x170] sm:$0x11] }
 0x184   :  { %3160 = vmatmul.bf16.gmra.mxu3 %v2774_v57  ;;  %v2432_v57 = vshll.u32 %v4059_v40, 16  ;;  %v2777_v30 = vpack.c.b16 %v2733_v59, %v2729_v53  ;;  %v2778_v33 = vpack.c.b16 %v2734_v7, %v2730_v2  ;;  %v2444_v40 = vrot.slane %v2443_v61, 4 }
 0x185   :  { %v2470_v9 = vrot.slane %v2468_v46, 5  ;;  %v2463_v26 = vsel %vm4616_vm2, %v2458_v18, %v2462_v20  ;;  %v2496_v58 = vshll.u32 %v4066_v36, 16 }
 0x186   :  { %v2105_v55 = vpop.f32.mrf.mxu2  ;;  %v2019_v43 = vpop.f32.mrf.mxu0  ;;  %v2434_v14 = vrot.slane %v2432_v57, 5  ;;  %v2449_v22 = vsel %vm4616_vm2, %v2444_v40, %v2448_v1  ;;  %v2493_v57 = vshrl.u32 %v4066_v36, 16  ;;  %v2740_v2 = vunpack.c.h.b16 %v2463_v26 }
 0x187   :  { %v2149_v35 = vpop.f32.mrf.mxu3  ;;  %v2106_v42 = vadd.f32 %v2105_v55, %v2062_v8  ;;  %v2063_v56 = vpop.f32.mrf.mxu1  ;;  %v2467_v8 = vrot.slane %v2465_v45, 4  ;;  %v2737_v61 = vunpack.c.l.b16 %v2449_v22  ;;  %v2738_v18 = vunpack.c.h.b16 %v2449_v22 }
 0x188   :  { %v2064_v50 = vadd.f32 %v2063_v56, %v2019_v43  ;;  %v2435_v38 = vsel %vm4616_vm2, %v2430_v13, %v2434_v14  ;;  %v2479_v43 = vshrl.u32 %v4065_v29, 16  ;;  %v2482_v56 = vshll.u32 %v4065_v29, 16 }
 0x189   :  { %v2150_v54 = vadd.f32 %v2149_v35, %v2106_v42  ;;  %v2471_v34 = vor.u32 %v2470_v9, %v2467_v8  ;;  %v4069_v35 = vld [vmem:[%s5868_s0 + $0x160] sm:$0xff]  ;;  %v2476_v42 = vrot.slane %v2474_v24, 5  ;;  %v2735_v51 = vunpack.c.l.b16 %v2435_v38  ;;  %v4067_v9 = vld [vmem:[%s5868_s0 + $0x150] sm:$0x11] }
 0x18a   :  { %v2507_v46 = vshrl.u32 %v4069_v35, 16  ;;  %v2736_v53 = vunpack.c.h.b16 %v2435_v38  ;;  %v2481_v60 = vrot.slane %v2479_v43, 4  ;;  %v2484_v62 = vrot.slane %v2482_v56, 5  ;;  %v4073_v43 = vld [vmem:[%s5868_s0 + $0x180] sm:$0xff] }
 0x18b   :  { %v5665_v6 = vadd.f32 %v2150_v54, %v5339_v48  ;;  %v2472_v45 = vrot.slane %v2471_v34, 4  ;;  %v4070_v54 = vld [vmem:[%s5868_s0 + $0x168] sm:$0xff]  ;;  %v2495_v20 = vrot.slane %v2493_v57, 4  ;;  %v2498_v24 = vrot.slane %v2496_v58, 5 }
 0x18c   :  { %v2780_v1 = vpack.c.b16 %v2740_v2, %v2736_v53  ;;  %v2535_v2 = vshrl.u32 %v4073_v43, 16 }
 0x18d   :  { %v2477_v8 = vsel %vm4616_vm2, %v2472_v45, %v2476_v42 }
 0x18e   :  { %v2107_v16 = vpop.f32.mrf.mxu2  ;;  %v2022_v25 = vpop.f32.mrf.mxu0 }
 0x18f   :  { %v2151_v17 = vpop.f32.mrf.mxu3  ;;  %v2108_v48 = vadd.f32 %v2107_v16, %v2064_v50  ;;  %v2066_v27 = vpop.f32.mrf.mxu1  ;;  %v2510_v50 = vshll.u32 %v4069_v35, 16  ;;  %v2521_v16 = vshrl.u32 %v4070_v54, 16  ;;  %v4072_v35 = vld [vmem:[%s5868_s0 + $0x178] sm:$0x11] }
 0x190   :  { %v2067_v55 = vadd.f32 %v2066_v27, %v2022_v25  ;;  %v2742_v25 = vunpack.c.h.b16 %v2477_v8  ;;  %v2485_v27 = vor.u32 %v2484_v62, %v2481_v60  ;;  %v2538_v60 = vshll.u32 %v4073_v43, 16 }
 0x191   :  { %v2152_v37 = vadd.f32 %v2151_v17, %v2108_v48  ;;  %3033 = vmatmul.bf16.gmra.mxu0 %v2775_v3  ;;  %v2509_v3 = vrot.slane %v2507_v46, 4  ;;  %v2512_v13 = vrot.slane %v2510_v50, 5  ;;  %v2524_v17 = vshll.u32 %v4070_v54, 16 }
 0x192   :  { %3077 = vmatmul.bf16.gmra.mxu1 %v2776_v31  ;;  %v2741_v48 = vunpack.c.l.b16 %v2477_v8  ;;  %v2782_v45 = vpack.c.b16 %v2742_v25, %v2738_v18  ;;  %v2486_v46 = vrot.slane %v2485_v27, 4  ;;  %v4075_v27 = vld [vmem:[%s5868_s0 + $0x190] sm:$0x11] }
 0x193   :  { %v5684_v44 = vadd.f32 %v2152_v37, %v5372_v12  ;;  %3121 = vmatmul.bf16.gmra.mxu2 %v2777_v30  ;;  %v2739_v12 = vunpack.c.l.b16 %v2463_v26  ;;  %v2488_v30 = vshll.u32 %v4067_v9, 16  ;;  %v2513_v29 = vor.u32 %v2512_v13, %v2509_v3  ;;  %v4074_v3 = vld [vmem:[%s5868_s0 + $0x188] sm:$0xff] }
 0x194   :  { %3165 = vmatmul.bf16.gmra.mxu3 %v2778_v33  ;;  %v4068_v33 = vld [vmem:[%s5868_s0 + $0x158] sm:$0x11]  ;;  %v2523_v37 = vrot.slane %v2521_v16, 4  ;;  %v2526_v38 = vrot.slane %v2524_v17, 5  ;;  %v2499_v26 = vor.u32 %v2498_v24, %v2495_v20  ;;  %v2537_v17 = vrot.slane %v2535_v2, 4 }
 0x195   :  { %v2779_v40 = vpack.c.b16 %v2739_v12, %v2735_v51  ;;  %v2502_v42 = vshll.u32 %v4068_v33, 16  ;;  %v2490_v50 = vrot.slane %v2488_v30, 5  ;;  %v2514_v58 = vrot.slane %v2513_v29, 4  ;;  %v4077_v51 = vld [vmem:[%s5868_s0 + $0x1a0] sm:$0xff] }
 0x196   :  { %v2110_v11 = vpop.f32.mrf.mxu2  ;;  %v2024_v7 = vpop.f32.mrf.mxu0  ;;  %v2527_v12 = vor.u32 %v2526_v38, %v2523_v37  ;;  %v2563_v8 = vshrl.u32 %v4077_v51, 16  ;;  %v2566_v9 = vshll.u32 %v4077_v51, 16  ;;  %v2549_v24 = vshrl.u32 %v4074_v3, 16 }
 0x197   :  { %v2154_v59 = vpop.f32.mrf.mxu3  ;;  %v2111_v4 = vadd.f32 %v2110_v11, %v2067_v55  ;;  %v2068_v0 = vpop.f32.mrf.mxu1  ;;  %v2516_v55 = vshll.u32 %v4071_v15, 16 }
 0x198   :  { %v2069_v14 = vadd.f32 %v2068_v0, %v2024_v7  ;;  %v2504_v7 = vrot.slane %v2502_v42, 5  ;;  %v2491_v0 = vsel %vm4616_vm2, %v2486_v46, %v2490_v50  ;;  %v2528_v15 = vrot.slane %v2527_v12, 4  ;;  %v4079_v42 = vld [vmem:[%s5868_s0 + $0x1b0] sm:$0x11] }
 0x199   :  { %v2155_v31 = vadd.f32 %v2154_v59, %v2111_v4  ;;  %v2518_v11 = vrot.slane %v2516_v55, 5  ;;  %v2530_v59 = vshll.u32 %v4072_v35, 16  ;;  %v2500_v4 = vrot.slane %v2499_v26, 4 }
 0x19a   :  { %v2743_v18 = vunpack.c.l.b16 %v2491_v0  ;;  %v2565_v30 = vrot.slane %v2563_v8, 4  ;;  %v2568_v33 = vrot.slane %v2566_v9, 5  ;;  %v2544_v46 = vshll.u32 %v4075_v27, 16 }
 0x19b   :  { %v5703_v34 = vadd.f32 %v2155_v31, %v5381_v21  ;;  %v2781_v21 = vpack.c.b16 %v2741_v48, %v2737_v61  ;;  %v4078_v61 = vld [vmem:[%s5868_s0 + $0x1a8] sm:$0xff]  ;;  %v2532_v16 = vrot.slane %v2530_v59, 5  ;;  %v2540_v31 = vrot.slane %v2538_v60, 5  ;;  %v4080_v60 = vld [vmem:[%s5868_s0 + $0x1b8] sm:$0x11] }
 0x19c   :  { %v2505_v20 = vsel %vm4616_vm2, %v2500_v4, %v2504_v7  ;;  %v2577_v29 = vshrl.u32 %v4078_v61, 16  ;;  %v2580_v55 = vshll.u32 %v4078_v61, 16  ;;  %v2551_v50 = vrot.slane %v2549_v24, 4 }
 0x19d   :  { %v2746_v12 = vunpack.c.h.b16 %v2505_v20 }
 0x19e   :  { %v2112_v56 = vpop.f32.mrf.mxu2  ;;  %v2027_v54 = vpop.f32.mrf.mxu0  ;;  %v2582_v59 = vrot.slane %v2580_v55, 5 }
 0x19f   :  { %v2156_v36 = vpop.f32.mrf.mxu3  ;;  %v2113_v22 = vadd.f32 %v2112_v56, %v2069_v14  ;;  %v2071_v57 = vpop.f32.mrf.mxu1  ;;  %v2519_v14 = vsel %vm4616_vm2, %v2514_v58, %v2518_v11  ;;  %v2533_v56 = vsel %vm4616_vm2, %v2528_v15, %v2532_v16  ;;  %v4076_v58 = vld [vmem:[%s5868_s0 + $0x198] sm:$0x11]  ;;  %v2579_v11 = vrot.slane %v2577_v29, 4 }
 0x1a0   :  { %v2072_v53 = vadd.f32 %v2071_v57, %v2027_v54  ;;  %v2748_v26 = vunpack.c.h.b16 %v2519_v14  ;;  %v2569_v54 = vor.u32 %v2568_v33, %v2565_v30  ;;  %v2572_v57 = vshll.u32 %v4079_v42, 16 }
 0x1a1   :  { %v2157_v62 = vadd.f32 %v2156_v36, %v2113_v22  ;;  %3038 = vmatmul.bf16.gmra.mxu0 %v2779_v40  ;;  %v2747_v40 = vunpack.c.l.b16 %v2519_v14  ;;  %v2745_v36 = vunpack.c.l.b16 %v2505_v20  ;;  %v2750_v2 = vunpack.c.h.b16 %v2533_v56 }
 0x1a2   :  { %3082 = vmatmul.bf16.gmra.mxu1 %v2780_v1  ;;  %v2744_v1 = vunpack.c.h.b16 %v2491_v0  ;;  %v2546_v0 = vrot.slane %v2544_v46, 5  ;;  %v2558_v9 = vshll.u32 %v4076_v58, 16  ;;  %v2570_v61 = vrot.slane %v2569_v54, 4 }
 0x1a3   :  { %v5720_v13 = vadd.f32 %v2157_v62, %v5420_v52  ;;  %3126 = vmatmul.bf16.gmra.mxu2 %v2781_v21  ;;  %v2552_v52 = vshll.u32 %v4074_v3, 16  ;;  %v2541_v21 = vor.u32 %v2540_v31, %v2537_v17  ;;  %v2783_v62 = vpack.c.b16 %v2747_v40, %v2743_v18  ;;  %v4082_v40 = vld [vmem:[%s5868_s0 + $0x1c8] sm:$0xff] }
 0x1a4   :  { %3170 = vmatmul.bf16.gmra.mxu3 %v2782_v45  ;;  %v2784_v4 = vpack.c.b16 %v2748_v26, %v2744_v1  ;;  %v2574_v15 = vrot.slane %v2572_v57, 5  ;;  %v2583_v16 = vor.u32 %v2582_v59, %v2579_v11  ;;  %v2560_v18 = vrot.slane %v2558_v9, 5  ;;  %v4083_v9 = vld [vmem:[%s5868_s0 + $0x1d0] sm:$0x11] }
 0x1a5   :  { %v2554_v22 = vrot.slane %v2552_v52, 5  ;;  %v2542_v7 = vrot.slane %v2541_v21, 4  ;;  %v2786_v52 = vpack.c.b16 %v2750_v2, %v2746_v12  ;;  %v2605_v11 = vshrl.u32 %v4082_v40, 16 }
 0x1a6   :  { %v2115_v48 = vpop.f32.mrf.mxu2  ;;  %v2029_v37 = vpop.f32.mrf.mxu0  ;;  %v2575_v33 = vsel %vm4616_vm2, %v2570_v61, %v2574_v15  ;;  %v2584_v29 = vrot.slane %v2583_v16, 4  ;;  %v2608_v59 = vshll.u32 %v4082_v40, 16  ;;  %v4087_v16 = vld [vmem:[%s5868_s0 + $0x1f0] sm:$0x11] }
 0x1a7   :  { %v2159_v25 = vpop.f32.mrf.mxu3  ;;  %v2116_v35 = vadd.f32 %v2115_v48, %v2072_v53  ;;  %v2073_v38 = vpop.f32.mrf.mxu1  ;;  %v2749_v53 = vunpack.c.l.b16 %v2533_v56  ;;  %v2555_v8 = vor.u32 %v2554_v22, %v2551_v50  ;;  %v2547_v30 = vsel %vm4616_vm2, %v2542_v7, %v2546_v0 }
 0x1a8   :  { %v2074_v43 = vadd.f32 %v2073_v38, %v2029_v37  ;;  %v4081_v37 = vld [vmem:[%s5868_s0 + $0x1c0] sm:$0xff]  ;;  %v2751_v1 = vunpack.c.l.b16 %v2547_v30  ;;  %v2755_v26 = vunpack.c.l.b16 %v2575_v33  ;;  %v2752_v42 = vunpack.c.h.b16 %v2547_v30 }
 0x1a9   :  { %v2160_v45 = vadd.f32 %v2159_v25, %v2116_v35  ;;  %v2785_v24 = vpack.c.b16 %v2749_v53, %v2745_v36  ;;  %v2556_v27 = vrot.slane %v2555_v8, 4  ;;  %v4085_v38 = vld [vmem:[%s5868_s0 + $0x1e0] sm:$0xff]  ;;  %v2594_v46 = vshll.u32 %v4081_v37, 16 }
 0x1aa   :  { %v2619_v50 = vshrl.u32 %v4085_v38, 16  ;;  %v2622_v58 = vshll.u32 %v4085_v38, 16  ;;  %v2756_v12 = vunpack.c.h.b16 %v2575_v33 }
 0x1ab   :  { %v5741_v51 = vadd.f32 %v2160_v45, %v5423_v63  ;;  %v2586_v63 = vshll.u32 %v4080_v60, 16  ;;  %v2591_v45 = vshrl.u32 %v4081_v37, 16  ;;  %v2628_v37 = vshll.u32 %v4087_v16, 16 }
 0x1ac   :  { %v2621_v61 = vrot.slane %v2619_v50, 4 }
 0x1ad   :  { %v2588_v55 = vrot.slane %v2586_v63, 5  ;;  %v2624_v63 = vrot.slane %v2622_v58, 5  ;;  %v2630_v50 = vrot.slane %v2628_v37, 5 }
 0x1ae   :  { %v2117_v3 = vpop.f32.mrf.mxu2  ;;  %v2032_v31 = vpop.f32.mrf.mxu0 }
 0x1af   :  { %v2161_v14 = vpop.f32.mrf.mxu3  ;;  %v2118_v17 = vadd.f32 %v2117_v3, %v2074_v43  ;;  %v2076_v20 = vpop.f32.mrf.mxu1  ;;  %v4086_v43 = vld [vmem:[%s5868_s0 + $0x1e8] sm:$0xff]  ;;  %v2589_v21 = vsel %vm4616_vm2, %v2584_v29, %v2588_v55  ;;  %v2593_v3 = vrot.slane %v2591_v45, 4  ;;  %v2600_v55 = vshll.u32 %v4083_v9, 16 }
 0x1b0   :  { %v2077_v48 = vadd.f32 %v2076_v20, %v2032_v31  ;;  %v2633_v2 = vshrl.u32 %v4086_v43, 16  ;;  %v2636_v60 = vshll.u32 %v4086_v43, 16  ;;  %v2757_v7 = vunpack.c.l.b16 %v2589_v21  ;;  %v4084_v20 = vld [vmem:[%s5868_s0 + $0x1d8] sm:$0x11] }
 0x1b1   :  { %v2162_v25 = vadd.f32 %v2161_v14, %v2118_v17  ;;  %3043 = vmatmul.bf16.gmra.mxu0 %v2783_v62  ;;  %v2758_v8 = vunpack.c.h.b16 %v2589_v21  ;;  %v2596_v14 = vrot.slane %v2594_v46, 5  ;;  %v2607_v17 = vrot.slane %v2605_v11, 4 }
 0x1b2   :  { %3087 = vmatmul.bf16.gmra.mxu1 %v2784_v4  ;;  %v2610_v31 = vrot.slane %v2608_v59, 5  ;;  %v2625_v43 = vor.u32 %v2624_v63, %v2621_v61  ;;  %v2602_v46 = vrot.slane %v2600_v55, 5 }
 0x1b3   :  { %v5751_v35 = vadd.f32 %v2162_v25, %v5462_v28  ;;  %3131 = vmatmul.bf16.gmra.mxu2 %v2785_v24  ;;  %v2561_v28 = vsel %vm4616_vm2, %v2556_v27, %v2560_v18  ;;  %v2635_v24 = vrot.slane %v2633_v2, 4  ;;  %v2788_v25 = vpack.c.b16 %v2756_v12, %v2752_v42 }
 0x1b4   :  { %3175 = vmatmul.bf16.gmra.mxu3 %v2786_v52  ;;  %v2753_v4 = vunpack.c.l.b16 %v2561_v28  ;;  %v2754_v0 = vunpack.c.h.b16 %v2561_v28  ;;  %v2638_v52 = vrot.slane %v2636_v60, 5  ;;  %v2597_v29 = vor.u32 %v2596_v14, %v2593_v3 }
 0x1b6   :  { %v2120_v56 = vpop.f32.mrf.mxu2  ;;  %v2034_v54 = vpop.f32.mrf.mxu0  ;;  %v2789_v27 = vpack.c.b16 %v2757_v7, %v2753_v4  ;;  %v2790_v33 = vpack.c.b16 %v2758_v8, %v2754_v0  ;;  %v2598_v45 = vrot.slane %v2597_v29, 4 }
 0x1b7   :  { %v2164_v36 = vpop.f32.mrf.mxu3  ;;  %v2121_v22 = vadd.f32 %v2120_v56, %v2077_v48  ;;  %v2078_v57 = vpop.f32.mrf.mxu1  ;;  %v2787_v48 = vpack.c.b16 %v2755_v26, %v2751_v1  ;;  %v2611_v56 = vor.u32 %v2610_v31, %v2607_v17  ;;  %v2639_v1 = vor.u32 %v2638_v52, %v2635_v24 }
 0x1b8   :  { %v2079_v53 = vadd.f32 %v2078_v57, %v2034_v54  ;;  %v2626_v54 = vrot.slane %v2625_v43, 4  ;;  %v2603_v2 = vsel %vm4616_vm2, %v2598_v45, %v2602_v46 }
 0x1b9   :  { %v2165_v62 = vadd.f32 %v2164_v36, %v2121_v22  ;;  %v2614_v36 = vshll.u32 %v4084_v20, 16  ;;  %v2612_v57 = vrot.slane %v2611_v56, 4  ;;  %v2640_v11 = vrot.slane %v2639_v1, 4 }
 0x1ba   :  { %v2631_v7 = vsel %vm4616_vm2, %v2626_v54, %v2630_v50  ;;  %v2759_v3 = vunpack.c.l.b16 %v2603_v2  ;;  %v2760_v61 = vunpack.c.h.b16 %v2603_v2 }
 0x1bb   :  { %v5773_v15 = vadd.f32 %v2165_v62, %v5468_v32  ;;  %v4088_v32 = vld [vmem:[%s5868_s0 + $0x1f8] sm:$0x11]  ;;  %v2616_v58 = vrot.slane %v2614_v36, 5  ;;  %v2763_v14 = vunpack.c.l.b16 %v2631_v7  ;;  %v2764_v16 = vunpack.c.h.b16 %v2631_v7 }
 0x1bc   :  { %v2642_v26 = vshll.u32 %v4088_v32, 16 }
 0x1be   :  { %v2122_v18 = vpop.f32.mrf.mxu2  ;;  %v2037_v40 = vpop.f32.mrf.mxu0  ;;  %v2644_v59 = vrot.slane %v2642_v26, 5 }
 0x1bf   :  { %v2166_v30 = vpop.f32.mrf.mxu3  ;;  %v2123_v38 = vadd.f32 %v2122_v18, %v2079_v53  ;;  %v2081_v28 = vpop.f32.mrf.mxu1 }
 0x1c0   :  { %v2082_v21 = vadd.f32 %v2081_v28, %v2037_v40  ;;  %v2645_v8 = vsel %vm4616_vm2, %v2640_v11, %v2644_v59 }
 0x1c1   :  { %v2167_v42 = vadd.f32 %v2166_v30, %v2123_v38  ;;  %3048 = vmatmul.bf16.gmra.mxu0 %v2787_v48  ;;  %v2765_v31 = vunpack.c.l.b16 %v2645_v8  ;;  %v2766_v24 = vunpack.c.h.b16 %v2645_v8 }
 0x1c2   :  { %3092 = vmatmul.bf16.gmra.mxu1 %v2788_v25  ;;  %v2791_v25 = vpack.c.b16 %v2763_v14, %v2759_v3 }
 0x1c3   :  { %v5785_v22 = vadd.f32 %v2167_v42, %v5507_v5  ;;  %3136 = vmatmul.bf16.gmra.mxu2 %v2789_v27  ;;  %v2617_v5 = vsel %vm4616_vm2, %v2612_v57, %v2616_v58  ;;  %v2792_v27 = vpack.c.b16 %v2764_v16, %v2760_v61 }
 0x1c4   :  { %3180 = vmatmul.bf16.gmra.mxu3 %v2790_v33  ;;  %v2761_v63 = vunpack.c.l.b16 %v2617_v5  ;;  %v2762_v20 = vunpack.c.h.b16 %v2617_v5 }
 0x1c6   :  { %v2125_v53 = vpop.f32.mrf.mxu2  ;;  %v2039_v62 = vpop.f32.mrf.mxu0  ;;  %v2793_v30 = vpack.c.b16 %v2765_v31, %v2761_v63  ;;  %v2794_v33 = vpack.c.b16 %v2766_v24, %v2762_v20 }
 0x1c7   :  { %v2169_v12 = vpop.f32.mrf.mxu3  ;;  %v2126_v60 = vadd.f32 %v2125_v53, %v2082_v21  ;;  %v2083_v4 = vpop.f32.mrf.mxu1 }
 0x1c8   :  { %v2084_v0 = vadd.f32 %v2083_v4, %v2039_v62 }
 0x1c9   :  { %v2170_v9 = vadd.f32 %v2169_v12, %v2126_v60 }
 0x1cb   :  { %v5796_v17 = vadd.f32 %v2170_v9, %v5543_v41 }
 0x1ce   :  { %v2127_v52 = vpop.f32.mrf.mxu2  ;;  %v2042_v18 = vpop.f32.mrf.mxu0 }
 0x1cf   :  { %v2171_v48 = vpop.f32.mrf.mxu3  ;;  %v2128_v32 = vadd.f32 %v2127_v52, %v2084_v0  ;;  %v2086_v47 = vpop.f32.mrf.mxu1  ;;  %v5817_v52 = vld [vmem:[%s5869_s2] ss:$0 sm:$0xff] }
 0x1d0   :  { %v2087_v29 = vadd.f32 %v2086_v47, %v2042_v18 }
 0x1d1   :  { %v2172_v55 = vadd.f32 %v2171_v48, %v2128_v32  ;;  %3053 = vmatmul.bf16.gmra.mxu0 %v2791_v25 }
 0x1d2   :  { %3097 = vmatmul.bf16.gmra.mxu1 %v2792_v27 }
 0x1d3   :  { %v5799_v37 = vadd.f32 %v2172_v55, %v5564_v19  ;;  %3141 = vmatmul.bf16.gmra.mxu2 %v2793_v30 }
 0x1d4   :  { %3185 = vmatmul.bf16.gmra.mxu3 %v2794_v33 }
 0x1d6   :  { %v2130_v41 = vpop.f32.mrf.mxu2  ;;  %v2044_v28 = vpop.f32.mrf.mxu0 }
 0x1d7   :  { %v2174_v38 = vpop.f32.mrf.mxu3  ;;  %v2131_v40 = vadd.f32 %v2130_v41, %v2087_v29  ;;  %v2088_v43 = vpop.f32.mrf.mxu1 }
 0x1d8   :  { %v2089_v56 = vadd.f32 %v2088_v43, %v2044_v28 }
 0x1d9   :  { %v2175_v36 = vadd.f32 %v2174_v38, %v2131_v40 }
 0x1db   :  { %v5802_v21 = vadd.f32 %v2175_v36, %v5587_v23 }
 0x1de   :  { %v2132_v1 = vpop.f32.mrf.mxu2  ;;  %v2047_v45 = vpop.f32.mrf.mxu0 }
 0x1df   :  { %v2176_v26 = vpop.f32.mrf.mxu3  ;;  %v2133_v42 = vadd.f32 %v2132_v1, %v2089_v56  ;;  %v2091_v46 = vpop.f32.mrf.mxu1 }
 0x1e0   :  { %v2092_v50 = vadd.f32 %v2091_v46, %v2047_v45 }
 0x1e1   :  { %v2177_v19 = vadd.f32 %v2176_v26, %v2133_v42 }
 0x1e3   :  { %v5805_v54 = vadd.f32 %v2177_v19, %v5604_v49 }
 0x1e6   :  { %v2135_v57 = vpop.f32.mrf.mxu2  ;;  %v2049_v59 = vpop.f32.mrf.mxu0 }
 0x1e7   :  { %v2179_v58 = vpop.f32.mrf.mxu3  ;;  %v2136_v11 = vadd.f32 %v2135_v57, %v2092_v50  ;;  %v2093_v53 = vpop.f32.mrf.mxu1 }
 0x1e8   :  { %v2094_v12 = vadd.f32 %v2093_v53, %v2049_v59 }
 0x1e9   :  { %v2180_v2 = vadd.f32 %v2179_v58, %v2136_v11 }
 0x1eb   :  { %v5808_v23 = vadd.f32 %v2180_v2, %v5625_v39 }
 0x1ee   :  { %v2137_v60 = vpop.f32.mrf.mxu2  ;;  %v3024_v7 = vpop.f32.mrf.mxu0 }
 0x1ef   :  { %v2181_v62 = vpop.f32.mrf.mxu3  ;;  %v2138_v4 = vadd.f32 %v2137_v60, %v2094_v12  ;;  %v3068_v5 = vpop.f32.mrf.mxu1 }
 0x1f0   :  { %v3069_v49 = vadd.f32 %v3068_v5, %v3024_v7 }
 0x1f1   :  { %v2182_v0 = vadd.f32 %v2181_v62, %v2138_v4 }
 0x1f3   :  { %v5811_v8 = vadd.f32 %v2182_v0, %v5639_v10 }
 0x1f6   :  { %v3112_v9 = vpop.f32.mrf.mxu2  ;;  %v3026_v61 = vpop.f32.mrf.mxu0 }
 0x1f7   :  { %v3156_v3 = vpop.f32.mrf.mxu3  ;;  %v3113_v14 = vadd.f32 %v3112_v9, %v3069_v49  ;;  %v3070_v16 = vpop.f32.mrf.mxu1 }
 0x1f8   :  { %v3071_v31 = vadd.f32 %v3070_v16, %v3026_v61 }
 0x1f9   :  { %v3157_v63 = vadd.f32 %v3156_v3, %v3113_v14 }
 0x1fb   :  { %v3191_v24 = vadd.f32 %v3157_v63, %v5665_v6 }
 0x1fd   :  { %v3209_v32 = vadd.f32 %v5817_v52, %v3191_v24 }
 0x1fe   :  { %v3114_v20 = vpop.f32.mrf.mxu2  ;;  %v3029_v10 = vpop.f32.mrf.mxu0 }
 0x1ff   :  { %v3158_v39 = vpop.f32.mrf.mxu3  ;;  %v3115_v48 = vadd.f32 %v3114_v20, %v3071_v31  ;;  %v3073_v25 = vpop.f32.mrf.mxu1  ;;  %v3223_v55 = vmax.f32 %v3209_v32, 0.0 }
 0x200   :  { %v3074_v47 = vadd.f32 %v3073_v25, %v3029_v10 }
 0x201   :  { %v3159_v27 = vadd.f32 %v3158_v39, %v3115_v48 }
 0x203   :  { %v3192_v18 = vadd.f32 %v3159_v27, %v5684_v44 }
 0x205   :  { %v3210_v30 = vadd.f32 %v5817_v52, %v3192_v18 }
 0x206   :  { %v3117_v33 = vpop.f32.mrf.mxu2  ;;  %v3031_v38 = vpop.f32.mrf.mxu0 }
 0x207   :  { %v3161_v29 = vpop.f32.mrf.mxu3  ;;  %v3224_v6 = vmax.f32 %v3210_v30, 0.0  ;;  %v3118_v41 = vadd.f32 %v3117_v33, %v3074_v47  ;;  %v3075_v40 = vpop.f32.mrf.mxu1 }
 0x208   :  { %v3076_v56 = vadd.f32 %v3075_v40, %v3031_v38 }
 0x209   :  { %v4468_v28 = vpack.c.bf16 %v3224_v6, %v3223_v55  ;;  %v3162_v43 = vadd.f32 %v3161_v29, %v3118_v41 }
 0x20b   :  { %4469 = vst [vmem:[%s5870_s3] sm:$0xff] %v4468_v28   ;;  %v3193_v44 = vadd.f32 %v3162_v43, %v5703_v34 }
 0x20d   :  { %v3211_v50 = vadd.f32 %v5817_v52, %v3193_v44 }
 0x20e   :  { %v3119_v36 = vpop.f32.mrf.mxu2  ;;  %v3034_v42 = vpop.f32.mrf.mxu0 }
 0x20f   :  { %v3163_v1 = vpop.f32.mrf.mxu3  ;;  %v3120_v26 = vadd.f32 %v3119_v36, %v3076_v56  ;;  %v3078_v45 = vpop.f32.mrf.mxu1  ;;  %v3225_v53 = vmax.f32 %v3211_v50, 0.0 }
 0x210   :  { %v3079_v57 = vadd.f32 %v3078_v45, %v3034_v42 }
 0x211   :  { %v3164_v46 = vadd.f32 %v3163_v1, %v3120_v26 }
 0x213   :  { %v3194_v19 = vadd.f32 %v3164_v46, %v5720_v13 }
 0x215   :  { %v3212_v58 = vadd.f32 %v5817_v52, %v3194_v19 }
 0x216   :  { %v3122_v11 = vpop.f32.mrf.mxu2  ;;  %v3036_v60 = vpop.f32.mrf.mxu0 }
 0x217   :  { %v3166_v59 = vpop.f32.mrf.mxu3  ;;  %v3226_v12 = vmax.f32 %v3212_v58, 0.0  ;;  %v3123_v2 = vadd.f32 %v3122_v11, %v3079_v57  ;;  %v3080_v62 = vpop.f32.mrf.mxu1 }
 0x218   :  { %v3081_v7 = vadd.f32 %v3080_v62, %v3036_v60 }
 0x219   :  { %v4473_v4 = vpack.c.bf16 %v3226_v12, %v3225_v53  ;;  %v3167_v34 = vadd.f32 %v3166_v59, %v3123_v2 }
 0x21b   :  { %4500 = vst [vmem:[%s5870_s3 + $0x8] sm:$0xff] %v4473_v4   ;;  %v3195_v13 = vadd.f32 %v3167_v34, %v5741_v51 }
 0x21d   :  { %v3213_v61 = vadd.f32 %v5817_v52, %v3195_v13 }
 0x21e   :  { %v3124_v5 = vpop.f32.mrf.mxu2  ;;  %v3039_v9 = vpop.f32.mrf.mxu0 }
 0x21f   :  { %v3168_v0 = vpop.f32.mrf.mxu3  ;;  %v3125_v49 = vadd.f32 %v3124_v5, %v3081_v7  ;;  %v3083_v3 = vpop.f32.mrf.mxu1  ;;  %v3227_v24 = vmax.f32 %v3213_v61, 0.0 }
 0x220   :  { %v3084_v63 = vadd.f32 %v3083_v3, %v3039_v9 }
 0x221   :  { %v3169_v14 = vadd.f32 %v3168_v0, %v3125_v49 }
 0x223   :  { %v3196_v16 = vadd.f32 %v3169_v14, %v5751_v35 }
 0x225   :  { %v3214_v31 = vadd.f32 %v5817_v52, %v3196_v16 }
 0x226   :  { %v3127_v20 = vpop.f32.mrf.mxu2  ;;  %v3041_v25 = vpop.f32.mrf.mxu0 }
 0x227   :  { %v3171_v39 = vpop.f32.mrf.mxu3  ;;  %v3228_v48 = vmax.f32 %v3214_v31, 0.0  ;;  %v3128_v10 = vadd.f32 %v3127_v20, %v3084_v63  ;;  %v3085_v27 = vpop.f32.mrf.mxu1 }
 0x228   :  { %v3086_v18 = vadd.f32 %v3085_v27, %v3041_v25 }
 0x229   :  { %v4478_v32 = vpack.c.bf16 %v3228_v48, %v3227_v24  ;;  %v3172_v51 = vadd.f32 %v3171_v39, %v3128_v10 }
 0x22b   :  { %4501 = vst [vmem:[%s5870_s3 + $0x10] sm:$0xff] %v4478_v32   ;;  %v3197_v35 = vadd.f32 %v3172_v51, %v5773_v15 }
 0x22d   :  { %v3215_v41 = vadd.f32 %v5817_v52, %v3197_v35 }
 0x22e   :  { %v3129_v47 = vpop.f32.mrf.mxu2  ;;  %v3044_v29 = vpop.f32.mrf.mxu0 }
 0x22f   :  { %v3173_v30 = vpop.f32.mrf.mxu3  ;;  %v3130_v33 = vadd.f32 %v3129_v47, %v3086_v18  ;;  %v3088_v55 = vpop.f32.mrf.mxu1  ;;  %v3229_v36 = vmax.f32 %v3215_v41, 0.0 }
 0x230   :  { %v3089_v40 = vadd.f32 %v3088_v55, %v3044_v29 }
 0x231   :  { %v3174_v6 = vadd.f32 %v3173_v30, %v3130_v33 }
 0x233   :  { %v3198_v38 = vadd.f32 %v3174_v6, %v5785_v22 }
 0x235   :  { %v3216_v28 = vadd.f32 %v5817_v52, %v3198_v38 }
 0x236   :  { %v3132_v43 = vpop.f32.mrf.mxu2  ;;  %v3046_v26 = vpop.f32.mrf.mxu0 }
 0x237   :  { %v3176_v56 = vpop.f32.mrf.mxu3  ;;  %v3230_v1 = vmax.f32 %v3216_v28, 0.0  ;;  %v3133_v44 = vadd.f32 %v3132_v43, %v3089_v40  ;;  %v3090_v42 = vpop.f32.mrf.mxu1 }
 0x238   :  { %v3091_v46 = vadd.f32 %v3090_v42, %v3046_v26 }
 0x239   :  { %v4483_v45 = vpack.c.bf16 %v3230_v1, %v3229_v36  ;;  %v3177_v15 = vadd.f32 %v3176_v56, %v3133_v44 }
 0x23b   :  { %4502 = vst [vmem:[%s5870_s3 + $0x18] sm:$0xff] %v4483_v45   ;;  %v3199_v22 = vadd.f32 %v3177_v15, %v5796_v17 }
 0x23d   :  { %v3217_v53 = vadd.f32 %v5817_v52, %v3199_v22 }
 0x23e   :  { %v3134_v50 = vpop.f32.mrf.mxu2  ;;  %v3049_v58 = vpop.f32.mrf.mxu0 }
 0x23f   :  { %v3178_v19 = vpop.f32.mrf.mxu3  ;;  %v3135_v57 = vadd.f32 %v3134_v50, %v3091_v46  ;;  %v3093_v11 = vpop.f32.mrf.mxu1  ;;  %v3231_v34 = vmax.f32 %v3217_v53, 0.0 }
 0x240   :  { %v3094_v2 = vadd.f32 %v3093_v11, %v3049_v58 }
 0x241   :  { %v3179_v59 = vadd.f32 %v3178_v19, %v3135_v57 }
 0x243   :  { %v3200_v12 = vadd.f32 %v3179_v59, %v5799_v37 }
 0x245   :  { %v3218_v60 = vadd.f32 %v5817_v52, %v3200_v12 }
 0x246   :  { %v3137_v62 = vpop.f32.mrf.mxu2  ;;  %v3051_v0 = vpop.f32.mrf.mxu0 }
 0x247   :  { %v3181_v4 = vpop.f32.mrf.mxu3  ;;  %v3232_v7 = vmax.f32 %v3218_v60, 0.0  ;;  %v3138_v5 = vadd.f32 %v3137_v62, %v3094_v2  ;;  %v3095_v13 = vpop.f32.mrf.mxu1 }
 0x248   :  { %v3096_v9 = vadd.f32 %v3095_v13, %v3051_v0 }
 0x249   :  { %v4488_v49 = vpack.c.bf16 %v3232_v7, %v3231_v34  ;;  %v3182_v17 = vadd.f32 %v3181_v4, %v3138_v5 }
 0x24b   :  { %4503 = vst [vmem:[%s5870_s3 + $0x20] sm:$0xff] %v4488_v49   ;;  %v3201_v37 = vadd.f32 %v3182_v17, %v5802_v21 }
 0x24d   :  { %v3219_v20 = vadd.f32 %v5817_v52, %v3201_v37 }
 0x24e   :  { %v3139_v3 = vpop.f32.mrf.mxu2  ;;  %v3054_v16 = vpop.f32.mrf.mxu0 }
 0x24f   :  { %v3183_v14 = vpop.f32.mrf.mxu3  ;;  %v3140_v61 = vadd.f32 %v3139_v3, %v3096_v9  ;;  %v3098_v63 = vpop.f32.mrf.mxu1  ;;  %v3233_v27 = vmax.f32 %v3219_v20, 0.0 }
 0x250   :  { %v3099_v24 = vadd.f32 %v3098_v63, %v3054_v16 }
 0x251   :  { %v3184_v31 = vadd.f32 %v3183_v14, %v3140_v61 }
 0x253   :  { %v3202_v39 = vadd.f32 %v3184_v31, %v5805_v54 }
 0x255   :  { %v3220_v48 = vadd.f32 %v5817_v52, %v3202_v39 }
 0x256   :  { %v3142_v10 = vpop.f32.mrf.mxu2  ;;  %v3056_v47 = vpop.f32.mrf.mxu0 }
 0x257   :  { %v3186_v25 = vpop.f32.mrf.mxu3  ;;  %v3234_v32 = vmax.f32 %v3220_v48, 0.0  ;;  %v3143_v51 = vadd.f32 %v3142_v10, %v3099_v24  ;;  %v3100_v30 = vpop.f32.mrf.mxu1 }
 0x258   :  { %v3101_v35 = vadd.f32 %v3100_v30, %v3056_v47 }
 0x259   :  { %v4493_v18 = vpack.c.bf16 %v3234_v32, %v3233_v27  ;;  %v3187_v21 = vadd.f32 %v3186_v25, %v3143_v51 }
 0x25b   :  { %4504 = vst [vmem:[%s5870_s3 + $0x28] sm:$0xff] %v4493_v18   ;;  %v3203_v54 = vadd.f32 %v3187_v21, %v5808_v23 }
 0x25d   :  { %v3221_v41 = vadd.f32 %v5817_v52, %v3203_v54 }
 0x25e   :  { %v3144_v33 = vpop.f32.mrf.mxu2 }
 0x25f   :  { %v3145_v29 = vadd.f32 %v3144_v33, %v3101_v35  ;;  %v3188_v55 = vpop.f32.mrf.mxu3  ;;  %v3235_v28 = vmax.f32 %v3221_v41, 0.0 }
 0x261   :  { %v3189_v6 = vadd.f32 %v3188_v55, %v3145_v29 }
 0x263   :  { %v3204_v38 = vadd.f32 %v3189_v6, %v5811_v8 }
 0x265   :  { %v3222_v40 = vadd.f32 %v5817_v52, %v3204_v38 }
 0x267   :  { %v3236_v43 = vmax.f32 %v3222_v40, 0.0 }
 0x269   :  { %v4498_v56 = vpack.c.bf16 %v3236_v43, %v3235_v28 }
 0x26b   :  { %4505 = vst [vmem:[%s5870_s3 + $0x30] sm:$0xff] %v4498_v56  }

// kernel: cnn_dqn_a_forward.8
= control target key start
LH: loop header
LB: loop body
LE: loop exit
PB: predicated region body
PF: predicated region fallthrough
CT: control target
= control target key end

     0   :  { %vm50_vm0 = vsmask.f32 3328  ;;  %vm51_vm1 = vsmask.f32 7440  ;;  %vm454_vm3 = vcmask 1042432   ;;  %vm455_vm4 = vcmask 1046532   ;;  %s3622_s1 = inlined_call_operand.vmem [shape: bf16[3,3,128,128], index: 1, kind: input, shape index: {}]   ;;  %s3623_s0 = inlined_call_operand.vmem [shape: bf16[2,7,10,128], index: 0, kind: input, shape index: {}]   ;;  %s3624_s2 = inlined_call_operand.vmem [shape: f32[1,128], index: 2, kind: input, shape index: {}]   ;;  %s3625_s3 = inlined_call_operand.vmem [shape: bf16[80,128], index: 3, kind: output, shape index: {}]  }
   0x1   :  { %v2556_v0 = vld [vmem:[%s3622_s1 + $0x78] sm:$0xff]  ;;  %v2555_v1 = vld [vmem:[%s3622_s1 + $0x70] sm:$0xff]  ;;  %v14_v3 = vld [vmem:[%s3623_s0] sm:$0xf] }
   0x2   :  { %278 = vmatpush.bf16.msra.mxu0 %v2556_v0  ;;  %2652 = vmatpush.bf16.msra.mxu1 %v2556_v0  ;;  %v2577_v2 = vld [vmem:[%s3622_s1 + $0xf8] sm:$0xff]  ;;  %v2576_v4 = vld [vmem:[%s3622_s1 + $0xf0] sm:$0xff]  ;;  %v15_v5 = vld [vmem:[%s3623_s0 + $0x8] sm:$0xf]  ;;  %v54_v7 = vshrl.u32 %v14_v3, 16  ;;  %v57_v8 = vshll.u32 %v14_v3, 16 }
   0x3   :  { %2653 = vmatpush.bf16.msra.mxu2 %v2556_v0  ;;  %732 = vmatpush.bf16.msra.mxu3 %v2577_v2  ;;  %v2710_v6 = vld [vmem:[%s3623_s0 + $0x4] sm:$0x1]  ;;  %v68_v9 = vshrl.u32 %v15_v5, 16  ;;  %v18_v10 = vld [vmem:[%s3623_s0 + $0x20] sm:$0xf]  ;;  %v2554_v11 = vld [vmem:[%s3622_s1 + $0x68] sm:$0xff] }
   0x4   :  { %v2721_v12 = vld [vmem:[%s3623_s0 + $0xc] sm:$0x1]  ;;  %v71_v13 = vshll.u32 %v15_v5, 16  ;;  %v19_v14 = vld [vmem:[%s3623_s0 + $0x38] sm:$0xf]  ;;  %v56_v15 = vrot.slane %v54_v7, 4  ;;  %vm2771_vm2 = vmor %vm50_vm0, %vm51_vm1 }
   0x5   :  { %v59_v16 = vrot.slane %v57_v8, 5  ;;  %v2729_v17 = vld [vmem:[%s3623_s0 + $0x24] sm:$0x1]  ;;  %v70_v18 = vrot.slane %v68_v9, 4  ;;  %v110_v20 = vshrl.u32 %v18_v10, 16  ;;  %v113_v21 = vshll.u32 %v18_v10, 16  ;;  %vm2953_vm5 = vmor %vm454_vm3, %vm455_vm4 }
   0x6   :  { %279 = vmatpush.bf16.msra.mxu0 %v2555_v1  ;;  %2654 = vmatpush.bf16.msra.mxu1 %v2555_v1  ;;  %v73_v19 = vrot.slane %v71_v13, 5  ;;  %v2575_v22 = vld [vmem:[%s3622_s1 + $0xe8] sm:$0xff]  ;;  %v2553_v23 = vld [vmem:[%s3622_s1 + $0x60] sm:$0xff]  ;;  %v63_v24 = vshll.u32 %v2710_v6, 16  ;;  %v77_v25 = vshll.u32 %v2721_v12, 16  ;;  %v124_v26 = vshrl.u32 %v19_v14, 16 }
   0x7   :  { %2655 = vmatpush.bf16.msra.mxu2 %v2555_v1  ;;  %733 = vmatpush.bf16.msra.mxu3 %v2576_v4  ;;  %v127_v27 = vshll.u32 %v19_v14, 16  ;;  %v60_v28 = vor.u32 %v59_v16, %v56_v15  ;;  %v2742_v29 = vld [vmem:[%s3623_s0 + $0x3c] sm:$0x1]  ;;  %v112_v30 = vrot.slane %v110_v20, 4  ;;  %v115_v31 = vrot.slane %v113_v21, 5  ;;  %v2574_v38 = vld [vmem:[%s3622_s1 + $0xe0] sm:$0xff] }
   0x8   :  { %v22_v32 = vld [vmem:[%s3623_s0 + $0x50] sm:$0xf]  ;;  %v119_v33 = vshll.u32 %v2729_v17, 16  ;;  %v126_v34 = vrot.slane %v124_v26, 4  ;;  %v74_v36 = vor.u32 %v73_v19, %v70_v18  ;;  %v2754_v39 = vld [vmem:[%s3623_s0 + $0x54] sm:$0x1] }
   0x9   :  { %v129_v35 = vrot.slane %v127_v27, 5  ;;  %v116_v37 = vor.u32 %v115_v31, %v112_v30  ;;  %v133_v41 = vshll.u32 %v2742_v29, 16  ;;  %v23_v42 = vld [vmem:[%s3623_s0 + $0x58] sm:$0xf]  ;;  %v166_v43 = vshrl.u32 %v22_v32, 16  ;;  %v2551_v0 = vld [vmem:[%s3622_s1 + $0x50] sm:$0xff] }
   0xa   :  { %280 = vmatpush.bf16.msra.mxu0 %v2554_v11  ;;  %2656 = vmatpush.bf16.msra.mxu1 %v2554_v11  ;;  %v169_v44 = vshll.u32 %v22_v32, 16  ;;  %v2552_v45 = vld [vmem:[%s3622_s1 + $0x58] sm:$0xff]  ;;  %v61_v46 = vrot.slane %v60_v28, 4  ;;  %v65_v47 = vrot.slane %v63_v24, 5  ;;  %v79_v48 = vrot.slane %v77_v25, 5  ;;  %v2572_v14 = vld [vmem:[%s3622_s1 + $0xd0] sm:$0xff] }
   0xb   :  { %2657 = vmatpush.bf16.msra.mxu2 %v2554_v11  ;;  %734 = vmatpush.bf16.msra.mxu3 %v2575_v22  ;;  %v130_v40 = vor.u32 %v129_v35, %v126_v34  ;;  %v121_v49 = vrot.slane %v119_v33, 5  ;;  %v2766_v50 = vld [vmem:[%s3623_s0 + $0x5c] sm:$0x1]  ;;  %v168_v51 = vrot.slane %v166_v43, 4  ;;  %v175_v53 = vshll.u32 %v2754_v39, 16  ;;  %v2550_v22 = vld [vmem:[%s3622_s1 + $0x48] sm:$0xff] }
   0xc   :  { %v171_v52 = vrot.slane %v169_v44, 5  ;;  %v75_v55 = vrot.slane %v74_v36, 4  ;;  %v117_v56 = vrot.slane %v116_v37, 4  ;;  %v180_v57 = vshrl.u32 %v23_v42, 16  ;;  %v2573_v59 = vld [vmem:[%s3622_s1 + $0xd8] sm:$0xff]  ;;  %v2571_v35 = vld [vmem:[%s3622_s1 + $0xc8] sm:$0xff] }
   0xd   :  { %v183_v58 = vshll.u32 %v23_v42, 16  ;;  %v131_v60 = vrot.slane %v130_v40, 4  ;;  %v135_v61 = vrot.slane %v133_v41, 5  ;;  %v16_v63 = vld [vmem:[%s3623_s0 + $0x10] sm:$0xf]  ;;  %v189_v3 = vshll.u32 %v2766_v50, 16 }
   0xe   :  { %281 = vmatpush.bf16.msra.mxu0 %v2553_v23  ;;  %2658 = vmatpush.bf16.msra.mxu1 %v2553_v23  ;;  %v172_v62 = vor.u32 %v171_v52, %v168_v51  ;;  %v182_v1 = vrot.slane %v180_v57, 4  ;;  %v17_v4 = vld [vmem:[%s3623_s0 + $0x18] sm:$0xf]  ;;  %v66_v5 = vsel %vm2771_vm2, %v61_v46, %v65_v47  ;;  %v177_v8 = vrot.slane %v175_v53, 5  ;;  %v20_v15 = vld [vmem:[%s3623_s0 + $0x40] sm:$0xf] }
   0xf   :  { %2659 = vmatpush.bf16.msra.mxu2 %v2553_v23  ;;  %735 = vmatpush.bf16.msra.mxu3 %v2574_v38  ;;  %v185_v2 = vrot.slane %v183_v58, 5  ;;  %v80_v9 = vsel %vm2771_vm2, %v75_v55, %v79_v48  ;;  %v122_v10 = vsel %vm2771_vm2, %v117_v56, %v121_v49  ;;  %v191_v13 = vrot.slane %v189_v3, 5  ;;  %v21_v21 = vld [vmem:[%s3623_s0 + $0x48] sm:$0xf]  ;;  %v2818_v36 = vld [vmem:[%s3623_s0 + $0x14] sm:$0x1] }
  0x10   :  { %v173_v7 = vrot.slane %v172_v62, 4  ;;  %v136_v16 = vsel %vm2771_vm2, %v131_v60, %v135_v61  ;;  %v82_v18 = vshrl.u32 %v16_v63, 16  ;;  %v85_v19 = vshll.u32 %v16_v63, 16  ;;  %v2549_v42 = vld [vmem:[%s3622_s1 + $0x40] sm:$0xff]  ;;  %v2548_v43 = vld [vmem:[%s3622_s1 + $0x38] sm:$0xff] }
  0x11   :  { %v186_v11 = vor.u32 %v185_v2, %v182_v1  ;;  %v96_v20 = vshrl.u32 %v17_v4, 16  ;;  %v210_v23 = vunpack.c.l.b16 %v66_v5  ;;  %v99_v25 = vshll.u32 %v17_v4, 16  ;;  %v2829_v46 = vld [vmem:[%s3623_s0 + $0x1c] sm:$0x1]  ;;  %v2834_v49 = vld [vmem:[%s3623_s0 + $0x44] sm:$0x1] }
  0x12   :  { %282 = vmatpush.bf16.msra.mxu0 %v2552_v45  ;;  %2660 = vmatpush.bf16.msra.mxu1 %v2552_v45  ;;  %v211_v26 = vunpack.c.l.b16 %v80_v9  ;;  %v178_v27 = vsel %vm2771_vm2, %v173_v7, %v177_v8  ;;  %v138_v28 = vshrl.u32 %v20_v15, 16  ;;  %v141_v30 = vshll.u32 %v20_v15, 16  ;;  %v2839_v51 = vld [vmem:[%s3623_s0 + $0x4c] sm:$0x1]  ;;  %v2564_v55 = vld [vmem:[%s3622_s1 + $0xb8] sm:$0xff]  ;;  %v2547_v8 = vld [vmem:[%s3622_s1 + $0x30] sm:$0xff] }
  0x13   :  { %2661 = vmatpush.bf16.msra.mxu2 %v2552_v45  ;;  %736 = vmatpush.bf16.msra.mxu3 %v2573_v59  ;;  %v187_v24 = vrot.slane %v186_v11, 4  ;;  %v214_v31 = vunpack.c.l.b16 %v122_v10  ;;  %v215_v32 = vunpack.c.l.b16 %v136_v16  ;;  %v152_v34 = vshrl.u32 %v21_v21, 16  ;;  %v2585_v58 = vld [vmem:[%s3622_s1 + $0x138] sm:$0xff]  ;;  %v2136_v5 = vld [vmem:[%s3623_s0 + $0x8] sm:$0xf]  ;;  %v2563_v11 = vld [vmem:[%s3622_s1 + $0xb0] sm:$0xff] }
  0x14   :  { %v84_v37 = vrot.slane %v82_v18, 4  ;;  %v87_v38 = vrot.slane %v85_v19, 5  ;;  %v98_v40 = vrot.slane %v96_v20, 4  ;;  %v101_v41 = vrot.slane %v99_v25, 5  ;;  %v2565_v7 = vld [vmem:[%s3623_s0 + $0xc] sm:$0xf0] }
  0x15   :  { %v192_v33 = vsel %vm2771_vm2, %v187_v24, %v191_v13  ;;  %v218_v44 = vunpack.c.l.b16 %v178_v27  ;;  %v140_v47 = vrot.slane %v138_v28, 4  ;;  %v143_v48 = vrot.slane %v141_v30, 5  ;;  %v2614_v10 = vld [vmem:[%s3622_s1 + $0x1f8] sm:$0xff]  ;;  %v2584_v13 = vld [vmem:[%s3622_s1 + $0x130] sm:$0xff]  ;;  %v2186_v24 = vld [vmem:[%s3623_s0 + $0x8] sm:$0xf] }
  0x16   :  { %283 = vmatpush.bf16.msra.mxu0 %v2551_v0  ;;  %2662 = vmatpush.bf16.msra.mxu1 %v2551_v0  ;;  %v219_v45 = vunpack.c.l.b16 %v192_v33  ;;  %v154_v52 = vrot.slane %v152_v34, 4  ;;  %v155_v53 = vshll.u32 %v21_v21, 16  ;;  %v220_v56 = vpack.c.b16 %v211_v26, %v210_v23  ;;  %v2546_v25 = vld [vmem:[%s3622_s1 + $0x28] sm:$0xff]  ;;  %v2188_v26 = vld [vmem:[%s3623_s0 + $0x10] sm:$0xf] }
  0x17   :  { %2663 = vmatpush.bf16.msra.mxu2 %v2551_v0  ;;  %737 = vmatpush.bf16.msra.mxu3 %v2572_v14  ;;  %v222_v57 = vpack.c.b16 %v215_v32, %v214_v31  ;;  %v91_v59 = vshll.u32 %v2818_v36, 16  ;;  %v88_v60 = vor.u32 %v87_v38, %v84_v37  ;;  %v102_v61 = vor.u32 %v101_v41, %v98_v40  ;;  %v2570_v0 = vld [vmem:[%s3622_s1 + $0xc0] sm:$0xff]  ;;  %v2613_v27 = vld [vmem:[%s3622_s1 + $0x1f0] sm:$0xff]  ;;  %v2562_v28 = vld [vmem:[%s3622_s1 + $0xa8] sm:$0xff] }
  0x18   :  { %v105_v62 = vshll.u32 %v2829_v46, 16  ;;  %v157_v63 = vrot.slane %v155_v53, 5  ;;  %v224_v1 = vpack.c.b16 %v219_v45, %v218_v44  ;;  %v144_v2 = vor.u32 %v143_v48, %v140_v47  ;;  %v2583_v30 = vld [vmem:[%s3622_s1 + $0x128] sm:$0xff]  ;;  %v2545_v41 = vld [vmem:[%s3622_s1 + $0x20] sm:$0xff]  ;;  %v2474_v54 = vld [vmem:[%s3623_s0 + $0x50] sm:$0xe] }
  0x19   :  { %v147_v3 = vshll.u32 %v2834_v49, 16  ;;  %v161_v4 = vshll.u32 %v2839_v51, 16  ;;  %v93_v14 = vrot.slane %v91_v59, 5  ;;  %v89_v15 = vrot.slane %v88_v60, 4  ;;  %v2918_v59 = vld [vmem:[%s3623_s0 + $0x14] sm:$0x1] }
  0x1a   :  { %284 = vmatpush.bf16.msra.mxu0 %v2550_v22  ;;  %2664 = vmatpush.bf16.msra.mxu1 %v2550_v22  ;;  %v158_v9 = vor.u32 %v157_v63, %v154_v52  ;;  %v103_v16 = vrot.slane %v102_v61, 4  ;;  %v107_v18 = vrot.slane %v105_v62, 5  ;;  %v2137_v19 = vor.u32 %v2565_v7, %v2136_v5  ;;  %v2560_v60 = vld [vmem:[%s3622_s1 + $0x98] sm:$0xff] }
  0x1b   :  { %2665 = vmatpush.bf16.msra.mxu2 %v2550_v22  ;;  %738 = vmatpush.bf16.msra.mxu3 %v2571_v35  ;;  %v145_v20 = vrot.slane %v144_v2, 4  ;;  %v149_v21 = vrot.slane %v147_v3, 5  ;;  %v163_v23 = vrot.slane %v161_v4, 5  ;;  %v94_v31 = vsel %vm2771_vm2, %v89_v15, %v93_v14  ;;  %v2581_v61 = vld [vmem:[%s3622_s1 + $0x118] sm:$0xff] }
  0x1c   :  { %v159_v22 = vrot.slane %v158_v9, 4  ;;  %v108_v32 = vsel %vm2771_vm2, %v103_v16, %v107_v18  ;;  %v797_v33 = vshrl.u32 %v2186_v24, 16  ;;  %v800_v34 = vshll.u32 %v2186_v24, 16  ;;  %v2140_v7 = vld [vmem:[%s3623_s0 + $0x18] sm:$0xf]  ;;  %v2543_v9 = vld [vmem:[%s3622_s1 + $0x10] sm:$0xff] }
  0x1d   :  { %v150_v35 = vsel %vm2771_vm2, %v145_v20, %v149_v21  ;;  %v811_v38 = vshrl.u32 %v2188_v26, 16  ;;  %v814_v40 = vshll.u32 %v2188_v26, 16  ;;  %v212_v44 = vunpack.c.l.b16 %v94_v31  ;;  %v2192_v26 = vld [vmem:[%s3623_s0 + $0x20] sm:$0xf] }
  0x1e   :  { %285 = vmatpush.bf16.msra.mxu0 %v2549_v42  ;;  %2666 = vmatpush.bf16.msra.mxu1 %v2549_v42  ;;  %v164_v37 = vsel %vm2771_vm2, %v159_v22, %v163_v23  ;;  %v213_v45 = vunpack.c.l.b16 %v108_v32  ;;  %v216_v47 = vunpack.c.l.b16 %v150_v35  ;;  %v799_v52 = vrot.slane %v797_v33, 4  ;;  %v2612_v22 = vld [vmem:[%s3622_s1 + $0x1e8] sm:$0xff] }
  0x1f   :  { %2667 = vmatpush.bf16.msra.mxu2 %v2549_v42  ;;  %739 = vmatpush.bf16.msra.mxu3 %v2570_v0  ;;  %v2561_v42 = vld [vmem:[%s3622_s1 + $0xa0] sm:$0xff]  ;;  %v217_v48 = vunpack.c.l.b16 %v164_v37  ;;  %v802_v53 = vrot.slane %v800_v34, 5  ;;  %v820_v5 = vshll.u32 %v2918_v59, 16  ;;  %v459_v14 = vrot.slane %v2710_v6, 5 }
  0x20   :  { %v221_v62 = vpack.c.b16 %v213_v45, %v212_v44  ;;  %v424_v0 = vld [vmem:[%s3623_s0] sm:$0xe]  ;;  %v463_v16 = vrot.slane %v2721_v12, 5  ;;  %v2190_v12 = vld [vmem:[%s3623_s0 + $0x18] sm:$0xf]  ;;  %v475_v24 = vrot.slane %v2729_v17, 5 }
  0x21   :  { %286 = vmatmul.bf16.vlgmr.msra.gmra.mxu0 %v220_v56  ;;  %296 = vmatmul.bf16.vlgmr.msra.gmra.mxu1 %v222_v57  ;;  %v813_v56 = vrot.slane %v811_v38, 4  ;;  %v816_v57 = vrot.slane %v814_v40, 5  ;;  %v223_v63 = vpack.c.b16 %v217_v48, %v216_v47  ;;  %v803_v2 = vor.u32 %v802_v53, %v799_v52  ;;  %v2558_v17 = vld [vmem:[%s3622_s1 + $0x88] sm:$0xff]  ;;  %v2557_v44 = vld [vmem:[%s3622_s1 + $0x80] sm:$0xff] }
  0x22   :  { %390 = vmatpush.bf16.msrb.mxu1 %v2548_v43  ;;  %1021 = vmatpush.bf16.msrb.mxu0 %v2585_v58  ;;  %v2582_v43 = vld [vmem:[%s3622_s1 + $0x120] sm:$0xff]  ;;  %v2544_v58 = vld [vmem:[%s3622_s1 + $0x18] sm:$0xff]  ;;  %v822_v6 = vrot.slane %v820_v5, 5  ;;  %v825_v35 = vshrl.u32 %v2190_v12, 16  ;;  %v828_v37 = vshll.u32 %v2190_v12, 16 }
  0x23   :  { %582 = vmatpush.bf16.msrb.mxu2 %v2564_v55  ;;  %1659 = vmatpush.bf16.msrb.mxu3 %v2614_v10  ;;  %v2910_v55 = vld [vmem:[%s3623_s0 + $0xc] sm:$0x1]  ;;  %v817_v4 = vor.u32 %v816_v57, %v813_v56  ;;  %v2559_v10 = vld [vmem:[%s3622_s1 + $0x90] sm:$0xff]  ;;  %v2541_v45 = vld [vmem:[%s3622_s1] sm:$0xff] }
  0x24   :  { %306 = vmatmul.bf16.vlgmr.msra.gmra.mxu2 %v224_v1  ;;  %740 = vmatmul.bf16.vlgmr.msra.gmra.mxu3 %v2137_v19  ;;  %v425_v1 = vld [vmem:[%s3623_s0 + $0x8] sm:$0xe]  ;;  %v806_v3 = vshll.u32 %v2910_v55, 16  ;;  %v804_v19 = vrot.slane %v803_v2, 4  ;;  %v2578_v56 = vld [vmem:[%s3622_s1 + $0x100] sm:$0xff]  ;;  %v2606_v57 = vld [vmem:[%s3622_s1 + $0x1b8] sm:$0xff] }
  0x25   :  { %v2051_v15 = vrot.slane %v425_v1, 9  ;;  %v818_v23 = vrot.slane %v817_v4, 4  ;;  %v2622_v1 = vld [vmem:[%s3622_s1 + $0x238] sm:$0xff]  ;;  %v827_v2 = vrot.slane %v825_v35, 4  ;;  %v3027_v5 = vld [vmem:[%s3623_s0 + $0x24] sm:$0x1] }
  0x26   :  { %391 = vmatpush.bf16.msrb.mxu1 %v2547_v8  ;;  %1022 = vmatpush.bf16.msrb.mxu0 %v2584_v13  ;;  %v2566_v8 = vld [vmem:[%s3623_s0 + $0x1c] sm:$0xf0]  ;;  %v2050_v13 = vrot.slane %v424_v0, 9  ;;  %v808_v20 = vrot.slane %v806_v3, 5  ;;  %v2593_v0 = vld [vmem:[%s3622_s1 + $0x178] sm:$0xff]  ;;  %v830_v3 = vrot.slane %v828_v37, 5 }
  0x27   :  { %583 = vmatpush.bf16.msrb.mxu2 %v2563_v11  ;;  %1660 = vmatpush.bf16.msrb.mxu3 %v2613_v27  ;;  %v2580_v11 = vld [vmem:[%s3622_s1 + $0x110] sm:$0xff]  ;;  %v2141_v21 = vor.u32 %v2566_v8, %v2140_v7  ;;  %v428_v27 = vld [vmem:[%s3623_s0 + $0x20] sm:$0xe]  ;;  %v464_v32 = vsel %vm2953_vm5, %v2051_v15, %v463_v16  ;;  %v823_v40 = vsel %vm2771_vm2, %v818_v23, %v822_v6  ;;  %v3022_v4 = vld [vmem:[%s3623_s0 + $0x1c] sm:$0x1]  ;;  %v467_v6 = vrot.slane %v2818_v36, 5 }
  0x28   :  { %v460_v31 = vsel %vm2953_vm5, %v2050_v13, %v459_v14  ;;  %v2054_v33 = vrot.slane %v428_v27, 9  ;;  %v809_v34 = vsel %vm2771_vm2, %v804_v19, %v808_v20  ;;  %v515_v48 = vunpack.c.l.b16 %v464_v32  ;;  %v427_v14 = vld [vmem:[%s3623_s0 + $0x18] sm:$0xe]  ;;  %v2605_v16 = vld [vmem:[%s3622_s1 + $0x1b0] sm:$0xff]  ;;  %v2611_v36 = vld [vmem:[%s3622_s1 + $0x1e0] sm:$0xff] }
  0x29   :  { %v514_v47 = vunpack.c.l.b16 %v460_v31  ;;  %v2592_v19 = vld [vmem:[%s3622_s1 + $0x170] sm:$0xff]  ;;  %v831_v20 = vor.u32 %v830_v3, %v827_v2  ;;  %v471_v27 = vrot.slane %v2829_v46, 5  ;;  %v2604_v46 = vld [vmem:[%s3622_s1 + $0x1a8] sm:$0xff]  ;;  %v2619_v2 = vld [vmem:[%s3622_s1 + $0x220] sm:$0xff] }
  0x2a   :  { %392 = vmatpush.bf16.msrb.mxu1 %v2546_v25  ;;  %1023 = vmatpush.bf16.msrb.mxu0 %v2583_v30  ;;  %v2542_v25 = vld [vmem:[%s3622_s1 + $0x8] sm:$0xff] }
  0x2b   :  { %584 = vmatpush.bf16.msrb.mxu2 %v2562_v28  ;;  %1661 = vmatpush.bf16.msrb.mxu3 %v2612_v22  ;;  %v479_v28 = vrot.slane %v2742_v29, 5  ;;  %v2579_v30 = vld [vmem:[%s3622_s1 + $0x108] sm:$0xff]  ;;  %v429_v29 = vld [vmem:[%s3623_s0 + $0x38] sm:$0xe]  ;;  %v848_v22 = vshll.u32 %v3027_v5, 16 }
  0x2c   :  { %v2055_v38 = vrot.slane %v429_v29, 9  ;;  %v2591_v35 = vld [vmem:[%s3622_s1 + $0x168] sm:$0xff] }
  0x2d   :  { %v850_v32 = vrot.slane %v848_v22, 5  ;;  %v2620_v37 = vld [vmem:[%s3622_s1 + $0x228] sm:$0xff]  ;;  %v2602_v22 = vld [vmem:[%s3622_s1 + $0x198] sm:$0xff] }
  0x2e   :  { %393 = vmatpush.bf16.msrb.mxu1 %v2545_v41  ;;  %1024 = vmatpush.bf16.msrb.mxu0 %v2582_v43  ;;  %v839_v41 = vshrl.u32 %v2192_v26, 16  ;;  %v476_v43 = vsel %vm2953_vm5, %v2054_v33, %v475_v24  ;;  %v480_v52 = vsel %vm2953_vm5, %v2055_v38, %v479_v28  ;;  %v2144_v24 = vld [vmem:[%s3623_s0 + $0x28] sm:$0xf]  ;;  %v2621_v28 = vld [vmem:[%s3622_s1 + $0x230] sm:$0xff]  ;;  %v2196_v33 = vld [vmem:[%s3623_s0 + $0x40] sm:$0xf] }
  0x2f   :  { %585 = vmatpush.bf16.msrb.mxu2 %v2561_v42  ;;  %v842_v42 = vshll.u32 %v2192_v26, 16  ;;  %v518_v53 = vunpack.c.l.b16 %v476_v43  ;;  %v2053_v26 = vrot.slane %v427_v14, 9  ;;  %1662 = vmatpush.bf16.msrb.mxu3 %v2611_v36  ;;  %v2198_v36 = vld [vmem:[%s3623_s0 + $0x48] sm:$0xf] }
  0x30   :  { %v841_v7 = vrot.slane %v839_v41, 4  ;;  %v487_v41 = vrot.slane %v2839_v51, 5  ;;  %v867_v51 = vshrl.u32 %v2196_v33, 16 }
  0x31   :  { %291 = vmatmul.bf16.gmra.mxu0 %v221_v62  ;;  %301 = vmatmul.bf16.gmra.mxu1 %v223_v63  ;;  %v953_v62 = vunpack.c.l.b16 %v809_v34  ;;  %v954_v63 = vunpack.c.l.b16 %v823_v40  ;;  %v844_v8 = vrot.slane %v842_v42, 5  ;;  %v483_v40 = vrot.slane %v2834_v49, 5  ;;  %v431_v49 = vld [vmem:[%s3623_s0 + $0x48] sm:$0xe] }
  0x32   :  { %394 = vmatpush.bf16.msrb.mxu1 %v2544_v58  ;;  %1025 = vmatpush.bf16.msrb.mxu0 %v2581_v61  ;;  %v2000_v58 = vld [vmem:[%s3623_s0] sm:$0xf]  ;;  %v2536_v61 = vld [vmem:[%s3623_s0 + $0x4] sm:$0xf0]  ;;  %v472_v43 = vsel %vm2953_vm5, %v2053_v26, %v471_v27 }
  0x33   :  { %586 = vmatpush.bf16.msrb.mxu2 %v2560_v60  ;;  %v519_v60 = vunpack.c.l.b16 %v480_v52  ;;  %v2001_v13 = vor.u32 %v2536_v61, %v2000_v58  ;;  %v963_v15 = vpack.c.b16 %v954_v63, %v953_v62  ;;  %v845_v12 = vor.u32 %v844_v8, %v841_v7  ;;  %v2603_v58 = vld [vmem:[%s3622_s1 + $0x1a0] sm:$0xff] }
  0x34   :  { %745 = vmatmul.bf16.gmra.mxu3 %v2141_v21  ;;  %v834_v21 = vshll.u32 %v3022_v4, 16  ;;  %v3114_v8 = vld [vmem:[%s3623_s0 + $0x44] sm:$0x1] }
  0x35   :  { %v846_v34 = vrot.slane %v845_v12, 4 }
  0x36   :  { %395 = vmatpush.bf16.msrb.mxu1 %v2543_v9  ;;  %1026 = vmatpush.bf16.msrb.mxu0 %v2580_v11  ;;  %v3029_v9 = vpack.c.b16 %v519_v60, %v518_v53  ;;  %v426_v11 = vld [vmem:[%s3623_s0 + $0x10] sm:$0xe]  ;;  %v836_v31 = vrot.slane %v834_v21, 5  ;;  %v2057_v53 = vrot.slane %v431_v49, 9  ;;  %v2590_v60 = vld [vmem:[%s3622_s1 + $0x160] sm:$0xff]  ;;  %v2608_v49 = vld [vmem:[%s3622_s1 + $0x1c8] sm:$0xff] }
  0x37   :  { %587 = vmatpush.bf16.msrb.mxu2 %v2559_v10  ;;  %v524_v10 = vpack.c.b16 %v515_v48, %v514_v47  ;;  %v2052_v23 = vrot.slane %v426_v11, 9  ;;  %v430_v47 = vld [vmem:[%s3623_s0 + $0x40] sm:$0xe]  ;;  %v870_v48 = vshll.u32 %v2196_v33, 16  ;;  %v2537_v21 = vld [vmem:[%s3623_s0 + $0x14] sm:$0xf0] }
  0x38   :  { %v2056_v52 = vrot.slane %v430_v47, 9  ;;  %v488_v62 = vsel %vm2953_vm5, %v2057_v53, %v487_v41  ;;  %v2618_v33 = vld [vmem:[%s3622_s1 + $0x218] sm:$0xff]  ;;  %v2617_v47 = vld [vmem:[%s3622_s1 + $0x210] sm:$0xff] }
  0x39   :  { %v468_v42 = vsel %vm2953_vm5, %v2052_v23, %v467_v6  ;;  %v521_v7 = vunpack.c.l.b16 %v488_v62  ;;  %v872_v14 = vrot.slane %v870_v48, 5  ;;  %v2589_v23 = vld [vmem:[%s3622_s1 + $0x158] sm:$0xff] }
  0x3a   :  { %396 = vmatpush.bf16.msrb.mxu1 %v2542_v25  ;;  %1027 = vmatpush.bf16.msrb.mxu0 %v2579_v30  ;;  %v2567_v25 = vld [vmem:[%s3623_s0 + $0x3c] sm:$0xf0]  ;;  %v832_v30 = vrot.slane %v831_v20, 4  ;;  %v484_v61 = vsel %vm2953_vm5, %v2056_v52, %v483_v40  ;;  %v516_v63 = vunpack.c.l.b16 %v468_v42 }
  0x3b   :  { %588 = vmatpush.bf16.msrb.mxu2 %v2558_v17  ;;  %v2194_v17 = vld [vmem:[%s3623_s0 + $0x28] sm:$0xf]  ;;  %v2145_v29 = vor.u32 %v2567_v25, %v2144_v24  ;;  %v520_v3 = vunpack.c.l.b16 %v484_v61  ;;  %v876_v24 = vshll.u32 %v3114_v8, 16 }
  0x3c   :  { %v853_v38 = vshrl.u32 %v2194_v17, 16 }
  0x3d   :  { %v3119_v20 = vpack.c.b16 %v521_v7, %v520_v3 }
  0x3e   :  { %397 = vmatpush.bf16.msrb.mxu1 %v2541_v45  ;;  %1028 = vmatpush.bf16.msrb.mxu0 %v2578_v56  ;;  %v2610_v45 = vld [vmem:[%s3622_s1 + $0x1d8] sm:$0xff]  ;;  %v837_v56 = vsel %vm2771_vm2, %v832_v30, %v836_v31  ;;  %v2568_v30 = vld [vmem:[%s3623_s0 + $0x4c] sm:$0xf0] }
  0x3f   :  { %589 = vmatpush.bf16.msrb.mxu2 %v2557_v44  ;;  %v856_v44 = vshll.u32 %v2194_v17, 16  ;;  %1663 = vmatpush.bf16.msrb.mxu3 %v2610_v45  ;;  %v2148_v17 = vld [vmem:[%s3623_s0 + $0x48] sm:$0xf]  ;;  %v2200_v31 = vld [vmem:[%s3623_s0 + $0x50] sm:$0xf] }
  0x40   :  { %v2149_v40 = vor.u32 %v2568_v30, %v2148_v17  ;;  %v895_v41 = vshrl.u32 %v2200_v31, 16  ;;  %v898_v42 = vshll.u32 %v2200_v31, 16  ;;  %v2600_v45 = vld [vmem:[%s3622_s1 + $0x188] sm:$0xff]  ;;  %v2202_v17 = vld [vmem:[%s3623_s0 + $0x58] sm:$0xf] }
  0x41   :  { %398 = vmatmul.bf16.vlgmr.msrb.gmra.mxu1 %v2001_v13  ;;  %1029 = vmatmul.bf16.vlgmr.msrb.gmra.mxu0 %v963_v15  ;;  %v858_v11 = vrot.slane %v856_v44, 5  ;;  %v869_v13 = vrot.slane %v867_v51, 4  ;;  %v2004_v15 = vld [vmem:[%s3623_s0 + $0x10] sm:$0xf]  ;;  %v2204_v30 = vld [vmem:[%s3623_s0 + $0x60] sm:$0xf] }
  0x42   :  { %1220 = vmatpush.bf16.msra.mxu1 %v2593_v0  ;;  %1858 = vmatpush.bf16.msra.mxu0 %v2622_v1  ;;  %v517_v0 = vunpack.c.l.b16 %v472_v43  ;;  %v3106_v1 = vld [vmem:[%s3623_s0 + $0x2c] sm:$0x1]  ;;  %v2005_v27 = vor.u32 %v2537_v21, %v2004_v15  ;;  %v2609_v43 = vld [vmem:[%s3622_s1 + $0x1d0] sm:$0xff] }
  0x43   :  { %1370 = vmatpush.bf16.msra.mxu2 %v2606_v57  ;;  %v851_v57 = vsel %vm2771_vm2, %v846_v34, %v850_v32  ;;  %v862_v12 = vshll.u32 %v3106_v1, 16  ;;  %v873_v26 = vor.u32 %v872_v14, %v869_v13  ;;  %v2588_v44 = vld [vmem:[%s3622_s1 + $0x150] sm:$0xff]  ;;  %1664 = vmatpush.bf16.msrb.mxu3 %v2609_v43  ;;  %v912_v43 = vshll.u32 %v2202_v17, 16 }
  0x44   :  { %590 = vmatmul.bf16.vlgmr.msrb.gmra.mxu2 %v524_v10  ;;  %750 = vmatmul.bf16.gmra.mxu3 %v2145_v29  ;;  %v855_v10 = vrot.slane %v853_v38, 4  ;;  %v525_v6 = vpack.c.b16 %v517_v0, %v516_v63  ;;  %v2601_v29 = vld [vmem:[%s3622_s1 + $0x190] sm:$0xff]  ;;  %v884_v38 = vshll.u32 %v2198_v36, 16  ;;  %v2008_v63 = vld [vmem:[%s3623_s0 + $0x20] sm:$0xf] }
  0x45   :  { %v864_v32 = vrot.slane %v862_v12, 5  ;;  %v2538_v0 = vld [vmem:[%s3623_s0 + $0x34] sm:$0xf0]  ;;  %v2400_v14 = vld [vmem:[%s3623_s0 + $0x10] sm:$0xf] }
  0x46   :  { %1221 = vmatpush.bf16.msra.mxu1 %v2592_v19  ;;  %1859 = vmatpush.bf16.msra.mxu0 %v2621_v28  ;;  %v956_v19 = vunpack.c.l.b16 %v851_v57  ;;  %v859_v25 = vor.u32 %v858_v11, %v855_v10  ;;  %v886_v53 = vrot.slane %v884_v38, 5  ;;  %v897_v57 = vrot.slane %v895_v41, 4  ;;  %v2607_v38 = vld [vmem:[%s3622_s1 + $0x1c0] sm:$0xff] }
  0x47   :  { %1371 = vmatpush.bf16.msra.mxu2 %v2605_v16  ;;  %v955_v16 = vunpack.c.l.b16 %v837_v56  ;;  %v3172_v56 = vld [vmem:[%s3623_s0 + $0x4c] sm:$0x1]  ;;  %1665 = vmatpush.bf16.msrb.mxu3 %v2608_v49  ;;  %v2009_v11 = vor.u32 %v2538_v0, %v2008_v63  ;;  %v1435_v21 = vshrl.u32 %v2400_v14, 16  ;;  %v923_v49 = vshrl.u32 %v2204_v30, 16 }
  0x48   :  { %v860_v34 = vrot.slane %v859_v25, 4  ;;  %v890_v3 = vshll.u32 %v3172_v56, 16  ;;  %v2152_v25 = vld [vmem:[%s3623_s0 + $0x58] sm:$0xf]  ;;  %v914_v63 = vrot.slane %v912_v43, 5 }
  0x49   :  { %v964_v28 = vpack.c.b16 %v956_v19, %v955_v16  ;;  %v2402_v19 = vld [vmem:[%s3623_s0 + $0x18] sm:$0xf] }
  0x4a   :  { %1222 = vmatpush.bf16.msra.mxu1 %v2591_v35  ;;  %1860 = vmatpush.bf16.msra.mxu0 %v2620_v37  ;;  %v874_v35 = vrot.slane %v873_v26, 4  ;;  %v881_v37 = vshrl.u32 %v2198_v36, 16  ;;  %v865_v51 = vsel %vm2771_vm2, %v860_v34, %v864_v32  ;;  %v892_v16 = vrot.slane %v890_v3, 5  ;;  %v2569_v26 = vld [vmem:[%s3623_s0 + $0x5c] sm:$0xf0]  ;;  %v2587_v36 = vld [vmem:[%s3622_s1 + $0x148] sm:$0xff] }
  0x4b   :  { %1372 = vmatpush.bf16.msra.mxu2 %v2604_v46  ;;  %v878_v46 = vrot.slane %v876_v24, 5  ;;  %v957_v61 = vunpack.c.l.b16 %v865_v51  ;;  %v1449_v12 = vshrl.u32 %v2402_v19, 16  ;;  %v1452_v24 = vshll.u32 %v2402_v19, 16  ;;  %1666 = vmatpush.bf16.msrb.mxu3 %v2607_v38  ;;  %v432_v3 = vld [vmem:[%s3623_s0 + $0x50] sm:$0xe] }
  0x4c   :  { %v883_v52 = vrot.slane %v881_v37, 4  ;;  %v2153_v34 = vor.u32 %v2569_v26, %v2152_v25  ;;  %v2616_v37 = vld [vmem:[%s3622_s1 + $0x208] sm:$0xff]  ;;  %v926_v51 = vshll.u32 %v2204_v30, 16  ;;  %v495_v25 = vrot.slane %v2766_v50, 5  ;;  %v2404_v30 = vld [vmem:[%s3623_s0 + $0x20] sm:$0xf] }
  0x4d   :  { %v879_v48 = vsel %vm2771_vm2, %v874_v35, %v878_v46  ;;  %v1451_v31 = vrot.slane %v1449_v12, 4  ;;  %v3219_v46 = vld [vmem:[%s3623_s0 + $0x1c] sm:$0x1]  ;;  %v2599_v35 = vld [vmem:[%s3622_s1 + $0x180] sm:$0xff]  ;;  %v433_v12 = vld [vmem:[%s3623_s0 + $0x58] sm:$0xe] }
  0x4e   :  { %1223 = vmatpush.bf16.msra.mxu1 %v2590_v60  ;;  %1861 = vmatpush.bf16.msra.mxu0 %v2619_v2  ;;  %v3177_v60 = vld [vmem:[%s3623_s0 + $0x54] sm:$0x1]  ;;  %v958_v62 = vunpack.c.l.b16 %v879_v48  ;;  %v887_v2 = vor.u32 %v886_v53, %v883_v52  ;;  %v2012_v48 = vld [vmem:[%s3623_s0 + $0x40] sm:$0xf] }
  0x4f   :  { %1373 = vmatpush.bf16.msra.mxu2 %v2603_v58  ;;  %v900_v58 = vrot.slane %v898_v42, 5  ;;  %v904_v10 = vshll.u32 %v3177_v60, 16  ;;  %v909_v42 = vshrl.u32 %v2202_v17, 16 }
  0x50   :  { %v965_v13 = vpack.c.b16 %v958_v62, %v957_v61  ;;  %v888_v15 = vrot.slane %v887_v2, 4  ;;  %v2539_v61 = vld [vmem:[%s3623_s0 + $0x44] sm:$0xf0] }
  0x51   :  { %403 = vmatmul.bf16.gmra.mxu1 %v2005_v27  ;;  %1034 = vmatmul.bf16.gmra.mxu0 %v964_v28  ;;  %v901_v7 = vor.u32 %v900_v58, %v897_v57  ;;  %v1437_v27 = vrot.slane %v1435_v21, 4  ;;  %v911_v62 = vrot.slane %v909_v42, 4  ;;  %v3297_v42 = vld [vmem:[%s3623_s0 + $0x2c] sm:$0x1] }
  0x52   :  { %1224 = vmatpush.bf16.msra.mxu1 %v2589_v23  ;;  %1862 = vmatpush.bf16.msra.mxu0 %v2618_v33  ;;  %v893_v32 = vsel %vm2771_vm2, %v888_v15, %v892_v16  ;;  %v3251_v15 = vld [vmem:[%s3623_s0 + $0x5c] sm:$0x1]  ;;  %v3256_v16 = vld [vmem:[%s3623_s0 + $0x64] sm:$0x1] }
  0x53   :  { %1374 = vmatpush.bf16.msra.mxu2 %v2602_v22  ;;  %v1438_v22 = vshll.u32 %v2400_v14, 16  ;;  %v902_v23 = vrot.slane %v901_v7, 4  ;;  %v959_v52 = vunpack.c.l.b16 %v893_v32  ;;  %v925_v7 = vrot.slane %v923_v49, 4  ;;  %v2615_v32 = vld [vmem:[%s3622_s1 + $0x200] sm:$0xff] }
  0x54   :  { %595 = vmatmul.bf16.gmra.mxu2 %v525_v6  ;;  %755 = vmatmul.bf16.gmra.mxu3 %v2149_v40  ;;  %v906_v6 = vrot.slane %v904_v10, 5  ;;  %v928_v10 = vrot.slane %v926_v51, 5  ;;  %v2013_v14 = vor.u32 %v2539_v61, %v2012_v48 }
  0x55   :  { %v1440_v28 = vrot.slane %v1438_v22, 5  ;;  %v491_v22 = vrot.slane %v2754_v39, 5 }
  0x56   :  { %1225 = vmatpush.bf16.msra.mxu1 %v2588_v44  ;;  %1863 = vmatpush.bf16.msra.mxu0 %v2617_v47  ;;  %v907_v33 = vsel %vm2771_vm2, %v902_v23, %v906_v6  ;;  %v2586_v44 = vld [vmem:[%s3622_s1 + $0x140] sm:$0xff]  ;;  %v1458_v47 = vshll.u32 %v3219_v46, 16  ;;  %v2254_v23 = vld [vmem:[%s3623_s0 + $0x8] sm:$0xe]  ;;  %v2255_v6 = vld [vmem:[%s3623_s0 + $0x10] sm:$0xe] }
  0x57   :  { %1375 = vmatpush.bf16.msra.mxu2 %v2601_v29  ;;  %v1454_v29 = vrot.slane %v1452_v24, 5  ;;  %v1441_v40 = vor.u32 %v1440_v28, %v1437_v27  ;;  %v960_v53 = vunpack.c.l.b16 %v907_v33  ;;  %v2058_v24 = vrot.slane %v432_v3, 9  ;;  %v2406_v33 = vld [vmem:[%s3623_s0 + $0x28] sm:$0xf] }
  0x58   :  { %v1460_v2 = vrot.slane %v1458_v47, 5  ;;  %v2264_v39 = vrot.slane %v2254_v23, 9  ;;  %v2265_v26 = vrot.slane %v2255_v6, 9  ;;  %v918_v27 = vshll.u32 %v3251_v15, 16  ;;  %v2540_v6 = vld [vmem:[%s3623_s0 + $0x54] sm:$0xf0] }
  0x59   :  { %v1442_v57 = vrot.slane %v1441_v40, 4  ;;  %v966_v21 = vpack.c.b16 %v960_v53, %v959_v52  ;;  %v929_v28 = vor.u32 %v928_v10, %v925_v7  ;;  %v1477_v49 = vshrl.u32 %v2406_v33, 16 }
  0x5a   :  { %1226 = vmatpush.bf16.msra.mxu1 %v2587_v36  ;;  %1864 = vmatpush.bf16.msra.mxu0 %v2616_v37  ;;  %v932_v36 = vshll.u32 %v3256_v16, 16  ;;  %v1480_v51 = vshll.u32 %v2406_v33, 16 }
  0x5b   :  { %1376 = vmatpush.bf16.msra.mxu2 %v2600_v45  ;;  %v1455_v45 = vor.u32 %v1454_v29, %v1451_v31 }
  0x5c   :  { %v934_v48 = vrot.slane %v932_v36, 5  ;;  %v1482_v61 = vrot.slane %v1480_v51, 5  ;;  %v2408_v36 = vld [vmem:[%s3623_s0 + $0x30] sm:$0xf] }
  0x5d   :  { %v1456_v0 = vrot.slane %v1455_v45, 4  ;;  %v920_v45 = vrot.slane %v918_v27, 5  ;;  %v1494_v33 = vshll.u32 %v2408_v36, 16 }
  0x5e   :  { %1227 = vmatpush.bf16.msra.mxu1 %v2586_v44  ;;  %1865 = vmatpush.bf16.msra.mxu0 %v2615_v32  ;;  %v1466_v44 = vshll.u32 %v2404_v30, 16  ;;  %v1491_v32 = vshrl.u32 %v2408_v36, 16 }
  0x5f   :  { %1377 = vmatpush.bf16.msra.mxu2 %v2599_v35  ;;  %v2059_v35 = vrot.slane %v433_v12, 9 }
  0x60   :  { %v1468_v53 = vrot.slane %v1466_v44, 5 }
  0x61   :  { %408 = vmatmul.bf16.gmra.mxu1 %v2009_v11  ;;  %1039 = vmatmul.bf16.gmra.mxu0 %v965_v13  ;;  %v1097_v11 = vrot.slane %v2910_v55, 5  ;;  %v1101_v13 = vrot.slane %v2918_v59, 5  ;;  %v915_v55 = vor.u32 %v914_v63, %v911_v62  ;;  %v1461_v59 = vsel %vm2771_vm2, %v1456_v0, %v1460_v2 }
  0x62   :  { %v1592_v31 = vunpack.c.l.b16 %v1461_v59  ;;  %v1486_v62 = vshll.u32 %v3297_v42, 16  ;;  %v492_v0 = vsel %vm2953_vm5, %v2058_v24, %v491_v22  ;;  %v496_v2 = vsel %vm2953_vm5, %v2059_v35, %v495_v25  ;;  %v2016_v22 = vld [vmem:[%s3623_s0 + $0x50] sm:$0xf] }
  0x63   :  { %v1098_v50 = vsel %vm2953_vm5, %v2264_v39, %v1097_v11  ;;  %v1102_v29 = vsel %vm2953_vm5, %v2265_v26, %v1101_v13  ;;  %v916_v37 = vrot.slane %v915_v55, 4  ;;  %v523_v55 = vunpack.c.l.b16 %v496_v2 }
  0x64   :  { %600 = vmatmul.bf16.gmra.mxu2 %v3029_v9  ;;  %v3214_v9 = vld [vmem:[%s3623_s0 + $0x14] sm:$0x1]  ;;  %760 = vmatmul.bf16.gmra.mxu3 %v2153_v34  ;;  %v1463_v34 = vshrl.u32 %v2404_v30, 16  ;;  %v1152_v38 = vunpack.c.l.b16 %v1098_v50  ;;  %v1153_v40 = vunpack.c.l.b16 %v1102_v29  ;;  %v2017_v39 = vor.u32 %v2540_v6, %v2016_v22  ;;  %v2468_v30 = vld [vmem:[%s3623_s0 + $0x10] sm:$0xe] }
  0x65   :  { %v1444_v41 = vshll.u32 %v3214_v9, 16  ;;  %v921_v7 = vsel %vm2771_vm2, %v916_v37, %v920_v45  ;;  %v3336_v50 = vld [vmem:[%s3623_s0 + $0x34] sm:$0x1]  ;;  %v3341_v29 = vld [vmem:[%s3623_s0 + $0x4c] sm:$0x1]  ;;  %v1735_v35 = vrot.slane %v3214_v9, 5 }
  0x66   :  { %v1465_v43 = vrot.slane %v1463_v34, 4  ;;  %v3299_v47 = vpack.c.b16 %v1153_v40, %v1152_v38  ;;  %v961_v59 = vunpack.c.l.b16 %v921_v7  ;;  %v1739_v37 = vrot.slane %v3219_v46, 5  ;;  %v2412_v6 = vld [vmem:[%s3623_s0 + $0x50] sm:$0xf] }
  0x67   :  { %v1446_v58 = vrot.slane %v1444_v41, 5  ;;  %v3292_v41 = vld [vmem:[%s3623_s0 + $0x24] sm:$0x1]  ;;  %v1493_v38 = vrot.slane %v1491_v32, 4  ;;  %v2478_v40 = vrot.slane %v2468_v30, 9  ;;  %v1496_v45 = vrot.slane %v1494_v33, 5 }
  0x68   :  { %v1469_v63 = vor.u32 %v1468_v53, %v1465_v43  ;;  %v1519_v36 = vshrl.u32 %v2412_v6, 16 }
  0x69   :  { %v1447_v19 = vsel %vm2771_vm2, %v1442_v57, %v1446_v58  ;;  %v1472_v57 = vshll.u32 %v3292_v41, 16  ;;  %v1479_v58 = vrot.slane %v1477_v49, 4  ;;  %v1500_v49 = vshll.u32 %v3336_v50, 16 }
  0x6a   :  { %v1591_v17 = vunpack.c.l.b16 %v1447_v19  ;;  %v1470_v11 = vrot.slane %v1469_v63, 4  ;;  %v1488_v19 = vrot.slane %v1486_v62, 5  ;;  %v1736_v9 = vsel %vm2953_vm5, %v2478_v40, %v1735_v35  ;;  %v2350_v63 = vld [vmem:[%s3623_s0 + $0x10] sm:$0xf] }
  0x6b   :  { %v1483_v3 = vor.u32 %v1482_v61, %v1479_v58  ;;  %v1474_v13 = vrot.slane %v1472_v57, 5  ;;  %v1502_v58 = vrot.slane %v1500_v49, 5 }
  0x6c   :  { %v1601_v52 = vpack.c.b16 %v1592_v31, %v1591_v17  ;;  %v2410_v17 = vld [vmem:[%s3623_s0 + $0x48] sm:$0xf]  ;;  %v2469_v31 = vld [vmem:[%s3623_s0 + $0x18] sm:$0xe] }
  0x6d   :  { %v1475_v12 = vsel %vm2771_vm2, %v1470_v11, %v1474_v13  ;;  %v1505_v34 = vshrl.u32 %v2410_v17, 16  ;;  %v2479_v43 = vrot.slane %v2469_v31, 9  ;;  %v1743_v31 = vrot.slane %v3292_v41, 5 }
  0x6e   :  { %v1593_v27 = vunpack.c.l.b16 %v1475_v12  ;;  %v2414_v12 = vld [vmem:[%s3623_s0 + $0x58] sm:$0xf] }
  0x6f   :  { %v1507_v51 = vrot.slane %v1505_v34, 4  ;;  %v1740_v46 = vsel %vm2953_vm5, %v2479_v43, %v1739_v37  ;;  %v1533_v32 = vshrl.u32 %v2414_v12, 16  ;;  %v1521_v34 = vrot.slane %v1519_v36, 4 }
  0x70   :  { %v1791_v7 = vunpack.c.l.b16 %v1740_v46  ;;  %v1536_v40 = vshll.u32 %v2414_v12, 16  ;;  %v1113_v12 = vrot.slane %v3106_v1, 5 }
  0x71   :  { %413 = vmatmul.bf16.gmra.mxu1 %v2013_v14  ;;  %1044 = vmatmul.bf16.gmra.mxu0 %v966_v21  ;;  %v1484_v14 = vrot.slane %v1483_v3, 4  ;;  %v522_v21 = vunpack.c.l.b16 %v492_v0  ;;  %v2594_v0 = vld [vmem:[%s3623_s0 + $0x14] sm:$0xf0]  ;;  %v1790_v3 = vunpack.c.l.b16 %v1736_v9  ;;  %v2595_v9 = vld [vmem:[%s3623_s0 + $0x24] sm:$0xf0] }
  0x72   :  { %v2351_v13 = vor.u32 %v2594_v0, %v2350_v63 }
  0x73   :  { %v1489_v24 = vsel %vm2771_vm2, %v1484_v14, %v1488_v19  ;;  %v528_v25 = vpack.c.b16 %v523_v55, %v522_v21  ;;  %v2256_v14 = vld [vmem:[%s3623_s0 + $0x18] sm:$0xe]  ;;  %v2257_v19 = vld [vmem:[%s3623_s0 + $0x20] sm:$0xe]  ;;  %v1800_v55 = vpack.c.b16 %v1791_v7, %v1790_v3  ;;  %v2258_v3 = vld [vmem:[%s3623_s0 + $0x28] sm:$0xe] }
  0x74   :  { %605 = vmatmul.bf16.gmra.mxu2 %v3119_v20  ;;  %v930_v20 = vrot.slane %v929_v28, 4  ;;  %1667 = vmatmul.bf16.vlgmr.msrb.gmra.mxu3 %v1601_v52  ;;  %v1594_v28 = vunpack.c.l.b16 %v1489_v24  ;;  %v1497_v52 = vor.u32 %v1496_v45, %v1493_v38  ;;  %v2470_v21 = vld [vmem:[%s3623_s0 + $0x20] sm:$0xe]  ;;  %v2266_v24 = vrot.slane %v2256_v14, 9  ;;  %v2473_v14 = vld [vmem:[%s3623_s0 + $0x48] sm:$0xe] }
  0x75   :  { %v2480_v30 = vrot.slane %v2470_v21, 9  ;;  %v1535_v38 = vrot.slane %v1533_v32, 4  ;;  %v1538_v45 = vrot.slane %v1536_v40, 5  ;;  %v2259_v7 = vld [vmem:[%s3623_s0 + $0x40] sm:$0xe]  ;;  %v2483_v1 = vrot.slane %v2473_v14, 9 }
  0x76   :  { %v935_v10 = vsel %vm2771_vm2, %v930_v20, %v934_v48  ;;  %v1602_v44 = vpack.c.b16 %v1594_v28, %v1593_v27  ;;  %v1508_v20 = vshll.u32 %v2410_v17, 16  ;;  %v1514_v48 = vshll.u32 %v3341_v29, 16  ;;  %v3384_v27 = vld [vmem:[%s3623_s0 + $0x54] sm:$0x1]  ;;  %v3389_v28 = vld [vmem:[%s3623_s0 + $0x5c] sm:$0x1] }
  0x77   :  { %v962_v23 = vunpack.c.l.b16 %v935_v10  ;;  %v1498_v57 = vrot.slane %v1497_v52, 4  ;;  %v1522_v17 = vshll.u32 %v2412_v6, 16  ;;  %v1528_v37 = vshll.u32 %v3384_v27, 16 }
  0x78   :  { %v1510_v53 = vrot.slane %v1508_v20, 5  ;;  %v1516_v62 = vrot.slane %v1514_v48, 5  ;;  %v1542_v43 = vshll.u32 %v3389_v28, 16  ;;  %v1539_v48 = vor.u32 %v1538_v45, %v1535_v38 }
  0x79   :  { %v967_v26 = vpack.c.b16 %v962_v23, %v961_v59  ;;  %v1503_v10 = vsel %vm2771_vm2, %v1498_v57, %v1502_v58  ;;  %v2471_v59 = vld [vmem:[%s3623_s0 + $0x28] sm:$0xe]  ;;  %v1524_v35 = vrot.slane %v1522_v17, 5  ;;  %v1530_v20 = vrot.slane %v1528_v37, 5 }
  0x7a   :  { %v1511_v61 = vor.u32 %v1510_v53, %v1507_v51  ;;  %v1595_v23 = vunpack.c.l.b16 %v1503_v10  ;;  %v1544_v52 = vrot.slane %v1542_v43, 5  ;;  %v2354_v53 = vld [vmem:[%s3623_s0 + $0x20] sm:$0xf]  ;;  %v1540_v46 = vrot.slane %v1539_v48, 4  ;;  %v2472_v10 = vld [vmem:[%s3623_s0 + $0x30] sm:$0xe] }
  0x7b   :  { %v2268_v6 = vrot.slane %v2258_v3, 9  ;;  %v2358_v48 = vld [vmem:[%s3623_s0 + $0x30] sm:$0xf] }
  0x7c   :  { %v1512_v2 = vrot.slane %v1511_v61, 4  ;;  %v1545_v0 = vsel %vm2771_vm2, %v1540_v46, %v1544_v52  ;;  %v2596_v52 = vld [vmem:[%s3623_s0 + $0x44] sm:$0xf0] }
  0x7d   :  { %v1598_v21 = vunpack.c.l.b16 %v1545_v0  ;;  %v2359_v0 = vor.u32 %v2596_v52, %v2358_v48  ;;  %v2477_v48 = vld [vmem:[%s3623_s0 + $0x68] sm:$0xe] }
  0x7e   :  { %v1517_v11 = vsel %vm2771_vm2, %v1512_v2, %v1516_v62  ;;  %v2355_v2 = vor.u32 %v2595_v9, %v2354_v53 }
  0x7f   :  { %v1596_v22 = vunpack.c.l.b16 %v1517_v11 }
  0x81   :  { %418 = vmatmul.bf16.gmra.mxu1 %v2017_v39  ;;  %1049 = vmatmul.bf16.gmra.mxu0 %v967_v26  ;;  %v2267_v39 = vrot.slane %v2257_v19, 9  ;;  %v1109_v26 = vrot.slane %v3027_v5, 5  ;;  %v1747_v5 = vrot.slane %v3297_v42, 5  ;;  %v1603_v33 = vpack.c.b16 %v1596_v22, %v1595_v23 }
  0x82   :  { %v1744_v42 = vsel %vm2953_vm5, %v2480_v30, %v1743_v31  ;;  %v2482_v30 = vrot.slane %v2472_v10, 9  ;;  %v1751_v31 = vrot.slane %v3336_v50, 5  ;;  %v1114_v50 = vsel %vm2953_vm5, %v2268_v6, %v1113_v12 }
  0x83   :  { %v1792_v61 = vunpack.c.l.b16 %v1744_v42  ;;  %v1156_v46 = vunpack.c.l.b16 %v1114_v50  ;;  %v1121_v12 = vrot.slane %v3172_v56, 5 }
  0x84   :  { %610 = vmatmul.bf16.gmra.mxu2 %v528_v25  ;;  %1672 = vmatmul.bf16.gmra.mxu3 %v1602_v44  ;;  %v1105_v25 = vrot.slane %v3022_v4, 5  ;;  %v2481_v4 = vrot.slane %v2471_v59, 9  ;;  %v1525_v44 = vor.u32 %v1524_v35, %v1521_v34  ;;  %v2418_v59 = vld [vmem:[%s3623_s0 + $0x68] sm:$0xf] }
  0x85   :  { %v1564_v37 = vshll.u32 %v2418_v59, 16 }
  0x86   :  { %v1106_v41 = vsel %vm2953_vm5, %v2266_v24, %v1105_v25  ;;  %v1748_v49 = vsel %vm2953_vm5, %v2481_v4, %v1747_v5  ;;  %v1526_v51 = vrot.slane %v1525_v44, 4  ;;  %v2269_v24 = vrot.slane %v2259_v7, 9  ;;  %v2260_v7 = vld [vmem:[%s3623_s0 + $0x48] sm:$0xe] }
  0x87   :  { %v1154_v57 = vunpack.c.l.b16 %v1106_v41  ;;  %v1793_v62 = vunpack.c.l.b16 %v1748_v49  ;;  %v1117_v25 = vrot.slane %v3114_v8, 5  ;;  %v1561_v4 = vshrl.u32 %v2418_v59, 16 }
  0x88   :  { %v1531_v63 = vsel %vm2771_vm2, %v1526_v51, %v1530_v20  ;;  %v1755_v8 = vrot.slane %v3341_v29, 5  ;;  %v1566_v43 = vrot.slane %v1564_v37, 5  ;;  %v1752_v29 = vsel %vm2953_vm5, %v2482_v30, %v1751_v31 }
  0x89   :  { %v1597_v19 = vunpack.c.l.b16 %v1531_v63  ;;  %v1563_v35 = vrot.slane %v1561_v4, 4  ;;  %v1118_v44 = vsel %vm2953_vm5, %v2269_v24, %v1117_v25  ;;  %v2270_v59 = vrot.slane %v2260_v7, 9 }
  0x8a   :  { %v1756_v45 = vsel %vm2953_vm5, %v2483_v1, %v1755_v8  ;;  %v1125_v25 = vrot.slane %v3177_v60, 5  ;;  %v1759_v30 = vrot.slane %v3384_v27, 5  ;;  %v1763_v1 = vrot.slane %v3389_v28, 5  ;;  %v2362_v28 = vld [vmem:[%s3623_s0 + $0x50] sm:$0xf] }
  0x8b   :  { %v1604_v32 = vpack.c.b16 %v1598_v21, %v1597_v19  ;;  %v1567_v51 = vor.u32 %v1566_v43, %v1563_v35  ;;  %v2261_v19 = vld [vmem:[%s3623_s0 + $0x50] sm:$0xe]  ;;  %v2475_v21 = vld [vmem:[%s3623_s0 + $0x58] sm:$0xe] }
  0x8c   :  { %v2271_v24 = vrot.slane %v2261_v19, 9  ;;  %v2485_v31 = vrot.slane %v2475_v21, 9 }
  0x8d   :  { %v1568_v9 = vrot.slane %v1567_v51, 4 }
  0x8e   :  { %v1126_v56 = vsel %vm2953_vm5, %v2271_v24, %v1125_v25  ;;  %v1764_v27 = vsel %vm2953_vm5, %v2485_v31, %v1763_v1 }
  0x8f   :  { %v1159_v35 = vunpack.c.l.b16 %v1126_v56 }
  0x91   :  { %1228 = vmatmul.bf16.vlgmr.msra.gmra.mxu1 %v3299_v47  ;;  %1866 = vmatmul.bf16.vlgmr.msra.gmra.mxu0 %v1800_v55  ;;  %v1110_v47 = vsel %vm2953_vm5, %v2267_v39, %v1109_v26  ;;  %v2416_v55 = vld [vmem:[%s3623_s0 + $0x60] sm:$0xf]  ;;  %v3441_v39 = vld [vmem:[%s3623_s0 + $0x64] sm:$0x1]  ;;  %v3446_v26 = vld [vmem:[%s3623_s0 + $0x6c] sm:$0x1] }
  0x92   :  { %v1155_v58 = vunpack.c.l.b16 %v1110_v47  ;;  %v1547_v36 = vshrl.u32 %v2416_v55, 16  ;;  %v1550_v17 = vshll.u32 %v2416_v55, 16  ;;  %v1556_v34 = vshll.u32 %v3441_v39, 16 }
  0x93   :  { %v1570_v38 = vshll.u32 %v3446_v26, 16 }
  0x94   :  { %1378 = vmatmul.bf16.vlgmr.msra.gmra.mxu2 %v2351_v13  ;;  %1677 = vmatmul.bf16.gmra.mxu3 %v1603_v33  ;;  %v1163_v11 = vpack.c.b16 %v1155_v58, %v1154_v57  ;;  %v1801_v13 = vpack.c.b16 %v1793_v62, %v1792_v61  ;;  %v1549_v5 = vrot.slane %v1547_v36, 4  ;;  %v1552_v33 = vrot.slane %v1550_v17, 5 }
  0x95   :  { %v1558_v49 = vrot.slane %v1556_v34, 5  ;;  %v1572_v20 = vrot.slane %v1570_v38, 5  ;;  %v1157_v57 = vunpack.c.l.b16 %v1118_v44  ;;  %v1794_v58 = vunpack.c.l.b16 %v1752_v29 }
  0x96   :  { %v1553_v40 = vor.u32 %v1552_v33, %v1549_v5  ;;  %v1795_v61 = vunpack.c.l.b16 %v1756_v45  ;;  %v2484_v17 = vrot.slane %v2474_v54, 9  ;;  %v2597_v5 = vld [vmem:[%s3623_s0 + $0x54] sm:$0xf0]  ;;  %v1797_v38 = vunpack.c.l.b16 %v1764_v27  ;;  %v2598_v54 = vld [vmem:[%s3623_s0 + $0x64] sm:$0xf0] }
  0x97   :  { %v1573_v63 = vsel %vm2771_vm2, %v1568_v9, %v1572_v20  ;;  %v2363_v43 = vor.u32 %v2597_v5, %v2362_v28  ;;  %v2476_v20 = vld [vmem:[%s3623_s0 + $0x60] sm:$0xe] }
  0x98   :  { %v1554_v42 = vrot.slane %v1553_v40, 4  ;;  %v1802_v3 = vpack.c.b16 %v1795_v61, %v1794_v58  ;;  %v1760_v60 = vsel %vm2953_vm5, %v2484_v17, %v1759_v30  ;;  %v1133_v58 = vrot.slane %v3256_v16, 5 }
  0x99   :  { %v1796_v37 = vunpack.c.l.b16 %v1760_v60 }
  0x9a   :  { %v1559_v62 = vsel %vm2771_vm2, %v1554_v42, %v1558_v49  ;;  %v2262_v42 = vld [vmem:[%s3623_s0 + $0x58] sm:$0xe]  ;;  %v2263_v49 = vld [vmem:[%s3623_s0 + $0x60] sm:$0xe] }
  0x9b   :  { %v1599_v10 = vunpack.c.l.b16 %v1559_v62  ;;  %v1803_v44 = vpack.c.b16 %v1797_v38, %v1796_v37  ;;  %v2272_v9 = vrot.slane %v2262_v42, 9  ;;  %v1767_v62 = vrot.slane %v3441_v39, 5 }
  0x9e   :  { %v3432_v23 = vpop.f32.mrf.mxu0  ;;  %v3434_v22 = vpop.f32.mrf.mxu1 }
  0xa1   :  { %1233 = vmatmul.bf16.gmra.mxu1 %v1163_v11  ;;  %1871 = vmatmul.bf16.gmra.mxu0 %v1801_v13  ;;  %v1600_v11 = vunpack.c.l.b16 %v1573_v63  ;;  %v2487_v63 = vrot.slane %v2477_v48, 9 }
  0xa3   :  { %v1605_v36 = vpack.c.b16 %v1600_v11, %v1599_v10 }
  0xa4   :  { %1383 = vmatmul.bf16.gmra.mxu2 %v2355_v2  ;;  %1682 = vmatmul.bf16.gmra.mxu3 %v1604_v32  ;;  %v1164_v2 = vpack.c.b16 %v1157_v57, %v1156_v46  ;;  %v1122_v32 = vsel %vm2953_vm5, %v2270_v59, %v1121_v12  ;;  %v1129_v46 = vrot.slane %v3251_v15, 5  ;;  %v2273_v57 = vrot.slane %v2263_v49, 9 }
  0xa5   :  { %v1158_v34 = vunpack.c.l.b16 %v1122_v32 }
  0xa6   :  { %v3460_v41 = vpop.f32.mrf.mxu0  ;;  %v3462_v47 = vpop.f32.mrf.mxu1  ;;  %v1130_v11 = vsel %vm2953_vm5, %v2272_v9, %v1129_v46  ;;  %v1134_v15 = vsel %vm2953_vm5, %v2273_v57, %v1133_v58 }
  0xa7   :  { %v3470_v53 = vpop.f32.mrf.mxu3  ;;  %v3492_v55 = vpop.f32.mrf.mxu2  ;;  %v1165_v50 = vpack.c.b16 %v1159_v35, %v1158_v34  ;;  %v1160_v59 = vunpack.c.l.b16 %v1130_v11  ;;  %v1161_v12 = vunpack.c.l.b16 %v1134_v15 }
  0xa9   :  { %v1166_v30 = vpack.c.b16 %v1161_v12, %v1160_v59 }
  0xae   :  { %v3479_v13 = vpop.f32.mrf.mxu0  ;;  %v3481_v14 = vpop.f32.mrf.mxu1 }
  0xaf   :  { %v3494_v6 = vpop.f32.mrf.mxu3  ;;  %v3518_v40 = vpop.f32.mrf.mxu2 }
  0xb1   :  { %1238 = vmatmul.bf16.gmra.mxu1 %v1164_v2  ;;  %1876 = vmatmul.bf16.gmra.mxu0 %v1802_v3 }
  0xb4   :  { %1388 = vmatmul.bf16.gmra.mxu2 %v2359_v0  ;;  %1687 = vmatmul.bf16.gmra.mxu3 %v1605_v36  ;;  %v1771_v0 = vrot.slane %v3446_v26, 5 }
  0xb6   :  { %v3500_v4 = vpop.f32.mrf.mxu0  ;;  %v3502_v8 = vpop.f32.mrf.mxu1  ;;  %v1772_v39 = vsel %vm2953_vm5, %v2487_v63, %v1771_v0 }
  0xb7   :  { %v746_v33 = vpop.f32.mrf.mxu3  ;;  %v1799_v25 = vunpack.c.l.b16 %v1772_v39 }
  0xbe   :  { %v399_v29 = vpop.f32.mrf.mxu1  ;;  %v1030_v45 = vpop.f32.mrf.mxu0 }
  0xbf   :  { %v400_v51 = vadd.f32 %v399_v29, %v3432_v23  ;;  %v748_v52 = vpop.f32.mrf.mxu3  ;;  %v2486_v23 = vrot.slane %v2476_v20, 9 }
  0xc1   :  { %1243 = vmatmul.bf16.gmra.mxu1 %v1165_v50  ;;  %1881 = vmatmul.bf16.gmra.mxu0 %v1803_v44  ;;  %v1768_v16 = vsel %vm2953_vm5, %v2486_v23, %v1767_v62 }
  0xc2   :  { %v1798_v24 = vunpack.c.l.b16 %v1768_v16 }
  0xc4   :  { %1393 = vmatmul.bf16.gmra.mxu2 %v2363_v43  ;;  %v1804_v31 = vpack.c.b16 %v1799_v25, %v1798_v24 }
  0xc6   :  { %v401_v7 = vpop.f32.mrf.mxu1  ;;  %v1032_v10 = vpop.f32.mrf.mxu0 }
  0xc7   :  { %v591_v61 = vpop.f32.mrf.mxu2  ;;  %v402_v19 = vadd.f32 %v401_v7, %v3460_v41  ;;  %v751_v21 = vpop.f32.mrf.mxu3 }
  0xc8   :  { %v616_v2 = vadd.f32 %v591_v61, %v400_v51 }
  0xca   :  { %v766_v3 = vadd.f32 %v3470_v53, %v616_v2  ;;  %v2366_v53 = vld [vmem:[%s3623_s0 + $0x60] sm:$0xf] }
  0xcb   :  { %v2367_v17 = vor.u32 %v2598_v54, %v2366_v53 }
  0xcc   :  { %v3547_v26 = vadd.f32 %v1030_v45, %v766_v3 }
  0xce   :  { %v404_v1 = vpop.f32.mrf.mxu1  ;;  %v1035_v32 = vpop.f32.mrf.mxu0 }
  0xcf   :  { %v593_v36 = vpop.f32.mrf.mxu2  ;;  %v405_v56 = vadd.f32 %v404_v1, %v3479_v13  ;;  %v753_v27 = vpop.f32.mrf.mxu3 }
  0xd0   :  { %v617_v18 = vadd.f32 %v593_v36, %v402_v19 }
  0xd1   :  { %1248 = vmatmul.bf16.gmra.mxu1 %v1166_v30  ;;  %1886 = vmatmul.bf16.gmra.mxu0 %v1804_v31 }
  0xd2   :  { %v767_v41 = vadd.f32 %v3494_v6, %v617_v18 }
  0xd4   :  { %1398 = vmatmul.bf16.gmra.mxu2 %v2367_v17  ;;  %v3557_v60 = vadd.f32 %v1032_v10, %v767_v41 }
  0xd6   :  { %v406_v35 = vpop.f32.mrf.mxu1  ;;  %v1037_v37 = vpop.f32.mrf.mxu0 }
  0xd7   :  { %v596_v28 = vpop.f32.mrf.mxu2  ;;  %v407_v38 = vadd.f32 %v406_v35, %v3500_v4  ;;  %v756_v43 = vpop.f32.mrf.mxu3 }
  0xd8   :  { %v618_v5 = vadd.f32 %v596_v28, %v405_v56 }
  0xda   :  { %v768_v34 = vadd.f32 %v746_v33, %v618_v5 }
  0xdc   :  { %v3560_v6 = vadd.f32 %v1035_v32, %v768_v34 }
  0xde   :  { %v409_v13 = vpop.f32.mrf.mxu1  ;;  %v1040_v45 = vpop.f32.mrf.mxu0 }
  0xdf   :  { %v598_v50 = vpop.f32.mrf.mxu2  ;;  %v410_v42 = vadd.f32 %v409_v13, %v3434_v22  ;;  %v758_v48 = vpop.f32.mrf.mxu3 }
  0xe0   :  { %v619_v44 = vadd.f32 %v598_v50, %v407_v38 }
  0xe2   :  { %v769_v29 = vadd.f32 %v748_v52, %v619_v44 }
  0xe4   :  { %v3563_v49 = vadd.f32 %v1037_v37, %v769_v29  ;;  %v3587_v29 = vld [vmem:[%s3624_s2] ss:$0 sm:$0xff] }
  0xe6   :  { %v411_v9 = vpop.f32.mrf.mxu1  ;;  %v1042_v46 = vpop.f32.mrf.mxu0 }
  0xe7   :  { %v601_v51 = vpop.f32.mrf.mxu2  ;;  %v412_v4 = vadd.f32 %v411_v9, %v3462_v47  ;;  %v761_v52 = vpop.f32.mrf.mxu3 }
  0xe8   :  { %v620_v20 = vadd.f32 %v601_v51, %v410_v42 }
  0xea   :  { %v770_v33 = vadd.f32 %v751_v21, %v620_v20 }
  0xec   :  { %v3566_v57 = vadd.f32 %v1040_v45, %v770_v33 }
  0xee   :  { %v414_v62 = vpop.f32.mrf.mxu1  ;;  %v1045_v63 = vpop.f32.mrf.mxu0 }
  0xef   :  { %v603_v58 = vpop.f32.mrf.mxu2  ;;  %v415_v22 = vadd.f32 %v414_v62, %v3481_v14  ;;  %v763_v47 = vpop.f32.mrf.mxu3 }
  0xf0   :  { %v621_v61 = vadd.f32 %v603_v58, %v412_v4 }
  0xf2   :  { %v771_v23 = vadd.f32 %v753_v27, %v621_v61 }
  0xf4   :  { %v3569_v0 = vadd.f32 %v1042_v46, %v771_v23 }
  0xf6   :  { %v416_v10 = vpop.f32.mrf.mxu1  ;;  %v1047_v11 = vpop.f32.mrf.mxu0 }
  0xf7   :  { %v606_v2 = vpop.f32.mrf.mxu2  ;;  %v417_v15 = vadd.f32 %v416_v10, %v3502_v8  ;;  %v1668_v12 = vpop.f32.mrf.mxu3 }
  0xf8   :  { %v622_v3 = vadd.f32 %v606_v2, %v415_v22 }
  0xfa   :  { %v772_v7 = vadd.f32 %v756_v43, %v622_v3 }
  0xfc   :  { %v3572_v16 = vadd.f32 %v1045_v63, %v772_v7 }
  0xfe   :  { %v419_v54 = vpop.f32.mrf.mxu1  ;;  %v1050_v21 = vpop.f32.mrf.mxu0 }
  0xff   :  { %v608_v39 = vpop.f32.mrf.mxu2  ;;  %v420_v59 = vadd.f32 %v419_v54, %v3492_v55  ;;  %v1670_v1 = vpop.f32.mrf.mxu3 }
 0x100   :  { %v623_v19 = vadd.f32 %v608_v39, %v417_v15 }
 0x102   :  { %v773_v53 = vadd.f32 %v758_v48, %v623_v19 }
 0x104   :  { %v3575_v14 = vadd.f32 %v1047_v11, %v773_v53 }
 0x106   :  { %v421_v18 = vpop.f32.mrf.mxu1  ;;  %v1052_v17 = vpop.f32.mrf.mxu0 }
 0x107   :  { %v611_v24 = vpop.f32.mrf.mxu2  ;;  %v422_v8 = vadd.f32 %v421_v18, %v3518_v40  ;;  %v1673_v35 = vpop.f32.mrf.mxu3 }
 0x108   :  { %v624_v25 = vadd.f32 %v611_v24, %v420_v59 }
 0x10a   :  { %v774_v36 = vadd.f32 %v761_v52, %v624_v25 }
 0x10c   :  { %v3578_v41 = vadd.f32 %v1050_v21, %v774_v36 }
 0x10e   :  { %v1229_v56 = vpop.f32.mrf.mxu1  ;;  %v1867_v27 = vpop.f32.mrf.mxu0 }
 0x10f   :  { %v613_v30 = vpop.f32.mrf.mxu2  ;;  %v1254_v55 = vadd.f32 %v1229_v56, %v3547_v26  ;;  %v1675_v33 = vpop.f32.mrf.mxu3 }
 0x110   :  { %v625_v31 = vadd.f32 %v613_v30, %v422_v8 }
 0x112   :  { %v775_v32 = vadd.f32 %v763_v47, %v625_v31 }
 0x114   :  { %v3581_v28 = vadd.f32 %v1052_v17, %v775_v32 }
 0x116   :  { %v1231_v37 = vpop.f32.mrf.mxu1  ;;  %v1869_v38 = vpop.f32.mrf.mxu0 }
 0x117   :  { %v1379_v5 = vpop.f32.mrf.mxu2  ;;  %v1255_v40 = vadd.f32 %v1231_v37, %v3557_v60  ;;  %v1678_v2 = vpop.f32.mrf.mxu3 }
 0x118   :  { %v1404_v34 = vadd.f32 %v1379_v5, %v1254_v55 }
 0x11a   :  { %v1693_v43 = vadd.f32 %v1668_v12, %v1404_v34 }
 0x11c   :  { %v1892_v44 = vadd.f32 %v1867_v27, %v1693_v43 }
 0x11e   :  { %v1234_v26 = vpop.f32.mrf.mxu1  ;;  %v1872_v42 = vpop.f32.mrf.mxu0  ;;  %v1906_v51 = vadd.f32 %v3587_v29, %v1892_v44 }
 0x11f   :  { %v1381_v50 = vpop.f32.mrf.mxu2  ;;  %v1256_v48 = vadd.f32 %v1234_v26, %v3560_v6  ;;  %v1680_v12 = vpop.f32.mrf.mxu3 }
 0x120   :  { %v1405_v13 = vadd.f32 %v1381_v50, %v1255_v40  ;;  %v1916_v46 = vmax.f32 %v1906_v51, 0.0 }
 0x122   :  { %v1694_v45 = vadd.f32 %v1670_v1, %v1405_v13 }
 0x124   :  { %v1893_v20 = vadd.f32 %v1869_v38, %v1694_v45 }
 0x126   :  { %v1907_v9 = vadd.f32 %v3587_v29, %v1893_v20  ;;  %v1236_v23 = vpop.f32.mrf.mxu1  ;;  %v1874_v52 = vpop.f32.mrf.mxu0 }
 0x127   :  { %v1384_v60 = vpop.f32.mrf.mxu2  ;;  %v1257_v63 = vadd.f32 %v1236_v23, %v3563_v49  ;;  %v1683_v31 = vpop.f32.mrf.mxu3 }
 0x128   :  { %v1917_v4 = vmax.f32 %v1907_v9, 0.0  ;;  %v1406_v58 = vadd.f32 %v1384_v60, %v1256_v48 }
 0x12a   :  { %v2626_v61 = vpack.c.bf16 %v1917_v4, %v1916_v46  ;;  %v1695_v62 = vadd.f32 %v1673_v35, %v1406_v58 }
 0x12c   :  { %2627 = vst [vmem:[%s3625_s3] sm:$0xff] %v2626_v61   ;;  %v1894_v6 = vadd.f32 %v1872_v42, %v1695_v62 }
 0x12e   :  { %v1239_v10 = vpop.f32.mrf.mxu1  ;;  %v1877_v11 = vpop.f32.mrf.mxu0  ;;  %v1908_v15 = vadd.f32 %v3587_v29, %v1894_v6 }
 0x12f   :  { %v1386_v22 = vpop.f32.mrf.mxu2  ;;  %v1258_v39 = vadd.f32 %v1239_v10, %v3566_v57  ;;  %v1685_v44 = vpop.f32.mrf.mxu3 }
 0x130   :  { %v1407_v3 = vadd.f32 %v1386_v22, %v1257_v63  ;;  %v1918_v54 = vmax.f32 %v1908_v15, 0.0 }
 0x132   :  { %v1696_v7 = vadd.f32 %v1675_v33, %v1407_v3 }
 0x134   :  { %v1895_v47 = vadd.f32 %v1874_v52, %v1696_v7 }
 0x136   :  { %v1909_v19 = vadd.f32 %v3587_v29, %v1895_v47  ;;  %v1241_v24 = vpop.f32.mrf.mxu1  ;;  %v1879_v25 = vpop.f32.mrf.mxu0 }
 0x137   :  { %v1389_v53 = vpop.f32.mrf.mxu2  ;;  %v1259_v18 = vadd.f32 %v1241_v24, %v3569_v0  ;;  %v1688_v60 = vpop.f32.mrf.mxu3 }
 0x138   :  { %v1919_v21 = vmax.f32 %v1909_v19, 0.0  ;;  %v1408_v59 = vadd.f32 %v1389_v53, %v1258_v39 }
 0x13a   :  { %v2631_v49 = vpack.c.bf16 %v1919_v21, %v1918_v54  ;;  %v1697_v36 = vadd.f32 %v1678_v2, %v1408_v59 }
 0x13c   :  { %2648 = vst [vmem:[%s3625_s3 + $0x8] sm:$0xff] %v2631_v49   ;;  %v1896_v8 = vadd.f32 %v1877_v11, %v1697_v36 }
 0x13e   :  { %v1244_v1 = vpop.f32.mrf.mxu1  ;;  %v1910_v32 = vadd.f32 %v3587_v29, %v1896_v8  ;;  %v1882_v55 = vpop.f32.mrf.mxu0 }
 0x13f   :  { %v1391_v17 = vpop.f32.mrf.mxu2  ;;  %v1260_v27 = vadd.f32 %v1244_v1, %v3572_v16  ;;  %v1690_v3 = vpop.f32.mrf.mxu3 }
 0x140   :  { %v1409_v57 = vadd.f32 %v1391_v17, %v1259_v18  ;;  %v1920_v35 = vmax.f32 %v1910_v32, 0.0 }
 0x142   :  { %v1698_v30 = vadd.f32 %v1680_v12, %v1409_v57 }
 0x144   :  { %v1897_v56 = vadd.f32 %v1879_v25, %v1698_v30 }
 0x146   :  { %v1911_v5 = vadd.f32 %v3587_v29, %v1897_v56  ;;  %v1246_v0 = vpop.f32.mrf.mxu1  ;;  %v1884_v13 = vpop.f32.mrf.mxu0 }
 0x147   :  { %v1394_v34 = vpop.f32.mrf.mxu2  ;;  %v1261_v50 = vadd.f32 %v1246_v0, %v3575_v14 }
 0x148   :  { %v1921_v37 = vmax.f32 %v1911_v5, 0.0  ;;  %v1410_v38 = vadd.f32 %v1394_v34, %v1260_v27 }
 0x14a   :  { %v2636_v43 = vpack.c.bf16 %v1921_v37, %v1920_v35  ;;  %v1699_v40 = vadd.f32 %v1683_v31, %v1410_v38 }
 0x14c   :  { %2649 = vst [vmem:[%s3625_s3 + $0x10] sm:$0xff] %v2636_v43   ;;  %v1898_v16 = vadd.f32 %v1882_v55, %v1699_v40 }
 0x14e   :  { %v1249_v51 = vpop.f32.mrf.mxu1  ;;  %v1912_v20 = vadd.f32 %v3587_v29, %v1898_v16  ;;  %v1887_v14 = vpop.f32.mrf.mxu0 }
 0x14f   :  { %v1396_v45 = vpop.f32.mrf.mxu2  ;;  %v1262_v33 = vadd.f32 %v1249_v51, %v3578_v41 }
 0x150   :  { %v1411_v26 = vadd.f32 %v1396_v45, %v1261_v50  ;;  %v1922_v4 = vmax.f32 %v1912_v20, 0.0 }
 0x152   :  { %v1700_v42 = vadd.f32 %v1685_v44, %v1411_v26 }
 0x154   :  { %v1899_v48 = vadd.f32 %v1884_v13, %v1700_v42 }
 0x156   :  { %v1913_v9 = vadd.f32 %v3587_v29, %v1899_v48  ;;  %v1251_v62 = vpop.f32.mrf.mxu1  ;;  %v1889_v10 = vpop.f32.mrf.mxu0 }
 0x157   :  { %v1399_v46 = vpop.f32.mrf.mxu2  ;;  %v1263_v22 = vadd.f32 %v1251_v62, %v3581_v28 }
 0x158   :  { %v1923_v58 = vmax.f32 %v1913_v9, 0.0  ;;  %v1412_v61 = vadd.f32 %v1399_v46, %v1262_v33 }
 0x15a   :  { %v2641_v23 = vpack.c.bf16 %v1923_v58, %v1922_v4  ;;  %v1701_v52 = vadd.f32 %v1688_v60, %v1412_v61 }
 0x15c   :  { %2650 = vst [vmem:[%s3625_s3 + $0x18] sm:$0xff] %v2641_v23   ;;  %v1900_v63 = vadd.f32 %v1887_v14, %v1701_v52 }
 0x15e   :  { %v1914_v41 = vadd.f32 %v3587_v29, %v1900_v63 }
 0x15f   :  { %v1401_v2 = vpop.f32.mrf.mxu2 }
 0x160   :  { %v1413_v6 = vadd.f32 %v1401_v2, %v1263_v22  ;;  %v1924_v47 = vmax.f32 %v1914_v41, 0.0 }
 0x162   :  { %v1702_v7 = vadd.f32 %v1690_v3, %v1413_v6 }
 0x164   :  { %v1901_v11 = vadd.f32 %v1889_v10, %v1702_v7 }
 0x166   :  { %v1915_v15 = vadd.f32 %v3587_v29, %v1901_v11 }
 0x168   :  { %v1925_v39 = vmax.f32 %v1915_v15, 0.0 }
 0x16a   :  { %v2646_v19 = vpack.c.bf16 %v1925_v39, %v1924_v47 }
 0x16c   :  { %2651 = vst [vmem:[%s3625_s3 + $0x20] sm:$0xff] %v2646_v19  }

// kernel: cnn_dqn_a_forward.9
= control target key start
LH: loop header
LB: loop body
LE: loop exit
PB: predicated region body
PF: predicated region fallthrough
CT: control target
= control target key end

     0   :  { %vm42_vm0 = vsmask.f32 3328  ;;  %vm43_vm1 = vsmask.f32 7440  ;;  %vm338_vm2 = vcmask 1042432   ;;  %vm339_vm3 = vcmask 1046532   ;;  %s2715_s1 = inlined_call_operand.vmem [shape: bf16[3,3,128,128], index: 1, kind: input, shape index: {}]   ;;  %s2716_s0 = inlined_call_operand.vmem [shape: bf16[2,5,10,128], index: 0, kind: input, shape index: {}]   ;;  %s2717_s2 = inlined_call_operand.vmem [shape: f32[1,128], index: 2, kind: input, shape index: {}]   ;;  %s2718_s3 = inlined_call_operand.vmem [shape: bf16[48,128], index: 3, kind: output, shape index: {}]  }
   0x1   :  { %v1984_v0 = vld [vmem:[%s2715_s1 + $0x78] sm:$0xff]  ;;  %v1983_v2 = vld [vmem:[%s2715_s1 + $0x70] sm:$0xff]  ;;  %v1982_v6 = vld [vmem:[%s2715_s1 + $0x68] sm:$0xff] }
   0x2   :  { %v1992_v1 = vld [vmem:[%s2715_s1 + $0xb8] sm:$0xff]  ;;  %2064 = vmatpush.bf16.msra.mxu1 %v1984_v0  ;;  %206 = vmatpush.bf16.msra.mxu0 %v1984_v0  ;;  %v1991_v3 = vld [vmem:[%s2715_s1 + $0xb0] sm:$0xff]  ;;  %v1990_v7 = vld [vmem:[%s2715_s1 + $0xa8] sm:$0xff] }
   0x3   :  { %442 = vmatpush.bf16.msra.mxu2 %v1992_v1  ;;  %v2003_v4 = vld [vmem:[%s2715_s1 + $0xf8] sm:$0xff]  ;;  %v2002_v5 = vld [vmem:[%s2715_s1 + $0xf0] sm:$0xff]  ;;  %v14_v8 = vld [vmem:[%s2716_s0] sm:$0xf] }
   0x4   :  { %562 = vmatpush.bf16.msra.mxu3 %v2003_v4  ;;  %v15_v9 = vld [vmem:[%s2716_s0 + $0x8] sm:$0xf]  ;;  %v2134_v10 = vld [vmem:[%s2716_s0 + $0x4] sm:$0x1]  ;;  %v2139_v11 = vld [vmem:[%s2716_s0 + $0xc] sm:$0x1] }
   0x5   :  { %v46_v12 = vshrl.u32 %v14_v8, 16  ;;  %v49_v13 = vshll.u32 %v14_v8, 16  ;;  %v1981_v14 = vld [vmem:[%s2715_s1 + $0x60] sm:$0xff]  ;;  %v2001_v16 = vld [vmem:[%s2715_s1 + $0xe8] sm:$0xff]  ;;  %v60_v17 = vshrl.u32 %v15_v9, 16  ;;  %v63_v18 = vshll.u32 %v15_v9, 16  ;;  %vm2190_vm4 = vmor %vm42_vm0, %vm43_vm1 }
   0x6   :  { %2065 = vmatpush.bf16.msra.mxu1 %v1983_v2  ;;  %207 = vmatpush.bf16.msra.mxu0 %v1983_v2  ;;  %v1989_v15 = vld [vmem:[%s2715_s1 + $0xa0] sm:$0xff]  ;;  %v18_v21 = vld [vmem:[%s2716_s0 + $0x30] sm:$0xf]  ;;  %v19_v22 = vld [vmem:[%s2716_s0 + $0x38] sm:$0xf]  ;;  %v55_v23 = vshll.u32 %v2134_v10, 16 }
   0x7   :  { %443 = vmatpush.bf16.msra.mxu2 %v1991_v3  ;;  %v48_v19 = vrot.slane %v46_v12, 4  ;;  %v51_v20 = vrot.slane %v49_v13, 5  ;;  %v62_v24 = vrot.slane %v60_v17, 4  ;;  %v65_v25 = vrot.slane %v63_v18, 5  ;;  %v2161_v27 = vld [vmem:[%s2716_s0 + $0x34] sm:$0x1]  ;;  %vm2200_vm5 = vmor %vm338_vm2, %vm339_vm3 }
   0x8   :  { %563 = vmatpush.bf16.msra.mxu3 %v2002_v5  ;;  %v69_v26 = vshll.u32 %v2139_v11, 16  ;;  %v2166_v29 = vld [vmem:[%s2716_s0 + $0x3c] sm:$0x1]  ;;  %v102_v30 = vshrl.u32 %v18_v21, 16  ;;  %v105_v31 = vshll.u32 %v18_v21, 16  ;;  %v111_v32 = vshll.u32 %v2161_v27, 16 }
   0x9   :  { %v52_v28 = vor.u32 %v51_v20, %v48_v19  ;;  %v2000_v33 = vld [vmem:[%s2715_s1 + $0xe0] sm:$0xff]  ;;  %v66_v34 = vor.u32 %v65_v25, %v62_v24  ;;  %v116_v35 = vshrl.u32 %v19_v22, 16  ;;  %v119_v36 = vshll.u32 %v19_v22, 16  ;;  %v1980_v37 = vld [vmem:[%s2715_s1 + $0x58] sm:$0xff]  ;;  %v321_v46 = vld [vmem:[%s2716_s0 + $0x8] sm:$0xe] }
   0xa   :  { %2066 = vmatpush.bf16.msra.mxu1 %v1982_v6  ;;  %208 = vmatpush.bf16.msra.mxu0 %v1982_v6  ;;  %v104_v38 = vrot.slane %v102_v30, 4  ;;  %v107_v39 = vrot.slane %v105_v31, 5  ;;  %v125_v40 = vshll.u32 %v2166_v29, 16  ;;  %v320_v41 = vld [vmem:[%s2716_s0] sm:$0xe]  ;;  %v1988_v42 = vld [vmem:[%s2715_s1 + $0x98] sm:$0xff] }
   0xb   :  { %444 = vmatpush.bf16.msra.mxu2 %v1990_v7  ;;  %v57_v43 = vrot.slane %v55_v23, 5  ;;  %v118_v44 = vrot.slane %v116_v35, 4  ;;  %v121_v45 = vrot.slane %v119_v36, 5  ;;  %v53_v47 = vrot.slane %v52_v28, 4  ;;  %v1979_v51 = vld [vmem:[%s2715_s1 + $0x50] sm:$0xff]  ;;  %v1999_v54 = vld [vmem:[%s2715_s1 + $0xd8] sm:$0xff] }
   0xc   :  { %564 = vmatpush.bf16.msra.mxu3 %v2001_v16  ;;  %v71_v48 = vrot.slane %v69_v26, 5  ;;  %v108_v49 = vor.u32 %v107_v39, %v104_v38  ;;  %v113_v50 = vrot.slane %v111_v32, 5  ;;  %v67_v53 = vrot.slane %v66_v34, 4  ;;  %v16_v63 = vld [vmem:[%s2716_s0 + $0x10] sm:$0xf]  ;;  %v1978_v9 = vld [vmem:[%s2715_s1 + $0x48] sm:$0xff] }
   0xd   :  { %v122_v55 = vor.u32 %v121_v45, %v118_v44  ;;  %v1540_v56 = vrot.slane %v320_v41, 9  ;;  %v343_v57 = vrot.slane %v2134_v10, 5  ;;  %v127_v59 = vrot.slane %v125_v40, 5  ;;  %v1987_v0 = vld [vmem:[%s2715_s1 + $0x90] sm:$0xff]  ;;  %v17_v2 = vld [vmem:[%s2716_s0 + $0x28] sm:$0xf] }
   0xe   :  { %2067 = vmatpush.bf16.msra.mxu1 %v1981_v14  ;;  %209 = vmatpush.bf16.msra.mxu0 %v1981_v14  ;;  %v109_v58 = vrot.slane %v108_v49, 4  ;;  %v1541_v61 = vrot.slane %v321_v46, 9  ;;  %v347_v62 = vrot.slane %v2139_v11, 5  ;;  %v58_v3 = vsel %vm2190_vm4, %v53_v47, %v57_v43  ;;  %v1998_v7 = vld [vmem:[%s2715_s1 + $0xd0] sm:$0xff]  ;;  %v1986_v14 = vld [vmem:[%s2715_s1 + $0x88] sm:$0xff]  ;;  %v1977_v18 = vld [vmem:[%s2715_s1 + $0x40] sm:$0xff] }
   0xf   :  { %445 = vmatpush.bf16.msra.mxu2 %v1989_v15  ;;  %v123_v1 = vrot.slane %v122_v55, 4  ;;  %v72_v4 = vsel %vm2190_vm4, %v67_v53, %v71_v48  ;;  %v344_v6 = vsel %vm2200_vm5, %v1540_v56, %v343_v57  ;;  %v74_v8 = vshrl.u32 %v16_v63, 16  ;;  %v1997_v23 = vld [vmem:[%s2715_s1 + $0xc8] sm:$0xff]  ;;  %v2244_v24 = vld [vmem:[%s2716_s0 + $0x14] sm:$0x1]  ;;  %v1976_v31 = vld [vmem:[%s2715_s1 + $0x38] sm:$0xff] }
  0x10   :  { %565 = vmatpush.bf16.msra.mxu3 %v2000_v33  ;;  %v114_v5 = vsel %vm2190_vm4, %v109_v58, %v113_v50  ;;  %v348_v11 = vsel %vm2200_vm5, %v1541_v61, %v347_v62  ;;  %v77_v12 = vshll.u32 %v16_v63, 16  ;;  %v88_v13 = vshrl.u32 %v17_v2, 16  ;;  %v1985_v32 = vld [vmem:[%s2715_s1 + $0x80] sm:$0xff]  ;;  %v39_v33 = vld [vmem:[%s2716_s0 + $0x2c] sm:$0x1]  ;;  %v2011_v34 = vld [vmem:[%s2715_s1 + $0x138] sm:$0xff] }
  0x11   :  { %v128_v10 = vsel %vm2190_vm4, %v123_v1, %v127_v59  ;;  %v91_v15 = vshll.u32 %v17_v2, 16  ;;  %v146_v16 = vunpack.c.l.b16 %v58_v3  ;;  %v147_v17 = vunpack.c.l.b16 %v72_v4  ;;  %v2030_v35 = vld [vmem:[%s2715_s1 + $0x1b8] sm:$0xff]  ;;  %v1996_v40 = vld [vmem:[%s2715_s1 + $0xc0] sm:$0xff]  ;;  %v1618_v44 = vld [vmem:[%s2716_s0 + $0x8] sm:$0xf] }
  0x12   :  { %2068 = vmatpush.bf16.msra.mxu1 %v1980_v37  ;;  %210 = vmatpush.bf16.msra.mxu0 %v1980_v37  ;;  %v150_v19 = vunpack.c.l.b16 %v114_v5  ;;  %v151_v20 = vunpack.c.l.b16 %v128_v10  ;;  %v382_v21 = vunpack.c.l.b16 %v344_v6  ;;  %v383_v22 = vunpack.c.l.b16 %v348_v11  ;;  %v1993_v45 = vld [vmem:[%s2716_s0 + $0xc] sm:$0xf0]  ;;  %v2038_v48 = vld [vmem:[%s2715_s1 + $0x1f8] sm:$0xff]  ;;  %v1974_v61 = vld [vmem:[%s2715_s1 + $0x28] sm:$0xff] }
  0x13   :  { %446 = vmatpush.bf16.msra.mxu2 %v1988_v42  ;;  %v76_v25 = vrot.slane %v74_v8, 4  ;;  %v79_v26 = vrot.slane %v77_v12, 5  ;;  %v90_v28 = vrot.slane %v88_v13, 4  ;;  %v93_v30 = vrot.slane %v91_v15, 5  ;;  %v1975_v46 = vld [vmem:[%s2715_s1 + $0x30] sm:$0xff]  ;;  %v2009_v3 = vld [vmem:[%s2715_s1 + $0x128] sm:$0xff] }
  0x14   :  { %566 = vmatpush.bf16.msra.mxu3 %v1999_v54  ;;  %v152_v36 = vpack.c.b16 %v147_v17, %v146_v16  ;;  %v154_v37 = vpack.c.b16 %v151_v20, %v150_v19  ;;  %v83_v38 = vshll.u32 %v2244_v24, 16  ;;  %v388_v39 = vpack.c.b16 %v383_v22, %v382_v21  ;;  %v2010_v47 = vld [vmem:[%s2715_s1 + $0x130] sm:$0xff]  ;;  %v1660_v54 = vld [vmem:[%s2716_s0 + $0x8] sm:$0xf]  ;;  %v1973_v11 = vld [vmem:[%s2715_s1 + $0x20] sm:$0xff] }
  0x15   :  { %v80_v41 = vor.u32 %v79_v26, %v76_v25  ;;  %v94_v42 = vor.u32 %v93_v30, %v90_v28  ;;  %v97_v43 = vshll.u32 %v39_v33, 16  ;;  %v2029_v49 = vld [vmem:[%s2715_s1 + $0x1b0] sm:$0xff]  ;;  %v1619_v53 = vor.u32 %v1993_v45, %v1618_v44  ;;  %v2028_v4 = vld [vmem:[%s2715_s1 + $0x1a8] sm:$0xff]  ;;  %v2008_v15 = vld [vmem:[%s2715_s1 + $0x120] sm:$0xff] }
  0x16   :  { %2069 = vmatpush.bf16.msra.mxu1 %v1979_v51  ;;  %211 = vmatpush.bf16.msra.mxu0 %v1979_v51  ;;  %v322_v50 = vld [vmem:[%s2716_s0 + $0x10] sm:$0xe]  ;;  %v323_v51 = vld [vmem:[%s2716_s0 + $0x28] sm:$0xe]  ;;  %v85_v56 = vrot.slane %v83_v38, 5  ;;  %v351_v63 = vrot.slane %v2244_v24, 5 }
  0x17   :  { %447 = vmatpush.bf16.msra.mxu2 %v1987_v0  ;;  %v81_v55 = vrot.slane %v80_v41, 4  ;;  %v95_v57 = vrot.slane %v94_v42, 4  ;;  %v99_v58 = vrot.slane %v97_v43, 5  ;;  %v1662_v59 = vld [vmem:[%s2716_s0 + $0x10] sm:$0xf]  ;;  %v1542_v62 = vrot.slane %v322_v50, 9 }
  0x18   :  { %567 = vmatpush.bf16.msra.mxu3 %v1998_v7  ;;  %v1543_v0 = vrot.slane %v323_v51, 9  ;;  %v355_v1 = vrot.slane %v39_v33, 5  ;;  %v2037_v2 = vld [vmem:[%s2715_s1 + $0x1f0] sm:$0xff]  ;;  %v605_v5 = vshrl.u32 %v1660_v54, 16  ;;  %v608_v6 = vshll.u32 %v1660_v54, 16  ;;  %v2027_v16 = vld [vmem:[%s2715_s1 + $0x1a0] sm:$0xff] }
  0x19   :  { %v86_v7 = vsel %vm2190_vm4, %v81_v55, %v85_v56  ;;  %v100_v8 = vsel %vm2190_vm4, %v95_v57, %v99_v58  ;;  %v622_v10 = vshll.u32 %v1662_v59, 16  ;;  %v352_v12 = vsel %vm2200_vm5, %v1542_v62, %v351_v63  ;;  %v2331_v19 = vld [vmem:[%s2716_s0 + $0xc] sm:$0x1]  ;;  %v1972_v26 = vld [vmem:[%s2715_s1 + $0x18] sm:$0xff]  ;;  %v2339_v28 = vld [vmem:[%s2716_s0 + $0x14] sm:$0x1] }
  0x1a   :  { %2070 = vmatpush.bf16.msra.mxu1 %v1978_v9  ;;  %212 = vmatpush.bf16.msra.mxu0 %v1978_v9  ;;  %v619_v9 = vshrl.u32 %v1662_v59, 16  ;;  %v356_v13 = vsel %vm2200_vm5, %v1543_v0, %v355_v1  ;;  %v148_v17 = vunpack.c.l.b16 %v86_v7  ;;  %v607_v20 = vrot.slane %v605_v5, 4  ;;  %v2007_v30 = vld [vmem:[%s2715_s1 + $0x118] sm:$0xff]  ;;  %v1994_v38 = vld [vmem:[%s2716_s0 + $0x2c] sm:$0xf0]  ;;  %v2035_v41 = vld [vmem:[%s2715_s1 + $0x1e0] sm:$0xff] }
  0x1b   :  { %448 = vmatpush.bf16.msra.mxu2 %v1986_v14  ;;  %v2036_v14 = vld [vmem:[%s2715_s1 + $0x1e8] sm:$0xff]  ;;  %v610_v21 = vrot.slane %v608_v6, 5  ;;  %v384_v22 = vunpack.c.l.b16 %v352_v12  ;;  %v624_v25 = vrot.slane %v622_v10, 5  ;;  %v1664_v33 = vld [vmem:[%s2716_s0 + $0x18] sm:$0xf]  ;;  %v1971_v43 = vld [vmem:[%s2715_s1 + $0x10] sm:$0xff] }
  0x1c   :  { %568 = vmatpush.bf16.msra.mxu3 %v1997_v23  ;;  %v385_v23 = vunpack.c.l.b16 %v356_v13  ;;  %v621_v24 = vrot.slane %v619_v9, 4  ;;  %v1666_v42 = vld [vmem:[%s2716_s0 + $0x30] sm:$0xf]  ;;  %v633_v45 = vshrl.u32 %v1664_v33, 16  ;;  %v359_v59 = vrot.slane %v2161_v27, 5  ;;  %v1970_v62 = vld [vmem:[%s2715_s1 + $0x8] sm:$0xff] }
  0x1d   :  { %v324_v44 = vld [vmem:[%s2716_s0 + $0x30] sm:$0xe]  ;;  %v647_v54 = vshrl.u32 %v1666_v42, 16  ;;  %v650_v55 = vshll.u32 %v1666_v42, 16  ;;  %v363_v0 = vrot.slane %v2166_v29, 5  ;;  %v2024_v27 = vld [vmem:[%s2715_s1 + $0x188] sm:$0xff] }
  0x1e   :  { %2071 = vmatpush.bf16.msra.mxu1 %v1977_v18  ;;  %213 = vmatpush.bf16.msra.mxu0 %v1977_v18  ;;  %v149_v18 = vunpack.c.l.b16 %v100_v8  ;;  %v2025_v50 = vld [vmem:[%s2715_s1 + $0x190] sm:$0xff]  ;;  %v1544_v58 = vrot.slane %v324_v44, 9  ;;  %v635_v1 = vrot.slane %v633_v45, 4  ;;  %v2399_v29 = vld [vmem:[%s2716_s0 + $0x1c] sm:$0x1] }
  0x1f   :  { %449 = vmatpush.bf16.msra.mxu2 %v1985_v32  ;;  %v2026_v32 = vld [vmem:[%s2715_s1 + $0x198] sm:$0xff]  ;;  %v649_v5 = vrot.slane %v647_v54, 4  ;;  %v652_v6 = vrot.slane %v650_v55, 5  ;;  %v2408_v9 = vld [vmem:[%s2716_s0 + $0x34] sm:$0x1] }
  0x20   :  { %569 = vmatpush.bf16.msra.mxu3 %v1996_v40  ;;  %v628_v40 = vshll.u32 %v2339_v28, 16  ;;  %v2033_v10 = vld [vmem:[%s2715_s1 + $0x1d0] sm:$0xff]  ;;  %v1498_v12 = vld [vmem:[%s2716_s0] sm:$0xf]  ;;  %v1966_v13 = vld [vmem:[%s2716_s0 + $0x4] sm:$0xf0] }
  0x21   :  { %214 = vmatmul.bf16.vlgmr.msra.gmra.mxu0 %v152_v36  ;;  %224 = vmatmul.bf16.vlgmr.msra.gmra.mxu1 %v154_v37  ;;  %v611_v36 = vor.u32 %v610_v21, %v607_v20  ;;  %v389_v37 = vpack.c.b16 %v385_v23, %v384_v22  ;;  %v2004_v20 = vld [vmem:[%s2715_s1 + $0x100] sm:$0xff]  ;;  %v642_v21 = vshll.u32 %v2399_v29, 16  ;;  %v2045_v54 = vld [vmem:[%s2715_s1 + $0x230] sm:$0xff] }
  0x22   :  { %296 = vmatpush.bf16.msrb.mxu1 %v1976_v31  ;;  %765 = vmatpush.bf16.msrb.mxu0 %v2011_v34  ;;  %v614_v31 = vshll.u32 %v2331_v19, 16  ;;  %v153_v34 = vpack.c.b16 %v149_v18, %v148_v17  ;;  %v630_v57 = vrot.slane %v628_v40, 5  ;;  %v1848_v17 = vld [vmem:[%s2716_s0 + $0x18] sm:$0xf]  ;;  %v2018_v40 = vld [vmem:[%s2715_s1 + $0x170] sm:$0xff] }
  0x23   :  { %1034 = vmatpush.bf16.msrb.mxu2 %v2030_v35  ;;  %570 = vmatmul.bf16.vlgmr.msra.gmra.mxu3 %v1619_v53  ;;  %v1622_v35 = vld [vmem:[%s2716_s0 + $0x18] sm:$0xf]  ;;  %v612_v53 = vrot.slane %v611_v36, 4 }
  0x24   :  { %450 = vmatmul.bf16.vlgmr.msra.gmra.mxu2 %v388_v39  ;;  %1237 = vmatpush.bf16.msrb.mxu3 %v2038_v48  ;;  %v625_v39 = vor.u32 %v624_v25, %v621_v24  ;;  %v616_v48 = vrot.slane %v614_v31, 5  ;;  %v1623_v51 = vor.u32 %v1994_v38, %v1622_v35  ;;  %v2019_v18 = vld [vmem:[%s2715_s1 + $0x178] sm:$0xff]  ;;  %v1091_v24 = vshrl.u32 %v1848_v17, 16 }
  0x25   :  { %v653_v31 = vor.u32 %v652_v6, %v649_v5  ;;  %v1094_v38 = vshll.u32 %v1848_v17, 16  ;;  %v1502_v17 = vld [vmem:[%s2716_s0 + $0x10] sm:$0xf] }
  0x26   :  { %297 = vmatpush.bf16.msrb.mxu1 %v1975_v46  ;;  %766 = vmatpush.bf16.msrb.mxu0 %v2010_v47  ;;  %v636_v46 = vshll.u32 %v1664_v33, 16  ;;  %v2006_v47 = vld [vmem:[%s2715_s1 + $0x110] sm:$0xff]  ;;  %v626_v56 = vrot.slane %v625_v39, 4  ;;  %v617_v7 = vsel %vm2190_vm4, %v612_v53, %v616_v48  ;;  %v2046_v33 = vld [vmem:[%s2715_s1 + $0x238] sm:$0xff]  ;;  %v1093_v44 = vrot.slane %v1091_v24, 4 }
  0x27   :  { %1035 = vmatpush.bf16.msrb.mxu2 %v2029_v49  ;;  %v325_v49 = vld [vmem:[%s2716_s0 + $0x38] sm:$0xe]  ;;  %v705_v25 = vunpack.c.l.b16 %v617_v7  ;;  %v2452_v48 = vld [vmem:[%s2716_s0 + $0x14] sm:$0x1]  ;;  %v1995_v53 = vld [vmem:[%s2716_s0 + $0x3c] sm:$0xf0] }
  0x28   :  { %1238 = vmatpush.bf16.msrb.mxu3 %v2037_v2  ;;  %v1545_v63 = vrot.slane %v325_v49, 9  ;;  %v638_v2 = vrot.slane %v636_v46, 5  ;;  %v631_v8 = vsel %vm2190_vm4, %v626_v56, %v630_v57  ;;  %v654_v46 = vrot.slane %v653_v31, 4  ;;  %v2457_v49 = vld [vmem:[%s2716_s0 + $0x1c] sm:$0x1]  ;;  %v2017_v56 = vld [vmem:[%s2715_s1 + $0x168] sm:$0xff] }
  0x29   :  { %v1096_v55 = vrot.slane %v1094_v38, 5  ;;  %v2031_v57 = vld [vmem:[%s2715_s1 + $0x1c0] sm:$0xff]  ;;  %v2015_v24 = vld [vmem:[%s2715_s1 + $0x158] sm:$0xff] }
  0x2a   :  { %298 = vmatpush.bf16.msrb.mxu1 %v1974_v61  ;;  %767 = vmatpush.bf16.msrb.mxu0 %v2009_v3  ;;  %v2034_v61 = vld [vmem:[%s2715_s1 + $0x1d8] sm:$0xff]  ;;  %v2005_v3 = vld [vmem:[%s2715_s1 + $0x108] sm:$0xff] }
  0x2b   :  { %1036 = vmatpush.bf16.msrb.mxu2 %v2028_v4  ;;  %v1969_v4 = vld [vmem:[%s2715_s1] sm:$0xff] }
  0x2c   :  { %1239 = vmatpush.bf16.msrb.mxu3 %v2036_v14  ;;  %v360_v14 = vsel %vm2200_vm5, %v1544_v58, %v359_v59  ;;  %v1668_v58 = vld [vmem:[%s2716_s0 + $0x38] sm:$0xf]  ;;  %v1670_v59 = vld [vmem:[%s2716_s0 + $0x40] sm:$0xf] }
  0x2d   :  { %v386_v35 = vunpack.c.l.b16 %v360_v14  ;;  %v664_v5 = vshll.u32 %v1668_v58, 16  ;;  %v675_v6 = vshrl.u32 %v1670_v59, 16  ;;  %v678_v7 = vshll.u32 %v1670_v59, 16  ;;  %v2043_v14 = vld [vmem:[%s2715_s1 + $0x220] sm:$0xff] }
  0x2e   :  { %299 = vmatpush.bf16.msrb.mxu1 %v1973_v11  ;;  %768 = vmatpush.bf16.msrb.mxu0 %v2008_v15  ;;  %v1846_v11 = vld [vmem:[%s2716_s0 + $0x10] sm:$0xf]  ;;  %v364_v15 = vsel %vm2200_vm5, %v1545_v63, %v363_v0  ;;  %v1097_v63 = vor.u32 %v1096_v55, %v1093_v44  ;;  %v1100_v0 = vshll.u32 %v2457_v49, 16  ;;  %v2544_v59 = vld [vmem:[%s2716_s0 + $0x24] sm:$0x1] }
  0x2f   :  { %1037 = vmatpush.bf16.msrb.mxu2 %v2027_v16  ;;  %v639_v16 = vor.u32 %v638_v2, %v635_v1  ;;  %v1077_v22 = vshrl.u32 %v1846_v11, 16  ;;  %v1080_v23 = vshll.u32 %v1846_v11, 16  ;;  %v387_v36 = vunpack.c.l.b16 %v364_v15  ;;  %v1850_v15 = vld [vmem:[%s2716_s0 + $0x20] sm:$0xf] }
  0x30   :  { %1240 = vmatpush.bf16.msrb.mxu3 %v2035_v41  ;;  %v644_v41 = vrot.slane %v642_v21, 5 }
  0x31   :  { %219 = vmatmul.bf16.gmra.mxu0 %v153_v34  ;;  %v1499_v34 = vor.u32 %v1966_v13, %v1498_v12  ;;  %v640_v39 = vrot.slane %v639_v16, 4  ;;  %v1079_v42 = vrot.slane %v1077_v22, 4  ;;  %v1098_v12 = vrot.slane %v1097_v63, 4  ;;  %v1852_v16 = vld [vmem:[%s2716_s0 + $0x38] sm:$0xf]  ;;  %v2013_v63 = vld [vmem:[%s2715_s1 + $0x148] sm:$0xff] }
  0x32   :  { %300 = vmatpush.bf16.msrb.mxu1 %v1972_v26  ;;  %769 = vmatpush.bf16.msrb.mxu0 %v2007_v30  ;;  %v706_v26 = vunpack.c.l.b16 %v631_v8  ;;  %v2023_v30 = vld [vmem:[%s2715_s1 + $0x180] sm:$0xff]  ;;  %v1102_v13 = vrot.slane %v1100_v0, 5 }
  0x33   :  { %1038 = vmatpush.bf16.msrb.mxu2 %v2026_v32  ;;  %575 = vmatmul.bf16.gmra.mxu3 %v1623_v51  ;;  %v656_v32 = vshll.u32 %v2408_v9, 16  ;;  %v1626_v51 = vld [vmem:[%s2716_s0 + $0x38] sm:$0xf]  ;;  %v645_v2 = vsel %vm2190_vm4, %v640_v39, %v644_v41  ;;  %v2016_v8 = vld [vmem:[%s2715_s1 + $0x160] sm:$0xff]  ;;  %v1804_v41 = vld [vmem:[%s2716_s0 + $0x10] sm:$0xf] }
  0x34   :  { %455 = vmatmul.bf16.gmra.mxu2 %v389_v37  ;;  %1241 = vmatpush.bf16.msrb.mxu3 %v2034_v61  ;;  %v2032_v37 = vld [vmem:[%s2715_s1 + $0x1c8] sm:$0xff]  ;;  %v711_v45 = vpack.c.b16 %v706_v26, %v705_v25  ;;  %v1627_v1 = vor.u32 %v1995_v53, %v1626_v51  ;;  %v2513_v25 = vld [vmem:[%s2716_s0 + $0x3c] sm:$0x1]  ;;  %v677_v26 = vrot.slane %v675_v6, 4 }
  0x35   :  { %v2042_v39 = vld [vmem:[%s2715_s1 + $0x218] sm:$0xff]  ;;  %v670_v44 = vshll.u32 %v2513_v25, 16 }
  0x36   :  { %301 = vmatpush.bf16.msrb.mxu1 %v1971_v43  ;;  %770 = vmatpush.bf16.msrb.mxu0 %v2006_v47  ;;  %v1082_v43 = vrot.slane %v1080_v23, 5  ;;  %v658_v47 = vrot.slane %v656_v32, 5  ;;  %v666_v23 = vrot.slane %v664_v5, 5  ;;  %v1103_v32 = vsel %vm2190_vm4, %v1098_v12, %v1102_v13 }
  0x37   :  { %1039 = vmatpush.bf16.msrb.mxu2 %v2025_v50  ;;  %v390_v50 = vpack.c.b16 %v387_v36, %v386_v35  ;;  %v1108_v35 = vshll.u32 %v1850_v15, 16  ;;  %v1119_v36 = vshrl.u32 %v1852_v16, 16  ;;  %v1178_v51 = vunpack.c.l.b16 %v1103_v32 }
  0x38   :  { %1242 = vmatpush.bf16.msrb.mxu3 %v2033_v10  ;;  %v1083_v61 = vor.u32 %v1082_v43, %v1079_v42  ;;  %v2020_v42 = vld [vmem:[%s2716_s0 + $0x14] sm:$0xf0]  ;;  %v672_v0 = vrot.slane %v670_v44, 5 }
  0x39   :  { %v1121_v55 = vrot.slane %v1119_v36, 4 }
  0x3a   :  { %302 = vmatpush.bf16.msrb.mxu1 %v1970_v62  ;;  %771 = vmatpush.bf16.msrb.mxu0 %v2005_v3  ;;  %v1086_v62 = vshll.u32 %v2452_v48, 16  ;;  %v659_v3 = vsel %vm2190_vm4, %v654_v46, %v658_v47  ;;  %v1084_v10 = vrot.slane %v1083_v61, 4  ;;  %v2549_v61 = vld [vmem:[%s2716_s0 + $0x3c] sm:$0x1] }
  0x3b   :  { %1040 = vmatpush.bf16.msrb.mxu2 %v2024_v27  ;;  %v2044_v27 = vld [vmem:[%s2715_s1 + $0x228] sm:$0xff]  ;;  %v708_v21 = vunpack.c.l.b16 %v659_v3  ;;  %v1128_v6 = vshll.u32 %v2549_v61, 16 }
  0x3c   :  { %1243 = vmatpush.bf16.msrb.mxu3 %v2032_v37  ;;  %v1088_v11 = vrot.slane %v1086_v62, 5  ;;  %v1122_v37 = vshll.u32 %v1852_v16, 16  ;;  %v1506_v16 = vld [vmem:[%s2716_s0 + $0x30] sm:$0xf] }
  0x3e   :  { %303 = vmatpush.bf16.msrb.mxu1 %v1969_v4  ;;  %772 = vmatpush.bf16.msrb.mxu0 %v2004_v20  ;;  %v661_v4 = vshrl.u32 %v1668_v58, 16  ;;  %v707_v20 = vunpack.c.l.b16 %v645_v2  ;;  %v1089_v31 = vsel %vm2190_vm4, %v1084_v10, %v1088_v11  ;;  %v2041_v58 = vld [vmem:[%s2715_s1 + $0x210] sm:$0xff]  ;;  %v2012_v11 = vld [vmem:[%s2715_s1 + $0x140] sm:$0xff] }
  0x3f   :  { %1041 = vmatpush.bf16.msrb.mxu2 %v2023_v30  ;;  %v680_v30 = vrot.slane %v678_v7, 5  ;;  %v2040_v7 = vld [vmem:[%s2715_s1 + $0x208] sm:$0xff] }
  0x40   :  { %1244 = vmatpush.bf16.msrb.mxu3 %v2031_v57  ;;  %v663_v22 = vrot.slane %v661_v4, 4  ;;  %v1805_v57 = vor.u32 %v2020_v42, %v1804_v41  ;;  %v1114_v4 = vshll.u32 %v2544_v59, 16  ;;  %v819_v41 = vrot.slane %v2339_v28, 5  ;;  %v2608_v28 = vld [vmem:[%s2716_s0 + $0x44] sm:$0x1] }
  0x41   :  { %304 = vmatmul.bf16.vlgmr.msrb.gmra.mxu1 %v1499_v34  ;;  %773 = vmatmul.bf16.vlgmr.msrb.gmra.mxu0 %v711_v45  ;;  %v1105_v34 = vshrl.u32 %v1850_v15, 16  ;;  %v2014_v45 = vld [vmem:[%s2715_s1 + $0x150] sm:$0xff]  ;;  %v681_v46 = vor.u32 %v680_v30, %v677_v26  ;;  %v1130_v15 = vrot.slane %v1128_v6, 5  ;;  %v1808_v26 = vld [vmem:[%s2716_s0 + $0x20] sm:$0xf] }
  0x42   :  { %914 = vmatpush.bf16.msra.mxu1 %v2019_v18  ;;  %1386 = vmatpush.bf16.msra.mxu0 %v2046_v33  ;;  %v1967_v18 = vld [vmem:[%s2716_s0 + $0x24] sm:$0xf0]  ;;  %v667_v43 = vor.u32 %v666_v23, %v663_v22  ;;  %v1116_v13 = vrot.slane %v1114_v4, 5  ;;  %v2021_v30 = vld [vmem:[%s2716_s0 + $0x34] sm:$0xf0] }
  0x43   :  { %2072 = vmatpush.bf16.msra.mxu2 %v2046_v33  ;;  %580 = vmatmul.bf16.gmra.mxu3 %v1627_v1  ;;  %v2522_v33 = vld [vmem:[%s2716_s0 + $0x44] sm:$0x1]  ;;  %v1503_v38 = vor.u32 %v1967_v18, %v1502_v17  ;;  %v1107_v53 = vrot.slane %v1105_v34, 4  ;;  %v682_v1 = vrot.slane %v681_v46, 4  ;;  %v1968_v17 = vld [vmem:[%s2716_s0 + $0x34] sm:$0xf0]  ;;  %v1809_v44 = vor.u32 %v2021_v30, %v1808_v26 }
  0x44   :  { %460 = vmatmul.bf16.gmra.mxu2 %v390_v50  ;;  %v684_v47 = vshll.u32 %v2522_v33, 16  ;;  %v1177_v50 = vunpack.c.l.b16 %v1089_v31  ;;  %v668_v62 = vrot.slane %v667_v43, 4  ;;  %v2039_v18 = vld [vmem:[%s2715_s1 + $0x200] sm:$0xff]  ;;  %v1720_v31 = vld [vmem:[%s2716_s0 + $0x8] sm:$0xe]  ;;  %v827_v26 = vrot.slane %v2408_v9, 5 }
  0x45   :  { %v1726_v43 = vrot.slane %v1720_v31, 9  ;;  %v1911_v9 = vld [vmem:[%s2716_s0 + $0x48] sm:$0xe] }
  0x46   :  { %915 = vmatpush.bf16.msra.mxu1 %v2018_v40  ;;  %1387 = vmatpush.bf16.msra.mxu0 %v2045_v54  ;;  %v712_v40 = vpack.c.b16 %v708_v21, %v707_v20  ;;  %v686_v2 = vrot.slane %v684_v47, 5  ;;  %v1183_v3 = vpack.c.b16 %v1178_v51, %v1177_v50  ;;  %v1854_v20 = vld [vmem:[%s2716_s0 + $0x40] sm:$0xf]  ;;  %v1856_v21 = vld [vmem:[%s2716_s0 + $0x48] sm:$0xf] }
  0x47   :  { %2073 = vmatpush.bf16.msra.mxu2 %v2045_v54  ;;  %v1110_v54 = vrot.slane %v1108_v35, 5  ;;  %v1721_v35 = vld [vmem:[%s2716_s0 + $0x10] sm:$0xe]  ;;  %v1133_v36 = vshrl.u32 %v1854_v20, 16  ;;  %v1907_v51 = vld [vmem:[%s2716_s0 + $0x18] sm:$0xe] }
  0x48   :  { %v687_v10 = vsel %vm2190_vm4, %v682_v1, %v686_v2  ;;  %v1906_v50 = vld [vmem:[%s2716_s0 + $0x10] sm:$0xe]  ;;  %v1913_v2 = vrot.slane %v1907_v51, 9 }
  0x49   :  { %v710_v23 = vunpack.c.l.b16 %v687_v10  ;;  %v1912_v1 = vrot.slane %v1906_v50, 9 }
  0x4a   :  { %916 = vmatpush.bf16.msra.mxu1 %v2017_v56  ;;  %1388 = vmatpush.bf16.msra.mxu0 %v2044_v27  ;;  %v1124_v56 = vrot.slane %v1122_v37, 5  ;;  %v1136_v37 = vshll.u32 %v1854_v20, 16 }
  0x4b   :  { %2074 = vmatpush.bf16.msra.mxu2 %v2044_v27  ;;  %v1111_v27 = vor.u32 %v1110_v54, %v1107_v53  ;;  %v1135_v53 = vrot.slane %v1133_v36, 4  ;;  %v1909_v36 = vld [vmem:[%s2716_s0 + $0x38] sm:$0xe] }
  0x4c   :  { %v1125_v5 = vor.u32 %v1124_v56, %v1121_v55  ;;  %v1138_v54 = vrot.slane %v1136_v37, 5  ;;  %v2613_v56 = vld [vmem:[%s2716_s0 + $0x4c] sm:$0x1] }
  0x4d   :  { %v1112_v12 = vrot.slane %v1111_v27, 4  ;;  %v1142_v27 = vshll.u32 %v2608_v28, 16 }
  0x4e   :  { %917 = vmatpush.bf16.msra.mxu1 %v2016_v8  ;;  %1389 = vmatpush.bf16.msra.mxu0 %v2043_v14  ;;  %v673_v8 = vsel %vm2190_vm4, %v668_v62, %v672_v0 }
  0x4f   :  { %2075 = vmatpush.bf16.msra.mxu2 %v2043_v14  ;;  %v1126_v14 = vrot.slane %v1125_v5, 4  ;;  %v709_v22 = vunpack.c.l.b16 %v673_v8  ;;  %v1117_v32 = vsel %vm2190_vm4, %v1112_v12, %v1116_v13  ;;  %v1156_v5 = vshll.u32 %v2613_v56, 16 }
  0x50   :  { %v1179_v46 = vunpack.c.l.b16 %v1117_v32  ;;  %v1144_v10 = vrot.slane %v1142_v27, 5  ;;  %v835_v27 = vrot.slane %v2522_v33, 5 }
  0x51   :  { %309 = vmatmul.bf16.gmra.mxu1 %v1503_v38  ;;  %778 = vmatmul.bf16.gmra.mxu0 %v712_v40  ;;  %v1131_v34 = vsel %vm2190_vm4, %v1126_v14, %v1130_v15  ;;  %v1147_v38 = vshrl.u32 %v1856_v21, 16  ;;  %v815_v40 = vrot.slane %v2331_v19, 5  ;;  %v713_v42 = vpack.c.b16 %v710_v23, %v709_v22  ;;  %v2022_v22 = vld [vmem:[%s2716_s0 + $0x44] sm:$0xf0] }
  0x52   :  { %918 = vmatpush.bf16.msra.mxu1 %v2015_v24  ;;  %1390 = vmatpush.bf16.msra.mxu0 %v2042_v39  ;;  %v1507_v24 = vor.u32 %v1968_v17, %v1506_v16  ;;  %v1180_v47 = vunpack.c.l.b16 %v1131_v34  ;;  %v1158_v12 = vrot.slane %v1156_v5, 5  ;;  %v1722_v16 = vld [vmem:[%s2716_s0 + $0x18] sm:$0xe]  ;;  %v1723_v17 = vld [vmem:[%s2716_s0 + $0x30] sm:$0xe] }
  0x53   :  { %2076 = vmatpush.bf16.msra.mxu2 %v2042_v39  ;;  %1245 = vmatmul.bf16.vlgmr.msrb.gmra.mxu3 %v1183_v3  ;;  %v1150_v39 = vshll.u32 %v1856_v21, 16  ;;  %v1149_v19 = vrot.slane %v1147_v38, 4  ;;  %v816_v62 = vsel %vm2200_vm5, %v1726_v43, %v815_v40  ;;  %v1139_v3 = vor.u32 %v1138_v54, %v1135_v53  ;;  %v1812_v21 = vld [vmem:[%s2716_s0 + $0x40] sm:$0xf] }
  0x54   :  { %1042 = vmatmul.bf16.vlgmr.msrb.gmra.mxu2 %v1805_v57  ;;  %v1287_v57 = vrot.slane %v2452_v48, 5  ;;  %v1184_v0 = vpack.c.b16 %v1180_v47, %v1179_v46  ;;  %v854_v48 = vunpack.c.l.b16 %v816_v62  ;;  %v1728_v30 = vrot.slane %v1722_v16, 9  ;;  %v1725_v62 = vld [vmem:[%s2716_s0 + $0x40] sm:$0xe] }
  0x55   :  { %v1152_v55 = vrot.slane %v1150_v39, 5  ;;  %v1140_v8 = vrot.slane %v1139_v3, 4  ;;  %v1729_v31 = vrot.slane %v1723_v17, 9  ;;  %v1813_v52 = vor.u32 %v2022_v22, %v1812_v21 }
  0x56   :  { %919 = vmatpush.bf16.msra.mxu1 %v2014_v45  ;;  %1391 = vmatpush.bf16.msra.mxu0 %v2041_v58  ;;  %v1727_v45 = vrot.slane %v1721_v35, 9  ;;  %v1908_v35 = vld [vmem:[%s2716_s0 + $0x20] sm:$0xe]  ;;  %v1299_v43 = vrot.slane %v2549_v61, 5  ;;  %v1917_v47 = vrot.slane %v1911_v9, 9  ;;  %v1731_v3 = vrot.slane %v1725_v62, 9 }
  0x57   :  { %2077 = vmatpush.bf16.msra.mxu2 %v2041_v58  ;;  %v1291_v58 = vrot.slane %v2457_v49, 5  ;;  %v1153_v4 = vor.u32 %v1152_v55, %v1149_v19  ;;  %v1288_v49 = vsel %vm2200_vm5, %v1912_v1, %v1287_v57  ;;  %v828_v38 = vsel %vm2200_vm5, %v1729_v31, %v827_v26 }
  0x58   :  { %v1326_v13 = vunpack.c.l.b16 %v1288_v49  ;;  %v1914_v40 = vrot.slane %v1908_v35, 9  ;;  %v857_v51 = vunpack.c.l.b16 %v828_v38  ;;  %v836_v5 = vsel %vm2200_vm5, %v1731_v3, %v835_v27 }
  0x5a   :  { %920 = vmatpush.bf16.msra.mxu1 %v2013_v63  ;;  %1392 = vmatpush.bf16.msra.mxu0 %v2040_v7  ;;  %v820_v63 = vsel %vm2200_vm5, %v1727_v45, %v819_v41  ;;  %v1295_v41 = vrot.slane %v2544_v59, 5  ;;  %v1307_v45 = vrot.slane %v2613_v56, 5 }
  0x5b   :  { %2078 = vmatpush.bf16.msra.mxu2 %v2040_v7  ;;  %v855_v6 = vunpack.c.l.b16 %v820_v63  ;;  %v1292_v7 = vsel %vm2200_vm5, %v1913_v2, %v1291_v58  ;;  %v1724_v58 = vld [vmem:[%s2716_s0 + $0x38] sm:$0xe]  ;;  %v831_v2 = vrot.slane %v2513_v25, 5 }
  0x5c   :  { %v1327_v14 = vunpack.c.l.b16 %v1292_v7  ;;  %v1296_v53 = vsel %vm2200_vm5, %v1914_v40, %v1295_v41  ;;  %v1308_v61 = vsel %vm2200_vm5, %v1917_v47, %v1307_v45  ;;  %v1730_v1 = vrot.slane %v1724_v58, 9 }
  0x5d   :  { %v860_v15 = vpack.c.b16 %v855_v6, %v854_v48  ;;  %v1328_v19 = vunpack.c.l.b16 %v1296_v53  ;;  %v1331_v57 = vunpack.c.l.b16 %v1308_v61  ;;  %v859_v6 = vunpack.c.l.b16 %v836_v5 }
  0x5e   :  { %921 = vmatpush.bf16.msra.mxu1 %v2012_v11  ;;  %1393 = vmatpush.bf16.msra.mxu0 %v2039_v18  ;;  %v1154_v11 = vrot.slane %v1153_v4, 4  ;;  %v1332_v23 = vpack.c.b16 %v1327_v14, %v1326_v13  ;;  %v832_v4 = vsel %vm2200_vm5, %v1730_v1, %v831_v2  ;;  %v2080_v2 = vld [vmem:[%s2717_s2] ss:$0 sm:$0xff] }
  0x5f   :  { %2079 = vmatpush.bf16.msra.mxu2 %v2039_v18  ;;  %v1145_v18 = vsel %vm2190_vm4, %v1140_v8, %v1144_v10  ;;  %v858_v48 = vunpack.c.l.b16 %v832_v4 }
  0x60   :  { %v1159_v20 = vsel %vm2190_vm4, %v1154_v11, %v1158_v12  ;;  %v1181_v32 = vunpack.c.l.b16 %v1145_v18 }
  0x61   :  { %314 = vmatmul.bf16.gmra.mxu1 %v1507_v24  ;;  %783 = vmatmul.bf16.gmra.mxu0 %v713_v42  ;;  %v823_v24 = vrot.slane %v2399_v29, 5  ;;  %v1182_v34 = vunpack.c.l.b16 %v1159_v20  ;;  %v1910_v29 = vld [vmem:[%s2716_s0 + $0x40] sm:$0xe]  ;;  %v1915_v42 = vrot.slane %v1909_v36, 9  ;;  %v862_v49 = vpack.c.b16 %v859_v6, %v858_v48 }
  0x62   :  { %v1916_v46 = vrot.slane %v1910_v29, 9 }
  0x63   :  { %1250 = vmatmul.bf16.gmra.mxu3 %v1184_v0  ;;  %v824_v37 = vsel %vm2200_vm5, %v1728_v30, %v823_v24  ;;  %v1185_v39 = vpack.c.b16 %v1182_v34, %v1181_v32  ;;  %v1300_v54 = vsel %vm2200_vm5, %v1915_v42, %v1299_v43 }
  0x64   :  { %1047 = vmatmul.bf16.gmra.mxu2 %v1809_v44  ;;  %v1303_v44 = vrot.slane %v2608_v28, 5  ;;  %v856_v50 = vunpack.c.l.b16 %v824_v37  ;;  %v1329_v55 = vunpack.c.l.b16 %v1300_v54 }
  0x66   :  { %v1304_v59 = vsel %vm2200_vm5, %v1916_v46, %v1303_v44  ;;  %v861_v28 = vpack.c.b16 %v857_v51, %v856_v50  ;;  %v1333_v63 = vpack.c.b16 %v1329_v55, %v1328_v19 }
  0x67   :  { %v1330_v56 = vunpack.c.l.b16 %v1304_v59 }
  0x69   :  { %v1334_v0 = vpack.c.b16 %v1331_v57, %v1330_v56 }
  0x71   :  { %922 = vmatmul.bf16.vlgmr.msra.gmra.mxu1 %v860_v15  ;;  %1394 = vmatmul.bf16.vlgmr.msra.gmra.mxu0 %v1332_v23 }
  0x73   :  { %1255 = vmatmul.bf16.gmra.mxu3 %v1185_v39 }
  0x74   :  { %1052 = vmatmul.bf16.gmra.mxu2 %v1813_v52 }
  0x81   :  { %927 = vmatmul.bf16.gmra.mxu1 %v861_v28  ;;  %1399 = vmatmul.bf16.gmra.mxu0 %v1333_v63 }
  0x84   :  { %1404 = vmatmul.bf16.vlgmr.msra.gmra.mxu2 %v1334_v0 }
  0x91   :  { %932 = vmatmul.bf16.gmra.mxu1 %v862_v49 }
  0x9e   :  { %v215_v7 = vpop.f32.mrf.mxu0  ;;  %v2685_v11 = vpop.f32.mrf.mxu1 }
  0xa6   :  { %v217_v10 = vpop.f32.mrf.mxu0  ;;  %v571_v25 = vpop.f32.mrf.mxu3 }
  0xa7   :  { %v451_v8 = vpop.f32.mrf.mxu2  ;;  %v2687_v13 = vpop.f32.mrf.mxu1 }
  0xae   :  { %v220_v33 = vpop.f32.mrf.mxu0  ;;  %v573_v14 = vpop.f32.mrf.mxu3 }
  0xaf   :  { %v453_v12 = vpop.f32.mrf.mxu2 }
  0xb6   :  { %v222_v16 = vpop.f32.mrf.mxu0  ;;  %v576_v18 = vpop.f32.mrf.mxu3 }
  0xb7   :  { %v456_v15 = vpop.f32.mrf.mxu2 }
  0xbe   :  { %v305_v17 = vpop.f32.mrf.mxu1  ;;  %v774_v20 = vpop.f32.mrf.mxu0 }
  0xbf   :  { %v458_v60 = vpop.f32.mrf.mxu2  ;;  %v578_v24 = vpop.f32.mrf.mxu3  ;;  %v306_v37 = vadd.f32 %v305_v17, %v215_v7 }
  0xc1   :  { %v466_v39 = vadd.f32 %v451_v8, %v306_v37 }
  0xc3   :  { %v586_v42 = vadd.f32 %v571_v25, %v466_v39 }
  0xc5   :  { %v789_v46 = vadd.f32 %v774_v20, %v586_v42 }
  0xc6   :  { %v307_v21 = vpop.f32.mrf.mxu1  ;;  %v776_v23 = vpop.f32.mrf.mxu0 }
  0xc7   :  { %v461_v22 = vpop.f32.mrf.mxu2  ;;  %v2691_v32 = vpop.f32.mrf.mxu3  ;;  %v308_v43 = vadd.f32 %v307_v21, %v217_v10 }
  0xc9   :  { %v467_v47 = vadd.f32 %v453_v12, %v308_v43 }
  0xcb   :  { %v587_v53 = vadd.f32 %v573_v14, %v467_v47 }
  0xcd   :  { %v790_v28 = vadd.f32 %v776_v23, %v587_v53 }
  0xce   :  { %v310_v26 = vpop.f32.mrf.mxu1  ;;  %v779_v31 = vpop.f32.mrf.mxu0 }
  0xcf   :  { %v2689_v30 = vpop.f32.mrf.mxu2  ;;  %v2693_v29 = vpop.f32.mrf.mxu3  ;;  %v311_v54 = vadd.f32 %v310_v26, %v220_v33 }
  0xd1   :  { %v468_v56 = vadd.f32 %v456_v15, %v311_v54 }
  0xd3   :  { %v588_v0 = vadd.f32 %v576_v18, %v468_v56 }
  0xd5   :  { %v791_v6 = vadd.f32 %v779_v31, %v588_v0 }
  0xd6   :  { %v312_v34 = vpop.f32.mrf.mxu1  ;;  %v781_v35 = vpop.f32.mrf.mxu0 }
  0xd7   :  { %v1043_v52 = vpop.f32.mrf.mxu2  ;;  %v1246_v41 = vpop.f32.mrf.mxu3  ;;  %v313_v63 = vadd.f32 %v312_v34, %v222_v16 }
  0xd9   :  { %v469_v5 = vadd.f32 %v458_v60, %v313_v63 }
  0xdb   :  { %v589_v33 = vadd.f32 %v578_v24, %v469_v5 }
  0xdd   :  { %v792_v21 = vadd.f32 %v781_v35, %v589_v33 }
  0xde   :  { %v315_v36 = vpop.f32.mrf.mxu1  ;;  %v784_v38 = vpop.f32.mrf.mxu0 }
  0xdf   :  { %v1045_v9 = vpop.f32.mrf.mxu2  ;;  %v1248_v19 = vpop.f32.mrf.mxu3  ;;  %v316_v14 = vadd.f32 %v315_v36, %v2685_v11 }
  0xe1   :  { %v470_v23 = vadd.f32 %v461_v22, %v316_v14 }
  0xe3   :  { %v590_v24 = vadd.f32 %v2691_v32, %v470_v23 }
  0xe6   :  { %v317_v40 = vpop.f32.mrf.mxu1  ;;  %v2695_v44 = vpop.f32.mrf.mxu0 }
  0xe7   :  { %v1048_v45 = vpop.f32.mrf.mxu2  ;;  %v1251_v48 = vpop.f32.mrf.mxu3  ;;  %v318_v11 = vadd.f32 %v317_v40, %v2687_v13 }
  0xe9   :  { %v471_v22 = vadd.f32 %v2689_v30, %v318_v11 }
  0xee   :  { %v923_v50 = vpop.f32.mrf.mxu1  ;;  %v1395_v61 = vpop.f32.mrf.mxu0 }
  0xef   :  { %v938_v51 = vadd.f32 %v923_v50, %v789_v46  ;;  %v1050_v55 = vpop.f32.mrf.mxu2  ;;  %v1253_v26 = vpop.f32.mrf.mxu3  ;;  %v591_v50 = vadd.f32 %v2693_v29, %v471_v22 }
  0xf1   :  { %v1058_v59 = vadd.f32 %v1043_v52, %v938_v51  ;;  %v794_v40 = vadd.f32 %v2695_v44, %v591_v50 }
  0xf3   :  { %v1261_v57 = vadd.f32 %v1246_v41, %v1058_v59  ;;  %v793_v41 = vadd.f32 %v784_v38, %v590_v24 }
  0xf5   :  { %v1410_v1 = vadd.f32 %v1395_v61, %v1261_v57 }
  0xf6   :  { %v925_v58 = vpop.f32.mrf.mxu1  ;;  %v1397_v27 = vpop.f32.mrf.mxu0 }
  0xf7   :  { %v939_v62 = vadd.f32 %v925_v58, %v790_v28  ;;  %v1420_v49 = vadd.f32 %v2080_v2, %v1410_v1  ;;  %v1053_v8 = vpop.f32.mrf.mxu2  ;;  %v1256_v47 = vpop.f32.mrf.mxu3 }
  0xf9   :  { %v1059_v3 = vadd.f32 %v1045_v9, %v939_v62  ;;  %v1426_v15 = vmax.f32 %v1420_v49, 0.0 }
  0xfb   :  { %v1262_v4 = vadd.f32 %v1248_v19, %v1059_v3 }
  0xfd   :  { %v1411_v7 = vadd.f32 %v1397_v27, %v1262_v4 }
  0xfe   :  { %v928_v10 = vpop.f32.mrf.mxu1  ;;  %v1400_v18 = vpop.f32.mrf.mxu0 }
  0xff   :  { %v1421_v25 = vadd.f32 %v2080_v2, %v1411_v7  ;;  %v940_v12 = vadd.f32 %v928_v10, %v791_v6  ;;  %v1055_v52 = vpop.f32.mrf.mxu2 }
 0x101   :  { %v1427_v16 = vmax.f32 %v1421_v25, 0.0  ;;  %v1060_v17 = vadd.f32 %v1048_v45, %v940_v12 }
 0x103   :  { %v2050_v20 = vpack.c.bf16 %v1427_v16, %v1426_v15  ;;  %v1263_v60 = vadd.f32 %v1251_v48, %v1060_v17 }
 0x105   :  { %2051 = vst [vmem:[%s2718_s3] sm:$0xff] %v2050_v20   ;;  %v1412_v36 = vadd.f32 %v1400_v18, %v1263_v60 }
 0x106   :  { %v930_v31 = vpop.f32.mrf.mxu1  ;;  %v1402_v37 = vpop.f32.mrf.mxu0 }
 0x107   :  { %v941_v34 = vadd.f32 %v930_v31, %v792_v21  ;;  %v1422_v35 = vadd.f32 %v2080_v2, %v1412_v36  ;;  %v1405_v54 = vpop.f32.mrf.mxu2 }
 0x109   :  { %v1061_v9 = vadd.f32 %v1050_v55, %v941_v34  ;;  %v1428_v51 = vmax.f32 %v1422_v35, 0.0  ;;  %v1258_v55 = vpop.f32.mrf.mxu3 }
 0x10b   :  { %v1264_v39 = vadd.f32 %v1253_v26, %v1061_v9 }
 0x10d   :  { %v1413_v42 = vadd.f32 %v1402_v37, %v1264_v39 }
 0x10e   :  { %v933_v43 = vpop.f32.mrf.mxu1 }
 0x10f   :  { %v1423_v45 = vadd.f32 %v2080_v2, %v1413_v42  ;;  %v942_v46 = vadd.f32 %v933_v43, %v793_v41  ;;  %v1407_v56 = vpop.f32.mrf.mxu2 }
 0x111   :  { %v1429_v53 = vmax.f32 %v1423_v45, 0.0  ;;  %v1062_v32 = vadd.f32 %v1053_v8, %v942_v46 }
 0x113   :  { %v2055_v13 = vpack.c.bf16 %v1429_v53, %v1428_v51  ;;  %v1265_v30 = vadd.f32 %v1256_v47, %v1062_v32 }
 0x115   :  { %2062 = vst [vmem:[%s2718_s3 + $0x8] sm:$0xff] %v2055_v13   ;;  %v1414_v61 = vadd.f32 %v1405_v54, %v1265_v30 }
 0x116   :  { %v935_v38 = vpop.f32.mrf.mxu1 }
 0x117   :  { %v943_v59 = vadd.f32 %v935_v38, %v794_v40  ;;  %v1424_v29 = vadd.f32 %v2080_v2, %v1414_v61 }
 0x119   :  { %v1063_v19 = vadd.f32 %v1055_v52, %v943_v59  ;;  %v1430_v62 = vmax.f32 %v1424_v29, 0.0 }
 0x11b   :  { %v1266_v28 = vadd.f32 %v1258_v55, %v1063_v19 }
 0x11d   :  { %v1415_v57 = vadd.f32 %v1407_v56, %v1266_v28 }
 0x11f   :  { %v1425_v58 = vadd.f32 %v2080_v2, %v1415_v57 }
 0x121   :  { %v1431_v63 = vmax.f32 %v1425_v58, 0.0 }
 0x123   :  { %v2060_v0 = vpack.c.bf16 %v1431_v63, %v1430_v62 }
 0x125   :  { %2063 = vst [vmem:[%s2718_s3 + $0x10] sm:$0xff] %v2060_v0  }

// kernel: cnn_dqn_a_forward.10
= control target key start
LH: loop header
LB: loop body
LE: loop exit
PB: predicated region body
PF: predicated region fallthrough
CT: control target
= control target key end

     0   :  { %vm34_vm0 = vsmask.f32 3328  ;;  %vm222_vm1 = vcmask 1042432   ;;  %vm223_vm2 = vcmask 1046532   ;;  %vm35_vm3 = vsmask.f32 7440  ;;  %s1835_s1 = inlined_call_operand.vmem [shape: bf16[3,3,128,128], index: 1, kind: input, shape index: {}]   ;;  %s1836_s0 = inlined_call_operand.vmem [shape: bf16[2,3,10,128], index: 0, kind: input, shape index: {}]   ;;  %s1837_s2 = inlined_call_operand.vmem [shape: f32[1,128], index: 2, kind: input, shape index: {}]   ;;  %s1838_s3 = inlined_call_operand.vmem [shape: bf16[16,128], index: 3, kind: output, shape index: {}]  }
   0x1   :  { %v1412_v0 = vld [vmem:[%s1835_s1 + $0x78] sm:$0xff]  ;;  %v1411_v4 = vld [vmem:[%s1835_s1 + $0x70] sm:$0xff]  ;;  %v1410_v8 = vld [vmem:[%s1835_s1 + $0x68] sm:$0xff] }
   0x2   :  { %v1420_v1 = vld [vmem:[%s1835_s1 + $0xb8] sm:$0xff]  ;;  %134 = vmatpush.bf16.msra.mxu0 %v1412_v0  ;;  %v1419_v5 = vld [vmem:[%s1835_s1 + $0xb0] sm:$0xff]  ;;  %v1418_v9 = vld [vmem:[%s1835_s1 + $0xa8] sm:$0xff] }
   0x3   :  { %v1404_v2 = vld [vmem:[%s1835_s1 + $0x38] sm:$0xff]  ;;  %302 = vmatpush.bf16.msra.mxu2 %v1420_v1  ;;  %v1403_v6 = vld [vmem:[%s1835_s1 + $0x30] sm:$0xff]  ;;  %v1402_v10 = vld [vmem:[%s1835_s1 + $0x28] sm:$0xff] }
   0x4   :  { %v1429_v3 = vld [vmem:[%s1835_s1 + $0xf8] sm:$0xff]  ;;  %202 = vmatpush.bf16.msra.mxu1 %v1404_v2  ;;  %v1428_v7 = vld [vmem:[%s1835_s1 + $0xf0] sm:$0xff]  ;;  %v1427_v11 = vld [vmem:[%s1835_s1 + $0xe8] sm:$0xff] }
   0x5   :  { %392 = vmatpush.bf16.msra.mxu3 %v1429_v3  ;;  %v1409_v12 = vld [vmem:[%s1835_s1 + $0x60] sm:$0xff]  ;;  %v1408_v16 = vld [vmem:[%s1835_s1 + $0x58] sm:$0xff]  ;;  %v1407_v20 = vld [vmem:[%s1835_s1 + $0x50] sm:$0xff] }
   0x6   :  { %135 = vmatpush.bf16.msra.mxu0 %v1411_v4  ;;  %v1417_v13 = vld [vmem:[%s1835_s1 + $0xa0] sm:$0xff]  ;;  %v1416_v17 = vld [vmem:[%s1835_s1 + $0x98] sm:$0xff]  ;;  %v1415_v21 = vld [vmem:[%s1835_s1 + $0x90] sm:$0xff] }
   0x7   :  { %303 = vmatpush.bf16.msra.mxu2 %v1419_v5  ;;  %v1401_v14 = vld [vmem:[%s1835_s1 + $0x20] sm:$0xff]  ;;  %v1400_v18 = vld [vmem:[%s1835_s1 + $0x18] sm:$0xff]  ;;  %v1399_v25 = vld [vmem:[%s1835_s1 + $0x10] sm:$0xff] }
   0x8   :  { %203 = vmatpush.bf16.msra.mxu1 %v1403_v6  ;;  %v1426_v15 = vld [vmem:[%s1835_s1 + $0xe0] sm:$0xff]  ;;  %v1425_v19 = vld [vmem:[%s1835_s1 + $0xd8] sm:$0xff]  ;;  %v1424_v35 = vld [vmem:[%s1835_s1 + $0xd0] sm:$0xff] }
   0x9   :  { %393 = vmatpush.bf16.msra.mxu3 %v1428_v7  ;;  %v14_v22 = vld [vmem:[%s1836_s0] sm:$0xf]  ;;  %v15_v23 = vld [vmem:[%s1836_s0 + $0x18] sm:$0xf]  ;;  %v32_v24 = vld [vmem:[%s1836_s0 + $0x4] sm:$0x1] }
   0xa   :  { %136 = vmatpush.bf16.msra.mxu0 %v1410_v8  ;;  %v33_v26 = vld [vmem:[%s1836_s0 + $0x1c] sm:$0x1]  ;;  %v38_v27 = vshrl.u32 %v14_v22, 16  ;;  %v41_v28 = vshll.u32 %v14_v22, 16  ;;  %v47_v29 = vshll.u32 %v32_v24, 16  ;;  %v52_v30 = vshrl.u32 %v15_v23, 16  ;;  %vm1589_vm4 = vmor %vm222_vm1, %vm223_vm2 }
   0xb   :  { %304 = vmatpush.bf16.msra.mxu2 %v1418_v9  ;;  %v55_v31 = vshll.u32 %v15_v23, 16  ;;  %v61_v32 = vshll.u32 %v33_v26, 16  ;;  %v216_v33 = vld [vmem:[%s1836_s0] sm:$0xe]  ;;  %v217_v34 = vld [vmem:[%s1836_s0 + $0x18] sm:$0xe]  ;;  %vm1601_vm5 = vmor %vm34_vm0, %vm35_vm3 }
   0xc   :  { %204 = vmatpush.bf16.msra.mxu1 %v1402_v10  ;;  %v40_v36 = vrot.slane %v38_v27, 4  ;;  %v43_v37 = vrot.slane %v41_v28, 5  ;;  %v54_v38 = vrot.slane %v52_v30, 4  ;;  %v1030_v41 = vrot.slane %v216_v33, 9  ;;  %v1406_v47 = vld [vmem:[%s1835_s1 + $0x48] sm:$0xff]  ;;  %v1405_v59 = vld [vmem:[%s1835_s1 + $0x40] sm:$0xff] }
   0xd   :  { %394 = vmatpush.bf16.msra.mxu3 %v1427_v11  ;;  %v57_v39 = vrot.slane %v55_v31, 5  ;;  %v227_v42 = vrot.slane %v32_v24, 5  ;;  %v49_v44 = vrot.slane %v47_v29, 5  ;;  %v1031_v45 = vrot.slane %v217_v34, 9  ;;  %v1414_v48 = vld [vmem:[%s1835_s1 + $0x88] sm:$0xff]  ;;  %v1413_v60 = vld [vmem:[%s1835_s1 + $0x80] sm:$0xff] }
   0xe   :  { %137 = vmatpush.bf16.msra.mxu0 %v1409_v12  ;;  %v44_v43 = vor.u32 %v43_v37, %v40_v36  ;;  %v231_v46 = vrot.slane %v33_v26, 5  ;;  %v63_v51 = vrot.slane %v61_v32, 5  ;;  %v1398_v52 = vld [vmem:[%s1835_s1 + $0x8] sm:$0xff]  ;;  %v1437_v61 = vld [vmem:[%s1835_s1 + $0x138] sm:$0xff]  ;;  %v1397_v3 = vld [vmem:[%s1835_s1] sm:$0xff] }
   0xf   :  { %305 = vmatpush.bf16.msra.mxu2 %v1417_v13  ;;  %v58_v50 = vor.u32 %v57_v39, %v54_v38  ;;  %v1423_v53 = vld [vmem:[%s1835_s1 + $0xc8] sm:$0xff]  ;;  %v228_v55 = vsel %vm1589_vm4, %v1030_v41, %v227_v42  ;;  %v1454_v2 = vld [vmem:[%s1835_s1 + $0x1b8] sm:$0xff]  ;;  %v1422_v4 = vld [vmem:[%s1835_s1 + $0xc0] sm:$0xff] }
  0x10   :  { %205 = vmatpush.bf16.msra.mxu1 %v1401_v14  ;;  %v45_v54 = vrot.slane %v44_v43, 4  ;;  %v232_v56 = vsel %vm1589_vm4, %v1031_v45, %v231_v46  ;;  %v250_v0 = vunpack.c.l.b16 %v228_v55  ;;  %v1445_v6 = vld [vmem:[%s1835_s1 + $0x178] sm:$0xff]  ;;  %v996_v8 = vld [vmem:[%s1836_s0] sm:$0xf]  ;;  %v1100_v10 = vld [vmem:[%s1836_s0 + $0x8] sm:$0xf] }
  0x11   :  { %395 = vmatpush.bf16.msra.mxu3 %v1426_v15  ;;  %v59_v57 = vrot.slane %v58_v50, 4  ;;  %v251_v1 = vunpack.c.l.b16 %v232_v56  ;;  %v1462_v7 = vld [vmem:[%s1835_s1 + $0x1f8] sm:$0xff]  ;;  %v1421_v11 = vld [vmem:[%s1836_s0 + $0x1c] sm:$0xf0]  ;;  %v1436_v14 = vld [vmem:[%s1835_s1 + $0x130] sm:$0xff] }
  0x12   :  { %138 = vmatpush.bf16.msra.mxu0 %v1408_v16  ;;  %v50_v58 = vsel %vm1601_vm5, %v45_v54, %v49_v44  ;;  %v1396_v9 = vld [vmem:[%s1836_s0 + $0x14] sm:$0xf0]  ;;  %v1453_v15 = vld [vmem:[%s1835_s1 + $0x1b0] sm:$0xff]  ;;  %v1294_v23 = vld [vmem:[%s1836_s0 + $0x28] sm:$0xf] }
  0x13   :  { %306 = vmatpush.bf16.msra.mxu2 %v1416_v17  ;;  %v64_v62 = vsel %vm1601_vm5, %v59_v57, %v63_v51  ;;  %v82_v63 = vunpack.c.l.b16 %v50_v58  ;;  %v252_v13 = vpack.c.b16 %v251_v1, %v250_v0  ;;  %v997_v16 = vor.u32 %v1396_v9, %v996_v8  ;;  %v1292_v22 = vld [vmem:[%s1836_s0 + $0x10] sm:$0xf]  ;;  %v1435_v24 = vld [vmem:[%s1835_s1 + $0x128] sm:$0xff]  ;;  %v1434_v36 = vld [vmem:[%s1835_s1 + $0x120] sm:$0xff] }
  0x14   :  { %206 = vmatpush.bf16.msra.mxu1 %v1400_v18  ;;  %v83_v5 = vunpack.c.l.b16 %v64_v62  ;;  %v1101_v17 = vor.u32 %v1421_v11, %v1100_v10  ;;  %v1134_v18 = vld [vmem:[%s1836_s0 + $0x8] sm:$0xf]  ;;  %v719_v32 = vshrl.u32 %v1292_v22, 16  ;;  %v722_v33 = vshll.u32 %v1292_v22, 16  ;;  %v1451_v37 = vld [vmem:[%s1835_s1 + $0x1a0] sm:$0xff]  ;;  %v1433_v54 = vld [vmem:[%s1835_s1 + $0x118] sm:$0xff] }
  0x15   :  { %396 = vmatpush.bf16.msra.mxu3 %v1425_v19  ;;  %v1136_v19 = vld [vmem:[%s1836_s0 + $0x20] sm:$0xf]  ;;  %v413_v26 = vshrl.u32 %v1134_v18, 16  ;;  %v416_v27 = vshll.u32 %v1134_v18, 16  ;;  %v1443_v30 = vld [vmem:[%s1835_s1 + $0x168] sm:$0xff]  ;;  %v733_v34 = vshrl.u32 %v1294_v23, 16 }
  0x16   :  { %139 = vmatpush.bf16.msra.mxu0 %v1407_v20  ;;  %v84_v12 = vpack.c.b16 %v83_v5, %v82_v63  ;;  %v1444_v20 = vld [vmem:[%s1835_s1 + $0x170] sm:$0xff]  ;;  %v427_v28 = vshrl.u32 %v1136_v19, 16  ;;  %v430_v29 = vshll.u32 %v1136_v19, 16  ;;  %v1460_v31 = vld [vmem:[%s1835_s1 + $0x1e8] sm:$0xff]  ;;  %v1137_v44 = vld [vmem:[%s1836_s0 + $0x24] sm:$0x1] }
  0x17   :  { %307 = vmatpush.bf16.msra.mxu2 %v1415_v21  ;;  %v1461_v21 = vld [vmem:[%s1835_s1 + $0x1f0] sm:$0xff]  ;;  %v415_v38 = vrot.slane %v413_v26, 4  ;;  %v418_v39 = vrot.slane %v416_v27, 5  ;;  %v1135_v43 = vld [vmem:[%s1836_s0 + $0xc] sm:$0x1]  ;;  %v1442_v45 = vld [vmem:[%s1835_s1 + $0x160] sm:$0xff] }
  0x18   :  { %207 = vmatpush.bf16.msra.mxu1 %v1399_v25  ;;  %v1452_v25 = vld [vmem:[%s1835_s1 + $0x1a8] sm:$0xff]  ;;  %v429_v41 = vrot.slane %v427_v28, 4  ;;  %v432_v42 = vrot.slane %v430_v29, 5  ;;  %v1459_v46 = vld [vmem:[%s1835_s1 + $0x1e0] sm:$0xff]  ;;  %v735_v50 = vrot.slane %v733_v34, 4  ;;  %v1450_v55 = vld [vmem:[%s1835_s1 + $0x198] sm:$0xff] }
  0x19   :  { %397 = vmatpush.bf16.msra.mxu3 %v1424_v35  ;;  %v736_v35 = vshll.u32 %v1294_v23, 16  ;;  %v419_v56 = vor.u32 %v418_v39, %v415_v38  ;;  %v422_v57 = vshll.u32 %v1135_v43, 16  ;;  %v1186_v62 = vld [vmem:[%s1836_s0 + $0x8] sm:$0xe]  ;;  %v1187_v63 = vld [vmem:[%s1836_s0 + $0x20] sm:$0xe] }
  0x1a   :  { %140 = vmatpush.bf16.msra.mxu0 %v1406_v47  ;;  %v721_v47 = vrot.slane %v719_v32, 4  ;;  %v433_v58 = vor.u32 %v432_v42, %v429_v41  ;;  %v1449_v5 = vld [vmem:[%s1835_s1 + $0x190] sm:$0xff]  ;;  %v1188_v10 = vrot.slane %v1186_v62, 9  ;;  %v533_v11 = vrot.slane %v1135_v43, 5  ;;  %v1456_v26 = vld [vmem:[%s1835_s1 + $0x1c8] sm:$0xff]  ;;  %v1438_v41 = vld [vmem:[%s1835_s1 + $0x140] sm:$0xff] }
  0x1b   :  { %308 = vmatpush.bf16.msra.mxu2 %v1414_v48  ;;  %v724_v48 = vrot.slane %v722_v33, 5  ;;  %v738_v51 = vrot.slane %v736_v35, 5  ;;  %v1447_v33 = vld [vmem:[%s1835_s1 + $0x180] sm:$0xff]  ;;  %v1258_v34 = vld [vmem:[%s1836_s0 + $0x10] sm:$0xf]  ;;  %v1470_v35 = vld [vmem:[%s1835_s1 + $0x238] sm:$0xff] }
  0x1c   :  { %208 = vmatpush.bf16.msra.mxu1 %v1398_v52  ;;  %v1712_v52 = vld [vmem:[%s1836_s0 + $0x14] sm:$0x1]  ;;  %v434_v8 = vrot.slane %v433_v58, 4  ;;  %v1446_v49 = vld [vmem:[%s1836_s0 + $0x24] sm:$0xf0]  ;;  %v1455_v42 = vld [vmem:[%s1835_s1 + $0x1c0] sm:$0xff] }
  0x1d   :  { %398 = vmatpush.bf16.msra.mxu3 %v1423_v53  ;;  %v1717_v53 = vld [vmem:[%s1836_s0 + $0x2c] sm:$0x1]  ;;  %v725_v0 = vor.u32 %v724_v48, %v721_v47  ;;  %v728_v1 = vshll.u32 %v1712_v52, 16  ;;  %v1469_v47 = vld [vmem:[%s1835_s1 + $0x230] sm:$0xff] }
  0x1e   :  { %141 = vmatpush.bf16.msra.mxu0 %v1405_v59  ;;  %v436_v59 = vshll.u32 %v1137_v44, 16  ;;  %v1468_v48 = vld [vmem:[%s1835_s1 + $0x228] sm:$0xff]  ;;  %v1465_v58 = vld [vmem:[%s1835_s1 + $0x210] sm:$0xff] }
  0x1f   :  { %309 = vmatpush.bf16.msra.mxu2 %v1413_v60  ;;  %v1441_v60 = vld [vmem:[%s1835_s1 + $0x158] sm:$0xff] }
  0x20   :  { %209 = vmatpush.bf16.msra.mxu1 %v1397_v3  ;;  %v742_v3 = vshll.u32 %v1717_v53, 16  ;;  %v438_v9 = vrot.slane %v436_v59, 5 }
  0x21   :  { %399 = vmatpush.bf16.msra.mxu3 %v1422_v4  ;;  %142 = vmatmul.bf16.vlgmr.msra.gmra.mxu0 %v84_v12  ;;  %v1432_v4 = vld [vmem:[%s1835_s1 + $0x110] sm:$0xff]  ;;  %v1189_v12 = vrot.slane %v1187_v63, 9 }
  0x22   :  { %509 = vmatpush.bf16.msrb.mxu0 %v1437_v61  ;;  %310 = vmatmul.bf16.vlgmr.msra.gmra.mxu2 %v252_v13  ;;  %v1458_v61 = vld [vmem:[%s1835_s1 + $0x1d8] sm:$0xff]  ;;  %v537_v13 = vrot.slane %v1137_v44, 5  ;;  %v744_v19 = vrot.slane %v742_v3, 5  ;;  %v439_v23 = vsel %vm1601_vm5, %v434_v8, %v438_v9  ;;  %v1259_v44 = vor.u32 %v1446_v49, %v1258_v34 }
  0x23   :  { %698 = vmatpush.bf16.msrb.mxu2 %v1454_v2  ;;  %210 = vmatmul.bf16.vlgmr.msra.gmra.mxu1 %v997_v16  ;;  %v739_v2 = vor.u32 %v738_v51, %v735_v50  ;;  %v726_v16 = vrot.slane %v725_v0, 4  ;;  %v458_v32 = vunpack.c.l.b16 %v439_v23  ;;  %v1467_v50 = vld [vmem:[%s1835_s1 + $0x220] sm:$0xff]  ;;  %v1466_v51 = vld [vmem:[%s1835_s1 + $0x218] sm:$0xff] }
  0x24   :  { %608 = vmatpush.bf16.msrb.mxu1 %v1445_v6  ;;  %400 = vmatmul.bf16.vlgmr.msra.gmra.mxu3 %v1101_v17  ;;  %v420_v6 = vrot.slane %v419_v56, 4  ;;  %v730_v17 = vrot.slane %v728_v1, 5  ;;  %v538_v27 = vsel %vm1589_vm4, %v1189_v12, %v537_v13  ;;  %v839_v56 = vrot.slane %v1712_v52, 5  ;;  %v1463_v0 = vld [vmem:[%s1835_s1 + $0x200] sm:$0xff] }
  0x25   :  { %815 = vmatpush.bf16.msrb.mxu3 %v1462_v7  ;;  %v424_v7 = vrot.slane %v422_v57, 5  ;;  %v740_v18 = vrot.slane %v739_v2, 4  ;;  %v843_v57 = vrot.slane %v1717_v53, 5 }
  0x26   :  { %510 = vmatpush.bf16.msrb.mxu0 %v1436_v14  ;;  %v1440_v14 = vld [vmem:[%s1835_s1 + $0x150] sm:$0xff]  ;;  %v731_v28 = vsel %vm1601_vm5, %v726_v16, %v730_v17 }
  0x27   :  { %699 = vmatpush.bf16.msrb.mxu2 %v1453_v15  ;;  %v1457_v15 = vld [vmem:[%s1835_s1 + $0x1d0] sm:$0xff]  ;;  %v425_v22 = vsel %vm1601_vm5, %v420_v6, %v424_v7  ;;  %v745_v29 = vsel %vm1601_vm5, %v740_v18, %v744_v19  ;;  %v763_v38 = vunpack.c.l.b16 %v731_v28 }
  0x28   :  { %609 = vmatpush.bf16.msrb.mxu1 %v1444_v20  ;;  %v1431_v20 = vld [vmem:[%s1835_s1 + $0x108] sm:$0xff]  ;;  %v764_v39 = vunpack.c.l.b16 %v745_v29 }
  0x29   :  { %816 = vmatpush.bf16.msrb.mxu3 %v1461_v21  ;;  %v1448_v21 = vld [vmem:[%s1835_s1 + $0x188] sm:$0xff] }
  0x2a   :  { %511 = vmatpush.bf16.msrb.mxu0 %v1435_v24  ;;  %v534_v24 = vsel %vm1589_vm4, %v1188_v10, %v533_v11 }
  0x2b   :  { %700 = vmatpush.bf16.msrb.mxu2 %v1452_v25  ;;  %v1439_v25 = vld [vmem:[%s1835_s1 + $0x148] sm:$0xff] }
  0x2c   :  { %610 = vmatpush.bf16.msrb.mxu1 %v1443_v30  ;;  %v1430_v30 = vld [vmem:[%s1835_s1 + $0x100] sm:$0xff] }
  0x2d   :  { %817 = vmatpush.bf16.msrb.mxu3 %v1460_v31  ;;  %v457_v31 = vunpack.c.l.b16 %v425_v22 }
  0x2e   :  { %512 = vmatpush.bf16.msrb.mxu0 %v1434_v36  ;;  %v556_v36 = vunpack.c.l.b16 %v534_v24 }
  0x2f   :  { %701 = vmatpush.bf16.msrb.mxu2 %v1451_v37  ;;  %v557_v37 = vunpack.c.l.b16 %v538_v27  ;;  %v459_v43 = vpack.c.b16 %v458_v32, %v457_v31  ;;  %v1476_v32 = vld [vmem:[%s1837_s2] ss:$0 sm:$0xff] }
  0x30   :  { %611 = vmatpush.bf16.msrb.mxu1 %v1442_v45 }
  0x31   :  { %818 = vmatpush.bf16.msrb.mxu3 %v1459_v46  ;;  %v558_v45 = vpack.c.b16 %v557_v37, %v556_v36  ;;  %v765_v46 = vpack.c.b16 %v764_v39, %v763_v38 }
  0x32   :  { %513 = vmatpush.bf16.msrb.mxu0 %v1433_v54  ;;  %v1344_v54 = vld [vmem:[%s1836_s0 + $0x10] sm:$0xe] }
  0x33   :  { %702 = vmatpush.bf16.msrb.mxu2 %v1450_v55  ;;  %v1345_v55 = vld [vmem:[%s1836_s0 + $0x28] sm:$0xe]  ;;  %v1346_v59 = vrot.slane %v1344_v54, 9 }
  0x34   :  { %612 = vmatpush.bf16.msrb.mxu1 %v1441_v60  ;;  %v1347_v60 = vrot.slane %v1345_v55, 9 }
  0x35   :  { %819 = vmatpush.bf16.msrb.mxu3 %v1458_v61  ;;  %v1464_v61 = vld [vmem:[%s1835_s1 + $0x208] sm:$0xff]  ;;  %v840_v62 = vsel %vm1589_vm4, %v1346_v59, %v839_v56 }
  0x36   :  { %514 = vmatpush.bf16.msrb.mxu0 %v1432_v4  ;;  %v844_v52 = vsel %vm1589_vm4, %v1347_v60, %v843_v57  ;;  %v862_v63 = vunpack.c.l.b16 %v840_v62 }
  0x37   :  { %703 = vmatpush.bf16.msrb.mxu2 %v1449_v5  ;;  %v863_v53 = vunpack.c.l.b16 %v844_v52 }
  0x38   :  { %613 = vmatpush.bf16.msrb.mxu1 %v1440_v14 }
  0x39   :  { %820 = vmatpush.bf16.msrb.mxu3 %v1457_v15  ;;  %v864_v1 = vpack.c.b16 %v863_v53, %v862_v63 }
  0x3a   :  { %515 = vmatpush.bf16.msrb.mxu0 %v1431_v20 }
  0x3b   :  { %704 = vmatpush.bf16.msrb.mxu2 %v1448_v21 }
  0x3c   :  { %614 = vmatpush.bf16.msrb.mxu1 %v1439_v25 }
  0x3d   :  { %821 = vmatpush.bf16.msrb.mxu3 %v1456_v26 }
  0x3e   :  { %516 = vmatpush.bf16.msrb.mxu0 %v1430_v30 }
  0x3f   :  { %705 = vmatpush.bf16.msrb.mxu2 %v1447_v33 }
  0x40   :  { %615 = vmatpush.bf16.msrb.mxu1 %v1438_v41 }
  0x41   :  { %822 = vmatpush.bf16.msrb.mxu3 %v1455_v42  ;;  %517 = vmatmul.bf16.vlgmr.msrb.gmra.mxu0 %v459_v43 }
  0x42   :  { %914 = vmatpush.bf16.msra.mxu0 %v1470_v35  ;;  %706 = vmatmul.bf16.vlgmr.msrb.gmra.mxu2 %v1259_v44 }
  0x43   :  { %616 = vmatmul.bf16.vlgmr.msrb.gmra.mxu1 %v558_v45 }
  0x44   :  { %823 = vmatmul.bf16.vlgmr.msrb.gmra.mxu3 %v765_v46 }
  0x46   :  { %915 = vmatpush.bf16.msra.mxu0 %v1469_v47 }
  0x4a   :  { %916 = vmatpush.bf16.msra.mxu0 %v1468_v48 }
  0x4e   :  { %917 = vmatpush.bf16.msra.mxu0 %v1467_v50 }
  0x52   :  { %918 = vmatpush.bf16.msra.mxu0 %v1466_v51 }
  0x56   :  { %919 = vmatpush.bf16.msra.mxu0 %v1465_v58 }
  0x5a   :  { %920 = vmatpush.bf16.msra.mxu0 %v1464_v61 }
  0x5e   :  { %921 = vmatpush.bf16.msra.mxu0 %v1463_v0 }
  0x61   :  { %922 = vmatmul.bf16.vlgmr.msra.gmra.mxu0 %v864_v1 }
  0x9e   :  { %v143_v2 = vpop.f32.mrf.mxu0 }
  0xa0   :  { %v211_v3 = vpop.f32.mrf.mxu1 }
  0xa1   :  { %v212_v8 = vadd.f32 %v211_v3, %v143_v2 }
  0xa5   :  { %v311_v4 = vpop.f32.mrf.mxu2 }
  0xa6   :  { %v145_v5 = vpop.f32.mrf.mxu0  ;;  %v316_v10 = vadd.f32 %v311_v4, %v212_v8 }
  0xa7   :  { %v401_v6 = vpop.f32.mrf.mxu3 }
  0xa8   :  { %v213_v7 = vpop.f32.mrf.mxu1  ;;  %v406_v12 = vadd.f32 %v401_v6, %v316_v10 }
  0xa9   :  { %v214_v13 = vadd.f32 %v213_v7, %v145_v5 }
  0xad   :  { %v313_v9 = vpop.f32.mrf.mxu2 }
  0xae   :  { %v317_v16 = vadd.f32 %v313_v9, %v214_v13 }
  0xaf   :  { %v403_v11 = vpop.f32.mrf.mxu3 }
  0xb0   :  { %v407_v20 = vadd.f32 %v403_v11, %v317_v16 }
  0xbe   :  { %v518_v40 = vpop.f32.mrf.mxu0 }
  0xbf   :  { %v523_v17 = vadd.f32 %v518_v40, %v406_v12 }
  0xc0   :  { %v617_v14 = vpop.f32.mrf.mxu1 }
  0xc1   :  { %v622_v21 = vadd.f32 %v617_v14, %v523_v17 }
  0xc5   :  { %v707_v15 = vpop.f32.mrf.mxu2 }
  0xc6   :  { %v520_v18 = vpop.f32.mrf.mxu0  ;;  %v712_v24 = vadd.f32 %v707_v15, %v622_v21 }
  0xc7   :  { %v824_v19 = vpop.f32.mrf.mxu3  ;;  %v524_v22 = vadd.f32 %v520_v18, %v407_v20 }
  0xc8   :  { %v619_v23 = vpop.f32.mrf.mxu1  ;;  %v829_v28 = vadd.f32 %v824_v19, %v712_v24 }
  0xc9   :  { %v623_v27 = vadd.f32 %v619_v23, %v524_v22 }
  0xcd   :  { %v709_v25 = vpop.f32.mrf.mxu2 }
  0xce   :  { %v713_v29 = vadd.f32 %v709_v25, %v623_v27 }
  0xcf   :  { %v826_v30 = vpop.f32.mrf.mxu3 }
  0xd0   :  { %v830_v33 = vadd.f32 %v826_v30, %v713_v29 }
  0xde   :  { %v923_v26 = vpop.f32.mrf.mxu0 }
  0xdf   :  { %v928_v31 = vadd.f32 %v923_v26, %v829_v28 }
  0xe1   :  { %v934_v49 = vadd.f32 %v1476_v32, %v928_v31 }
  0xe3   :  { %v936_v37 = vmax.f32 %v934_v49, 0.0 }
  0xe6   :  { %v925_v34 = vpop.f32.mrf.mxu0 }
  0xe7   :  { %v929_v35 = vadd.f32 %v925_v34, %v830_v33 }
  0xe9   :  { %v935_v36 = vadd.f32 %v1476_v32, %v929_v35 }
  0xeb   :  { %v937_v38 = vmax.f32 %v935_v36, 0.0 }
  0xed   :  { %v1474_v39 = vpack.c.bf16 %v937_v38, %v936_v37 }
  0xef   :  { %1475 = vst [vmem:[%s1838_s3] sm:$0xff] %v1474_v39  }

// kernel: cnn_dqn_a_forward.11
= control target key start
LH: loop header
LB: loop body
LE: loop exit
PB: predicated region body
PF: predicated region fallthrough
CT: control target
= control target key end

     0   :  { %vm627_vm0 = vcmask 517120   ;;  %vm636_vm1 = vcmask 1024   ;;  %s1331_s2 = inlined_call_operand.vmem [shape: bf16[128,512], index: 2, kind: input, shape index: {}]   ;;  %s1332_s4 = inlined_call_operand.vmem [shape: bf16[512,64], index: 4, kind: input, shape index: {}]   ;;  %s1333_s0 = inlined_call_operand.vmem [shape: bf16[2,128], index: 0, kind: input, shape index: {}]   ;;  %s1334_s1 = inlined_call_operand.vmem [shape: f32[2,1], index: 1, kind: input, shape index: {}]   ;;  %s1335_s3 = inlined_call_operand.vmem [shape: f32[1,512], index: 3, kind: input, shape index: {}]   ;;  %s1336_s5 = inlined_call_operand.vmem [shape: f32[1,64], index: 5, kind: input, shape index: {}]   ;;  %s1337_s6 = inlined_call_operand.vmem [shape: f32[1,64], index: 6, kind: input, shape index: {}]   ;;  %s1338_s7 = inlined_call_operand.vmem [shape: f32[1,64], index: 7, kind: input, shape index: {}]   ;;  %s1339_s8 = inlined_call_operand.<no memory space> [shape: f32[1,1], index: 8, kind: input, shape index: {}]   ;;  %s1340_s9 = inlined_call_operand.vmem [shape: f32[2,1], index: 9, kind: output, shape index: {}]  }
   0x1   :  { %v756_v0 = vld [vmem:[%s1331_s2 + $0xe0] sm:$0xf]  ;;  %v928_v1 = vld [vmem:[%s1331_s2 + $0xec] sm:$0xf0]  ;;  %v764_v2 = vld [vmem:[%s1331_s2 + $0xe8] sm:$0xf] }
   0x2   :  { %v757_v3 = vor.u32 %v928_v1, %v756_v0  ;;  %v929_v4 = vld [vmem:[%s1331_s2 + $0xf4] sm:$0xf0]  ;;  %v927_v5 = vld [vmem:[%s1331_s2 + $0xec] sm:$0xf]  ;;  %v766_v6 = vld [vmem:[%s1331_s2 + $0xf8] sm:$0xf0] }
   0x3   :  { %v765_v7 = vor.u32 %v929_v4, %v764_v2  ;;  %v769_v8 = vor.u32 %v927_v5, %v766_v6  ;;  %v926_v9 = vld [vmem:[%s1331_s2 + $0xe4] sm:$0xf]  ;;  %v758_v10 = vld [vmem:[%s1331_s2 + $0xf0] sm:$0xf0]  ;;  %v740_v11 = vld [vmem:[%s1331_s2 + $0xc0] sm:$0xf] }
   0x4   :  { %237 = vmatpush.bf16.msra.mxu0 %v757_v3  ;;  %v761_v12 = vor.u32 %v926_v9, %v758_v10  ;;  %v924_v13 = vld [vmem:[%s1331_s2 + $0xcc] sm:$0xf0]  ;;  %v748_v14 = vld [vmem:[%s1331_s2 + $0xc8] sm:$0xf]  ;;  %v925_v15 = vld [vmem:[%s1331_s2 + $0xd4] sm:$0xf0] }
   0x5   :  { %263 = vmatpush.bf16.msra.mxu2 %v765_v7  ;;  %276 = vmatpush.bf16.msra.mxu3 %v769_v8  ;;  %v741_v16 = vor.u32 %v924_v13, %v740_v11  ;;  %v749_v17 = vor.u32 %v925_v15, %v748_v14  ;;  %v923_v18 = vld [vmem:[%s1331_s2 + $0xcc] sm:$0xf]  ;;  %v750_v19 = vld [vmem:[%s1331_s2 + $0xd8] sm:$0xf0]  ;;  %v922_v20 = vld [vmem:[%s1331_s2 + $0xc4] sm:$0xf] }
   0x6   :  { %250 = vmatpush.bf16.msra.mxu1 %v761_v12  ;;  %v753_v21 = vor.u32 %v923_v18, %v750_v19  ;;  %v742_v22 = vld [vmem:[%s1331_s2 + $0xd0] sm:$0xf0]  ;;  %v724_v23 = vld [vmem:[%s1331_s2 + $0xa0] sm:$0xf]  ;;  %v920_v24 = vld [vmem:[%s1331_s2 + $0xac] sm:$0xf0] }
   0x7   :  { %v745_v25 = vor.u32 %v922_v20, %v742_v22  ;;  %v732_v26 = vld [vmem:[%s1331_s2 + $0xa8] sm:$0xf]  ;;  %v921_v27 = vld [vmem:[%s1331_s2 + $0xb4] sm:$0xf0]  ;;  %v919_v28 = vld [vmem:[%s1331_s2 + $0xac] sm:$0xf]  ;;  %v725_v29 = vor.u32 %v920_v24, %v724_v23 }
   0x8   :  { %238 = vmatpush.bf16.msra.mxu0 %v741_v16  ;;  %v734_v30 = vld [vmem:[%s1331_s2 + $0xb8] sm:$0xf0]  ;;  %v918_v31 = vld [vmem:[%s1331_s2 + $0xa4] sm:$0xf]  ;;  %v726_v32 = vld [vmem:[%s1331_s2 + $0xb0] sm:$0xf0]  ;;  %v733_v33 = vor.u32 %v921_v27, %v732_v26 }
   0x9   :  { %264 = vmatpush.bf16.msra.mxu2 %v749_v17  ;;  %277 = vmatpush.bf16.msra.mxu3 %v753_v21  ;;  %v737_v34 = vor.u32 %v919_v28, %v734_v30  ;;  %v708_v35 = vld [vmem:[%s1331_s2 + $0x80] sm:$0xf]  ;;  %v916_v36 = vld [vmem:[%s1331_s2 + $0x8c] sm:$0xf0]  ;;  %v716_v37 = vld [vmem:[%s1331_s2 + $0x88] sm:$0xf]  ;;  %v729_v38 = vor.u32 %v918_v31, %v726_v32 }
   0xa   :  { %251 = vmatpush.bf16.msra.mxu1 %v745_v25  ;;  %v917_v39 = vld [vmem:[%s1331_s2 + $0x94] sm:$0xf0]  ;;  %v915_v40 = vld [vmem:[%s1331_s2 + $0x8c] sm:$0xf]  ;;  %v718_v41 = vld [vmem:[%s1331_s2 + $0x98] sm:$0xf0]  ;;  %v709_v44 = vor.u32 %v916_v36, %v708_v35 }
   0xb   :  { %v914_v42 = vld [vmem:[%s1331_s2 + $0x84] sm:$0xf]  ;;  %v710_v43 = vld [vmem:[%s1331_s2 + $0x90] sm:$0xf0]  ;;  %v717_v45 = vor.u32 %v917_v39, %v716_v37  ;;  %v721_v46 = vor.u32 %v915_v40, %v718_v41  ;;  %v692_v47 = vld [vmem:[%s1331_s2 + $0x60] sm:$0xf] }
   0xc   :  { %239 = vmatpush.bf16.msra.mxu0 %v725_v29  ;;  %v912_v48 = vld [vmem:[%s1331_s2 + $0x6c] sm:$0xf0]  ;;  %v700_v49 = vld [vmem:[%s1331_s2 + $0x68] sm:$0xf]  ;;  %v713_v50 = vor.u32 %v914_v42, %v710_v43  ;;  %v913_v51 = vld [vmem:[%s1331_s2 + $0x74] sm:$0xf0] }
   0xd   :  { %265 = vmatpush.bf16.msra.mxu2 %v733_v33  ;;  %278 = vmatpush.bf16.msra.mxu3 %v737_v34  ;;  %v911_v52 = vld [vmem:[%s1331_s2 + $0x6c] sm:$0xf]  ;;  %v702_v53 = vld [vmem:[%s1331_s2 + $0x78] sm:$0xf0]  ;;  %v910_v54 = vld [vmem:[%s1331_s2 + $0x64] sm:$0xf]  ;;  %v693_v56 = vor.u32 %v912_v48, %v692_v47  ;;  %v701_v57 = vor.u32 %v913_v51, %v700_v49 }
   0xe   :  { %252 = vmatpush.bf16.msra.mxu1 %v729_v38  ;;  %v694_v55 = vld [vmem:[%s1331_s2 + $0x70] sm:$0xf0]  ;;  %v705_v58 = vor.u32 %v911_v52, %v702_v53  ;;  %v676_v59 = vld [vmem:[%s1331_s2 + $0x40] sm:$0xf]  ;;  %v908_v60 = vld [vmem:[%s1331_s2 + $0x4c] sm:$0xf0] }
   0xf   :  { %v684_v61 = vld [vmem:[%s1331_s2 + $0x48] sm:$0xf]  ;;  %v697_v62 = vor.u32 %v910_v54, %v694_v55  ;;  %v909_v63 = vld [vmem:[%s1331_s2 + $0x54] sm:$0xf0]  ;;  %v907_v0 = vld [vmem:[%s1331_s2 + $0x4c] sm:$0xf]  ;;  %v677_v4 = vor.u32 %v908_v60, %v676_v59 }
  0x10   :  { %240 = vmatpush.bf16.msra.mxu0 %v709_v44  ;;  %v686_v1 = vld [vmem:[%s1331_s2 + $0x58] sm:$0xf0]  ;;  %v906_v2 = vld [vmem:[%s1331_s2 + $0x44] sm:$0xf]  ;;  %v678_v3 = vld [vmem:[%s1331_s2 + $0x50] sm:$0xf0]  ;;  %v685_v5 = vor.u32 %v909_v63, %v684_v61 }
  0x11   :  { %266 = vmatpush.bf16.msra.mxu2 %v717_v45  ;;  %279 = vmatpush.bf16.msra.mxu3 %v721_v46  ;;  %v689_v6 = vor.u32 %v907_v0, %v686_v1  ;;  %v660_v7 = vld [vmem:[%s1331_s2 + $0x20] sm:$0xf]  ;;  %v904_v8 = vld [vmem:[%s1331_s2 + $0x2c] sm:$0xf0]  ;;  %v668_v9 = vld [vmem:[%s1331_s2 + $0x28] sm:$0xf]  ;;  %v681_v10 = vor.u32 %v906_v2, %v678_v3 }
  0x12   :  { %253 = vmatpush.bf16.msra.mxu1 %v713_v50  ;;  %v905_v11 = vld [vmem:[%s1331_s2 + $0x34] sm:$0xf0]  ;;  %v903_v12 = vld [vmem:[%s1331_s2 + $0x2c] sm:$0xf]  ;;  %v670_v13 = vld [vmem:[%s1331_s2 + $0x38] sm:$0xf0]  ;;  %v661_v16 = vor.u32 %v904_v8, %v660_v7 }
  0x13   :  { %v902_v14 = vld [vmem:[%s1331_s2 + $0x24] sm:$0xf]  ;;  %v662_v15 = vld [vmem:[%s1331_s2 + $0x30] sm:$0xf0]  ;;  %v669_v17 = vor.u32 %v905_v11, %v668_v9  ;;  %v673_v18 = vor.u32 %v903_v12, %v670_v13  ;;  %v644_v19 = vld [vmem:[%s1331_s2] sm:$0xf] }
  0x14   :  { %241 = vmatpush.bf16.msra.mxu0 %v693_v56  ;;  %v900_v20 = vld [vmem:[%s1331_s2 + $0xc] sm:$0xf0]  ;;  %v652_v21 = vld [vmem:[%s1331_s2 + $0x8] sm:$0xf]  ;;  %v665_v22 = vor.u32 %v902_v14, %v662_v15  ;;  %v901_v23 = vld [vmem:[%s1331_s2 + $0x14] sm:$0xf0] }
  0x15   :  { %267 = vmatpush.bf16.msra.mxu2 %v701_v57  ;;  %280 = vmatpush.bf16.msra.mxu3 %v705_v58  ;;  %v899_v24 = vld [vmem:[%s1331_s2 + $0xc] sm:$0xf]  ;;  %v654_v25 = vld [vmem:[%s1331_s2 + $0x18] sm:$0xf0]  ;;  %v898_v26 = vld [vmem:[%s1331_s2 + $0x4] sm:$0xf]  ;;  %v645_v28 = vor.u32 %v900_v20, %v644_v19  ;;  %v653_v29 = vor.u32 %v901_v23, %v652_v21 }
  0x16   :  { %254 = vmatpush.bf16.msra.mxu1 %v697_v62  ;;  %v646_v27 = vld [vmem:[%s1331_s2 + $0x10] sm:$0xf0]  ;;  %v657_v30 = vor.u32 %v899_v24, %v654_v25  ;;  %v937_v32 = vld [vmem:[%s1332_s4 + $0x38] sm:$0xff]  ;;  %v34_v34 = vld [vmem:[%s1333_s0] sm:$0x1]  ;;  %v968_v2 = vmov 0  }
  0x17   :  { %v649_v31 = vor.u32 %v898_v26, %v646_v27  ;;  %v945_v33 = vld [vmem:[%s1332_s4 + $0x78] sm:$0xff]  ;;  %v936_v36 = vld [vmem:[%s1332_s4 + $0x30] sm:$0xff]  ;;  %v935_v40 = vld [vmem:[%s1332_s4 + $0x28] sm:$0xff]  ;;  %963 = vset.pattern.permute.xlu0 %v968_v2 }
  0x18   :  { %242 = vmatpush.bf16.msra.mxu0 %v677_v4  ;;  %v953_v35 = vld [vmem:[%s1332_s4 + $0xb8] sm:$0xff]  ;;  %v944_v38 = vld [vmem:[%s1332_s4 + $0x70] sm:$0xff]  ;;  %v943_v42 = vld [vmem:[%s1332_s4 + $0x68] sm:$0xff] }
  0x19   :  { %268 = vmatpush.bf16.msra.mxu2 %v685_v5  ;;  %281 = vmatpush.bf16.msra.mxu3 %v689_v6  ;;  %v961_v37 = vld [vmem:[%s1332_s4 + $0xf8] sm:$0xff]  ;;  %v952_v39 = vld [vmem:[%s1332_s4 + $0xb0] sm:$0xff]  ;;  %v951_v43 = vld [vmem:[%s1332_s4 + $0xa8] sm:$0xff] }
  0x1a   :  { %255 = vmatpush.bf16.msra.mxu1 %v681_v10  ;;  %v960_v41 = vld [vmem:[%s1332_s4 + $0xf0] sm:$0xff]  ;;  %v934_v44 = vld [vmem:[%s1332_s4 + $0x20] sm:$0xff]  ;;  %v959_v45 = vld [vmem:[%s1332_s4 + $0xe8] sm:$0xff] }
  0x1b   :  { %v942_v46 = vld [vmem:[%s1332_s4 + $0x60] sm:$0xff]  ;;  %v933_v48 = vld [vmem:[%s1332_s4 + $0x18] sm:$0xff]  ;;  %v932_v52 = vld [vmem:[%s1332_s4 + $0x10] sm:$0xff] }
  0x1c   :  { %243 = vmatpush.bf16.msra.mxu0 %v661_v16  ;;  %v950_v47 = vld [vmem:[%s1332_s4 + $0xa0] sm:$0xff]  ;;  %v941_v50 = vld [vmem:[%s1332_s4 + $0x58] sm:$0xff]  ;;  %v940_v54 = vld [vmem:[%s1332_s4 + $0x50] sm:$0xff] }
  0x1d   :  { %269 = vmatpush.bf16.msra.mxu2 %v669_v17  ;;  %282 = vmatpush.bf16.msra.mxu3 %v673_v18  ;;  %v958_v49 = vld [vmem:[%s1332_s4 + $0xe0] sm:$0xff]  ;;  %v949_v51 = vld [vmem:[%s1332_s4 + $0x98] sm:$0xff]  ;;  %v931_v55 = vld [vmem:[%s1332_s4 + $0x8] sm:$0xff] }
  0x1e   :  { %256 = vmatpush.bf16.msra.mxu1 %v665_v22  ;;  %v957_v53 = vld [vmem:[%s1332_s4 + $0xd8] sm:$0xff]  ;;  %v939_v56 = vld [vmem:[%s1332_s4 + $0x48] sm:$0xff]  ;;  %v948_v57 = vld [vmem:[%s1332_s4 + $0x90] sm:$0xff] }
  0x1f   :  { %v956_v58 = vld [vmem:[%s1332_s4 + $0xd0] sm:$0xff]  ;;  %v930_v59 = vld [vmem:[%s1332_s4] sm:$0xff]  ;;  %v947_v61 = vld [vmem:[%s1332_s4 + $0x88] sm:$0xff] }
  0x20   :  { %244 = vmatpush.bf16.msra.mxu0 %v645_v28  ;;  %v938_v60 = vld [vmem:[%s1332_s4 + $0x40] sm:$0xff]  ;;  %v955_v62 = vld [vmem:[%s1332_s4 + $0xc8] sm:$0xff]  ;;  %v14_v28 = vstv %s1339_s8 }
  0x21   :  { %270 = vmatpush.bf16.msra.mxu2 %v653_v29  ;;  %283 = vmatpush.bf16.msra.mxu3 %v657_v30  ;;  %v946_v63 = vld [vmem:[%s1332_s4 + $0x80] sm:$0xff]  ;;  %15 = vst [vmem:[#allocation2] sm:$0x1] %v14_v28 }
  0x22   :  { %257 = vmatpush.bf16.msra.mxu1 %v649_v31  ;;  %v954_v0 = vld [vmem:[%s1332_s4 + $0xc0] sm:$0xff] }
  0x23   :  { %245 = vmatmul.bf16.vlgmr.msra.gmra.mxu0 %v34_v34  ;;  %v361_v1 = vld [vmem:[%s1334_s1] sm:$0x3] }
  0x24   :  { %564 = vmatpush.bf16.msrb.mxu0 %v937_v32  ;;  %271 = vmatmul.bf16.vlgmr.msra.gmra.mxu2 %v34_v34  ;;  %v67_v3 = vld [vmem:[%s1335_s3] sm:$0xf] }
  0x25   :  { %284 = vmatmul.bf16.vlgmr.msra.gmra.mxu3 %v34_v34  ;;  %258 = vmatmul.bf16.vlgmr.msra.gmra.mxu1 %v34_v34  ;;  %v69_v4 = vperm.slane %v67_v3, 0  ;;  %v70_v5 = vperm.slane %v67_v3, 1  ;;  %v71_v11 = vperm.slane %v67_v3, 2  ;;  %v72_v12 = vperm.slane %v67_v3, 3  ;;  %v964_v29 = vld [vmem:[%s1336_s5] ss:$0 sm:$0xff] }
  0x26   :  { %577 = vmatpush.bf16.msrb.mxu1 %v945_v33  ;;  %590 = vmatpush.bf16.msrb.mxu2 %v953_v35 }
  0x27   :  { %603 = vmatpush.bf16.msrb.mxu3 %v961_v37  ;;  %365 = vperm.xlu0 %963, %v361_v1  }
  0x28   :  { %565 = vmatpush.bf16.msrb.mxu0 %v936_v36 }
  0x2a   :  { %578 = vmatpush.bf16.msrb.mxu1 %v944_v38  ;;  %591 = vmatpush.bf16.msrb.mxu2 %v952_v39 }
  0x2b   :  { %604 = vmatpush.bf16.msrb.mxu3 %v960_v41  ;;  %v965_v41 = vld [vmem:[%s1337_s6] ss:$0 sm:$0xff] }
  0x2c   :  { %566 = vmatpush.bf16.msrb.mxu0 %v935_v40 }
  0x2e   :  { %579 = vmatpush.bf16.msrb.mxu1 %v943_v42  ;;  %592 = vmatpush.bf16.msrb.mxu2 %v951_v43 }
  0x2f   :  { %605 = vmatpush.bf16.msrb.mxu3 %v959_v45 }
  0x30   :  { %567 = vmatpush.bf16.msrb.mxu0 %v934_v44  ;;  %v966_v44 = vld [vmem:[%s1338_s7] ss:$0 sm:$0xff] }
  0x32   :  { %580 = vmatpush.bf16.msrb.mxu1 %v942_v46  ;;  %593 = vmatpush.bf16.msrb.mxu2 %v950_v47 }
  0x33   :  { %606 = vmatpush.bf16.msrb.mxu3 %v958_v49 }
  0x34   :  { %568 = vmatpush.bf16.msrb.mxu0 %v933_v48 }
  0x36   :  { %581 = vmatpush.bf16.msrb.mxu1 %v941_v50  ;;  %594 = vmatpush.bf16.msrb.mxu2 %v949_v51  ;;  %v967_v50 = vld [vmem:[#allocation2] ss:$0 sm:$0xff] }
  0x37   :  { %607 = vmatpush.bf16.msrb.mxu3 %v957_v53 }
  0x38   :  { %569 = vmatpush.bf16.msrb.mxu0 %v932_v52 }
  0x3a   :  { %582 = vmatpush.bf16.msrb.mxu1 %v940_v54  ;;  %595 = vmatpush.bf16.msrb.mxu2 %v948_v57 }
  0x3b   :  { %608 = vmatpush.bf16.msrb.mxu3 %v956_v58 }
  0x3c   :  { %570 = vmatpush.bf16.msrb.mxu0 %v931_v55 }
  0x3e   :  { %583 = vmatpush.bf16.msrb.mxu1 %v939_v56  ;;  %596 = vmatpush.bf16.msrb.mxu2 %v947_v61 }
  0x3f   :  { %609 = vmatpush.bf16.msrb.mxu3 %v955_v62 }
  0x40   :  { %571 = vmatpush.bf16.msrb.mxu0 %v930_v59 }
  0x42   :  { %584 = vmatpush.bf16.msrb.mxu1 %v938_v60  ;;  %597 = vmatpush.bf16.msrb.mxu2 %v946_v63 }
  0x43   :  { %610 = vmatpush.bf16.msrb.mxu3 %v954_v0 }
  0x99   :  { %v366_v30 = vpop.permute.xlu0 %365 }
  0x9a   :  { %v371_v33 = vmul.f32 %v964_v29, %v366_v30 }
  0xa0   :  { %v246_v6 = vpop.f32.mrf.mxu0 }
  0xa1   :  { %v247_v7 = vadd.f32 %v246_v6, %v69_v4 }
  0xa2   :  { %v259_v8 = vpop.f32.mrf.mxu1 }
  0xa3   :  { %v289_v9 = vmax.f32 %v247_v7, 0.0  ;;  %v260_v10 = vadd.f32 %v259_v8, %v70_v5 }
  0xa5   :  { %v293_v13 = vpack.c.bf16 %v289_v9, %v289_v9  ;;  %v290_v14 = vmax.f32 %v260_v10, 0.0 }
  0xa7   :  { %v294_v15 = vpack.c.bf16 %v290_v14, %v290_v14  ;;  %v272_v16 = vpop.f32.mrf.mxu2  ;;  %572 = vmatmul.bf16.vlgmr.msrb.gmra.mxu0 %v293_v13 }
  0xa8   :  { %v285_v17 = vpop.f32.mrf.mxu3  ;;  %v273_v18 = vadd.f32 %v272_v16, %v71_v11  ;;  %v248_v20 = vpop.f32.mrf.mxu0 }
  0xa9   :  { %v286_v19 = vadd.f32 %v285_v17, %v72_v12  ;;  %585 = vmatmul.bf16.vlgmr.msrb.gmra.mxu1 %v294_v15 }
  0xaa   :  { %v291_v21 = vmax.f32 %v273_v18, 0.0  ;;  %v261_v23 = vpop.f32.mrf.mxu1 }
  0xab   :  { %v292_v22 = vmax.f32 %v286_v19, 0.0 }
  0xac   :  { %v295_v24 = vpack.c.bf16 %v291_v21, %v291_v21 }
  0xad   :  { %v296_v25 = vpack.c.bf16 %v292_v22, %v292_v22 }
  0xae   :  { %598 = vmatmul.bf16.vlgmr.msrb.gmra.mxu2 %v295_v24 }
  0xaf   :  { %611 = vmatmul.bf16.vlgmr.msrb.gmra.mxu3 %v296_v25  ;;  %v274_v26 = vpop.f32.mrf.mxu2 }
  0xb0   :  { %v287_v27 = vpop.f32.mrf.mxu3 }
 0x124   :  { %v573_v31 = vpop.f32.mrf.mxu0 }
 0x125   :  { %v574_v34 = vadd.f32 %v573_v31, %v371_v33 }
 0x126   :  { %v586_v32 = vpop.f32.mrf.mxu1 }
 0x127   :  { %v587_v37 = vadd.f32 %v586_v32, %v574_v34 }
 0x12c   :  { %v575_v35 = vpop.f32.mrf.mxu0 }
 0x12e   :  { %v588_v36 = vpop.f32.mrf.mxu1 }
 0x131   :  { %v599_v38 = vpop.f32.mrf.mxu2 }
 0x132   :  { %v612_v39 = vpop.f32.mrf.mxu3  ;;  %v600_v40 = vadd.f32 %v599_v38, %v587_v37 }
 0x134   :  { %v613_v42 = vadd.f32 %v612_v39, %v600_v40 }
 0x136   :  { %v620_v43 = vadd.f32 %v965_v41, %v613_v42 }
 0x138   :  { %v621_v45 = vmax.f32 %v620_v43, 0.0 }
 0x139   :  { %v601_v46 = vpop.f32.mrf.mxu2 }
 0x13a   :  { %v614_v47 = vpop.f32.mrf.mxu3  ;;  %v626_v48 = vmul.f32 %v966_v44, %v621_v45 }
 0x13c   :  { %v628_v49 = vsel %vm627_vm0, %v626_v48, 0.0 }
 0x13d   :  { %629 = vadd.xlane.f32.xlu0 %v628_v49 }
 0x1b0   :  { %v630_v51 = vpop.xlane.xlu0 %629 }
 0x1b1   :  { %v635_v52 = vadd.f32 %v967_v50, %v630_v51 }
 0x1b3   :  { %637 = vst.msk [vmem:[%s1340_s9] sm:$0x3] %vm636_vm1, %v635_v52 }

</bundles_post_ra>
